<compile_context>
chip_gen: v7x
topology: tpu7x:2x2x1
jax: 0.10.0
libtpu: 0.0.40
codegen_flags: <defaults>
</compile_context>

<pallas_src>
import jax
import jax.numpy as jnp
from jax.experimental import pallas as pl
from jax.experimental.pallas import tpu as pltpu


def _round_up(x, m):
    return ((x + m - 1) // m) * m


# ----------------------------------------------------------------------------
# ObservationEmbedding (synthetic stand-in) + conditioning layer — plain JAX.
# TODO(synk): ObservationEmbedding source was not provided; this is a
# deterministic stand-in (mean-pool static/dynamic obstacles + heading,
# 2-layer ReLU MLP to embedding_dim). StaticObstacleType is not used.
# ----------------------------------------------------------------------------
def observation_embedding_forward(static_obstacles, dynamic_obstacles,
                                  heading_to_goal, p):
    head = heading_to_goal[:, None]                      # .unsqueeze(-1)
    feats = jnp.concatenate(
        [static_obstacles.mean(-1), dynamic_obstacles.mean(-1), head], axis=-1)
    h = jax.nn.relu(feats @ p["obs_w_in"] + p["obs_b_in"])
    return jax.nn.relu(h @ p["obs_w_out"] + p["obs_b_out"])   # (B, E)


# ----------------------------------------------------------------------------
# Toeplitz expansion of a k=3 / pad=1 Conv1d so the whole conv is one matmul.
# w: (3, Cin, Cout) with w[k] multiplying x[t + k - 1] (PyTorch convention).
# Result: (T*Cin, T*Cout) with input index t_in*Cin + cin, output t_out*Cout + c.
# ----------------------------------------------------------------------------
def _toeplitz_conv_weight(w, T):
    K, cin, cout = w.shape
    off = jnp.arange(T)[:, None] - jnp.arange(T)[None, :] + 1      # t_in - t_out + 1
    valid = ((off >= 0) & (off < K)).astype(w.dtype)
    blk = w[jnp.clip(off, 0, K - 1)] * valid[:, :, None, None]     # (T, T, Cin, Cout)
    return jnp.transpose(blk, (0, 2, 1, 3)).reshape(T * cin, T * cout)


# ----------------------------------------------------------------------------
# ScoringNetwork kernel: one grid step == TILE_M trajectories, pure matmul chain.
# ----------------------------------------------------------------------------
def _scoring_kernel(x_ref, cond_ref,
                    w1_ref, b1_ref, w2_ref, b2_ref, wp1_ref,
                    wd2_ref, bd2_ref, wd3_ref, bd3_ref,
                    wd4t_ref, bd4_ref, out_ref):
    f32 = jnp.float32
    x = x_ref[...]                                                  # (TM, T*C)
    # conv1 (+folded BN) + ReLU as one Toeplitz matmul
    h1 = jnp.maximum(
        jnp.dot(x, w1_ref[...], preferred_element_type=f32) + b1_ref[...], 0.0)
    # conv2 (+folded BN) + ReLU
    h2 = jnp.maximum(
        jnp.dot(h1, w2_ref[...], preferred_element_type=f32) + b2_ref[...], 0.0)
    # AdaptiveAvgPool1d(1) + Flatten + cat([conv, condition]) + dense layer 1
    # (pooling folded into wp1; condition @ Wd1[H:] + bd1 precomputed per row)
    d = jnp.maximum(
        jnp.dot(h2, wp1_ref[...], preferred_element_type=f32) + cond_ref[...], 0.0)
    d = jnp.maximum(
        jnp.dot(d, wd2_ref[...], preferred_element_type=f32) + bd2_ref[...], 0.0)
    d = jnp.maximum(
        jnp.dot(d, wd3_ref[...], preferred_element_type=f32) + bd3_ref[...], 0.0)
    # final Linear(D -> 1), emitted as a lane-dense (1, TM) row
    out_ref[...] = (jnp.dot(wd4t_ref[...], d.T, preferred_element_type=f32)
                    + bd4_ref[...])


def scoring_network_forward(trajectories, cond_embed, p, tile_m=256):
    B, N, C, T = trajectories.shape
    M = B * N
    H = p["conv_w1"].shape[-1]
    D = p["dense_w1"].shape[-1]

    # Lane-dense per-trajectory slab: (M, T*C), time-major within a trajectory.
    x = jnp.transpose(trajectories.reshape(M, C, T), (0, 2, 1)).reshape(M, T * C)

    # Hoisted conditioning: relu(emb @ Wc + bc) @ Wd1[H:] + bd1, once per batch row.
    cond_h = jax.nn.relu(cond_embed @ p["cond_w"] + p["cond_b"])        # (B, H)
    cond_contrib = cond_h @ p["dense_w1"][H:] + p["dense_b1"]           # (B, D)
    cond_rep = jnp.broadcast_to(cond_contrib[:, None, :], (B, N, D)).reshape(M, D)

    # Derived (folded) weights — built once per call in plain JAX.
    w1t = _toeplitz_conv_weight(p["conv_w1"], T)       # (T*C, T*H)
    b1t = jnp.tile(p["conv_b1"], (1, T))               # (1, T*H)
    w2t = _toeplitz_conv_weight(p["conv_w2"], T)       # (T*H, T*H)
    b2t = jnp.tile(p["conv_b2"], (1, T))               # (1, T*H)
    wp1 = jnp.tile(p["dense_w1"][:H], (T, 1)) / T      # (T*H, D): avg-pool folded in
    wd4t = p["dense_w4"].T                             # (1, D)

    # Tile M into lane-aligned blocks (multiple of 128 => unmasked output stores).
    tile_m = min(tile_m, _round_up(M, 128))
    g = pl.cdiv(M, tile_m)
    m_pad = g * tile_m
    if m_pad != M:
        x = jnp.pad(x, ((0, m_pad - M), (0, 0)))
        cond_rep = jnp.pad(cond_rep, ((0, m_pad - M), (0, 0)))

    def _whole(a):  # whole-array block, resident across the grid
        return pl.BlockSpec(a.shape, lambda i, nd=a.ndim: (0,) * nd)

    out = pl.pallas_call(
        _scoring_kernel,
        out_shape=jax.ShapeDtypeStruct((1, m_pad), jnp.float32),
        grid=(g,),
        in_specs=[
            pl.BlockSpec((tile_m, T * C), lambda i: (i, 0)),   # trajectory tile
            pl.BlockSpec((tile_m, D), lambda i: (i, 0)),       # per-row cond term
            _whole(w1t), _whole(b1t), _whole(w2t), _whole(b2t), _whole(wp1),
            _whole(p["dense_w2"]), _whole(p["dense_b2"]),
            _whole(p["dense_w3"]), _whole(p["dense_b3"]),
            _whole(wd4t), _whole(p["dense_b4"]),
        ],
        out_specs=pl.BlockSpec((1, tile_m), lambda i: (0, i)),
        compiler_params=pltpu.CompilerParams(
            dimension_semantics=("parallel",),
            vmem_limit_bytes=32 * 1024 * 1024),
    )(x, cond_rep, w1t, b1t, w2t, b2t, wp1,
      p["dense_w2"], p["dense_b2"], p["dense_w3"], p["dense_b3"],
      wd4t, p["dense_b4"])

    return out[0, :M].reshape(B, N)    # .squeeze(-1)


def combined_scoring_network_forward(params, trajectories, static_obstacles,
                                     dynamic_obstacles, heading_to_goal):
    emb = observation_embedding_forward(static_obstacles, dynamic_obstacles,
                                        heading_to_goal, params)
    return scoring_network_forward(trajectories, emb, params)


# ----------------------------------------------------------------------------
# Deterministic parameter init (synthetic; BatchNorm folded in eval mode).
# ----------------------------------------------------------------------------
def init_params(key, obstacle_embedding_dim=32, hidden_channels=64,
                dense_hidden_dim=128, obs_hidden_dim=32, obs_in_features=7):
    ks = iter(jax.random.split(key, 32))

    def nrm(shape, scale=0.1):
        return (scale * jax.random.normal(next(ks), shape)).astype(jnp.float32)

    H, D, E = hidden_channels, dense_hidden_dim, obstacle_embedding_dim
    eps = 1e-5

    def folded_conv(cin):
        w = nrm((3, cin, H)); b = nrm((H,))
        gamma = 1.0 + nrm((H,)); beta = nrm((H,))
        rmean = nrm((H,)); rvar = 1.0 + jnp.abs(nrm((H,)))
        s = gamma / jnp.sqrt(rvar + eps)
        return w * s[None, None, :], ((b - rmean) * s + beta)[None, :]

    conv_w1, conv_b1 = folded_conv(2)
    conv_w2, conv_b2 = folded_conv(H)

    return dict(
        conv_w1=conv_w1, conv_b1=conv_b1,
        conv_w2=conv_w2, conv_b2=conv_b2,
        cond_w=nrm((E, H)), cond_b=nrm((1, H)),
        dense_w1=nrm((2 * H, D)), dense_b1=nrm((1, D)),
        dense_w2=nrm((D, D)), dense_b2=nrm((1, D)),
        dense_w3=nrm((D, D)), dense_b3=nrm((1, D)),
        dense_w4=nrm((D, 1)), dense_b4=nrm((1, 1)),
        obs_w_in=nrm((obs_in_features, obs_hidden_dim)),
        obs_b_in=nrm((1, obs_hidden_dim)),
        obs_w_out=nrm((obs_hidden_dim, E)),
        obs_b_out=nrm((1, E)),
    )


# ----------------------------------------------------------------------------
# Pure-JAX reference (same folded params) for a correctness check.
# ----------------------------------------------------------------------------
def _reference_forward(p, trajectories, static_obstacles, dynamic_obstacles,
                       heading_to_goal):
    head = heading_to_goal[:, None]
    feats = jnp.concatenate(
        [static_obstacles.mean(-1), dynamic_obstacles.mean(-1), head], axis=-1)
    h = jax.nn.relu(feats @ p["obs_w_in"] + p["obs_b_in"])
    emb = jax.nn.relu(h @ p["obs_w_out"] + p["obs_b_out"])

    B, N, C, T = trajectories.shape
    x = jnp.transpose(trajectories.reshape(B * N, C, T), (0, 2, 1))

    def conv3(a, w, b):
        pad = jnp.zeros(a[:, :1, :].shape, a.dtype)
        am1 = jnp.concatenate([pad, a[:, :-1, :]], axis=1)
        ap1 = jnp.concatenate([a[:, 1:, :], pad], axis=1)
        return (jnp.einsum("mtc,ch->mth", am1, w[0])
                + jnp.einsum("mtc,ch->mth", a, w[1])
                + jnp.einsum("mtc,ch->mth", ap1, w[2]) + b)

    h1 = jax.nn.relu(conv3(x, p["conv_w1"], p["conv_b1"]))
    h2 = jax.nn.relu(conv3(h1, p["conv_w2"], p["conv_b2"]))
    pooled = h2.mean(axis=1)
    cond = jax.nn.relu(emb @ p["cond_w"] + p["cond_b"])
    cond = jnp.repeat(cond, N, axis=0)
    feat = jnp.concatenate([pooled, cond], axis=-1)
    d = jax.nn.relu(feat @ p["dense_w1"] + p["dense_b1"])
    d = jax.nn.relu(d @ p["dense_w2"] + p["dense_b2"])
    d = jax.nn.relu(d @ p["dense_w3"] + p["dense_b3"])
    out = d @ p["dense_w4"] + p["dense_b4"]
    return out.reshape(B, N)


if __name__ == "__main__":
    key = jax.random.PRNGKey(0)
    k_param, k_traj, k_stat, k_dyn, k_head = jax.random.split(key, 5)

    B, N, C, T = 2, 8, 2, 16          # batch, trajectories per batch, xy, timesteps
    E = 32                            # observation_embedding_dim
    params = init_params(k_param, obstacle_embedding_dim=E)

    trajectories = jax.random.normal(k_traj, (B, N, C, T), dtype=jnp.float32)
    static_obstacles = jax.random.normal(k_stat, (B, 2, 16), dtype=jnp.float32)
    dynamic_obstacles = jax.random.normal(k_dyn, (B, 4, 8), dtype=jnp.float32)
    heading_to_goal = jax.random.normal(k_head, (B,), dtype=jnp.float32)

    out = combined_scoring_network_forward(params, trajectories, static_obstacles,
                                           dynamic_obstacles, heading_to_goal)
    out = jax.block_until_ready(out)

    ref = _reference_forward(params, trajectories, static_obstacles,
                             dynamic_obstacles, heading_to_goal)
    assert out.shape == (B, N), out.shape
    assert jnp.allclose(out, ref, rtol=1e-3, atol=1e-3), (out, ref)
    print("KERNEL_OK")
</pallas_src>

<mosaic_0001>
module attributes {stable_mosaic.version = 11 : i64} {
  func.func @_scoring_kernel(%arg0: i32, %arg1: memref<128x32xf32, #tpu.memory_space<vmem>>, %arg2: memref<128x128xf32, #tpu.memory_space<vmem>>, %arg3: memref<32x1024xf32, #tpu.memory_space<vmem>>, %arg4: memref<1x1024xf32, #tpu.memory_space<vmem>>, %arg5: memref<1024x1024xf32, #tpu.memory_space<vmem>>, %arg6: memref<1x1024xf32, #tpu.memory_space<vmem>>, %arg7: memref<1024x128xf32, #tpu.memory_space<vmem>>, %arg8: memref<128x128xf32, #tpu.memory_space<vmem>>, %arg9: memref<1x128xf32, #tpu.memory_space<vmem>>, %arg10: memref<128x128xf32, #tpu.memory_space<vmem>>, %arg11: memref<1x128xf32, #tpu.memory_space<vmem>>, %arg12: memref<1x128xf32, #tpu.memory_space<vmem>>, %arg13: memref<1x1xf32, #tpu.memory_space<vmem>>, %arg14: memref<1x128xf32, #tpu.memory_space<vmem>>) attributes {dimension_semantics = [#tpu.dimension_semantics<parallel>], iteration_bounds = array<i64: 1>, scalar_prefetch = 0 : i64, scratch_operands = 0 : i64, tpu.core_type = #tpu.core_type<tc>, window_params = [{transform_indices = @transform_0, window_bounds = array<i64: 128, 32>}, {transform_indices = @transform_1, window_bounds = array<i64: 128, 128>}, {pipeline_mode = #tpu.pipeline_mode<synchronous>, transform_indices = @transform_2, window_bounds = array<i64: 32, 1024>}, {pipeline_mode = #tpu.pipeline_mode<synchronous>, transform_indices = @transform_3, window_bounds = array<i64: 1, 1024>}, {pipeline_mode = #tpu.pipeline_mode<synchronous>, transform_indices = @transform_4, window_bounds = array<i64: 1024, 1024>}, {pipeline_mode = #tpu.pipeline_mode<synchronous>, transform_indices = @transform_5, window_bounds = array<i64: 1, 1024>}, {pipeline_mode = #tpu.pipeline_mode<synchronous>, transform_indices = @transform_6, window_bounds = array<i64: 1024, 128>}, {pipeline_mode = #tpu.pipeline_mode<synchronous>, transform_indices = @transform_7, window_bounds = array<i64: 128, 128>}, {pipeline_mode = #tpu.pipeline_mode<synchronous>, transform_indices = @transform_8, window_bounds = array<i64: 1, 128>}, {pipeline_mode = #tpu.pipeline_mode<synchronous>, transform_indices = @transform_9, window_bounds = array<i64: 128, 128>}, {pipeline_mode = #tpu.pipeline_mode<synchronous>, transform_indices = @transform_10, window_bounds = array<i64: 1, 128>}, {pipeline_mode = #tpu.pipeline_mode<synchronous>, transform_indices = @transform_11, window_bounds = array<i64: 1, 128>}, {pipeline_mode = #tpu.pipeline_mode<synchronous>, transform_indices = @transform_12, window_bounds = array<i64: 1, 1>}, {transform_indices = @transform_13, window_bounds = array<i64: 1, 128>}]} {
    %c0 = arith.constant 0 : index
    %c0_0 = arith.constant 0 : index
    %0 = vector.load %arg1[%c0, %c0_0] : memref<128x32xf32, #tpu.memory_space<vmem>>, vector<128x32xf32>
    %c0_1 = arith.constant 0 : index
    %c0_2 = arith.constant 0 : index
    %1 = vector.load %arg3[%c0_1, %c0_2] : memref<32x1024xf32, #tpu.memory_space<vmem>>, vector<32x1024xf32>
    %cst = arith.constant dense<0.000000e+00> : vector<128x1024xf32>
    %2 = tpu.matmul %0, %1, %cst {dimension_numbers = #tpu.dot_dimension_numbers<[1], [0], [0], [1], [0, 0, 1, 1], [], []>} : vector<128x32xf32>, vector<32x1024xf32>, vector<128x1024xf32> -> vector<128x1024xf32>
    %c0_3 = arith.constant 0 : index
    %c0_4 = arith.constant 0 : index
    %3 = vector.load %arg4[%c0_3, %c0_4] : memref<1x1024xf32, #tpu.memory_space<vmem>>, vector<1x1024xf32>
    %4 = vector.broadcast %3 : vector<1x1024xf32> to vector<128x1024xf32>
    %5 = arith.addf %2, %4 : vector<128x1024xf32>
    %cst_5 = arith.constant 0.000000e+00 : f32
    %6 = vector.broadcast %cst_5 : f32 to vector<128x1024xf32>
    %7 = arith.maximumf %5, %6 : vector<128x1024xf32>
    %c0_6 = arith.constant 0 : index
    %c0_7 = arith.constant 0 : index
    %8 = vector.load %arg5[%c0_6, %c0_7] : memref<1024x1024xf32, #tpu.memory_space<vmem>>, vector<1024x1024xf32>
    %cst_8 = arith.constant dense<0.000000e+00> : vector<128x1024xf32>
    %9 = tpu.matmul %7, %8, %cst_8 {dimension_numbers = #tpu.dot_dimension_numbers<[1], [0], [0], [1], [0, 0, 1, 1], [], []>} : vector<128x1024xf32>, vector<1024x1024xf32>, vector<128x1024xf32> -> vector<128x1024xf32>
    %c0_9 = arith.constant 0 : index
    %c0_10 = arith.constant 0 : index
    %10 = vector.load %arg6[%c0_9, %c0_10] : memref<1x1024xf32, #tpu.memory_space<vmem>>, vector<1x1024xf32>
    %11 = vector.broadcast %10 : vector<1x1024xf32> to vector<128x1024xf32>
    %12 = arith.addf %9, %11 : vector<128x1024xf32>
    %cst_11 = arith.constant 0.000000e+00 : f32
    %13 = vector.broadcast %cst_11 : f32 to vector<128x1024xf32>
    %14 = arith.maximumf %12, %13 : vector<128x1024xf32>
    %c0_12 = arith.constant 0 : index
    %c0_13 = arith.constant 0 : index
    %15 = vector.load %arg7[%c0_12, %c0_13] : memref<1024x128xf32, #tpu.memory_space<vmem>>, vector<1024x128xf32>
    %cst_14 = arith.constant dense<0.000000e+00> : vector<128x128xf32>
    %16 = tpu.matmul %14, %15, %cst_14 {dimension_numbers = #tpu.dot_dimension_numbers<[1], [0], [0], [1], [0, 0, 1, 1], [], []>} : vector<128x1024xf32>, vector<1024x128xf32>, vector<128x128xf32> -> vector<128x128xf32>
    %c0_15 = arith.constant 0 : index
    %c0_16 = arith.constant 0 : index
    %17 = vector.load %arg2[%c0_15, %c0_16] : memref<128x128xf32, #tpu.memory_space<vmem>>, vector<128x128xf32>
    %18 = arith.addf %16, %17 : vector<128x128xf32>
    %cst_17 = arith.constant 0.000000e+00 : f32
    %19 = vector.broadcast %cst_17 : f32 to vector<128x128xf32>
    %20 = arith.maximumf %18, %19 : vector<128x128xf32>
    %c0_18 = arith.constant 0 : index
    %c0_19 = arith.constant 0 : index
    %21 = vector.load %arg8[%c0_18, %c0_19] : memref<128x128xf32, #tpu.memory_space<vmem>>, vector<128x128xf32>
    %cst_20 = arith.constant dense<0.000000e+00> : vector<128x128xf32>
    %22 = tpu.matmul %20, %21, %cst_20 {dimension_numbers = #tpu.dot_dimension_numbers<[1], [0], [0], [1], [0, 0, 1, 1], [], []>} : vector<128x128xf32>, vector<128x128xf32>, vector<128x128xf32> -> vector<128x128xf32>
    %c0_21 = arith.constant 0 : index
    %c0_22 = arith.constant 0 : index
    %23 = vector.load %arg9[%c0_21, %c0_22] : memref<1x128xf32, #tpu.memory_space<vmem>>, vector<1x128xf32>
    %24 = vector.broadcast %23 : vector<1x128xf32> to vector<128x128xf32>
    %25 = arith.addf %22, %24 : vector<128x128xf32>
    %cst_23 = arith.constant 0.000000e+00 : f32
    %26 = vector.broadcast %cst_23 : f32 to vector<128x128xf32>
    %27 = arith.maximumf %25, %26 : vector<128x128xf32>
    %c0_24 = arith.constant 0 : index
    %c0_25 = arith.constant 0 : index
    %28 = vector.load %arg10[%c0_24, %c0_25] : memref<128x128xf32, #tpu.memory_space<vmem>>, vector<128x128xf32>
    %cst_26 = arith.constant dense<0.000000e+00> : vector<128x128xf32>
    %29 = tpu.matmul %27, %28, %cst_26 {dimension_numbers = #tpu.dot_dimension_numbers<[1], [0], [0], [1], [0, 0, 1, 1], [], []>} : vector<128x128xf32>, vector<128x128xf32>, vector<128x128xf32> -> vector<128x128xf32>
    %c0_27 = arith.constant 0 : index
    %c0_28 = arith.constant 0 : index
    %30 = vector.load %arg11[%c0_27, %c0_28] : memref<1x128xf32, #tpu.memory_space<vmem>>, vector<1x128xf32>
    %31 = vector.broadcast %30 : vector<1x128xf32> to vector<128x128xf32>
    %32 = arith.addf %29, %31 : vector<128x128xf32>
    %cst_29 = arith.constant 0.000000e+00 : f32
    %33 = vector.broadcast %cst_29 : f32 to vector<128x128xf32>
    %34 = arith.maximumf %32, %33 : vector<128x128xf32>
    %c0_30 = arith.constant 0 : index
    %c0_31 = arith.constant 0 : index
    %35 = vector.load %arg12[%c0_30, %c0_31] : memref<1x128xf32, #tpu.memory_space<vmem>>, vector<1x128xf32>
    %36 = tpu.transpose %34, [1, 0] : vector<128x128xf32> -> vector<128x128xf32>
    %cst_32 = arith.constant dense<0.000000e+00> : vector<1x128xf32>
    %37 = tpu.matmul %35, %36, %cst_32 {dimension_numbers = #tpu.dot_dimension_numbers<[1], [0], [0], [1], [0, 0, 1, 1], [], []>} : vector<1x128xf32>, vector<128x128xf32>, vector<1x128xf32> -> vector<1x128xf32>
    %c0_33 = arith.constant 0 : index
    %c0_34 = arith.constant 0 : index
    %38 = vector.load %arg13[%c0_33, %c0_34] : memref<1x1xf32, #tpu.memory_space<vmem>>, vector<1x1xf32>
    %39 = vector.broadcast %38 : vector<1x1xf32> to vector<1x128xf32>
    %40 = arith.addf %37, %39 : vector<1x128xf32>
    %c0_35 = arith.constant 0 : index
    %c0_36 = arith.constant 0 : index
    %41 = vector.load %arg14[%c0_35, %c0_36] : memref<1x128xf32, #tpu.memory_space<vmem>>, vector<1x128xf32>
    tpu.vector_store %arg14[%c0_35, %c0_36], %40 {strides = array<i32>} : memref<1x128xf32, #tpu.memory_space<vmem>>, vector<1x128xf32>,
    return
  }
  func.func @transform_0(%arg0: i32) -> (i32, i32) {
    %c0_i32 = arith.constant 0 : i32
    %c0_i32_0 = arith.constant 0 : i32
    return %arg0, %c0_i32 : i32, i32
  }
  func.func @transform_1(%arg0: i32) -> (i32, i32) {
    %c0_i32 = arith.constant 0 : i32
    %c0_i32_0 = arith.constant 0 : i32
    return %arg0, %c0_i32 : i32, i32
  }
  func.func @transform_2(%arg0: i32) -> (i32, i32) {
    %c0_i32 = arith.constant 0 : i32
    %c0_i32_0 = arith.constant 0 : i32
    %c0_i32_1 = arith.constant 0 : i32
    return %c0_i32, %c0_i32_0 : i32, i32
  }
  func.func @transform_3(%arg0: i32) -> (i32, i32) {
    %c0_i32 = arith.constant 0 : i32
    %c0_i32_0 = arith.constant 0 : i32
    %c0_i32_1 = arith.constant 0 : i32
    return %c0_i32, %c0_i32_0 : i32, i32
  }
  func.func @transform_4(%arg0: i32) -> (i32, i32) {
    %c0_i32 = arith.constant 0 : i32
    %c0_i32_0 = arith.constant 0 : i32
    %c0_i32_1 = arith.constant 0 : i32
    return %c0_i32, %c0_i32_0 : i32, i32
  }
  func.func @transform_5(%arg0: i32) -> (i32, i32) {
    %c0_i32 = arith.constant 0 : i32
    %c0_i32_0 = arith.constant 0 : i32
    %c0_i32_1 = arith.constant 0 : i32
    return %c0_i32, %c0_i32_0 : i32, i32
  }
  func.func @transform_6(%arg0: i32) -> (i32, i32) {
    %c0_i32 = arith.constant 0 : i32
    %c0_i32_0 = arith.constant 0 : i32
    %c0_i32_1 = arith.constant 0 : i32
    return %c0_i32, %c0_i32_0 : i32, i32
  }
  func.func @transform_7(%arg0: i32) -> (i32, i32) {
    %c0_i32 = arith.constant 0 : i32
    %c0_i32_0 = arith.constant 0 : i32
    %c0_i32_1 = arith.constant 0 : i32
    return %c0_i32, %c0_i32_0 : i32, i32
  }
  func.func @transform_8(%arg0: i32) -> (i32, i32) {
    %c0_i32 = arith.constant 0 : i32
    %c0_i32_0 = arith.constant 0 : i32
    %c0_i32_1 = arith.constant 0 : i32
    return %c0_i32, %c0_i32_0 : i32, i32
  }
  func.func @transform_9(%arg0: i32) -> (i32, i32) {
    %c0_i32 = arith.constant 0 : i32
    %c0_i32_0 = arith.constant 0 : i32
    %c0_i32_1 = arith.constant 0 : i32
    return %c0_i32, %c0_i32_0 : i32, i32
  }
  func.func @transform_10(%arg0: i32) -> (i32, i32) {
    %c0_i32 = arith.constant 0 : i32
    %c0_i32_0 = arith.constant 0 : i32
    %c0_i32_1 = arith.constant 0 : i32
    return %c0_i32, %c0_i32_0 : i32, i32
  }
  func.func @transform_11(%arg0: i32) -> (i32, i32) {
    %c0_i32 = arith.constant 0 : i32
    %c0_i32_0 = arith.constant 0 : i32
    %c0_i32_1 = arith.constant 0 : i32
    return %c0_i32, %c0_i32_0 : i32, i32
  }
  func.func @transform_12(%arg0: i32) -> (i32, i32) {
    %c0_i32 = arith.constant 0 : i32
    %c0_i32_0 = arith.constant 0 : i32
    %c0_i32_1 = arith.constant 0 : i32
    return %c0_i32, %c0_i32_0 : i32, i32
  }
  func.func @transform_13(%arg0: i32) -> (i32, i32) {
    %c0_i32 = arith.constant 0 : i32
    %c0_i32_0 = arith.constant 0 : i32
    return %c0_i32, %arg0 : i32, i32
  }
}

</mosaic_0001>

<bundles_post_ra>
// kernel: tpu_custom_call.1
= control target key start
LH: loop header
LB: loop body
LE: loop exit
PB: predicated region body
PF: predicated region fallthrough
CT: control target
= control target key end

     0   :  { %s11022_s0 = inlined_call_operand.vmem [shape: f32[128,32], index: 0, kind: input, shape index: {}]   ;;  %s11023_s1 = inlined_call_operand.hbm [shape: f32[128,128], index: 1, kind: input, shape index: {}]   ;;  %s11024_s2 = inlined_call_operand.hbm [shape: f32[32,1024], index: 2, kind: input, shape index: {}]   ;;  %s11025_s3 = inlined_call_operand.hbm [shape: f32[1,1024], index: 3, kind: input, shape index: {}]   ;;  %s11026_s4 = inlined_call_operand.hbm [shape: f32[1024,1024], index: 4, kind: input, shape index: {}]   ;;  %s11027_s5 = inlined_call_operand.hbm [shape: f32[1,1024], index: 5, kind: input, shape index: {}]   ;;  %s11028_s6 = inlined_call_operand.hbm [shape: f32[1024,128], index: 6, kind: input, shape index: {}]   ;;  %s11029_s7 = inlined_call_operand.hbm [shape: f32[128,128], index: 7, kind: input, shape index: {}]   ;;  %s11030_s8 = inlined_call_operand.hbm [shape: f32[1,128], index: 8, kind: input, shape index: {}]   ;;  %s11031_s9 = inlined_call_operand.hbm [shape: f32[128,128], index: 9, kind: input, shape index: {}]   ;;  %s11032_s10 = inlined_call_operand.hbm [shape: f32[1,128], index: 10, kind: input, shape index: {}]   ;;  %s11033_s11 = inlined_call_operand.hbm [shape: f32[1,128], index: 11, kind: input, shape index: {}]   ;;  %s11034_s12 = inlined_call_operand.<no memory space> [shape: f32[1,1], index: 12, kind: input, shape index: {}]   ;;  %s11035_s13 = inlined_call_operand.hbm [shape: f32[1,128], index: 13, kind: output, shape index: {}]  }
   0x1   :  { %v18_v0 = vstv %s11034_s12 }
   0x2   :  { %19 = vst [vmem:[#allocation2] sm:$0x1] %v18_v0 }
   0x3   :  { %20 = vsyncpa [#allocation4], 0 }
   0x4   :  { %21 = vsyncpa [#allocation7], 0 }
   0x5   :  { %22 = vsyncpa [#allocation10], 0 }
   0x6   :  { %23 = vsyncpa [#allocation13], 0 }
   0x7   :  { %24 = vsyncpa [#allocation16], 0 }
   0x8   :  { %25 = vsyncpa [#allocation19], 0 }
   0x9   :  { %26 = vsyncpa [#allocation5], 0  ;;  %s8779_s27 = smov [#allocation6]   ;;  %s8501_s14 = scalar_lea.hbm %s11024_s2, 4096 }
   0xa   :  { %s46_s28 = sshll.u32 %s8779_s27, 4  ;;  %p8502_p0 = scmp.ne.s32.totalorder %s11024_s2, %s8501_s14  ;;  %s47_s28 = int_to_ptr.vmem [resolvable:$true] %s46_s28 }
   0xb   :  { %p8505_p1 = scmp.lt.u32.totalorder %s8501_s14, %s11024_s2 }
   0xd   :  { %p8507_p2 = pnand %p8505_p1, %p8502_p0 }
   0xf   :  { %8510 = shalt.err (!%p8507_p2)
}
  0x10   :  { %s8511_s18 = scalar_lea.vmem %s47_s28, 4096  ;;  %p8516_p4 = scmp.lt.s32.totalorder %s47_s28, %s47_s28 }
  0x11   :  { %p8512_p3 = scmp.ne.s32.totalorder %s47_s28, %s8511_s18  ;;  %p8517_p5 = scmp.lt.s32.totalorder %s8511_s18, %s8511_s18 }
  0x13   :  { %p8518_p6 = por %p8517_p5, %p8516_p4 }
  0x15   :  { %p8519_p7 = pnand %p8518_p6, %p8512_p3 }
  0x17   :  { %8522 = shalt.err (!%p8519_p7)
}
  0x18   :  { %s8780_s19 = smov 1024   ;;  %s8781_s20 = smov 64  }
  0x19   :  { %52 = dma.hbm_to_vmem [thread:$0]  %s11024_s2, 4096, %s47_s28, [#allocation7], %s8780_s19, %s8780_s19, %s8781_s20  }
  0x1a   :  { %s8782_s23 = smov [#allocation9]   ;;  %s8523_s27 = scalar_lea.hbm %s11026_s4, 131072 }
  0x1b   :  { %s68_s24 = sshll.u32 %s8782_s23, 4  ;;  %p8524_p8 = scmp.ne.s32.totalorder %s11026_s4, %s8523_s27  ;;  %s69_s24 = int_to_ptr.vmem [resolvable:$true] %s68_s24 }
  0x1c   :  { %p8527_p9 = scmp.lt.u32.totalorder %s8523_s27, %s11026_s4 }
  0x1e   :  { %p8529_p10 = pnand %p8527_p9, %p8524_p8 }
  0x20   :  { %8532 = shalt.err (!%p8529_p10)
}
  0x21   :  { %s8533_s16 = scalar_lea.vmem %s69_s24, 131072  ;;  %p8538_p12 = scmp.lt.s32.totalorder %s69_s24, %s69_s24 }
  0x22   :  { %p8534_p11 = scmp.ne.s32.totalorder %s69_s24, %s8533_s16  ;;  %p8539_p13 = scmp.lt.s32.totalorder %s8533_s16, %s8533_s16 }
  0x24   :  { %p8540_p0 = por %p8539_p13, %p8538_p12 }
  0x26   :  { %p8541_p1 = pnand %p8540_p0, %p8534_p11 }
  0x28   :  { %8544 = shalt.err (!%p8541_p1)
}
  0x29   :  { %74 = dma.hbm_to_vmem [thread:$0]  %s11026_s4, 131072, %s69_s24, [#allocation10], %s8780_s19, %s8780_s19, %s8781_s20  }
  0x2a   :  { %s8783_s12 = smov [#allocation12]   ;;  %s8784_s18 = smov [#allocation15]  }
  0x2b   :  { %s90_s17 = sshll.u32 %s8783_s12, 4  ;;  %s115_s21 = sshll.u32 %s8784_s18, 4  ;;  %s91_s17 = int_to_ptr.vmem [resolvable:$true] %s90_s17  ;;  %s8896_s21 = int_to_ptr.vmem [resolvable:$true] %s115_s21 }
  0x2c   :  { %s8545_s25 = scalar_lea.hbm %s11028_s6, 16384 }
  0x2d   :  { %p8546_p2 = scmp.ne.s32.totalorder %s11028_s6, %s8545_s25  ;;  %p8549_p3 = scmp.lt.u32.totalorder %s8545_s25, %s11028_s6 }
  0x2f   :  { %p8551_p4 = pnand %p8549_p3, %p8546_p2 }
  0x31   :  { %8554 = shalt.err (!%p8551_p4)
}
  0x32   :  { %s8555_s4 = scalar_lea.vmem %s91_s17, 16384  ;;  %p8560_p6 = scmp.lt.s32.totalorder %s91_s17, %s91_s17 }
  0x33   :  { %p8556_p5 = scmp.ne.s32.totalorder %s91_s17, %s8555_s4  ;;  %p8561_p7 = scmp.lt.s32.totalorder %s8555_s4, %s8555_s4 }
  0x35   :  { %p8562_p8 = por %p8561_p7, %p8560_p6 }
  0x37   :  { %p8563_p9 = pnand %p8562_p8, %p8556_p5 }
  0x39   :  { %8566 = shalt.err (!%p8563_p9)
}
  0x3a   :  { %s8785_s19 = smov 128   ;;  %s8786_s20 = smov 8  }
  0x3b   :  { %96 = dma.hbm_to_vmem [thread:$0]  %s11028_s6, 16384, %s91_s17, [#allocation13], %s8785_s19, %s8785_s19, %s8786_s20  }
  0x3c   :  { %s8567_s2 = scalar_lea.hbm %s11030_s8, 16 }
  0x3d   :  { %p8568_p10 = scmp.ne.s32.totalorder %s11030_s8, %s8567_s2  ;;  %p8571_p11 = scmp.lt.u32.totalorder %s8567_s2, %s11030_s8 }
  0x3f   :  { %p8573_p12 = pnand %p8571_p11, %p8568_p10 }
  0x41   :  { %8576 = shalt.err (!%p8573_p12)
}
  0x42   :  { %s8577_s23 = scalar_lea.vmem %s8896_s21, 16  ;;  %s8581_s6 = scalar_lea.vmem %s8896_s21, 32 }
  0x43   :  { %p8578_p13 = scmp.ne.s32.totalorder %s8896_s21, %s8577_s23  ;;  %p8582_p0 = scmp.lt.s32.totalorder %s8896_s21, %s8896_s21 }
  0x44   :  { %p8583_p1 = scmp.lt.s32.totalorder %s8581_s6, %s8577_s23 }
  0x46   :  { %p8584_p2 = por %p8583_p1, %p8582_p0 }
  0x48   :  { %p8585_p3 = pnand %p8584_p2, %p8578_p13 }
  0x4a   :  { %8588 = shalt.err (!%p8585_p3)
}
  0x4b   :  { %118 = dma.hbm_to_vmem [thread:$0]  %s11030_s8, 16, %s8896_s21, [#allocation16]  }
  0x4c   :  { %s8787_s26 = smov [#allocation18]   ;;  %s8788_s29 = smov [#allocation3]  }
  0x4d   :  { %s137_s27 = sshll.u32 %s8787_s26, 4  ;;  %s34_s30 = sshll.u32 %s8788_s29, 4  ;;  %s138_s27 = int_to_ptr.vmem [resolvable:$true] %s137_s27  ;;  %s8931_s30 = int_to_ptr.vmem [resolvable:$true] %s34_s30 }
  0x4e   :  { %s8589_s14 = scalar_lea.hbm %s11032_s10, 16 }
  0x4f   :  { %p8590_p4 = scmp.ne.s32.totalorder %s11032_s10, %s8589_s14  ;;  %p8593_p5 = scmp.lt.u32.totalorder %s8589_s14, %s11032_s10 }
  0x51   :  { %p8595_p6 = pnand %p8593_p5, %p8590_p4 }
  0x53   :  { %8598 = shalt.err (!%p8595_p6)
}
  0x54   :  { %s8599_s8 = scalar_lea.vmem %s138_s27, 16  ;;  %s8603_s21 = scalar_lea.vmem %s138_s27, 32 }
  0x55   :  { %p8600_p7 = scmp.ne.s32.totalorder %s138_s27, %s8599_s8  ;;  %p8604_p8 = scmp.lt.s32.totalorder %s138_s27, %s138_s27 }
  0x56   :  { %p8605_p9 = scmp.lt.s32.totalorder %s8603_s21, %s8599_s8 }
  0x58   :  { %p8606_p10 = por %p8605_p9, %p8604_p8 }
  0x5a   :  { %p8607_p11 = pnand %p8606_p10, %p8600_p7 }
  0x5c   :  { %8610 = shalt.err (!%p8607_p11)
}
  0x5d   :  { %140 = dma.hbm_to_vmem [thread:$0]  %s11032_s10, 16, %s138_s27, [#allocation19]  }
  0x5e   :  { %s8611_s6 = scalar_lea.hbm %s11023_s1, 2048 }
  0x5f   :  { %p8612_p12 = scmp.ne.s32.totalorder %s11023_s1, %s8611_s6  ;;  %p8615_p13 = scmp.lt.u32.totalorder %s8611_s6, %s11023_s1 }
  0x61   :  { %p8617_p0 = pnand %p8615_p13, %p8612_p12 }
  0x63   :  { %8620 = shalt.err (!%p8617_p0)
}
  0x64   :  { %s8621_s4 = scalar_lea.vmem %s8931_s30, 2048  ;;  %p8626_p2 = scmp.lt.s32.totalorder %s8931_s30, %s8931_s30 }
  0x65   :  { %p8622_p1 = scmp.ne.s32.totalorder %s8931_s30, %s8621_s4  ;;  %p8627_p3 = scmp.lt.s32.totalorder %s8621_s4, %s8621_s4 }
  0x67   :  { %p8628_p4 = por %p8627_p3, %p8626_p2 }
  0x69   :  { %p8629_p5 = pnand %p8628_p4, %p8622_p1 }
  0x6b   :  { %8632 = shalt.err (!%p8629_p5)
}
  0x6c   :  { %40 = dma.hbm_to_vmem [thread:$0]  %s11023_s1, 2048, %s8931_s30, [#allocation4], %s8785_s19, %s8785_s19, %s8786_s20  }
  0x6d   :  { %s8789_s24 = smov [#allocation8]   ;;  %s8790_s15 = smov [#allocation11]  }
  0x6e   :  { %s59_s14 = sshll.u32 %s8789_s24, 4  ;;  %s81_s16 = sshll.u32 %s8790_s15, 4  ;;  %s60_s14 = int_to_ptr.vmem [resolvable:$true] %s59_s14  ;;  %s82_s16 = int_to_ptr.vmem [resolvable:$true] %s81_s16 }
  0x6f   :  { %s8633_s8 = scalar_lea.hbm %s11025_s3, 128 }
  0x70   :  { %p8634_p6 = scmp.ne.s32.totalorder %s11025_s3, %s8633_s8  ;;  %p8637_p7 = scmp.lt.u32.totalorder %s8633_s8, %s11025_s3 }
  0x72   :  { %p8639_p8 = pnand %p8637_p7, %p8634_p6 }
  0x74   :  { %8642 = shalt.err (!%p8639_p8)
}
  0x75   :  { %s8643_s1 = scalar_lea.vmem %s60_s14, 128  ;;  %p8648_p10 = scmp.lt.s32.totalorder %s60_s14, %s60_s14 }
  0x76   :  { %p8644_p9 = scmp.ne.s32.totalorder %s60_s14, %s8643_s1  ;;  %p8649_p11 = scmp.lt.s32.totalorder %s8643_s1, %s8643_s1 }
  0x78   :  { %p8650_p12 = por %p8649_p11, %p8648_p10 }
  0x7a   :  { %p8651_p13 = pnand %p8650_p12, %p8644_p9 }
  0x7c   :  { %8654 = shalt.err (!%p8651_p13)
}
  0x7d   :  { %62 = dma.hbm_to_vmem [thread:$0]  %s11025_s3, 128, %s60_s14, [#allocation7]  }
  0x7e   :  { %s8655_s25 = scalar_lea.hbm %s11027_s5, 128 }
  0x7f   :  { %p8656_p0 = scmp.ne.s32.totalorder %s11027_s5, %s8655_s25  ;;  %p8659_p1 = scmp.lt.u32.totalorder %s8655_s25, %s11027_s5 }
  0x81   :  { %p8661_p2 = pnand %p8659_p1, %p8656_p0 }
  0x83   :  { %8664 = shalt.err (!%p8661_p2)
}
  0x84   :  { %s8665_s27 = scalar_lea.vmem %s82_s16, 128  ;;  %p8670_p4 = scmp.lt.s32.totalorder %s82_s16, %s82_s16 }
  0x85   :  { %p8666_p3 = scmp.ne.s32.totalorder %s82_s16, %s8665_s27  ;;  %p8671_p5 = scmp.lt.s32.totalorder %s8665_s27, %s8665_s27 }
  0x87   :  { %p8672_p6 = por %p8671_p5, %p8670_p4 }
  0x89   :  { %p8673_p7 = pnand %p8672_p6, %p8666_p3 }
  0x8b   :  { %8676 = shalt.err (!%p8673_p7)
}
  0x8c   :  { %84 = dma.hbm_to_vmem [thread:$0]  %s11027_s5, 128, %s82_s16, [#allocation10]  }
  0x8d   :  { %s8791_s14 = smov [#allocation14]   ;;  %s8792_s2 = smov [#allocation17]  }
  0x8e   :  { %s102_s15 = sshll.u32 %s8791_s14, 4  ;;  %s124_s28 = sshll.u32 %s8792_s2, 4  ;;  %s103_s15 = int_to_ptr.vmem [resolvable:$true] %s102_s15  ;;  %s8989_s28 = int_to_ptr.vmem [resolvable:$true] %s124_s28 }
  0x8f   :  { %s8677_s12 = scalar_lea.hbm %s11029_s7, 2048 }
  0x90   :  { %p8678_p8 = scmp.ne.s32.totalorder %s11029_s7, %s8677_s12  ;;  %p8681_p9 = scmp.lt.u32.totalorder %s8677_s12, %s11029_s7 }
  0x92   :  { %p8683_p10 = pnand %p8681_p9, %p8678_p8 }
  0x94   :  { %8686 = shalt.err (!%p8683_p10)
}
  0x95   :  { %s8687_s5 = scalar_lea.vmem %s103_s15, 2048  ;;  %p8692_p12 = scmp.lt.s32.totalorder %s103_s15, %s103_s15 }
  0x96   :  { %p8688_p11 = scmp.ne.s32.totalorder %s103_s15, %s8687_s5  ;;  %p8693_p13 = scmp.lt.s32.totalorder %s8687_s5, %s8687_s5 }
  0x98   :  { %p8694_p0 = por %p8693_p13, %p8692_p12 }
  0x9a   :  { %p8695_p1 = pnand %p8694_p0, %p8688_p11 }
  0x9c   :  { %8698 = shalt.err (!%p8695_p1)
}
  0x9d   :  { %108 = dma.hbm_to_vmem [thread:$0]  %s11029_s7, 2048, %s103_s15, [#allocation13], %s8785_s19, %s8785_s19, %s8786_s20  }
  0x9e   :  { %s8699_s25 = scalar_lea.hbm %s11031_s9, 2048 }
  0x9f   :  { %p8700_p2 = scmp.ne.s32.totalorder %s11031_s9, %s8699_s25  ;;  %p8703_p3 = scmp.lt.u32.totalorder %s8699_s25, %s11031_s9 }
  0xa1   :  { %p8705_p4 = pnand %p8703_p3, %p8700_p2 }
  0xa3   :  { %8708 = shalt.err (!%p8705_p4)
}
  0xa4   :  { %s8709_s27 = scalar_lea.vmem %s8989_s28, 2048  ;;  %p8714_p6 = scmp.lt.s32.totalorder %s8989_s28, %s8989_s28 }
  0xa5   :  { %p8710_p5 = scmp.ne.s32.totalorder %s8989_s28, %s8709_s27  ;;  %p8715_p7 = scmp.lt.s32.totalorder %s8709_s27, %s8709_s27 }
  0xa7   :  { %p8716_p8 = por %p8715_p7, %p8714_p6 }
  0xa9   :  { %p8717_p9 = pnand %p8716_p8, %p8710_p5 }
  0xab   :  { %8720 = shalt.err (!%p8717_p9)
}
  0xac   :  { %130 = dma.hbm_to_vmem [thread:$0]  %s11031_s9, 2048, %s8989_s28, [#allocation16], %s8785_s19, %s8785_s19, %s8786_s20  }
  0xad   :  { %s8793_s24 = smov [#allocation20]   ;;  %s8721_s8 = scalar_lea.hbm %s11033_s11, 16 }
  0xae   :  { %s147_s14 = sshll.u32 %s8793_s24, 4  ;;  %p8722_p10 = scmp.ne.s32.totalorder %s11033_s11, %s8721_s8  ;;  %s148_s14 = int_to_ptr.vmem [resolvable:$true] %s147_s14 }
  0xaf   :  { %p8725_p11 = scmp.lt.u32.totalorder %s8721_s8, %s11033_s11 }
  0xb1   :  { %p8727_p12 = pnand %p8725_p11, %p8722_p10 }
  0xb3   :  { %8730 = shalt.err (!%p8727_p12)
}
  0xb4   :  { %s8731_s1 = scalar_lea.vmem %s148_s14, 16  ;;  %s8735_s9 = scalar_lea.vmem %s148_s14, 32 }
  0xb5   :  { %p8732_p13 = scmp.ne.s32.totalorder %s148_s14, %s8731_s1  ;;  %p8736_p0 = scmp.lt.s32.totalorder %s148_s14, %s148_s14 }
  0xb6   :  { %p8737_p1 = scmp.lt.s32.totalorder %s8735_s9, %s8731_s1 }
  0xb8   :  { %p8738_p2 = por %p8737_p1, %p8736_p0 }
  0xba   :  { %p8739_p3 = pnand %p8738_p2, %p8732_p13 }
  0xbc   :  { %8742 = shalt.err (!%p8739_p3)
}
  0xbd   :  { %150 = dma.hbm_to_vmem [thread:$0]  %s11033_s11, 16, %s148_s14, [#allocation19]  }
  0xbe   :  { %8765 = dma.done.wait [#allocation4], 2048  }
  0xbf   :  { %8766 = vsyncadd [#allocation4], 4294965248 }
  0xc0   :  { %8767 = dma.done.wait [#allocation7], 4224  }
  0xc1   :  { %8768 = vsyncadd [#allocation7], 4294963072 }
  0xc2   :  { %8769 = dma.done.wait [#allocation10], 131200  }
  0xc3   :  { %8770 = vsyncadd [#allocation10], 4294836096 }
  0xc4   :  { %8771 = dma.done.wait [#allocation13], 18432  }
  0xc5   :  { %8772 = vsyncadd [#allocation13], 4294948864 }
  0xc6   :  { %8773 = dma.done.wait [#allocation16], 2064  }
  0xc7   :  { %8774 = vsyncadd [#allocation16], 4294965232 }
  0xc8   :  { %8775 = dma.done.wait [#allocation19], 32  }
  0xc9   :  { %8776 = vsyncadd [#allocation19], 4294967264  ;;  %v11036_v1 = vmov 0.0   ;;  %v203_v2 = vld [vmem:[#allocation6 + $0x8] sm:$0xff]  ;;  %v202_v4 = vld [vmem:[#allocation6] sm:$0xff]  ;;  %vm276_vm0 = vcmask 261120  }
  0xca   :  { %389 = vmatprep.mubr.f32.mxu0 %v11036_v1  ;;  %461 = vmatprep.mubr.f32.mxu1 %v11036_v1  ;;  %v211_v3 = vld [vmem:[#allocation6 + $0x48] sm:$0xff]  ;;  %v210_v6 = vld [vmem:[#allocation6 + $0x40] sm:$0xff]  ;;  %v205_v14 = vld [vmem:[#allocation6 + $0x18] sm:$0xff]  ;;  %vm8796_vm1 = vmmov 0  }
  0xcb   :  { %v6691_v5 = vpack.c.bf16 %v211_v3, %v203_v2  ;;  %v219_v7 = vld [vmem:[#allocation6 + $0x88] sm:$0xff]  ;;  %v6693_v9 = vpack.c.bf16 %v210_v6, %v202_v4  ;;  %v218_v11 = vld [vmem:[#allocation6 + $0x80] sm:$0xff]  ;;  %v213_v15 = vld [vmem:[#allocation6 + $0x58] sm:$0xff] }
  0xcc   :  { %v227_v8 = vld [vmem:[#allocation6 + $0xc8] sm:$0xff]  ;;  %v226_v12 = vld [vmem:[#allocation6 + $0xc0] sm:$0xff]  ;;  %v204_v16 = vld [vmem:[#allocation6 + $0x10] sm:$0xff]  ;;  %v6699_v19 = vpack.c.bf16 %v213_v15, %v205_v14 }
  0xcd   :  { %v6695_v10 = vpack.c.bf16 %v227_v8, %v219_v7  ;;  %6692 = vmatprep.subr.bf16.mxu0 %v6691_v5  ;;  %7963 = vmatprep.subr.bf16.mxu1 %v6691_v5  ;;  %v6697_v13 = vpack.c.bf16 %v226_v12, %v218_v11  ;;  %v9043_v17 = vld [vmem:[%s11022_s0] sm:$0xff]  ;;  %v212_v20 = vld [vmem:[#allocation6 + $0x50] sm:$0xff]  ;;  %v9053_v24 = vld [vmem:[%s11022_s0 + $0x8] sm:$0xff] }
  0xce   :  { %6694 = vmatpush1.bf16.msra.mxu0 %v6693_v9  ;;  %7965 = vmatpush1.bf16.msra.mxu1 %v6693_v9  ;;  %v9048_v18 = vld [vmem:[%s11022_s0 + $0x60] sm:$0xff]  ;;  %v6701_v21 = vpack.c.bf16 %v212_v20, %v204_v16  ;;  %v220_v26 = vld [vmem:[#allocation6 + $0x90] sm:$0xff]  ;;  %v207_v28 = vld [vmem:[#allocation6 + $0x28] sm:$0xff] }
  0xcf   :  { %6696 = vmatprep.subr.bf16.mxu0 %v6695_v10  ;;  %7964 = vmatprep.subr.bf16.mxu1 %v6695_v10  ;;  %v221_v22 = vld [vmem:[#allocation6 + $0x98] sm:$0xff]  ;;  %v228_v27 = vld [vmem:[#allocation6 + $0xd0] sm:$0xff]  ;;  %v215_v29 = vld [vmem:[#allocation6 + $0x68] sm:$0xff] }
  0xd0   :  { %v229_v23 = vld [vmem:[#allocation6 + $0xd8] sm:$0xff]  ;;  %v206_v30 = vld [vmem:[#allocation6 + $0x20] sm:$0xff]  ;;  %v6707_v33 = vpack.c.bf16 %v215_v29, %v207_v28  ;;  %v6705_v36 = vpack.c.bf16 %v228_v27, %v220_v26  ;;  %v223_v38 = vld [vmem:[#allocation6 + $0xa8] sm:$0xff] }
  0xd1   :  { %v6703_v25 = vpack.c.bf16 %v229_v23, %v221_v22  ;;  %v214_v31 = vld [vmem:[#allocation6 + $0x60] sm:$0xff]  ;;  %v209_v34 = vld [vmem:[#allocation6 + $0x38] sm:$0xff]  ;;  %v231_v39 = vld [vmem:[#allocation6 + $0xe8] sm:$0xff] }
  0xd2   :  { %6698 = vmatpush1.bf16.msra.mxu0 %v6697_v13  ;;  %7966 = vmatpush1.bf16.msra.mxu1 %v6697_v13  ;;  %v9063_v32 = vld [vmem:[%s11022_s0 + $0x68] sm:$0xff]  ;;  %v217_v35 = vld [vmem:[#allocation6 + $0x78] sm:$0xff]  ;;  %v6709_v37 = vpack.c.bf16 %v214_v31, %v206_v30  ;;  %v6711_v41 = vpack.c.bf16 %v231_v39, %v223_v38  ;;  %v9071_v44 = vld [vmem:[%s11022_s0 + $0x10] sm:$0xff] }
  0xd3   :  { %6700 = vmatprep.subr.bf16.mxu1 %v6699_v19  ;;  %6708 = vmatprep.subr.bf16.mxu0 %v6707_v33  ;;  %v6715_v40 = vpack.c.bf16 %v217_v35, %v209_v34  ;;  %v222_v42 = vld [vmem:[#allocation6 + $0xa0] sm:$0xff]  ;;  %v9080_v45 = vld [vmem:[%s11022_s0 + $0x70] sm:$0xff]  ;;  %v9090_v50 = vld [vmem:[%s11022_s0 + $0x18] sm:$0xff] }
  0xd4   :  { %v230_v43 = vld [vmem:[#allocation6 + $0xe0] sm:$0xff]  ;;  %v1098_v46 = vld [vmem:[#allocation9 + $0x8] sm:$0xff]  ;;  %v225_v54 = vld [vmem:[#allocation6 + $0xb8] sm:$0xff] }
  0xd5   :  { %6077 = vmatmul.mubr.msk.f32.vlgmr.msra.gmra.mrb[0].mxu0 %vm276_vm0, %v9043_v17  ;;  %6089 = vmatmul.mubr.msk.f32.vlgmr.msra.gmra.mrb[0].mxu1 %vm276_vm0, %v9048_v18  ;;  %v1106_v47 = vld [vmem:[#allocation9 + $0x48] sm:$0xff]  ;;  %v6713_v48 = vpack.c.bf16 %v230_v43, %v222_v42  ;;  %v233_v55 = vld [vmem:[#allocation6 + $0xf8] sm:$0xff]  ;;  %v1100_v61 = vld [vmem:[#allocation9 + $0x18] sm:$0xff] }
  0xd6   :  { %395 = vmatprep.mubr.f32.mxu0 %v11036_v1  ;;  %6702 = vmatpush1.bf16.msra.mxu1 %v6701_v21  ;;  %v6723_v49 = vpack.c.bf16 %v1106_v47, %v1098_v46  ;;  %v9096_v51 = vld [vmem:[%s11022_s0 + $0x78] sm:$0xff]  ;;  %v9106_v56 = vld [vmem:[%s11022_s0 + $0x20] sm:$0xff]  ;;  %v6719_v58 = vpack.c.bf16 %v233_v55, %v225_v54  ;;  %v9117_v63 = vld [vmem:[%s11022_s0 + $0x28] sm:$0xff] }
  0xd7   :  { %467 = vmatprep.mubr.f32.mxu1 %v11036_v1  ;;  %6704 = vmatprep.subr.bf16.mxu1 %v6703_v25  ;;  %v208_v52 = vld [vmem:[#allocation6 + $0x30] sm:$0xff]  ;;  %v1108_v62 = vld [vmem:[#allocation9 + $0x58] sm:$0xff]  ;;  %v1097_v9 = vld [vmem:[#allocation9] sm:$0xff] }
  0xd8   :  { %6710 = vmatpush1.bf16.msra.mxu0 %v6709_v37  ;;  %v216_v53 = vld [vmem:[#allocation6 + $0x70] sm:$0xff]  ;;  %v6979_v2 = vpack.c.bf16 %v1108_v62, %v1100_v61  ;;  %v9150_v5 = vld [vmem:[%s11022_s0 + $0x40] sm:$0xff]  ;;  %v9161_v6 = vld [vmem:[%s11022_s0 + $0x48] sm:$0xff] }
  0xd9   :  { %6078 = vmatmul.mubr.msk.f32.gmra.mrb[2].mxu0 %vm276_vm0, %v9053_v24  ;;  %6090 = vmatmul.mubr.msk.f32.gmra.mrb[2].mxu1 %vm276_vm0, %v9063_v32  ;;  %v6717_v57 = vpack.c.bf16 %v216_v53, %v208_v52  ;;  %v224_v59 = vld [vmem:[#allocation6 + $0xb0] sm:$0xff]  ;;  %v1105_v10 = vld [vmem:[#allocation9 + $0x40] sm:$0xff] }
  0xda   :  { %401 = vmatprep.mubr.f32.mxu0 %v11036_v1  ;;  %473 = vmatprep.mubr.f32.mxu1 %v11036_v1  ;;  %v232_v60 = vld [vmem:[#allocation6 + $0xf0] sm:$0xff]  ;;  %v6725_v13 = vpack.c.bf16 %v1105_v10, %v1097_v9  ;;  %v1113_v15 = vld [vmem:[#allocation9 + $0x80] sm:$0xff]  ;;  %v1107_v9 = vld [vmem:[#allocation9 + $0x50] sm:$0xff] }
  0xdb   :  { %6706 = vmatpush1.bf16.msra.mxu1 %v6705_v36  ;;  %6712 = vmatprep.subr.bf16.mxu0 %v6711_v41  ;;  %v6721_v0 = vpack.c.bf16 %v232_v60, %v224_v59  ;;  %v9128_v3 = vld [vmem:[%s11022_s0 + $0x30] sm:$0xff]  ;;  %v9139_v4 = vld [vmem:[%s11022_s0 + $0x38] sm:$0xff] }
  0xdc   :  { %6716 = vmatprep.subr.bf16.mxu1 %v6715_v40  ;;  %6714 = vmatpush1.bf16.msra.mxu0 %v6713_v48  ;;  %v9172_v7 = vld [vmem:[%s11022_s0 + $0x50] sm:$0xff]  ;;  %v9183_v8 = vld [vmem:[%s11022_s0 + $0x58] sm:$0xff]  ;;  %s8798_s0 = smov [#allocation21]  }
  0xdd   :  { %6079 = vmatmul.mubr.msk.f32.gmra.mrb[4].mxu0 %vm276_vm0, %v9071_v44  ;;  %6091 = vmatmul.mubr.msk.f32.gmra.mrb[4].mxu1 %vm276_vm0, %v9080_v45  ;;  %v1114_v11 = vld [vmem:[#allocation9 + $0x88] sm:$0xff]  ;;  %v1121_v16 = vld [vmem:[#allocation9 + $0xc0] sm:$0xff]  ;;  %s6063_s5 = sshll.u32 %s8798_s0, 4  ;;  %s6064_s5 = int_to_ptr.vmem [resolvable:$true] %s6063_s5 }
  0xde   :  { %407 = vmatprep.mubr.f32.mxu0 %v11036_v1  ;;  %479 = vmatprep.mubr.f32.mxu1 %v11036_v1  ;;  %v1122_v12 = vld [vmem:[#allocation9 + $0xc8] sm:$0xff]  ;;  %v6729_v21 = vpack.c.bf16 %v1121_v16, %v1113_v15  ;;  %v1129_v23 = vld [vmem:[#allocation9 + $0x100] sm:$0xff]  ;;  %s8743_s16 = scalar_lea.vmem %s6064_s5, 16  ;;  %s8747_s23 = scalar_lea.vmem %s6064_s5, 32 }
  0xdf   :  { %6724 = vmatprep.subr.bf16.mxu0 %v6723_v49  ;;  %v6727_v14 = vpack.c.bf16 %v1122_v12, %v1114_v11  ;;  %v1130_v19 = vld [vmem:[#allocation9 + $0x108] sm:$0xff]  ;;  %v1137_v25 = vld [vmem:[#allocation9 + $0x140] sm:$0xff]  ;;  %v1116_v11 = vld [vmem:[#allocation9 + $0x98] sm:$0xff]  ;;  %p8744_p4 = scmp.ne.s32.totalorder %s6064_s5, %s8743_s16  ;;  %p8748_p5 = scmp.lt.s32.totalorder %s6064_s5, %s6064_s5 }
  0xe0   :  { %v1138_v20 = vld [vmem:[#allocation9 + $0x148] sm:$0xff]  ;;  %v6733_v28 = vpack.c.bf16 %v1137_v25, %v1129_v23  ;;  %v1145_v30 = vld [vmem:[#allocation9 + $0x180] sm:$0xff]  ;;  %v1124_v12 = vld [vmem:[#allocation9 + $0xd8] sm:$0xff]  ;;  %p8749_p6 = scmp.lt.s32.totalorder %s8747_s23, %s8743_s16 }
  0xe1   :  { %6080 = vmatmul.mubr.msk.f32.gmra.mrb[6].mxu0 %vm276_vm0, %v9090_v50  ;;  %6092 = vmatmul.mubr.msk.f32.gmra.mrb[6].mxu1 %vm276_vm0, %v9096_v51  ;;  %v6731_v22 = vpack.c.bf16 %v1138_v20, %v1130_v19  ;;  %v1146_v26 = vld [vmem:[#allocation9 + $0x188] sm:$0xff]  ;;  %v1153_v31 = vld [vmem:[#allocation9 + $0x1c0] sm:$0xff]  ;;  %v6983_v19 = vpack.c.bf16 %v1124_v12, %v1116_v11  ;;  %v1115_v20 = vld [vmem:[#allocation9 + $0x90] sm:$0xff] }
  0xe2   :  { %413 = vmatprep.mubr.f32.mxu0 %v11036_v1  ;;  %550 = vmatprep.mubr.f32.mxu1 %v11036_v1  ;;  %v1154_v27 = vld [vmem:[#allocation9 + $0x1c8] sm:$0xff]  ;;  %v6737_v35 = vpack.c.bf16 %v1153_v31, %v1145_v30  ;;  %v1161_v37 = vld [vmem:[#allocation9 + $0x200] sm:$0xff]  ;;  %v1140_v23 = vld [vmem:[#allocation9 + $0x158] sm:$0xff]  ;;  %p8750_p7 = por %p8749_p6, %p8748_p5 }
  0xe3   :  { %v6735_v29 = vpack.c.bf16 %v1154_v27, %v1146_v26  ;;  %v1162_v33 = vld [vmem:[#allocation9 + $0x208] sm:$0xff]  ;;  %v1169_v38 = vld [vmem:[#allocation9 + $0x240] sm:$0xff]  ;;  %v1131_v30 = vld [vmem:[#allocation9 + $0x110] sm:$0xff] }
  0xe4   :  { %v1170_v34 = vld [vmem:[#allocation9 + $0x248] sm:$0xff]  ;;  %v6741_v41 = vpack.c.bf16 %v1169_v38, %v1161_v37  ;;  %v1177_v43 = vld [vmem:[#allocation9 + $0x280] sm:$0xff]  ;;  %v1139_v31 = vld [vmem:[#allocation9 + $0x150] sm:$0xff]  ;;  %p8751_p8 = pnand %p8750_p7, %p8744_p4 }
  0xe5   :  { %6081 = vmatmul.mubr.msk.f32.gmra.mrb[8].mxu0 %vm276_vm0, %v9106_v56  ;;  %6093 = vmatmul.mubr.msk.f32.vlgmr.msra.gmra.mrb[8].mxu1 %vm276_vm0, %v9043_v17  ;;  %v6739_v36 = vpack.c.bf16 %v1170_v34, %v1162_v33  ;;  %v1178_v39 = vld [vmem:[#allocation9 + $0x288] sm:$0xff]  ;;  %v1185_v46 = vld [vmem:[#allocation9 + $0x2c0] sm:$0xff]  ;;  %v1148_v33 = vld [vmem:[#allocation9 + $0x198] sm:$0xff]  ;;  %v6989_v37 = vpack.c.bf16 %v1139_v31, %v1131_v30 }
  0xe6   :  { %419 = vmatprep.mubr.f32.mxu0 %v11036_v1  ;;  %556 = vmatprep.mubr.f32.mxu1 %v11036_v1  ;;  %v1186_v40 = vld [vmem:[#allocation9 + $0x2c8] sm:$0xff]  ;;  %v6745_v49 = vpack.c.bf16 %v1185_v46, %v1177_v43  ;;  %v1193_v53 = vld [vmem:[#allocation9 + $0x300] sm:$0xff]  ;;  %v1156_v34 = vld [vmem:[#allocation9 + $0x1d8] sm:$0xff] }
  0xe7   :  { %6718 = vmatpush1.bf16.msra.mxu1 %v6717_v57  ;;  %v6743_v42 = vpack.c.bf16 %v1186_v40, %v1178_v39  ;;  %v1194_v47 = vld [vmem:[#allocation9 + $0x308] sm:$0xff]  ;;  %v1201_v54 = vld [vmem:[#allocation9 + $0x340] sm:$0xff]  ;;  %v6991_v38 = vpack.c.bf16 %v1156_v34, %v1148_v33  ;;  %v1147_v39 = vld [vmem:[#allocation9 + $0x190] sm:$0xff] }
  0xe8   :  { %6720 = vmatprep.subr.bf16.mxu1 %v6719_v58  ;;  %v1202_v48 = vld [vmem:[#allocation9 + $0x348] sm:$0xff]  ;;  %v6749_v58 = vpack.c.bf16 %v1201_v54, %v1193_v53  ;;  %v1209_v60 = vld [vmem:[#allocation9 + $0x380] sm:$0xff]  ;;  %v1155_v40 = vld [vmem:[#allocation9 + $0x1d0] sm:$0xff] }
  0xe9   :  { %6082 = vmatmul.mubr.msk.f32.gmra.mrb[10].mxu0 %vm276_vm0, %v9117_v63  ;;  %6094 = vmatmul.mubr.msk.f32.gmra.mrb[10].mxu1 %vm276_vm0, %v9053_v24  ;;  %v6747_v52 = vpack.c.bf16 %v1202_v48, %v1194_v47  ;;  %v1210_v55 = vld [vmem:[#allocation9 + $0x388] sm:$0xff]  ;;  %v1217_v61 = vld [vmem:[#allocation9 + $0x3c0] sm:$0xff]  ;;  %v6993_v47 = vpack.c.bf16 %v1155_v40, %v1147_v39  ;;  %v1180_v53 = vld [vmem:[#allocation9 + $0x298] sm:$0xff] }
  0xea   :  { %425 = vmatprep.mubr.f32.mxu0 %v11036_v1  ;;  %562 = vmatprep.mubr.f32.mxu1 %v11036_v1  ;;  %v1218_v57 = vld [vmem:[#allocation9 + $0x3c8] sm:$0xff]  ;;  %v6753_v10 = vpack.c.bf16 %v1217_v61, %v1209_v60  ;;  %v1233_v15 = vld [vmem:[#allocation9 + $0x440] sm:$0xff]  ;;  %v1188_v54 = vld [vmem:[#allocation9 + $0x2d8] sm:$0xff] }
  0xeb   :  { %6722 = vmatpush1.bf16.msra.mxu1 %v6721_v0  ;;  %v6751_v59 = vpack.c.bf16 %v1218_v57, %v1210_v55  ;;  %v1226_v62 = vld [vmem:[#allocation9 + $0x408] sm:$0xff]  ;;  %v1265_v57 = vld [vmem:[#allocation9 + $0x540] sm:$0xff]  ;;  %v1179_v60 = vld [vmem:[#allocation9 + $0x290] sm:$0xff] }
  0xec   :  { %6980 = vmatprep.subr.bf16.mxu1 %v6979_v2  ;;  %v1234_v0 = vld [vmem:[#allocation9 + $0x448] sm:$0xff]  ;;  %v1099_v2 = vld [vmem:[#allocation9 + $0x10] sm:$0xff]  ;;  %v1297_v30 = vld [vmem:[#allocation9 + $0x640] sm:$0xff] }
  0xed   :  { %6083 = vmatmul.mubr.msk.f32.gmra.mrb[12].mxu0 %vm276_vm0, %v9128_v3  ;;  %6095 = vmatmul.mubr.msk.f32.gmra.mrb[12].mxu1 %vm276_vm0, %v9071_v44  ;;  %v6981_v16 = vpack.c.bf16 %v1107_v9, %v1099_v2  ;;  %v1242_v26 = vld [vmem:[#allocation9 + $0x488] sm:$0xff]  ;;  %v1187_v61 = vld [vmem:[#allocation9 + $0x2d0] sm:$0xff] }
  0xee   :  { %431 = vmatprep.mubr.f32.mxu0 %v11036_v1  ;;  %568 = vmatprep.mubr.f32.mxu1 %v11036_v1  ;;  %v1250_v27 = vld [vmem:[#allocation9 + $0x4c8] sm:$0xff]  ;;  %v1195_v12 = vld [vmem:[#allocation9 + $0x310] sm:$0xff] }
  0xef   :  { %v1266_v46 = vld [vmem:[#allocation9 + $0x548] sm:$0xff] }
  0xf0   :  { %v1282_v9 = vld [vmem:[#allocation9 + $0x5c8] sm:$0xff] }
  0xf1   :  { %6084 = vmatmul.mubr.msk.f32.gmra.mrb[14].mxu0 %vm276_vm0, %v9139_v4  ;;  %6096 = vmatmul.mubr.msk.f32.gmra.mrb[14].mxu1 %vm276_vm0, %v9090_v50  ;;  %v1306_v33 = vld [vmem:[#allocation9 + $0x688] sm:$0xff] }
  0xf2   :  { %437 = vmatprep.mubr.f32.mxu0 %v11036_v1  ;;  %574 = vmatprep.mubr.f32.mxu1 %v11036_v1  ;;  %v1314_v34 = vld [vmem:[#allocation9 + $0x6c8] sm:$0xff] }
  0xf3   :  { %v6775_v40 = vpack.c.bf16 %v1314_v34, %v1306_v33  ;;  %v1323_v34 = vld [vmem:[#allocation9 + $0x710] sm:$0xff] }
  0xf5   :  { %6085 = vmatmul.mubr.msk.f32.gmra.mrb[16].mxu0 %vm276_vm0, %v9150_v5  ;;  %6097 = vmatmul.mubr.msk.f32.gmra.mrb[16].mxu1 %vm276_vm0, %v9106_v56 }
  0xf6   :  { %443 = vmatprep.mubr.f32.mxu0 %v11036_v1  ;;  %580 = vmatprep.mubr.f32.mxu1 %v11036_v1 }
  0xf9   :  { %6086 = vmatmul.mubr.msk.f32.gmra.mrb[18].mxu0 %vm276_vm0, %v9161_v6  ;;  %6098 = vmatmul.mubr.msk.f32.gmra.mrb[18].mxu1 %vm276_vm0, %v9117_v63 }
  0xfa   :  { %449 = vmatprep.mubr.f32.mxu0 %v11036_v1  ;;  %586 = vmatprep.mubr.f32.mxu1 %v11036_v1 }
  0xfd   :  { %6087 = vmatmul.mubr.msk.f32.gmra.mrb[20].mxu0 %vm276_vm0, %v9172_v7  ;;  %6099 = vmatmul.mubr.msk.f32.gmra.mrb[20].mxu1 %vm276_vm0, %v9128_v3 }
  0xfe   :  { %455 = vmatprep.mubr.f32.mxu0 %v11036_v1  ;;  %592 = vmatprep.mubr.f32.mxu1 %v11036_v1 }
 0x101   :  { %6088 = vmatmul.mubr.msk.f32.gmra.mrb[22].mxu0 %vm276_vm0, %v9183_v8  ;;  %6100 = vmatmul.mubr.msk.f32.gmra.mrb[22].mxu1 %vm276_vm0, %v9139_v4 }
 0x102   :  { %598 = vmatprep.mubr.f32.mxu1 %v11036_v1  ;;  %711 = vmatprep.mubr.f32.mxu0 %v11036_v1 }
 0x105   :  { %6101 = vmatmul.mubr.msk.f32.gmra.mrb[24].mxu1 %vm276_vm0, %v9150_v5  ;;  %6109 = vmatmul.mubr.msk.f32.vlgmr.msra.gmra.mrb[24].mxu0 %vm276_vm0, %v9043_v17 }
 0x106   :  { %604 = vmatprep.mubr.f32.mxu1 %v11036_v1  ;;  %717 = vmatprep.mubr.f32.mxu0 %v11036_v1 }
 0x107   :  { %6726 = vmatpush1.bf16.msra.mxu0 %v6725_v13  ;;  %v6755_v13 = vpack.c.bf16 %v1234_v0, %v1226_v62  ;;  %v1196_v62 = vld [vmem:[#allocation9 + $0x318] sm:$0xff] }
 0x108   :  { %6728 = vmatprep.subr.bf16.mxu0 %v6727_v14  ;;  %v1225_v14 = vld [vmem:[#allocation9 + $0x400] sm:$0xff]  ;;  %v1204_v0 = vld [vmem:[#allocation9 + $0x358] sm:$0xff] }
 0x109   :  { %6102 = vmatmul.mubr.msk.f32.gmra.mrb[26].mxu1 %vm276_vm0, %v9161_v6  ;;  %6110 = vmatmul.mubr.msk.f32.gmra.mrb[26].mxu0 %vm276_vm0, %v9053_v24  ;;  %v6757_v25 = vpack.c.bf16 %v1233_v15, %v1225_v14  ;;  %v7003_v11 = vpack.c.bf16 %v1204_v0, %v1196_v62  ;;  %v1212_v14 = vld [vmem:[#allocation9 + $0x398] sm:$0xff]  ;;  %v1267_v62 = vld [vmem:[#allocation9 + $0x550] sm:$0xff] }
 0x10a   :  { %610 = vmatprep.mubr.f32.mxu1 %v11036_v1  ;;  %723 = vmatprep.mubr.f32.mxu0 %v11036_v1  ;;  %v1220_v15 = vld [vmem:[#allocation9 + $0x3d8] sm:$0xff] }
 0x10b   :  { %6730 = vmatpush1.bf16.msra.mxu0 %v6729_v21  ;;  %v1123_v21 = vld [vmem:[#allocation9 + $0xd0] sm:$0xff]  ;;  %v1276_v0 = vld [vmem:[#allocation9 + $0x598] sm:$0xff] }
 0x10c   :  { %6732 = vmatprep.subr.bf16.mxu0 %v6731_v22  ;;  %v1132_v22 = vld [vmem:[#allocation9 + $0x118] sm:$0xff] }
 0x10d   :  { %6103 = vmatmul.mubr.msk.f32.gmra.mrb[28].mxu1 %vm276_vm0, %v9172_v7  ;;  %6111 = vmatmul.mubr.msk.f32.gmra.mrb[28].mxu0 %vm276_vm0, %v9071_v44 }
 0x10e   :  { %616 = vmatprep.mubr.f32.mxu1 %v11036_v1  ;;  %729 = vmatprep.mubr.f32.mxu0 %v11036_v1 }
 0x10f   :  { %6734 = vmatpush1.bf16.msra.mxu0 %v6733_v28  ;;  %v6985_v28 = vpack.c.bf16 %v1123_v21, %v1115_v20  ;;  %v7007_v21 = vpack.c.bf16 %v1220_v15, %v1212_v14  ;;  %v1275_v15 = vld [vmem:[#allocation9 + $0x590] sm:$0xff] }
 0x110   :  { %6736 = vmatprep.subr.bf16.mxu0 %v6735_v29  ;;  %v6987_v29 = vpack.c.bf16 %v1140_v23, %v1132_v22  ;;  %v1211_v22 = vld [vmem:[#allocation9 + $0x390] sm:$0xff] }
 0x111   :  { %6104 = vmatmul.mubr.msk.f32.gmra.mrb[30].mxu1 %vm276_vm0, %v9183_v8  ;;  %6112 = vmatmul.mubr.msk.f32.gmra.mrb[30].mxu0 %vm276_vm0, %v9090_v50  ;;  %v1219_v23 = vld [vmem:[#allocation9 + $0x3d0] sm:$0xff] }
 0x112   :  { %622 = vmatprep.mubr.f32.mxu1 %v11036_v1  ;;  %735 = vmatprep.mubr.f32.mxu0 %v11036_v1  ;;  %v7009_v31 = vpack.c.bf16 %v1219_v23, %v1211_v22  ;;  %v1291_v23 = vld [vmem:[#allocation9 + $0x610] sm:$0xff] }
 0x113   :  { %6738 = vmatpush1.bf16.msra.mxu0 %v6737_v35  ;;  %v6759_v35 = vpack.c.bf16 %v1250_v27, %v1242_v26  ;;  %v1236_v26 = vld [vmem:[#allocation9 + $0x458] sm:$0xff] }
 0x114   :  { %6740 = vmatprep.subr.bf16.mxu0 %v6739_v36  ;;  %v1249_v36 = vld [vmem:[#allocation9 + $0x4c0] sm:$0xff] }
 0x115   :  { %6105 = vmatmul.mubr.msk.f32.gmra.mrb[32].mxu1 %vm276_vm0, %v9048_v18  ;;  %6113 = vmatmul.mubr.msk.f32.gmra.mrb[32].mxu0 %vm276_vm0, %v9106_v56 }
 0x116   :  { %628 = vmatprep.mubr.f32.mxu1 %v11036_v1  ;;  %741 = vmatprep.mubr.f32.mxu0 %v11036_v1 }
 0x117   :  { %6742 = vmatpush1.bf16.msra.mxu0 %v6741_v41  ;;  %v1164_v41 = vld [vmem:[#allocation9 + $0x218] sm:$0xff] }
 0x118   :  { %6744 = vmatprep.subr.bf16.mxu0 %v6743_v42  ;;  %v1172_v42 = vld [vmem:[#allocation9 + $0x258] sm:$0xff] }
 0x119   :  { %6106 = vmatmul.mubr.msk.f32.gmra.mrb[34].mxu1 %vm276_vm0, %v9063_v32  ;;  %6114 = vmatmul.mubr.msk.f32.gmra.mrb[34].mxu0 %vm276_vm0, %v9117_v63  ;;  %v6995_v48 = vpack.c.bf16 %v1172_v42, %v1164_v41  ;;  %v1305_v41 = vld [vmem:[#allocation9 + $0x680] sm:$0xff] }
 0x11a   :  { %634 = vmatprep.mubr.f32.mxu1 %v11036_v1  ;;  %747 = vmatprep.mubr.f32.mxu0 %v11036_v1  ;;  %v1313_v42 = vld [vmem:[#allocation9 + $0x6c0] sm:$0xff] }
 0x11b   :  { %6746 = vmatpush1.bf16.msra.mxu0 %v6745_v49  ;;  %v1163_v49 = vld [vmem:[#allocation9 + $0x210] sm:$0xff] }
 0x11c   :  { %6748 = vmatprep.subr.bf16.mxu0 %v6747_v52  ;;  %v1171_v52 = vld [vmem:[#allocation9 + $0x250] sm:$0xff] }
 0x11d   :  { %6107 = vmatmul.mubr.msk.f32.gmra.mrb[36].mxu1 %vm276_vm0, %v9080_v45  ;;  %6115 = vmatmul.mubr.msk.f32.gmra.mrb[36].mxu0 %vm276_vm0, %v9128_v3 }
 0x11e   :  { %640 = vmatprep.mubr.f32.mxu1 %v11036_v1  ;;  %753 = vmatprep.mubr.f32.mxu0 %v11036_v1 }
 0x11f   :  { %6750 = vmatpush1.bf16.msra.mxu0 %v6749_v58  ;;  %v6997_v58 = vpack.c.bf16 %v1171_v52, %v1163_v49  ;;  %v1251_v49 = vld [vmem:[#allocation9 + $0x4d0] sm:$0xff]  ;;  %v1260_v52 = vld [vmem:[#allocation9 + $0x518] sm:$0xff] }
 0x120   :  { %6752 = vmatprep.subr.bf16.mxu0 %v6751_v59  ;;  %v6999_v59 = vpack.c.bf16 %v1188_v54, %v1180_v53  ;;  %v1268_v53 = vld [vmem:[#allocation9 + $0x558] sm:$0xff] }
 0x121   :  { %6108 = vmatmul.mubr.msk.f32.gmra.mrb[38].mxu1 %vm276_vm0, %v9096_v51  ;;  %6116 = vmatmul.mubr.msk.f32.gmra.mrb[38].mxu0 %vm276_vm0, %v9139_v4 }
 0x122   :  { %872 = vmatprep.mubr.f32.mxu1 %v11036_v1  ;;  %759 = vmatprep.mubr.f32.mxu0 %v11036_v1 }
 0x123   :  { %6754 = vmatpush1.bf16.msra.mxu0 %v6753_v10  ;;  %v7001_v10 = vpack.c.bf16 %v1187_v61, %v1179_v60  ;;  %v7019_v60 = vpack.c.bf16 %v1268_v53, %v1260_v52  ;;  %v1259_v61 = vld [vmem:[#allocation9 + $0x510] sm:$0xff]  ;;  %v1361_v52 = vld [vmem:[#allocation9 + $0x840] sm:$0xff] }
 0x124   :  { %6756 = vmatprep.subr.bf16.mxu0 %v6755_v13  ;;  %v1203_v13 = vld [vmem:[#allocation9 + $0x350] sm:$0xff] }
 0x125   :  { %6125 = vmatmul.mubr.msk.f32.vlgmr.msra.gmra.mrb[40].mxu1 %vm276_vm0, %v9043_v17  ;;  %6117 = vmatmul.mubr.msk.f32.gmra.mrb[40].mxu0 %vm276_vm0, %v9150_v5  ;;  %v1241_v17 = vld [vmem:[#allocation9 + $0x480] sm:$0xff]  ;;  %v7005_v20 = vpack.c.bf16 %v1203_v13, %v1195_v12  ;;  %v1354_v12 = vld [vmem:[#allocation9 + $0x808] sm:$0xff] }
 0x126   :  { %6982 = vmatpush1.bf16.msra.mxu1 %v6981_v16  ;;  %878 = vmatprep.mubr.f32.mxu1 %v11036_v1  ;;  %v6761_v43 = vpack.c.bf16 %v1249_v36, %v1241_v17  ;;  %v1227_v17 = vld [vmem:[#allocation9 + $0x410] sm:$0xff]  ;;  %v1362_v13 = vld [vmem:[#allocation9 + $0x848] sm:$0xff] }
 0x127   :  { %6984 = vmatprep.subr.bf16.mxu1 %v6983_v19  ;;  %765 = vmatprep.mubr.f32.mxu0 %v11036_v1  ;;  %v1281_v19 = vld [vmem:[#allocation9 + $0x5c0] sm:$0xff]  ;;  %v1235_v36 = vld [vmem:[#allocation9 + $0x450] sm:$0xff] }
 0x128   :  { %6758 = vmatpush1.bf16.msra.mxu0 %v6757_v25  ;;  %v1228_v25 = vld [vmem:[#allocation9 + $0x418] sm:$0xff] }
 0x129   :  { %6126 = vmatmul.mubr.msk.f32.gmra.mrb[42].mxu1 %vm276_vm0, %v9053_v24  ;;  %6118 = vmatmul.mubr.msk.f32.gmra.mrb[42].mxu0 %vm276_vm0, %v9161_v6  ;;  %v1258_v24 = vld [vmem:[#allocation9 + $0x508] sm:$0xff] }
 0x12a   :  { %6986 = vmatpush1.bf16.msra.mxu1 %v6985_v28  ;;  %884 = vmatprep.mubr.f32.mxu1 %v11036_v1  ;;  %v6763_v55 = vpack.c.bf16 %v1266_v46, %v1258_v24  ;;  %v1298_v28 = vld [vmem:[#allocation9 + $0x648] sm:$0xff] }
 0x12b   :  { %6988 = vmatprep.subr.bf16.mxu1 %v6987_v29  ;;  %771 = vmatprep.mubr.f32.mxu0 %v11036_v1  ;;  %v1289_v29 = vld [vmem:[#allocation9 + $0x600] sm:$0xff]  ;;  %v1322_v24 = vld [vmem:[#allocation9 + $0x708] sm:$0xff] }
 0x12c   :  { %6760 = vmatprep.subr.bf16.mxu0 %v6759_v35  ;;  %v7011_v35 = vpack.c.bf16 %v1236_v26, %v1228_v25  ;;  %v6773_v39 = vpack.c.bf16 %v1297_v30, %v1289_v29  ;;  %v1330_v46 = vld [vmem:[#allocation9 + $0x748] sm:$0xff]  ;;  %v1299_v25 = vld [vmem:[#allocation9 + $0x650] sm:$0xff]  ;;  %v1308_v26 = vld [vmem:[#allocation9 + $0x698] sm:$0xff] }
 0x12d   :  { %6127 = vmatmul.mubr.msk.f32.gmra.mrb[44].mxu1 %vm276_vm0, %v9071_v44  ;;  %6119 = vmatmul.mubr.msk.f32.gmra.mrb[44].mxu0 %vm276_vm0, %v9172_v7  ;;  %v1257_v44 = vld [vmem:[#allocation9 + $0x500] sm:$0xff]  ;;  %v6779_v54 = vpack.c.bf16 %v1330_v46, %v1322_v24  ;;  %v1315_v29 = vld [vmem:[#allocation9 + $0x6d0] sm:$0xff]  ;;  %v1324_v30 = vld [vmem:[#allocation9 + $0x718] sm:$0xff] }
 0x12e   :  { %6990 = vmatpush1.bf16.msra.mxu1 %v6989_v37  ;;  %890 = vmatprep.mubr.f32.mxu1 %v11036_v1  ;;  %v6765_v2 = vpack.c.bf16 %v1265_v57, %v1257_v44  ;;  %v1329_v44 = vld [vmem:[#allocation9 + $0x740] sm:$0xff]  ;;  %v9315_v46 = vld [vmem:[#allocation8] sm:$0xff] }
 0x12f   :  { %6992 = vmatprep.subr.bf16.mxu1 %v6991_v38  ;;  %777 = vmatprep.mubr.f32.mxu0 %v11036_v1  ;;  %v1244_v38 = vld [vmem:[#allocation9 + $0x498] sm:$0xff] }
 0x130   :  { %6762 = vmatpush1.bf16.msra.mxu0 %v6761_v43  ;;  %v7013_v43 = vpack.c.bf16 %v1235_v36, %v1227_v17  ;;  %v1340_v17 = vld [vmem:[#allocation9 + $0x798] sm:$0xff] }
 0x131   :  { %6128 = vmatmul.mubr.msk.f32.gmra.mrb[46].mxu1 %vm276_vm0, %v9090_v50  ;;  %6120 = vmatmul.mubr.msk.f32.gmra.mrb[46].mxu0 %vm276_vm0, %v9183_v8  ;;  %v1274_v50 = vld [vmem:[#allocation9 + $0x588] sm:$0xff]  ;;  %v1348_v36 = vld [vmem:[#allocation9 + $0x7d8] sm:$0xff] }
 0x132   :  { %6994 = vmatpush1.bf16.msra.mxu1 %v6993_v47  ;;  %896 = vmatprep.mubr.f32.mxu1 %v11036_v1  ;;  %v6767_v16 = vpack.c.bf16 %v1282_v9, %v1274_v50  ;;  %v1337_v9 = vld [vmem:[#allocation9 + $0x780] sm:$0xff] }
 0x133   :  { %6996 = vmatprep.subr.bf16.mxu1 %v6995_v48  ;;  %783 = vmatprep.mubr.f32.mxu0 %v11036_v1  ;;  %v1243_v48 = vld [vmem:[#allocation9 + $0x490] sm:$0xff] }
 0x134   :  { %6764 = vmatprep.subr.bf16.mxu0 %v6763_v55  ;;  %v1321_v55 = vld [vmem:[#allocation9 + $0x700] sm:$0xff]  ;;  %v7017_v57 = vpack.c.bf16 %v1251_v49, %v1243_v48 }
 0x135   :  { %6129 = vmatmul.mubr.msk.f32.gmra.mrb[48].mxu1 %vm276_vm0, %v9106_v56  ;;  %6121 = vmatmul.mubr.msk.f32.gmra.mrb[48].mxu0 %vm276_vm0, %v9048_v18  ;;  %v1273_v56 = vld [vmem:[#allocation9 + $0x580] sm:$0xff]  ;;  %v6781_v50 = vpack.c.bf16 %v1329_v44, %v1321_v55  ;;  %v1355_v55 = vld [vmem:[#allocation9 + $0x810] sm:$0xff] }
 0x136   :  { %6998 = vmatpush1.bf16.msra.mxu1 %v6997_v58  ;;  %902 = vmatprep.mubr.f32.mxu1 %v11036_v1  ;;  %v6769_v27 = vpack.c.bf16 %v1281_v19, %v1273_v56  ;;  %v1338_v58 = vld [vmem:[#allocation9 + $0x788] sm:$0xff]  ;;  %v1292_v56 = vld [vmem:[#allocation9 + $0x618] sm:$0xff]  ;;  %v1353_v49 = vld [vmem:[#allocation9 + $0x800] sm:$0xff] }
 0x137   :  { %7000 = vmatprep.subr.bf16.mxu1 %v6999_v59  ;;  %789 = vmatprep.mubr.f32.mxu0 %v11036_v1  ;;  %v1346_v59 = vld [vmem:[#allocation9 + $0x7c8] sm:$0xff]  ;;  %v1300_v19 = vld [vmem:[#allocation9 + $0x658] sm:$0xff]  ;;  %v1363_v44 = vld [vmem:[#allocation9 + $0x850] sm:$0xff] }
 0x138   :  { %6766 = vmatpush1.bf16.msra.mxu0 %v6765_v2  ;;  %v1284_v2 = vld [vmem:[#allocation9 + $0x5d8] sm:$0xff]  ;;  %v7027_v22 = vpack.c.bf16 %v1300_v19, %v1292_v56  ;;  %v1371_v56 = vld [vmem:[#allocation9 + $0x890] sm:$0xff] }
 0x139   :  { %6130 = vmatmul.mubr.msk.f32.gmra.mrb[50].mxu1 %vm276_vm0, %v9117_v63  ;;  %6122 = vmatmul.mubr.msk.f32.gmra.mrb[50].mxu0 %vm276_vm0, %v9063_v32  ;;  %v1290_v63 = vld [vmem:[#allocation9 + $0x608] sm:$0xff]  ;;  %v7023_v14 = vpack.c.bf16 %v1284_v2, %v1276_v0  ;;  %v1379_v19 = vld [vmem:[#allocation9 + $0x8d0] sm:$0xff] }
 0x13a   :  { %7002 = vmatpush1.bf16.msra.mxu1 %v7001_v10  ;;  %908 = vmatprep.mubr.f32.mxu1 %v11036_v1  ;;  %v6771_v37 = vpack.c.bf16 %v1298_v28, %v1290_v63  ;;  %v1345_v10 = vld [vmem:[#allocation9 + $0x7c0] sm:$0xff]  ;;  %v1307_v28 = vld [vmem:[#allocation9 + $0x690] sm:$0xff] }
 0x13b   :  { %7004 = vmatprep.subr.bf16.mxu1 %v7003_v11  ;;  %795 = vmatprep.mubr.f32.mxu0 %v11036_v1  ;;  %v7021_v11 = vpack.c.bf16 %v1267_v62, %v1259_v61  ;;  %v7033_v33 = vpack.c.bf16 %v1315_v29, %v1307_v28  ;;  %v1372_v61 = vld [vmem:[#allocation9 + $0x898] sm:$0xff]  ;;  %v1385_v28 = vld [vmem:[#allocation9 + $0x900] sm:$0xff] }
 0x13c   :  { %6768 = vmatprep.subr.bf16.mxu0 %v6767_v16  ;;  %v1283_v16 = vld [vmem:[#allocation9 + $0x5d0] sm:$0xff]  ;;  %v1380_v62 = vld [vmem:[#allocation9 + $0x8d8] sm:$0xff]  ;;  %v1393_v29 = vld [vmem:[#allocation9 + $0x940] sm:$0xff] }
 0x13d   :  { %6131 = vmatmul.mubr.msk.f32.gmra.mrb[52].mxu1 %vm276_vm0, %v9128_v3  ;;  %6123 = vmatmul.mubr.msk.f32.gmra.mrb[52].mxu0 %vm276_vm0, %v9080_v45  ;;  %v1252_v3 = vld [vmem:[#allocation9 + $0x4d8] sm:$0xff] }
 0x13e   :  { %7006 = vmatpush1.bf16.msra.mxu1 %v7005_v20  ;;  %914 = vmatprep.mubr.f32.mxu1 %v11036_v1  ;;  %v7015_v47 = vpack.c.bf16 %v1252_v3, %v1244_v38  ;;  %v6785_v20 = vpack.c.bf16 %v1345_v10, %v1337_v9  ;;  %v7039_v38 = vpack.c.bf16 %v1348_v36, %v1340_v17  ;;  %v1347_v3 = vld [vmem:[#allocation9 + $0x7d0] sm:$0xff]  ;;  %v1369_v9 = vld [vmem:[#allocation9 + $0x880] sm:$0xff] }
 0x13f   :  { %7008 = vmatprep.subr.bf16.mxu1 %v7007_v21  ;;  %801 = vmatprep.mubr.f32.mxu0 %v11036_v1  ;;  %v7025_v21 = vpack.c.bf16 %v1283_v16, %v1275_v15  ;;  %v1377_v10 = vld [vmem:[#allocation9 + $0x8c0] sm:$0xff]  ;;  %v7047_v16 = vpack.c.bf16 %v1380_v62, %v1372_v61  ;;  %v1387_v17 = vld [vmem:[#allocation9 + $0x910] sm:$0xff]  ;;  %v1418_v62 = vld [vmem:[#allocation9 + $0xa08] sm:$0xff] }
 0x140   :  { %6770 = vmatpush1.bf16.msra.mxu0 %v6769_v27  ;;  %v1316_v27 = vld [vmem:[#allocation9 + $0x6d8] sm:$0xff]  ;;  %v1395_v36 = vld [vmem:[#allocation9 + $0x950] sm:$0xff] }
 0x141   :  { %6132 = vmatmul.mubr.msk.f32.gmra.mrb[54].mxu1 %vm276_vm0, %v9139_v4  ;;  %6124 = vmatmul.mubr.msk.f32.gmra.mrb[54].mxu0 %vm276_vm0, %v9096_v51  ;;  %v6777_v4 = vpack.c.bf16 %v1313_v42, %v1305_v41  ;;  %v7031_v63 = vpack.c.bf16 %v1316_v27, %v1308_v26  ;;  %v1411_v61 = vld [vmem:[#allocation9 + $0x9d0] sm:$0xff] }
 0x142   :  { %7010 = vmatpush1.bf16.msra.mxu1 %v7009_v31  ;;  %920 = vmatprep.mubr.f32.mxu1 %v11036_v1  ;;  %v1332_v31 = vld [vmem:[#allocation9 + $0x758] sm:$0xff] }
 0x143   :  { %7012 = vmatprep.subr.bf16.mxu1 %v7011_v35  ;;  %6772 = vmatprep.subr.bf16.mxu0 %v6771_v37  ;;  %v1331_v35 = vld [vmem:[#allocation9 + $0x750] sm:$0xff] }
 0x144   :  { %6774 = vmatpush1.bf16.msra.mxu0 %v6773_v39  ;;  %v7037_v37 = vpack.c.bf16 %v1331_v35, %v1323_v34  ;;  %v1356_v39 = vld [vmem:[#allocation9 + $0x818] sm:$0xff] }
 0x145   :  { %6133 = vmatmul.mubr.msk.f32.gmra.mrb[56].mxu1 %vm276_vm0, %v9150_v5  ;;  %6776 = vmatprep.subr.bf16.mxu0 %v6775_v40  ;;  %v6783_v5 = vpack.c.bf16 %v1346_v59, %v1338_v58  ;;  %v1364_v40 = vld [vmem:[#allocation9 + $0x858] sm:$0xff] }
 0x146   :  { %7014 = vmatpush1.bf16.msra.mxu1 %v7013_v43  ;;  %926 = vmatprep.mubr.f32.mxu1 %v11036_v1  ;;  %v7043_v42 = vpack.c.bf16 %v1364_v40, %v1356_v39  ;;  %v1404_v39 = vld [vmem:[#allocation9 + $0x998] sm:$0xff] }
 0x147   :  { %7016 = vmatprep.subr.bf16.mxu1 %v7015_v47  ;;  %v1412_v40 = vld [vmem:[#allocation9 + $0x9d8] sm:$0xff] }
 0x148   :  { %6778 = vmatpush1.bf16.msra.mxu0 %v6777_v4 }
 0x149   :  { %6134 = vmatmul.mubr.msk.f32.gmra.mrb[58].mxu1 %vm276_vm0, %v9161_v6  ;;  %6780 = vmatprep.subr.bf16.mxu0 %v6779_v54  ;;  %v6787_v6 = vpack.c.bf16 %v1362_v13, %v1354_v12 }
 0x14a   :  { %7018 = vmatpush1.bf16.msra.mxu1 %v7017_v57  ;;  %932 = vmatprep.mubr.f32.mxu1 %v11036_v1  ;;  %v1370_v57 = vld [vmem:[#allocation9 + $0x888] sm:$0xff] }
 0x14b   :  { %7020 = vmatprep.subr.bf16.mxu1 %v7019_v60  ;;  %v1378_v60 = vld [vmem:[#allocation9 + $0x8c8] sm:$0xff] }
 0x14c   :  { %6782 = vmatpush1.bf16.msra.mxu0 %v6781_v50  ;;  %v6789_v50 = vpack.c.bf16 %v1361_v52, %v1353_v49  ;;  %v6791_v15 = vpack.c.bf16 %v1378_v60, %v1370_v57  ;;  %v1401_v49 = vld [vmem:[#allocation9 + $0x980] sm:$0xff]  ;;  %v1403_v60 = vld [vmem:[#allocation9 + $0x990] sm:$0xff] }
 0x14d   :  { %6135 = vmatmul.mubr.msk.f32.gmra.mrb[60].mxu1 %vm276_vm0, %v9172_v7  ;;  %6784 = vmatprep.subr.bf16.mxu0 %v6783_v5  ;;  %v7029_v7 = vpack.c.bf16 %v1299_v25, %v1291_v23  ;;  %v7045_v5 = vpack.c.bf16 %v1363_v44, %v1355_v55  ;;  %v1388_v23 = vld [vmem:[#allocation9 + $0x918] sm:$0xff]  ;;  %v1409_v52 = vld [vmem:[#allocation9 + $0x9c0] sm:$0xff] }
 0x14e   :  { %7022 = vmatpush1.bf16.msra.mxu1 %v7021_v11  ;;  %938 = vmatprep.mubr.f32.mxu1 %v11036_v1  ;;  %v1396_v25 = vld [vmem:[#allocation9 + $0x958] sm:$0xff] }
 0x14f   :  { %7024 = vmatprep.subr.bf16.mxu1 %v7023_v14  ;;  %v7051_v35 = vpack.c.bf16 %v1396_v25, %v1388_v23 }
 0x150   :  { %6786 = vmatpush1.bf16.msra.mxu0 %v6785_v20  ;;  %v1386_v20 = vld [vmem:[#allocation9 + $0x908] sm:$0xff] }
 0x151   :  { %6136 = vmatmul.mubr.msk.f32.gmra.mrb[62].mxu1 %vm276_vm0, %v9183_v8  ;;  %6788 = vmatprep.subr.bf16.mxu0 %v6787_v6  ;;  %v7035_v8 = vpack.c.bf16 %v1332_v31, %v1324_v30 }
 0x152   :  { %7026 = vmatpush1.bf16.msra.mxu1 %v7025_v21  ;;  %944 = vmatprep.mubr.f32.mxu1 %v11036_v1 }
 0x153   :  { %7028 = vmatprep.subr.bf16.mxu1 %v7027_v22  ;;  %v1394_v22 = vld [vmem:[#allocation9 + $0x948] sm:$0xff] }
 0x154   :  { %v6795_v34 = vpack.c.bf16 %v1394_v22, %v1386_v20 }
 0x155   :  { %6137 = vmatmul.mubr.msk.f32.gmra.mrb[64].mxu1 %vm276_vm0, %v9048_v18  ;;  %v1339_v18 = vld [vmem:[#allocation9 + $0x790] sm:$0xff] }
 0x156   :  { %7030 = vmatpush1.bf16.msra.mxu1 %v7029_v7  ;;  %950 = vmatprep.mubr.f32.mxu1 %v11036_v1  ;;  %v7041_v41 = vpack.c.bf16 %v1347_v3, %v1339_v18  ;;  %v6793_v7 = vpack.c.bf16 %v1377_v10, %v1369_v9  ;;  %v1410_v3 = vld [vmem:[#allocation9 + $0x9c8] sm:$0xff]  ;;  %v1420_v9 = vld [vmem:[#allocation9 + $0xa18] sm:$0xff] }
 0x157   :  { %7032 = vmatprep.subr.bf16.mxu1 %v7031_v63  ;;  %v7049_v63 = vpack.c.bf16 %v1379_v19, %v1371_v56  ;;  %v1428_v10 = vld [vmem:[#allocation9 + $0xa58] sm:$0xff]  ;;  %v1417_v56 = vld [vmem:[#allocation9 + $0xa00] sm:$0xff] }
 0x158   :  { %v1425_v19 = vld [vmem:[#allocation9 + $0xa40] sm:$0xff] }
 0x159   :  { %6138 = vmatmul.mubr.msk.f32.gmra.mrb[66].mxu1 %vm276_vm0, %v9063_v32  ;;  %v236_v32 = vlaneseq }
 0x15a   :  { %7034 = vmatpush1.bf16.msra.mxu1 %v7033_v33  ;;  %956 = vmatprep.mubr.f32.mxu1 %v11036_v1 }
 0x15b   :  { %7036 = vmatprep.subr.bf16.mxu1 %v7035_v8  ;;  %v9310_v43 = vshrl.u32 %v236_v32, 7  ;;  %v6797_v32 = vpack.c.bf16 %v1393_v29, %v1385_v28  ;;  %v1434_v28 = vld [vmem:[#allocation9 + $0xa88] sm:$0xff] }
 0x15d   :  { %6139 = vmatmul.mubr.msk.f32.gmra.mrb[68].mxu1 %vm276_vm0, %v9080_v45  ;;  %11219 = vst [vmem:[#allocation29_spill] sm:$0xff] %v9310_v43  ;;  %v9313_v24 = vsub.s32 0, %v9310_v43  ;;  %v11037_v45 = vsub.s32 1, %v9310_v43 }
 0x15e   :  { %7038 = vmatpush1.bf16.msra.mxu1 %v7037_v37  ;;  %962 = vmatprep.mubr.f32.mxu1 %v11036_v1  ;;  %v1402_v37 = vld [vmem:[#allocation9 + $0x988] sm:$0xff] }
 0x15f   :  { %7040 = vmatprep.subr.bf16.mxu1 %v7039_v38  ;;  %11220 = vst [vmem:[#allocation30_spill] sm:$0xff] %v9313_v24  ;;  %v9320_v47 = vrot.slane %v9315_v46, %v9313_v24  ;;  %v6799_v57 = vpack.c.bf16 %v1410_v3, %v1402_v37  ;;  %v6805_v37 = vpack.c.bf16 %v1425_v19, %v1417_v56  ;;  %v1433_v3 = vld [vmem:[#allocation9 + $0xa80] sm:$0xff] }
 0x161   :  { %6140 = vmatmul.mubr.msk.f32.gmra.mrb[70].mxu1 %vm276_vm0, %v9096_v51  ;;  %v9325_v51 = vrot.slane %v9315_v46, %v11037_v45 }
 0x162   :  { %7042 = vmatpush1.bf16.msra.mxu1 %v7041_v41 }
 0x163   :  { %7044 = vmatprep.subr.bf16.mxu1 %v7043_v42 }
 0x1a8   :  { %v391_v48 = vpop.f32.mrb[0].mxu0  ;;  %v9327_v53 = vpop.f32.mrb[0].mxu1 }
 0x1a9   :  { %v392_v4 = vadd.f32 %v391_v48, %v9320_v47  ;;  %v393_v54 = vpop.f32.mrb[1].mxu0  ;;  %v9330_v58 = vpop.f32.mrb[1].mxu1  ;;  %v7053_v48 = vpack.c.bf16 %v1395_v36, %v1387_v17 }
 0x1aa   :  { %v394_v59 = vadd.f32 %v393_v54, %v9325_v51 }
 0x1ab   :  { %v9337_v12 = vmax.f32 %v392_v4, 0.0 }
 0x1ac   :  { %v9333_v0 = vmax.f32 %v394_v59, 0.0  ;;  %v397_v2 = vpop.f32.mrb[2].mxu0  ;;  %v9335_v11 = vpop.f32.mrb[2].mxu1  ;;  %v7055_v59 = vpack.c.bf16 %v1412_v40, %v1404_v39  ;;  %v1441_v39 = vld [vmem:[#allocation9 + $0xac0] sm:$0xff] }
 0x1ad   :  { %11222 = vst [vmem:[#allocation32_spill] sm:$0xff] %v9337_v12  ;;  %v398_v13 = vadd.f32 %v397_v2, %v9320_v47  ;;  %v399_v14 = vpop.f32.mrb[3].mxu0  ;;  %v9340_v6 = vpop.f32.mrb[3].mxu1 }
 0x1ae   :  { %11221 = vst [vmem:[#allocation31_spill] sm:$0xff] %v9333_v0  ;;  %v400_v21 = vadd.f32 %v399_v14, %v9325_v51  ;;  %2227 = vmatprep.mubr.f32.mxu0 %v9333_v0  ;;  %2871 = vmatprep.mubr.f32.mxu1 %v9333_v0  ;;  %v1649_v0 = vld [vmem:[#allocation9 + $0x1140] sm:$0xff] }
 0x1af   :  { %2228 = vmatmul.mubr.f32.vlgmr.msra.gmra.mrb[56].mxu0 %v9337_v12  ;;  %2872 = vmatmul.mubr.f32.vlgmr.msra.gmra.mrb[72].mxu1 %v9337_v12  ;;  %v9351_v31 = vmax.f32 %v398_v13, 0.0 }
 0x1b0   :  { %v9347_v26 = vmax.f32 %v400_v21, 0.0  ;;  %6790 = vmatpush1.bf16.msra.mxu0 %v6789_v50  ;;  %v403_v27 = vpop.f32.mrb[4].mxu0  ;;  %7046 = vmatpush1.bf16.msra.mxu1 %v7045_v5  ;;  %v9349_v30 = vpop.f32.mrb[4].mxu1  ;;  %v1426_v5 = vld [vmem:[#allocation9 + $0xa48] sm:$0xff] }
 0x1b1   :  { %11224 = vst [vmem:[#allocation34_spill] sm:$0xff] %v9351_v31  ;;  %v404_v33 = vadd.f32 %v403_v27, %v9320_v47  ;;  %v405_v8 = vpop.f32.mrb[5].mxu0  ;;  %6792 = vmatprep.subr.bf16.mxu0 %v6791_v15  ;;  %7048 = vmatprep.subr.bf16.mxu1 %v7047_v16  ;;  %v9354_v38 = vpop.f32.mrb[5].mxu1  ;;  %v6801_v15 = vpack.c.bf16 %v1409_v52, %v1401_v49 }
 0x1b2   :  { %11223 = vst [vmem:[#allocation33_spill] sm:$0xff] %v9347_v26  ;;  %v406_v18 = vadd.f32 %v405_v8, %v9325_v51  ;;  %2233 = vmatprep.mubr.f32.mxu0 %v9347_v26  ;;  %2877 = vmatprep.mubr.f32.mxu1 %v9347_v26  ;;  %v7057_v16 = vpack.c.bf16 %v1411_v61, %v1403_v60  ;;  %v1442_v8 = vld [vmem:[#allocation9 + $0xac8] sm:$0xff]  ;;  %v1633_v26 = vld [vmem:[#allocation9 + $0x10c0] sm:$0xff] }
 0x1b3   :  { %2234 = vmatmul.mubr.f32.gmra.mrb[58].mxu0 %v9351_v31  ;;  %2878 = vmatmul.mubr.f32.gmra.mrb[74].mxu1 %v9351_v31  ;;  %v9365_v54 = vmax.f32 %v404_v33, 0.0  ;;  %v6803_v25 = vpack.c.bf16 %v1426_v5, %v1418_v62  ;;  %v7059_v27 = vpack.c.bf16 %v1428_v10, %v1420_v9  ;;  %v6807_v49 = vpack.c.bf16 %v1442_v8, %v1434_v28  ;;  %v1458_v61 = vld [vmem:[#allocation9 + $0xb48] sm:$0xff]  ;;  %v1452_v62 = vld [vmem:[#allocation9 + $0xb18] sm:$0xff] }
 0x1b4   :  { %v9361_v41 = vmax.f32 %v406_v18, 0.0  ;;  %6794 = vmatpush1.bf16.msra.mxu0 %v6793_v7  ;;  %v409_v42 = vpop.f32.mrb[6].mxu0  ;;  %7050 = vmatpush1.bf16.msra.mxu1 %v7049_v63  ;;  %v9363_v4 = vpop.f32.mrb[6].mxu1  ;;  %v1419_v7 = vld [vmem:[#allocation9 + $0xa10] sm:$0xff]  ;;  %v6809_v10 = vpack.c.bf16 %v1441_v39, %v1433_v3  ;;  %v1466_v28 = vld [vmem:[#allocation9 + $0xb88] sm:$0xff] }
 0x1b5   :  { %11226 = vst [vmem:[#allocation36_spill] sm:$0xff] %v9365_v54  ;;  %v410_v55 = vadd.f32 %v409_v42, %v9320_v47  ;;  %v411_v44 = vpop.f32.mrb[7].mxu0  ;;  %6796 = vmatprep.subr.bf16.mxu0 %v6795_v34  ;;  %7052 = vmatprep.subr.bf16.mxu1 %v7051_v35  ;;  %v9368_v2 = vpop.f32.mrb[7].mxu1  ;;  %v1427_v63 = vld [vmem:[#allocation9 + $0xa50] sm:$0xff]  ;;  %v1436_v34 = vld [vmem:[#allocation9 + $0xa98] sm:$0xff] }
 0x1b6   :  { %11225 = vst [vmem:[#allocation35_spill] sm:$0xff] %v9361_v41  ;;  %v412_v50 = vadd.f32 %v411_v44, %v9325_v51  ;;  %2239 = vmatprep.mubr.f32.mxu0 %v9361_v41  ;;  %2883 = vmatprep.mubr.f32.mxu1 %v9361_v41  ;;  %v1444_v35 = vld [vmem:[#allocation9 + $0xad8] sm:$0xff]  ;;  %v7061_v18 = vpack.c.bf16 %v1427_v63, %v1419_v7  ;;  %v1443_v44 = vld [vmem:[#allocation9 + $0xad0] sm:$0xff]  ;;  %v1617_v41 = vld [vmem:[#allocation9 + $0x1040] sm:$0xff] }
 0x1b7   :  { %2240 = vmatmul.mubr.f32.gmra.mrb[60].mxu0 %v9365_v54  ;;  %2884 = vmatmul.mubr.f32.gmra.mrb[76].mxu1 %v9365_v54  ;;  %v9379_v21 = vmax.f32 %v410_v55, 0.0  ;;  %v7063_v52 = vpack.c.bf16 %v1444_v35, %v1436_v34  ;;  %v1435_v55 = vld [vmem:[#allocation9 + $0xa90] sm:$0xff]  ;;  %v1474_v34 = vld [vmem:[#allocation9 + $0xbc8] sm:$0xff]  ;;  %v1468_v35 = vld [vmem:[#allocation9 + $0xb98] sm:$0xff] }
 0x1b8   :  { %v9375_v13 = vmax.f32 %v412_v50, 0.0  ;;  %6798 = vmatpush1.bf16.msra.mxu0 %v6797_v32  ;;  %v415_v14 = vpop.f32.mrb[8].mxu0  ;;  %7054 = vmatpush1.bf16.msra.mxu1 %v7053_v48  ;;  %v9377_v20 = vpop.f32.mrb[8].mxu1  ;;  %v1460_v50 = vld [vmem:[#allocation9 + $0xb58] sm:$0xff]  ;;  %v1451_v7 = vld [vmem:[#allocation9 + $0xb10] sm:$0xff]  ;;  %v1609_v54 = vld [vmem:[#allocation9 + $0x1000] sm:$0xff] }
 0x1b9   :  { %11228 = vst [vmem:[#allocation38_spill] sm:$0xff] %v9379_v21  ;;  %v416_v22 = vadd.f32 %v415_v14, %v9320_v47  ;;  %v417_v23 = vpop.f32.mrb[9].mxu0  ;;  %6800 = vmatprep.subr.bf16.mxu0 %v6799_v57  ;;  %7056 = vmatprep.subr.bf16.mxu1 %v7055_v59  ;;  %v9382_v29 = vpop.f32.mrb[9].mxu1  ;;  %v1450_v57 = vld [vmem:[#allocation9 + $0xb08] sm:$0xff]  ;;  %v7065_v14 = vpack.c.bf16 %v1443_v44, %v1435_v55  ;;  %v1459_v63 = vld [vmem:[#allocation9 + $0xb50] sm:$0xff] }
 0x1ba   :  { %11227 = vst [vmem:[#allocation37_spill] sm:$0xff] %v9375_v13  ;;  %v418_v33 = vadd.f32 %v417_v23, %v9325_v51  ;;  %2245 = vmatprep.mubr.f32.mxu0 %v9375_v13  ;;  %2889 = vmatprep.mubr.f32.mxu1 %v9375_v13  ;;  %v7069_v39 = vpack.c.bf16 %v1459_v63, %v1451_v7  ;;  %v1481_v7 = vld [vmem:[#allocation9 + $0xc00] sm:$0xff] }
 0x1bb   :  { %2246 = vmatmul.mubr.f32.gmra.mrb[62].mxu0 %v9379_v21  ;;  %2890 = vmatmul.mubr.f32.gmra.mrb[78].mxu1 %v9379_v21  ;;  %v9393_v42 = vmax.f32 %v416_v22, 0.0  ;;  %v1489_v63 = vld [vmem:[#allocation9 + $0xc40] sm:$0xff] }
 0x1bc   :  { %v9389_v17 = vmax.f32 %v418_v33, 0.0  ;;  %6802 = vmatpush1.bf16.msra.mxu0 %v6801_v15  ;;  %v421_v36 = vpop.f32.mrb[10].mxu0  ;;  %7058 = vmatpush1.bf16.msra.mxu1 %v7057_v16  ;;  %v9391_v40 = vpop.f32.mrb[10].mxu1  ;;  %v1449_v15 = vld [vmem:[#allocation9 + $0xb00] sm:$0xff] }
 0x1bd   :  { %11230 = vst [vmem:[#allocation40_spill] sm:$0xff] %v9393_v42  ;;  %v422_v32 = vadd.f32 %v421_v36, %v9320_v47  ;;  %v423_v48 = vpop.f32.mrb[11].mxu0  ;;  %6804 = vmatprep.subr.bf16.mxu0 %v6803_v25  ;;  %7060 = vmatprep.subr.bf16.mxu1 %v7059_v27  ;;  %v9396_v59 = vpop.f32.mrb[11].mxu1  ;;  %v1457_v16 = vld [vmem:[#allocation9 + $0xb40] sm:$0xff]  ;;  %v6811_v25 = vpack.c.bf16 %v1458_v61, %v1450_v57  ;;  %v1476_v36 = vld [vmem:[#allocation9 + $0xbd8] sm:$0xff]  ;;  %v1467_v61 = vld [vmem:[#allocation9 + $0xb90] sm:$0xff] }
 0x1be   :  { %11229 = vst [vmem:[#allocation39_spill] sm:$0xff] %v9389_v17  ;;  %v424_v60 = vadd.f32 %v423_v48, %v9325_v51  ;;  %2251 = vmatprep.mubr.f32.mxu0 %v9389_v17  ;;  %2895 = vmatprep.mubr.f32.mxu1 %v9389_v17  ;;  %v7067_v27 = vpack.c.bf16 %v1460_v50, %v1452_v62  ;;  %v1473_v48 = vld [vmem:[#allocation9 + $0xbc0] sm:$0xff]  ;;  %v1475_v62 = vld [vmem:[#allocation9 + $0xbd0] sm:$0xff]  ;;  %v1482_v50 = vld [vmem:[#allocation9 + $0xc08] sm:$0xff] }
 0x1bf   :  { %2252 = vmatmul.mubr.f32.gmra.mrb[64].mxu0 %v9393_v42  ;;  %2896 = vmatmul.mubr.f32.gmra.mrb[80].mxu1 %v9393_v42  ;;  %v9407_v19 = vmax.f32 %v422_v32, 0.0  ;;  %v6813_v3 = vpack.c.bf16 %v1457_v16, %v1449_v15  ;;  %v1465_v32 = vld [vmem:[#allocation9 + $0xb80] sm:$0xff]  ;;  %v6815_v57 = vpack.c.bf16 %v1474_v34, %v1466_v28  ;;  %v1484_v15 = vld [vmem:[#allocation9 + $0xc18] sm:$0xff] }
 0x1c0   :  { %v9403_v5 = vmax.f32 %v424_v60, 0.0  ;;  %6806 = vmatpush1.bf16.msra.mxu0 %v6805_v37  ;;  %v427_v9 = vpop.f32.mrb[12].mxu0  ;;  %7062 = vmatpush1.bf16.msra.mxu1 %v7061_v18  ;;  %v9405_v56 = vpop.f32.mrb[12].mxu1  ;;  %v7071_v60 = vpack.c.bf16 %v1476_v36, %v1468_v35  ;;  %v1492_v16 = vld [vmem:[#allocation9 + $0xc58] sm:$0xff]  ;;  %v1577_v21 = vld [vmem:[#allocation9 + $0xf00] sm:$0xff] }
 0x1c1   :  { %11232 = vst [vmem:[#allocation42_spill] sm:$0xff] %v9407_v19  ;;  %v428_v22 = vadd.f32 %v427_v9, %v9320_v47  ;;  %v429_v23 = vpop.f32.mrb[13].mxu0  ;;  %6808 = vmatprep.subr.bf16.mxu0 %v6807_v49  ;;  %7064 = vmatprep.subr.bf16.mxu1 %v7063_v52  ;;  %v9410_v33 = vpop.f32.mrb[13].mxu1  ;;  %v1580_v42 = vld [vmem:[#allocation9 + $0xf18] sm:$0xff]  ;;  %v1585_v13 = vld [vmem:[#allocation9 + $0xf40] sm:$0xff] }
 0x1c2   :  { %11231 = vst [vmem:[#allocation41_spill] sm:$0xff] %v9403_v5  ;;  %v430_v8 = vadd.f32 %v429_v23, %v9325_v51  ;;  %2257 = vmatprep.mubr.f32.mxu0 %v9403_v5  ;;  %2901 = vmatprep.mubr.f32.mxu1 %v9403_v5  ;;  %v1569_v5 = vld [vmem:[#allocation9 + $0xec0] sm:$0xff] }
 0x1c3   :  { %2258 = vmatmul.mubr.f32.gmra.mrb[66].mxu0 %v9407_v19  ;;  %2902 = vmatmul.mubr.f32.gmra.mrb[82].mxu1 %v9407_v19  ;;  %v9421_v52 = vmax.f32 %v428_v22, 0.0  ;;  %v1561_v19 = vld [vmem:[#allocation9 + $0xe80] sm:$0xff] }
 0x1c4   :  { %v9417_v37 = vmax.f32 %v430_v8, 0.0  ;;  %6810 = vmatpush1.bf16.msra.mxu0 %v6809_v10  ;;  %v433_v18 = vpop.f32.mrb[14].mxu0  ;;  %7066 = vmatpush1.bf16.msra.mxu1 %v7065_v14  ;;  %v9419_v49 = vpop.f32.mrb[14].mxu1  ;;  %v1490_v14 = vld [vmem:[#allocation9 + $0xc48] sm:$0xff] }
 0x1c5   :  { %11234 = vst [vmem:[#allocation44_spill] sm:$0xff] %v9421_v52  ;;  %v434_v55 = vadd.f32 %v433_v18, %v9320_v47  ;;  %v435_v44 = vpop.f32.mrb[15].mxu0  ;;  %6812 = vmatprep.subr.bf16.mxu0 %v6811_v25  ;;  %7068 = vmatprep.subr.bf16.mxu1 %v7067_v27  ;;  %v9424_v9 = vpop.f32.mrb[15].mxu1  ;;  %v6817_v25 = vpack.c.bf16 %v1473_v48, %v1465_v32  ;;  %v1506_v32 = vld [vmem:[#allocation9 + $0xcc8] sm:$0xff]  ;;  %v1500_v48 = vld [vmem:[#allocation9 + $0xc98] sm:$0xff] }
 0x1c6   :  { %11233 = vst [vmem:[#allocation43_spill] sm:$0xff] %v9417_v37  ;;  %v436_v10 = vadd.f32 %v435_v44, %v9325_v51  ;;  %2263 = vmatprep.mubr.f32.mxu0 %v9417_v37  ;;  %2907 = vmatprep.mubr.f32.mxu1 %v9417_v37  ;;  %v7073_v27 = vpack.c.bf16 %v1475_v62, %v1467_v61  ;;  %v1483_v44 = vld [vmem:[#allocation9 + $0xc10] sm:$0xff]  ;;  %v1538_v37 = vld [vmem:[#allocation9 + $0xdc8] sm:$0xff] }
 0x1c7   :  { %2264 = vmatmul.mubr.f32.gmra.mrb[68].mxu0 %v9421_v52  ;;  %2908 = vmatmul.mubr.f32.gmra.mrb[84].mxu1 %v9421_v52  ;;  %v9435_v8 = vmax.f32 %v434_v55, 0.0  ;;  %v6819_v36 = vpack.c.bf16 %v1490_v14, %v1482_v50  ;;  %v7075_v18 = vpack.c.bf16 %v1492_v16, %v1484_v15  ;;  %v1508_v55 = vld [vmem:[#allocation9 + $0xcd8] sm:$0xff]  ;;  %v6821_v61 = vpack.c.bf16 %v1489_v63, %v1481_v7  ;;  %v1497_v50 = vld [vmem:[#allocation9 + $0xc80] sm:$0xff]  ;;  %v1522_v7 = vld [vmem:[#allocation9 + $0xd48] sm:$0xff] }
 0x1c8   :  { %v9431_v22 = vmax.f32 %v436_v10, 0.0  ;;  %6814 = vmatpush1.bf16.msra.mxu0 %v6813_v3  ;;  %v439_v23 = vpop.f32.mrb[16].mxu0  ;;  %7070 = vmatpush1.bf16.msra.mxu1 %v7069_v39  ;;  %v9433_v28 = vpop.f32.mrb[16].mxu1  ;;  %v1491_v10 = vld [vmem:[#allocation9 + $0xc50] sm:$0xff]  ;;  %v1498_v3 = vld [vmem:[#allocation9 + $0xc88] sm:$0xff]  ;;  %v1505_v14 = vld [vmem:[#allocation9 + $0xcc0] sm:$0xff]  ;;  %v7079_v24 = vpack.c.bf16 %v1508_v55, %v1500_v48 }
 0x1c9   :  { %11236 = vst [vmem:[#allocation46_spill] sm:$0xff] %v9435_v8  ;;  %v440_v34 = vadd.f32 %v439_v23, %v9320_v47  ;;  %v441_v35 = vpop.f32.mrb[17].mxu0  ;;  %6816 = vmatprep.subr.bf16.mxu0 %v6815_v57  ;;  %7072 = vmatprep.subr.bf16.mxu1 %v7071_v60  ;;  %v9438_v1 = vpop.f32.mrb[17].mxu1  ;;  %v7077_v62 = vpack.c.bf16 %v1491_v10, %v1483_v44  ;;  %v1516_v63 = vld [vmem:[#allocation9 + $0xd18] sm:$0xff]  ;;  %v1515_v48 = vld [vmem:[#allocation9 + $0xd10] sm:$0xff] }
 0x1ca   :  { %11235 = vst [vmem:[#allocation45_spill] sm:$0xff] %v9431_v22  ;;  %v442_v39 = vadd.f32 %v441_v35, %v9325_v51  ;;  %2269 = vmatprep.mubr.f32.mxu0 %v9431_v22  ;;  %2913 = vmatprep.mubr.f32.mxu1 %v9431_v22  ;;  %v6823_v45 = vpack.c.bf16 %v1506_v32, %v1498_v3  ;;  %v1513_v3 = vld [vmem:[#allocation9 + $0xd00] sm:$0xff]  ;;  %v1523_v52 = vld [vmem:[#allocation9 + $0xd50] sm:$0xff] }
 0x1cb   :  { %2270 = vmatmul.mubr.f32.gmra.mrb[70].mxu0 %v9435_v8  ;;  %2914 = vmatmul.mubr.f32.gmra.mrb[86].mxu1 %v9435_v8  ;;  %v9449_v16 = vmax.f32 %v440_v34, 0.0  ;;  %v1507_v8 = vld [vmem:[#allocation9 + $0xcd0] sm:$0xff]  ;;  %v1524_v34 = vld [vmem:[#allocation9 + $0xd58] sm:$0xff]  ;;  %v6825_v44 = vpack.c.bf16 %v1505_v14, %v1497_v50  ;;  %v1521_v32 = vld [vmem:[#allocation9 + $0xd40] sm:$0xff] }
 0x1cc   :  { %v9445_v57 = vmax.f32 %v442_v39, 0.0  ;;  %6818 = vmatpush1.bf16.msra.mxu0 %v6817_v25  ;;  %v445_v60 = vpop.f32.mrb[18].mxu0  ;;  %7074 = vmatpush1.bf16.msra.mxu1 %v7073_v27  ;;  %v9447_v15 = vpop.f32.mrb[18].mxu1  ;;  %v1499_v39 = vld [vmem:[#allocation9 + $0xc90] sm:$0xff]  ;;  %v1514_v25 = vld [vmem:[#allocation9 + $0xd08] sm:$0xff]  ;;  %v1532_v50 = vld [vmem:[#allocation9 + $0xd98] sm:$0xff] }
 0x1cd   :  { %11238 = vst [vmem:[#allocation48_spill] sm:$0xff] %v9449_v16  ;;  %v446_v23 = vadd.f32 %v445_v60, %v9320_v47  ;;  %v447_v35 = vpop.f32.mrb[19].mxu0  ;;  %6820 = vmatprep.subr.bf16.mxu0 %v6819_v36  ;;  %7076 = vmatprep.subr.bf16.mxu1 %v7075_v18  ;;  %v9452_v22 = vpop.f32.mrb[19].mxu1  ;;  %v7081_v10 = vpack.c.bf16 %v1507_v8, %v1499_v39  ;;  %v1540_v14 = vld [vmem:[#allocation9 + $0xdd8] sm:$0xff] }
 0x1ce   :  { %11237 = vst [vmem:[#allocation47_spill] sm:$0xff] %v9445_v57  ;;  %v448_v27 = vadd.f32 %v447_v35, %v9325_v51  ;;  %2275 = vmatprep.mubr.f32.mxu0 %v9445_v57  ;;  %2919 = vmatprep.mubr.f32.mxu1 %v9445_v57  ;;  %v7085_v39 = vpack.c.bf16 %v1523_v52, %v1515_v48  ;;  %v1546_v52 = vld [vmem:[#allocation9 + $0xe08] sm:$0xff] }
 0x1cf   :  { %2276 = vmatmul.mubr.f32.gmra.mrb[72].mxu0 %v9449_v16  ;;  %2920 = vmatmul.mubr.f32.gmra.mrb[88].mxu1 %v9449_v16  ;;  %v9463_v60 = vmax.f32 %v446_v23, 0.0  ;;  %v6827_v16 = vpack.c.bf16 %v1522_v7, %v1514_v25  ;;  %v6829_v23 = vpack.c.bf16 %v1521_v32, %v1513_v3  ;;  %v1529_v7 = vld [vmem:[#allocation9 + $0xd80] sm:$0xff]  ;;  %v1548_v32 = vld [vmem:[#allocation9 + $0xe18] sm:$0xff] }
 0x1d0   :  { %v9459_v36 = vmax.f32 %v448_v27, 0.0  ;;  %6822 = vmatpush1.bf16.msra.mxu0 %v6821_v61  ;;  %v451_v18 = vpop.f32.mrb[20].mxu0  ;;  %7078 = vmatpush1.bf16.msra.mxu1 %v7077_v62  ;;  %v9461_v55 = vpop.f32.mrb[20].mxu1  ;;  %v7083_v27 = vpack.c.bf16 %v1524_v34, %v1516_v63  ;;  %v1530_v61 = vld [vmem:[#allocation9 + $0xd88] sm:$0xff] }
 0x1d1   :  { %11240 = vst [vmem:[#allocation50_spill] sm:$0xff] %v9463_v60  ;;  %v452_v35 = vadd.f32 %v451_v18, %v9320_v47  ;;  %v453_v57 = vpop.f32.mrb[21].mxu0  ;;  %6824 = vmatprep.subr.bf16.mxu0 %v6823_v45  ;;  %7080 = vmatprep.subr.bf16.mxu1 %v7079_v24  ;;  %v9466_v62 = vpop.f32.mrb[21].mxu1  ;;  %v6831_v25 = vpack.c.bf16 %v1538_v37, %v1530_v61  ;;  %v1545_v61 = vld [vmem:[#allocation9 + $0xe00] sm:$0xff] }
 0x1d2   :  { %11239 = vst [vmem:[#allocation49_spill] sm:$0xff] %v9459_v36  ;;  %v454_v8 = vadd.f32 %v453_v57, %v9325_v51  ;;  %2281 = vmatprep.mubr.f32.mxu0 %v9459_v36  ;;  %2925 = vmatprep.mubr.f32.mxu1 %v9459_v36  ;;  %v1531_v36 = vld [vmem:[#allocation9 + $0xd90] sm:$0xff] }
 0x1d3   :  { %2282 = vmatmul.mubr.f32.gmra.mrb[74].mxu0 %v9463_v60  ;;  %2926 = vmatmul.mubr.f32.gmra.mrb[90].mxu1 %v9463_v60  ;;  %v9477_v63 = vmax.f32 %v452_v35, 0.0  ;;  %v1537_v60 = vld [vmem:[#allocation9 + $0xdc0] sm:$0xff] }
 0x1d4   :  { %v9473_v24 = vmax.f32 %v454_v8, 0.0  ;;  %6826 = vmatpush1.bf16.msra.mxu0 %v6825_v44  ;;  %v457_v45 = vpop.f32.mrb[22].mxu0  ;;  %7082 = vmatpush1.bf16.msra.mxu1 %v7081_v10  ;;  %v9475_v57 = vpop.f32.mrb[22].mxu1  ;;  %v466_v8 = vadd.f32 %v9330_v58, %v9325_v51  ;;  %v7087_v44 = vpack.c.bf16 %v1540_v14, %v1532_v50  ;;  %v1539_v10 = vld [vmem:[#allocation9 + $0xdd0] sm:$0xff]  ;;  %v1556_v58 = vld [vmem:[#allocation9 + $0xe58] sm:$0xff]  ;;  %v6833_v35 = vpack.c.bf16 %v1537_v60, %v1529_v7  ;;  %v1553_v50 = vld [vmem:[#allocation9 + $0xe40] sm:$0xff] }
 0x1d5   :  { %11242 = vst [vmem:[#allocation52_spill] sm:$0xff] %v9477_v63  ;;  %v458_v34 = vadd.f32 %v457_v45, %v9320_v47  ;;  %v459_v18 = vpop.f32.mrb[23].mxu0  ;;  %6828 = vmatprep.subr.bf16.mxu0 %v6827_v16  ;;  %7084 = vmatprep.subr.bf16.mxu1 %v7083_v27  ;;  %v9482_v3 = vpop.f32.mrb[23].mxu1  ;;  %v1554_v16 = vld [vmem:[#allocation9 + $0xe48] sm:$0xff]  ;;  %v7089_v27 = vpack.c.bf16 %v1539_v10, %v1531_v36  ;;  %v1547_v60 = vld [vmem:[#allocation9 + $0xe10] sm:$0xff] }
 0x1d6   :  { %11241 = vst [vmem:[#allocation51_spill] sm:$0xff] %v9473_v24  ;;  %v460_v37 = vadd.f32 %v459_v18, %v9325_v51  ;;  %2287 = vmatprep.mubr.f32.mxu0 %v9473_v24  ;;  %2931 = vmatprep.mubr.f32.mxu1 %v9473_v24  ;;  %v9499_v24 = vmax.f32 %v466_v8, 0.0  ;;  %v1555_v36 = vld [vmem:[#allocation9 + $0xe50] sm:$0xff]  ;;  %v7091_v10 = vpack.c.bf16 %v1556_v58, %v1548_v32  ;;  %v1564_v8 = vld [vmem:[#allocation9 + $0xe98] sm:$0xff] }
 0x1d7   :  { %2288 = vmatmul.mubr.f32.gmra.mrb[76].mxu0 %v9477_v63  ;;  %2932 = vmatmul.mubr.f32.gmra.mrb[92].mxu1 %v9477_v63  ;;  %v9495_v18 = vmax.f32 %v458_v34, 0.0  ;;  %v464_v63 = vadd.f32 %v9327_v53, %v9320_v47  ;;  %v6835_v34 = vpack.c.bf16 %v1554_v16, %v1546_v52  ;;  %v1562_v53 = vld [vmem:[#allocation9 + $0xe88] sm:$0xff]  ;;  %v470_v32 = vadd.f32 %v9335_v11, %v9320_v47 }
 0x1d8   :  { %v9489_v48 = vmax.f32 %v460_v37, 0.0  ;;  %6830 = vmatpush1.bf16.msra.mxu0 %v6829_v23  ;;  %7086 = vmatpush1.bf16.msra.mxu1 %v7085_v39  ;;  %v9491_v14 = vpop.f32.mrb[24].mxu1  ;;  %v9493_v45 = vpop.f32.mrb[24].mxu0  ;;  %11245 = vst [vmem:[#allocation55_spill] sm:$0xff] %v9499_v24  ;;  %v472_v23 = vadd.f32 %v9340_v6, %v9325_v51  ;;  %v1572_v6 = vld [vmem:[#allocation9 + $0xed8] sm:$0xff]  ;;  %v7093_v37 = vpack.c.bf16 %v1555_v36, %v1547_v60  ;;  %v1578_v11 = vld [vmem:[#allocation9 + $0xf08] sm:$0xff] }
 0x1d9   :  { %11244 = vst [vmem:[#allocation54_spill] sm:$0xff] %v9495_v18  ;;  %6832 = vmatprep.subr.bf16.mxu0 %v6831_v25  ;;  %7088 = vmatprep.subr.bf16.mxu1 %v7087_v44  ;;  %v9503_v39 = vpop.f32.mrb[25].mxu1  ;;  %v9505_v7 = vpop.f32.mrb[25].mxu0  ;;  %v1570_v25 = vld [vmem:[#allocation9 + $0xec8] sm:$0xff]  ;;  %v6837_v44 = vpack.c.bf16 %v1553_v50, %v1545_v61  ;;  %v9516_v16 = vmax.f32 %v464_v63, 0.0  ;;  %v1571_v61 = vld [vmem:[#allocation9 + $0xed0] sm:$0xff]  ;;  %v7095_v36 = vpack.c.bf16 %v1572_v6, %v1564_v8 }
 0x1da   :  { %11243 = vst [vmem:[#allocation53_spill] sm:$0xff] %v9489_v48  ;;  %2293 = vmatprep.mubr.f32.mxu0 %v9489_v48  ;;  %2937 = vmatprep.mubr.f32.mxu1 %v9489_v48  ;;  %v9520_v58 = vmax.f32 %v472_v23, 0.0  ;;  %v6839_v63 = vpack.c.bf16 %v1570_v25, %v1562_v53  ;;  %v1586_v23 = vld [vmem:[#allocation9 + $0xf48] sm:$0xff]  ;;  %v9542_v8 = vmax.f32 %v470_v32, 0.0  ;;  %v476_v6 = vadd.f32 %v9349_v30, %v9320_v47  ;;  %v1596_v48 = vld [vmem:[#allocation9 + $0xf98] sm:$0xff] }
 0x1db   :  { %2294 = vmatmul.mubr.f32.gmra.mrb[78].mxu0 %v9495_v18  ;;  %2938 = vmatmul.mubr.f32.gmra.mrb[94].mxu1 %v9495_v18  ;;  %11246 = vst [vmem:[#allocation56_spill] sm:$0xff] %v9516_v16  ;;  %v6843_v32 = vpack.c.bf16 %v1586_v23, %v1578_v11  ;;  %v1594_v30 = vld [vmem:[#allocation9 + $0xf88] sm:$0xff]  ;;  %v1601_v11 = vld [vmem:[#allocation9 + $0xfc0] sm:$0xff] }
 0x1dc   :  { %6834 = vmatpush1.bf16.msra.mxu0 %v6833_v35  ;;  %7090 = vmatpush1.bf16.msra.mxu1 %v7089_v27  ;;  %v9512_v17 = vpop.f32.mrb[26].mxu1  ;;  %v9514_v52 = vpop.f32.mrb[26].mxu0  ;;  %11247 = vst [vmem:[#allocation57_spill] sm:$0xff] %v9520_v58  ;;  %v478_v35 = vadd.f32 %v9354_v38, %v9325_v51  ;;  %v1563_v27 = vld [vmem:[#allocation9 + $0xe90] sm:$0xff]  ;;  %v6841_v38 = vpack.c.bf16 %v1569_v5, %v1561_v19  ;;  %11249 = vst [vmem:[#allocation58_spill] sm:$0xff] %v9542_v8  ;;  %v9567_v23 = vmax.f32 %v476_v6, 0.0 }
 0x1dd   :  { %2299 = vmatprep.mubr.f32.mxu0 %v9499_v24  ;;  %2943 = vmatprep.mubr.f32.mxu1 %v9499_v24  ;;  %v9526_v50 = vpop.f32.mrb[27].mxu1  ;;  %v9528_v60 = vpop.f32.mrb[27].mxu0  ;;  %v1588_v24 = vld [vmem:[#allocation9 + $0xf58] sm:$0xff]  ;;  %v7097_v18 = vpack.c.bf16 %v1571_v61, %v1563_v27  ;;  %v484_v19 = vadd.f32 %v9368_v2, %v9325_v51  ;;  %v11251_v51 = vsub.s32 2, %v9310_v43 }
 0x1de   :  { %6836 = vmatprep.subr.bf16.mxu0 %v6835_v34  ;;  %7092 = vmatprep.subr.bf16.mxu1 %v7091_v10  ;;  %v11248_v34 = vsub.s32 3, %v9310_v43  ;;  %v9546_v5 = vmax.f32 %v478_v35, 0.0  ;;  %v1602_v35 = vld [vmem:[#allocation9 + $0xfc8] sm:$0xff]  ;;  %11252 = vst [vmem:[#allocation60_spill] sm:$0xff] %v9567_v23 }
 0x1df   :  { %2300 = vmatmul.mubr.f32.gmra.mrb[80].mxu0 %v9516_v16  ;;  %2944 = vmatmul.mubr.f32.gmra.mrb[96].mxu1 %v9516_v16  ;;  %v9561_v2 = vrot.slane %v9315_v46, %v11251_v51  ;;  %v6845_v16 = vpack.c.bf16 %v1585_v13, %v1577_v21  ;;  %v1595_v13 = vld [vmem:[#allocation9 + $0xf90] sm:$0xff]  ;;  %v6847_v6 = vpack.c.bf16 %v1602_v35, %v1594_v30  ;;  %v1620_v51 = vld [vmem:[#allocation9 + $0x1058] sm:$0xff] }
 0x1e0   :  { %6838 = vmatpush1.bf16.msra.mxu0 %v6837_v44  ;;  %7094 = vmatpush1.bf16.msra.mxu1 %v7093_v37  ;;  %v9536_v10 = vrot.slane %v9315_v46, %v11248_v34  ;;  %v9538_v53 = vpop.f32.mrb[28].mxu1  ;;  %v9540_v25 = vpop.f32.mrb[28].mxu0  ;;  %11250 = vst [vmem:[#allocation59_spill] sm:$0xff] %v9546_v5  ;;  %v1579_v44 = vld [vmem:[#allocation9 + $0xf10] sm:$0xff]  ;;  %v7099_v34 = vpack.c.bf16 %v1588_v24, %v1580_v42 }
 0x1e1   :  { %2305 = vmatprep.mubr.f32.mxu0 %v9520_v58  ;;  %2949 = vmatprep.mubr.f32.mxu1 %v9520_v58  ;;  %v1587_v37 = vld [vmem:[#allocation9 + $0xf50] sm:$0xff]  ;;  %v9552_v27 = vpop.f32.mrb[29].mxu1  ;;  %v9554_v61 = vpop.f32.mrb[29].mxu0  ;;  %v1604_v58 = vld [vmem:[#allocation9 + $0xfd8] sm:$0xff] }
 0x1e2   :  { %6840 = vmatprep.subr.bf16.mxu0 %v6839_v63  ;;  %7096 = vmatprep.subr.bf16.mxu1 %v7095_v36  ;;  %v7101_v63 = vpack.c.bf16 %v1587_v37, %v1579_v44  ;;  %v1593_v36 = vld [vmem:[#allocation9 + $0xf80] sm:$0xff]  ;;  %v555_v46 = vadd.f32 %v9382_v29, %v9536_v10  ;;  %v1603_v21 = vld [vmem:[#allocation9 + $0xfd0] sm:$0xff]  ;;  %v7103_v37 = vpack.c.bf16 %v1604_v58, %v1596_v48 }
 0x1e3   :  { %2306 = vmatmul.mubr.f32.gmra.mrb[82].mxu0 %v9542_v8  ;;  %2950 = vmatmul.mubr.f32.gmra.mrb[98].mxu1 %v9542_v8  ;;  %v482_v8 = vadd.f32 %v9363_v4, %v9320_v47  ;;  %v1610_v47 = vld [vmem:[#allocation9 + $0x1008] sm:$0xff]  ;;  %v6849_v29 = vpack.c.bf16 %v1601_v11, %v1593_v36  ;;  %v553_v48 = vadd.f32 %v9377_v20, %v9561_v2  ;;  %v1611_v30 = vld [vmem:[#allocation9 + $0x1010] sm:$0xff] }
 0x1e4   :  { %6842 = vmatpush1.bf16.msra.mxu0 %v6841_v38  ;;  %7098 = vmatpush1.bf16.msra.mxu1 %v7097_v18  ;;  %v9563_v42 = vpop.f32.mrb[30].mxu1  ;;  %v9565_v24 = vpop.f32.mrb[30].mxu0  ;;  %v9571_v38 = vmax.f32 %v484_v19, 0.0  ;;  %v1618_v4 = vld [vmem:[#allocation9 + $0x1048] sm:$0xff]  ;;  %v1612_v19 = vld [vmem:[#allocation9 + $0x1018] sm:$0xff]  ;;  %v9591_v58 = vmax.f32 %v555_v46, 0.0 }
 0x1e5   :  { %2311 = vmatprep.mubr.f32.mxu0 %v9546_v5  ;;  %2955 = vmatprep.mubr.f32.mxu1 %v9546_v5  ;;  %v9577_v18 = vpop.f32.mrb[31].mxu1  ;;  %v9579_v44 = vpop.f32.mrb[31].mxu0  ;;  %v7105_v5 = vpack.c.bf16 %v1603_v21, %v1595_v13  ;;  %v1619_v35 = vld [vmem:[#allocation9 + $0x1050] sm:$0xff]  ;;  %v7107_v11 = vpack.c.bf16 %v1620_v51, %v1612_v19  ;;  %v1626_v20 = vld [vmem:[#allocation9 + $0x1088] sm:$0xff]  ;;  %v1628_v13 = vld [vmem:[#allocation9 + $0x1098] sm:$0xff] }
 0x1e6   :  { %11253 = vst [vmem:[#allocation61_spill] sm:$0xff] %v9571_v38  ;;  %6844 = vmatprep.subr.bf16.mxu0 %v6843_v32  ;;  %7100 = vmatprep.subr.bf16.mxu1 %v7099_v34  ;;  %v9587_v34 = vmax.f32 %v482_v8, 0.0  ;;  %11255 = vst [vmem:[#allocation63_spill] sm:$0xff] %v9591_v58  ;;  %v6851_v8 = vpack.c.bf16 %v1618_v4, %v1610_v47  ;;  %v1634_v46 = vld [vmem:[#allocation9 + $0x10c8] sm:$0xff]  ;;  %v1636_v21 = vld [vmem:[#allocation9 + $0x10d8] sm:$0xff]  ;;  %v559_v47 = vadd.f32 %v9391_v40, %v9561_v2 }
 0x1e7   :  { %2312 = vmatmul.mubr.f32.gmra.mrb[84].mxu0 %v9567_v23  ;;  %2956 = vmatmul.mubr.f32.gmra.mrb[100].mxu1 %v9567_v23  ;;  %v1625_v23 = vld [vmem:[#allocation9 + $0x1080] sm:$0xff]  ;;  %v1642_v40 = vld [vmem:[#allocation9 + $0x1108] sm:$0xff] }
 0x1e8   :  { %6846 = vmatpush1.bf16.msra.mxu0 %v6845_v16  ;;  %7102 = vmatpush1.bf16.msra.mxu1 %v7101_v63  ;;  %v9583_v31 = vpop.f32.mrb[32].mxu1  ;;  %v9585_v32 = vpop.f32.mrb[32].mxu0  ;;  %11254 = vst [vmem:[#allocation62_spill] sm:$0xff] %v9587_v34  ;;  %v561_v16 = vadd.f32 %v9396_v59, %v9536_v10  ;;  %v6853_v59 = vpack.c.bf16 %v1617_v41, %v1609_v54  ;;  %v1627_v54 = vld [vmem:[#allocation9 + $0x1090] sm:$0xff] }
 0x1e9   :  { %2317 = vmatprep.mubr.f32.mxu0 %v9571_v38  ;;  %2961 = vmatprep.mubr.f32.mxu1 %v9571_v38  ;;  %v9597_v63 = vpop.f32.mrb[33].mxu1  ;;  %v9599_v36 = vpop.f32.mrb[33].mxu0  ;;  %v7109_v38 = vpack.c.bf16 %v1619_v35, %v1611_v30  ;;  %v567_v41 = vadd.f32 %v9410_v33, %v9536_v10  ;;  %v1644_v30 = vld [vmem:[#allocation9 + $0x1118] sm:$0xff]  ;;  %v6857_v33 = vpack.c.bf16 %v1633_v26, %v1625_v23  ;;  %v1643_v23 = vld [vmem:[#allocation9 + $0x1110] sm:$0xff] }
 0x1ea   :  { %6848 = vmatprep.subr.bf16.mxu0 %v6847_v6  ;;  %7104 = vmatprep.subr.bf16.mxu1 %v7103_v37  ;;  %v9607_v37 = vmax.f32 %v553_v48, 0.0  ;;  %v9611_v4 = vmax.f32 %v561_v16, 0.0  ;;  %v7111_v48 = vpack.c.bf16 %v1636_v21, %v1628_v13  ;;  %v1650_v16 = vld [vmem:[#allocation9 + $0x1148] sm:$0xff]  ;;  %v1652_v35 = vld [vmem:[#allocation9 + $0x1158] sm:$0xff]  ;;  %v573_v26 = vadd.f32 %v9424_v9, %v9536_v10 }
 0x1eb   :  { %2318 = vmatmul.mubr.f32.gmra.mrb[86].mxu0 %v9587_v34  ;;  %2962 = vmatmul.mubr.f32.gmra.mrb[102].mxu1 %v9587_v34  ;;  %v1641_v34 = vld [vmem:[#allocation9 + $0x1100] sm:$0xff] }
 0x1ec   :  { %6850 = vmatpush1.bf16.msra.mxu0 %v6849_v29  ;;  %7106 = vmatpush1.bf16.msra.mxu1 %v7105_v5  ;;  %v9603_v12 = vpop.f32.mrb[34].mxu1  ;;  %v9605_v6 = vpop.f32.mrb[34].mxu0  ;;  %11257 = vst [vmem:[#allocation65_spill] sm:$0xff] %v9607_v37  ;;  %11258 = vst [vmem:[#allocation66_spill] sm:$0xff] %v9611_v4  ;;  %v1635_v5 = vld [vmem:[#allocation9 + $0x10d0] sm:$0xff]  ;;  %v6855_v29 = vpack.c.bf16 %v1634_v46, %v1626_v20  ;;  %v565_v20 = vadd.f32 %v9405_v56, %v9561_v2  ;;  %v9631_v46 = vmax.f32 %v567_v41, 0.0 }
 0x1ed   :  { %11256 = vst [vmem:[#allocation64_spill] sm:$0xff] %v9605_v6  ;;  %2388 = vmatprep.mubr.f32.mxu0 %v9591_v58  ;;  %3032 = vmatprep.mubr.f32.mxu1 %v9591_v58  ;;  %v9617_v19 = vpop.f32.mrb[35].mxu1  ;;  %v9619_v51 = vpop.f32.mrb[35].mxu0  ;;  %v7113_v58 = vpack.c.bf16 %v1635_v5, %v1627_v54  ;;  %v1658_v56 = vld [vmem:[#allocation9 + $0x1188] sm:$0xff]  ;;  %v1660_v54 = vld [vmem:[#allocation9 + $0x1198] sm:$0xff]  ;;  %v6861_v9 = vpack.c.bf16 %v1649_v0, %v1641_v34  ;;  %v1659_v34 = vld [vmem:[#allocation9 + $0x1190] sm:$0xff] }
 0x1ee   :  { %11259 = vst [vmem:[#allocation67_spill] sm:$0xff] %v9619_v51  ;;  %6852 = vmatprep.subr.bf16.mxu0 %v6851_v8  ;;  %7108 = vmatprep.subr.bf16.mxu1 %v7107_v11  ;;  %v9627_v11 = vmax.f32 %v559_v47, 0.0  ;;  %11262 = vst [vmem:[#allocation70_spill] sm:$0xff] %v9631_v46  ;;  %v7115_v47 = vpack.c.bf16 %v1652_v35, %v1644_v30  ;;  %v1666_v41 = vld [vmem:[#allocation9 + $0x11c8] sm:$0xff]  ;;  %v1668_v5 = vld [vmem:[#allocation9 + $0x11d8] sm:$0xff]  ;;  %v579_v0 = vadd.f32 %v9438_v1, %v9536_v10 }
 0x1ef   :  { %2389 = vmatmul.mubr.f32.vlgmr.msra.gmra.mrb[56].mxu0 %v9607_v37  ;;  %3033 = vmatmul.mubr.f32.vlgmr.msra.gmra.mrb[72].mxu1 %v9607_v37  ;;  %v1657_v37 = vld [vmem:[#allocation9 + $0x1180] sm:$0xff] }
 0x1f0   :  { %6854 = vmatpush1.bf16.msra.mxu0 %v6853_v59  ;;  %7110 = vmatpush1.bf16.msra.mxu1 %v7109_v38  ;;  %v9623_v6 = vpop.f32.mrb[36].mxu1  ;;  %v9625_v8 = vpop.f32.mrb[36].mxu0  ;;  %11261 = vst [vmem:[#allocation69_spill] sm:$0xff] %v9627_v11  ;;  %v1651_v38 = vld [vmem:[#allocation9 + $0x1150] sm:$0xff]  ;;  %v6859_v59 = vpack.c.bf16 %v1650_v16, %v1642_v40  ;;  %v571_v40 = vadd.f32 %v9419_v49, %v9561_v2  ;;  %v9651_v16 = vmax.f32 %v573_v26, 0.0  ;;  %v1674_v49 = vld [vmem:[#allocation9 + $0x1208] sm:$0xff] }
 0x1f1   :  { %11260 = vst [vmem:[#allocation68_spill] sm:$0xff] %v9625_v8  ;;  %2394 = vmatprep.mubr.f32.mxu0 %v9611_v4  ;;  %3038 = vmatprep.mubr.f32.mxu1 %v9611_v4  ;;  %v9637_v13 = vpop.f32.mrb[37].mxu1  ;;  %v9639_v21 = vpop.f32.mrb[37].mxu0  ;;  %v7117_v4 = vpack.c.bf16 %v1651_v38, %v1643_v23  ;;  %v1665_v8 = vld [vmem:[#allocation9 + $0x11c0] sm:$0xff]  ;;  %v1682_v26 = vld [vmem:[#allocation9 + $0x1248] sm:$0xff]  ;;  %v1676_v23 = vld [vmem:[#allocation9 + $0x1218] sm:$0xff] }
 0x1f2   :  { %11263 = vst [vmem:[#allocation71_spill] sm:$0xff] %v9639_v21  ;;  %6856 = vmatprep.subr.bf16.mxu0 %v6855_v29  ;;  %7112 = vmatprep.subr.bf16.mxu1 %v7111_v48  ;;  %v9647_v48 = vmax.f32 %v565_v20, 0.0  ;;  %11266 = vst [vmem:[#allocation74_spill] sm:$0xff] %v9651_v16  ;;  %v7119_v20 = vpack.c.bf16 %v1668_v5, %v1660_v54  ;;  %v1684_v38 = vld [vmem:[#allocation9 + $0x1258] sm:$0xff]  ;;  %v6865_v1 = vpack.c.bf16 %v1665_v8, %v1657_v37  ;;  %v1683_v8 = vld [vmem:[#allocation9 + $0x1250] sm:$0xff] }
 0x1f3   :  { %2395 = vmatmul.mubr.f32.gmra.mrb[58].mxu0 %v9627_v11  ;;  %3039 = vmatmul.mubr.f32.gmra.mrb[74].mxu1 %v9627_v11  ;;  %v1673_v11 = vld [vmem:[#allocation9 + $0x1200] sm:$0xff]  ;;  %v585_v37 = vadd.f32 %v9452_v22, %v9536_v10 }
 0x1f4   :  { %6858 = vmatpush1.bf16.msra.mxu0 %v6857_v33  ;;  %7114 = vmatpush1.bf16.msra.mxu1 %v7113_v58  ;;  %v9643_v51 = vpop.f32.mrb[38].mxu1  ;;  %v9645_v29 = vpop.f32.mrb[38].mxu0  ;;  %11265 = vst [vmem:[#allocation73_spill] sm:$0xff] %v9647_v48  ;;  %v1667_v58 = vld [vmem:[#allocation9 + $0x11d0] sm:$0xff]  ;;  %v6863_v33 = vpack.c.bf16 %v1666_v41, %v1658_v56  ;;  %v577_v56 = vadd.f32 %v9433_v28, %v9561_v2  ;;  %v9671_v41 = vmax.f32 %v579_v0, 0.0  ;;  %v1690_v28 = vld [vmem:[#allocation9 + $0x1288] sm:$0xff] }
 0x1f5   :  { %11264 = vst [vmem:[#allocation72_spill] sm:$0xff] %v9645_v29  ;;  %2400 = vmatprep.mubr.f32.mxu0 %v9631_v46  ;;  %3044 = vmatprep.mubr.f32.mxu1 %v9631_v46  ;;  %v9657_v30 = vpop.f32.mrb[39].mxu1  ;;  %v9659_v35 = vpop.f32.mrb[39].mxu0  ;;  %v7121_v46 = vpack.c.bf16 %v1667_v58, %v1659_v34  ;;  %v1681_v29 = vld [vmem:[#allocation9 + $0x1240] sm:$0xff]  ;;  %v1698_v0 = vld [vmem:[#allocation9 + $0x12c8] sm:$0xff]  ;;  %v1692_v34 = vld [vmem:[#allocation9 + $0x1298] sm:$0xff] }
 0x1f6   :  { %6860 = vmatprep.subr.bf16.mxu0 %v6859_v59  ;;  %7116 = vmatprep.subr.bf16.mxu1 %v7115_v47  ;;  %v9667_v47 = vmax.f32 %v571_v40, 0.0  ;;  %11269 = vst [vmem:[#allocation77_spill] sm:$0xff] %v9671_v41  ;;  %v7123_v40 = vpack.c.bf16 %v1684_v38, %v1676_v23  ;;  %v1700_v58 = vld [vmem:[#allocation9 + $0x12d8] sm:$0xff]  ;;  %v6869_v22 = vpack.c.bf16 %v1681_v29, %v1673_v11  ;;  %v1699_v29 = vld [vmem:[#allocation9 + $0x12d0] sm:$0xff] }
 0x1f7   :  { %2401 = vmatmul.mubr.f32.gmra.mrb[60].mxu0 %v9647_v48  ;;  %3045 = vmatmul.mubr.f32.gmra.mrb[76].mxu1 %v9647_v48  ;;  %v1689_v48 = vld [vmem:[#allocation9 + $0x1280] sm:$0xff]  ;;  %v591_v11 = vadd.f32 %v9466_v62, %v9536_v10 }
 0x1f8   :  { %6862 = vmatpush1.bf16.msra.mxu0 %v6861_v9  ;;  %7118 = vmatpush1.bf16.msra.mxu1 %v7117_v4  ;;  %v9663_v21 = vpop.f32.mrb[40].mxu1  ;;  %v9665_v59 = vpop.f32.mrb[40].mxu0  ;;  %11268 = vst [vmem:[#allocation76_spill] sm:$0xff] %v9667_v47  ;;  %v1675_v4 = vld [vmem:[#allocation9 + $0x1210] sm:$0xff]  ;;  %v6867_v9 = vpack.c.bf16 %v1682_v26, %v1674_v49  ;;  %v583_v49 = vadd.f32 %v9447_v15, %v9561_v2  ;;  %v9691_v26 = vmax.f32 %v585_v37, 0.0  ;;  %v1706_v15 = vld [vmem:[#allocation9 + $0x1308] sm:$0xff] }
 0x1f9   :  { %11267 = vst [vmem:[#allocation75_spill] sm:$0xff] %v9663_v21  ;;  %2406 = vmatprep.mubr.f32.mxu0 %v9651_v16  ;;  %3050 = vmatprep.mubr.f32.mxu1 %v9651_v16  ;;  %v9677_v54 = vpop.f32.mrb[41].mxu1  ;;  %v9679_v5 = vpop.f32.mrb[41].mxu0  ;;  %v7125_v16 = vpack.c.bf16 %v1683_v8, %v1675_v4  ;;  %v1697_v21 = vld [vmem:[#allocation9 + $0x12c0] sm:$0xff]  ;;  %v1714_v37 = vld [vmem:[#allocation9 + $0x1348] sm:$0xff]  ;;  %v1708_v4 = vld [vmem:[#allocation9 + $0x1318] sm:$0xff] }
 0x1fa   :  { %11270 = vst [vmem:[#allocation78_spill] sm:$0xff] %v9677_v54  ;;  %6864 = vmatprep.subr.bf16.mxu0 %v6863_v33  ;;  %7120 = vmatprep.subr.bf16.mxu1 %v7119_v20  ;;  %v9687_v20 = vmax.f32 %v577_v56, 0.0  ;;  %11273 = vst [vmem:[#allocation81_spill] sm:$0xff] %v9691_v26  ;;  %v7127_v56 = vpack.c.bf16 %v1700_v58, %v1692_v34  ;;  %v1716_v8 = vld [vmem:[#allocation9 + $0x1358] sm:$0xff]  ;;  %v6873_v62 = vpack.c.bf16 %v1697_v21, %v1689_v48  ;;  %v1707_v48 = vld [vmem:[#allocation9 + $0x1310] sm:$0xff] }
 0x1fb   :  { %2407 = vmatmul.mubr.f32.gmra.mrb[62].mxu0 %v9667_v47  ;;  %3051 = vmatmul.mubr.f32.gmra.mrb[78].mxu1 %v9667_v47  ;;  %v1705_v47 = vld [vmem:[#allocation9 + $0x1300] sm:$0xff]  ;;  %v597_v21 = vadd.f32 %v9482_v3, %v9536_v10 }
 0x1fc   :  { %6866 = vmatpush1.bf16.msra.mxu0 %v6865_v1  ;;  %7122 = vmatpush1.bf16.msra.mxu1 %v7121_v46  ;;  %v9683_v54 = vpop.f32.mrb[42].mxu1  ;;  %v9685_v33 = vpop.f32.mrb[42].mxu0  ;;  %11272 = vst [vmem:[#allocation80_spill] sm:$0xff] %v9687_v20  ;;  %v1691_v46 = vld [vmem:[#allocation9 + $0x1290] sm:$0xff]  ;;  %v6871_v1 = vpack.c.bf16 %v1698_v0, %v1690_v28  ;;  %v589_v28 = vadd.f32 %v9461_v55, %v9561_v2  ;;  %v9711_v0 = vmax.f32 %v591_v11, 0.0  ;;  %v1722_v55 = vld [vmem:[#allocation9 + $0x1388] sm:$0xff] }
 0x1fd   :  { %11271 = vst [vmem:[#allocation79_spill] sm:$0xff] %v9683_v54  ;;  %2412 = vmatprep.mubr.f32.mxu0 %v9671_v41  ;;  %3056 = vmatprep.mubr.f32.mxu1 %v9671_v41  ;;  %v9697_v23 = vpop.f32.mrb[43].mxu1  ;;  %v9699_v38 = vpop.f32.mrb[43].mxu0  ;;  %v7129_v41 = vpack.c.bf16 %v1699_v29, %v1691_v46  ;;  %v1713_v54 = vld [vmem:[#allocation9 + $0x1340] sm:$0xff]  ;;  %v1730_v11 = vld [vmem:[#allocation9 + $0x13c8] sm:$0xff]  ;;  %v1724_v46 = vld [vmem:[#allocation9 + $0x1398] sm:$0xff] }
 0x1fe   :  { %11274 = vst [vmem:[#allocation82_spill] sm:$0xff] %v9697_v23  ;;  %6868 = vmatprep.subr.bf16.mxu0 %v6867_v9  ;;  %7124 = vmatprep.subr.bf16.mxu1 %v7123_v40  ;;  %v9707_v40 = vmax.f32 %v583_v49, 0.0  ;;  %11277 = vst [vmem:[#allocation85_spill] sm:$0xff] %v9711_v0  ;;  %v7131_v49 = vpack.c.bf16 %v1716_v8, %v1708_v4  ;;  %v1732_v29 = vld [vmem:[#allocation9 + $0x13d8] sm:$0xff]  ;;  %v6877_v3 = vpack.c.bf16 %v1713_v54, %v1705_v47  ;;  %v1731_v54 = vld [vmem:[#allocation9 + $0x13d0] sm:$0xff] }
 0x1ff   :  { %2413 = vmatmul.mubr.f32.gmra.mrb[64].mxu0 %v9687_v20  ;;  %3057 = vmatmul.mubr.f32.gmra.mrb[80].mxu1 %v9687_v20  ;;  %v1721_v20 = vld [vmem:[#allocation9 + $0x1380] sm:$0xff]  ;;  %v603_v47 = vadd.f32 %v9503_v39, %v9536_v10 }
 0x200   :  { %6870 = vmatpush1.bf16.msra.mxu0 %v6869_v22  ;;  %7126 = vmatpush1.bf16.msra.mxu1 %v7125_v16  ;;  %v9703_v23 = vpop.f32.mrb[44].mxu1  ;;  %v9705_v9 = vpop.f32.mrb[44].mxu0  ;;  %11276 = vst [vmem:[#allocation84_spill] sm:$0xff] %v9707_v40  ;;  %v1715_v16 = vld [vmem:[#allocation9 + $0x1350] sm:$0xff]  ;;  %v6875_v22 = vpack.c.bf16 %v1714_v37, %v1706_v15  ;;  %v595_v15 = vadd.f32 %v9475_v57, %v9561_v2  ;;  %v9731_v37 = vmax.f32 %v597_v21, 0.0  ;;  %v1738_v57 = vld [vmem:[#allocation9 + $0x1408] sm:$0xff] }
 0x201   :  { %11275 = vst [vmem:[#allocation83_spill] sm:$0xff] %v9703_v23  ;;  %2418 = vmatprep.mubr.f32.mxu0 %v9691_v26  ;;  %3062 = vmatprep.mubr.f32.mxu1 %v9691_v26  ;;  %v9717_v34 = vpop.f32.mrb[45].mxu1  ;;  %v9719_v58 = vpop.f32.mrb[45].mxu0  ;;  %v7133_v26 = vpack.c.bf16 %v1715_v16, %v1707_v48  ;;  %v1729_v23 = vld [vmem:[#allocation9 + $0x13c0] sm:$0xff]  ;;  %v1746_v21 = vld [vmem:[#allocation9 + $0x1448] sm:$0xff]  ;;  %v1740_v48 = vld [vmem:[#allocation9 + $0x1418] sm:$0xff] }
 0x202   :  { %11278 = vst [vmem:[#allocation86_spill] sm:$0xff] %v9717_v34  ;;  %6872 = vmatprep.subr.bf16.mxu0 %v6871_v1  ;;  %7128 = vmatprep.subr.bf16.mxu1 %v7127_v56  ;;  %v9727_v56 = vmax.f32 %v589_v28, 0.0  ;;  %11281 = vst [vmem:[#allocation89_spill] sm:$0xff] %v9731_v37  ;;  %v7135_v28 = vpack.c.bf16 %v1732_v29, %v1724_v46  ;;  %v1748_v16 = vld [vmem:[#allocation9 + $0x1458] sm:$0xff]  ;;  %v6881_v39 = vpack.c.bf16 %v1729_v23, %v1721_v20  ;;  %v1747_v23 = vld [vmem:[#allocation9 + $0x1450] sm:$0xff] }
 0x203   :  { %2419 = vmatmul.mubr.f32.gmra.mrb[66].mxu0 %v9707_v40  ;;  %3063 = vmatmul.mubr.f32.gmra.mrb[82].mxu1 %v9707_v40  ;;  %v1737_v40 = vld [vmem:[#allocation9 + $0x1400] sm:$0xff]  ;;  %v609_v20 = vadd.f32 %v9526_v50, %v9536_v10 }
 0x204   :  { %6874 = vmatpush1.bf16.msra.mxu0 %v6873_v62  ;;  %7130 = vmatpush1.bf16.msra.mxu1 %v7129_v41  ;;  %v9723_v34 = vpop.f32.mrb[46].mxu1  ;;  %v9725_v1 = vpop.f32.mrb[46].mxu0  ;;  %11280 = vst [vmem:[#allocation88_spill] sm:$0xff] %v9727_v56  ;;  %v1723_v41 = vld [vmem:[#allocation9 + $0x1390] sm:$0xff]  ;;  %v6879_v62 = vpack.c.bf16 %v1730_v11, %v1722_v55  ;;  %v601_v55 = vadd.f32 %v9491_v14, %v9561_v2  ;;  %v9751_v11 = vmax.f32 %v603_v47, 0.0  ;;  %v1754_v14 = vld [vmem:[#allocation9 + $0x1488] sm:$0xff] }
 0x205   :  { %11279 = vst [vmem:[#allocation87_spill] sm:$0xff] %v9723_v34  ;;  %2424 = vmatprep.mubr.f32.mxu0 %v9711_v0  ;;  %3068 = vmatprep.mubr.f32.mxu1 %v9711_v0  ;;  %v9737_v4 = vpop.f32.mrb[47].mxu1  ;;  %v9739_v8 = vpop.f32.mrb[47].mxu0  ;;  %v7137_v0 = vpack.c.bf16 %v1731_v54, %v1723_v41  ;;  %v1745_v34 = vld [vmem:[#allocation9 + $0x1440] sm:$0xff]  ;;  %v1762_v47 = vld [vmem:[#allocation9 + $0x14c8] sm:$0xff]  ;;  %v1756_v41 = vld [vmem:[#allocation9 + $0x1498] sm:$0xff] }
 0x206   :  { %11282 = vst [vmem:[#allocation90_spill] sm:$0xff] %v9737_v4  ;;  %6876 = vmatprep.subr.bf16.mxu0 %v6875_v22  ;;  %7132 = vmatprep.subr.bf16.mxu1 %v7131_v49  ;;  %v9747_v49 = vmax.f32 %v595_v15, 0.0  ;;  %11285 = vst [vmem:[#allocation93_spill] sm:$0xff] %v9751_v11  ;;  %v7139_v15 = vpack.c.bf16 %v1748_v16, %v1740_v48  ;;  %v1764_v54 = vld [vmem:[#allocation9 + $0x14d8] sm:$0xff]  ;;  %v6885_v50 = vpack.c.bf16 %v1745_v34, %v1737_v40  ;;  %v1763_v34 = vld [vmem:[#allocation9 + $0x14d0] sm:$0xff] }
 0x207   :  { %2425 = vmatmul.mubr.f32.gmra.mrb[68].mxu0 %v9727_v56  ;;  %3069 = vmatmul.mubr.f32.gmra.mrb[84].mxu1 %v9727_v56  ;;  %v1753_v56 = vld [vmem:[#allocation9 + $0x1480] sm:$0xff]  ;;  %v615_v40 = vadd.f32 %v9552_v27, %v9536_v10 }
 0x208   :  { %6878 = vmatpush1.bf16.msra.mxu0 %v6877_v3  ;;  %7134 = vmatpush1.bf16.msra.mxu1 %v7133_v26  ;;  %v9743_v4 = vpop.f32.mrb[48].mxu1  ;;  %v9745_v22 = vpop.f32.mrb[48].mxu0  ;;  %11284 = vst [vmem:[#allocation92_spill] sm:$0xff] %v9747_v49  ;;  %v1739_v26 = vld [vmem:[#allocation9 + $0x1410] sm:$0xff]  ;;  %v6883_v3 = vpack.c.bf16 %v1746_v21, %v1738_v57  ;;  %v607_v57 = vadd.f32 %v9512_v17, %v9561_v2  ;;  %v9771_v21 = vmax.f32 %v609_v20, 0.0  ;;  %v1770_v17 = vld [vmem:[#allocation9 + $0x1508] sm:$0xff] }
 0x209   :  { %11283 = vst [vmem:[#allocation91_spill] sm:$0xff] %v9743_v4  ;;  %2430 = vmatprep.mubr.f32.mxu0 %v9731_v37  ;;  %3074 = vmatprep.mubr.f32.mxu1 %v9731_v37  ;;  %v9757_v46 = vpop.f32.mrb[49].mxu1  ;;  %v9759_v29 = vpop.f32.mrb[49].mxu0  ;;  %v7141_v37 = vpack.c.bf16 %v1747_v23, %v1739_v26  ;;  %v1761_v4 = vld [vmem:[#allocation9 + $0x14c0] sm:$0xff]  ;;  %v1778_v20 = vld [vmem:[#allocation9 + $0x1548] sm:$0xff]  ;;  %v1772_v26 = vld [vmem:[#allocation9 + $0x1518] sm:$0xff] }
 0x20a   :  { %11286 = vst [vmem:[#allocation94_spill] sm:$0xff] %v9757_v46  ;;  %6880 = vmatprep.subr.bf16.mxu0 %v6879_v62  ;;  %7136 = vmatprep.subr.bf16.mxu1 %v7135_v28  ;;  %v9767_v28 = vmax.f32 %v601_v55, 0.0  ;;  %11289 = vst [vmem:[#allocation97_spill] sm:$0xff] %v9771_v21  ;;  %v7143_v55 = vpack.c.bf16 %v1764_v54, %v1756_v41  ;;  %v1780_v23 = vld [vmem:[#allocation9 + $0x1558] sm:$0xff]  ;;  %v6889_v27 = vpack.c.bf16 %v1761_v4, %v1753_v56  ;;  %v1779_v4 = vld [vmem:[#allocation9 + $0x1550] sm:$0xff] }
 0x20b   :  { %2431 = vmatmul.mubr.f32.gmra.mrb[70].mxu0 %v9747_v49  ;;  %3075 = vmatmul.mubr.f32.gmra.mrb[86].mxu1 %v9747_v49  ;;  %v1769_v49 = vld [vmem:[#allocation9 + $0x1500] sm:$0xff]  ;;  %v621_v56 = vadd.f32 %v9577_v18, %v9536_v10 }
 0x20c   :  { %6882 = vmatpush1.bf16.msra.mxu0 %v6881_v39  ;;  %7138 = vmatpush1.bf16.msra.mxu1 %v7137_v0  ;;  %v9763_v46 = vpop.f32.mrb[50].mxu1  ;;  %v9765_v62 = vpop.f32.mrb[50].mxu0  ;;  %11288 = vst [vmem:[#allocation96_spill] sm:$0xff] %v9767_v28  ;;  %v1755_v0 = vld [vmem:[#allocation9 + $0x1490] sm:$0xff]  ;;  %v6887_v39 = vpack.c.bf16 %v1762_v47, %v1754_v14  ;;  %v613_v14 = vadd.f32 %v9538_v53, %v9561_v2  ;;  %v9791_v47 = vmax.f32 %v615_v40, 0.0  ;;  %v1786_v53 = vld [vmem:[#allocation9 + $0x1588] sm:$0xff] }
 0x20d   :  { %11287 = vst [vmem:[#allocation95_spill] sm:$0xff] %v9763_v46  ;;  %2436 = vmatprep.mubr.f32.mxu0 %v9751_v11  ;;  %3080 = vmatprep.mubr.f32.mxu1 %v9751_v11  ;;  %v9777_v48 = vpop.f32.mrb[51].mxu1  ;;  %v9779_v16 = vpop.f32.mrb[51].mxu0  ;;  %v7145_v11 = vpack.c.bf16 %v1763_v34, %v1755_v0  ;;  %v1777_v46 = vld [vmem:[#allocation9 + $0x1540] sm:$0xff]  ;;  %v1794_v40 = vld [vmem:[#allocation9 + $0x15c8] sm:$0xff]  ;;  %v1788_v0 = vld [vmem:[#allocation9 + $0x1598] sm:$0xff] }
 0x20e   :  { %11290 = vst [vmem:[#allocation98_spill] sm:$0xff] %v9777_v48  ;;  %6884 = vmatprep.subr.bf16.mxu0 %v6883_v3  ;;  %7140 = vmatprep.subr.bf16.mxu1 %v7139_v15  ;;  %v9787_v15 = vmax.f32 %v607_v57, 0.0  ;;  %11293 = vst [vmem:[#allocation101_spill] sm:$0xff] %v9791_v47  ;;  %v7147_v57 = vpack.c.bf16 %v1780_v23, %v1772_v26  ;;  %v1796_v34 = vld [vmem:[#allocation9 + $0x15d8] sm:$0xff]  ;;  %v6893_v18 = vpack.c.bf16 %v1777_v46, %v1769_v49  ;;  %v1795_v46 = vld [vmem:[#allocation9 + $0x15d0] sm:$0xff] }
 0x20f   :  { %2437 = vmatmul.mubr.f32.gmra.mrb[72].mxu0 %v9767_v28  ;;  %3081 = vmatmul.mubr.f32.gmra.mrb[88].mxu1 %v9767_v28  ;;  %v1785_v28 = vld [vmem:[#allocation9 + $0x1580] sm:$0xff]  ;;  %v627_v49 = vadd.f32 %v9597_v63, %v9536_v10 }
 0x210   :  { %6886 = vmatpush1.bf16.msra.mxu0 %v6885_v50  ;;  %7142 = vmatpush1.bf16.msra.mxu1 %v7141_v37  ;;  %v9783_v48 = vpop.f32.mrb[52].mxu1  ;;  %v9785_v3 = vpop.f32.mrb[52].mxu0  ;;  %11292 = vst [vmem:[#allocation100_spill] sm:$0xff] %v9787_v15  ;;  %v1771_v37 = vld [vmem:[#allocation9 + $0x1510] sm:$0xff]  ;;  %v6891_v50 = vpack.c.bf16 %v1778_v20, %v1770_v17  ;;  %v619_v17 = vadd.f32 %v9563_v42, %v9561_v2  ;;  %v9811_v20 = vmax.f32 %v621_v56, 0.0  ;;  %v1802_v42 = vld [vmem:[#allocation9 + $0x1608] sm:$0xff] }
 0x211   :  { %11291 = vst [vmem:[#allocation99_spill] sm:$0xff] %v9783_v48  ;;  %2442 = vmatprep.mubr.f32.mxu0 %v9771_v21  ;;  %3086 = vmatprep.mubr.f32.mxu1 %v9771_v21  ;;  %v9797_v41 = vpop.f32.mrb[53].mxu1  ;;  %v9799_v54 = vpop.f32.mrb[53].mxu0  ;;  %v7149_v21 = vpack.c.bf16 %v1779_v4, %v1771_v37  ;;  %v1793_v48 = vld [vmem:[#allocation9 + $0x15c0] sm:$0xff]  ;;  %v1810_v56 = vld [vmem:[#allocation9 + $0x1648] sm:$0xff]  ;;  %v1804_v37 = vld [vmem:[#allocation9 + $0x1618] sm:$0xff] }
 0x212   :  { %11294 = vst [vmem:[#allocation102_spill] sm:$0xff] %v9797_v41  ;;  %6888 = vmatprep.subr.bf16.mxu0 %v6887_v39  ;;  %7144 = vmatprep.subr.bf16.mxu1 %v7143_v55  ;;  %v9807_v55 = vmax.f32 %v613_v14, 0.0  ;;  %11297 = vst [vmem:[#allocation105_spill] sm:$0xff] %v9811_v20  ;;  %v7151_v14 = vpack.c.bf16 %v1796_v34, %v1788_v0  ;;  %v1812_v4 = vld [vmem:[#allocation9 + $0x1658] sm:$0xff]  ;;  %v6897_v63 = vpack.c.bf16 %v1793_v48, %v1785_v28  ;;  %v1803_v28 = vld [vmem:[#allocation9 + $0x1610] sm:$0xff] }
 0x213   :  { %2443 = vmatmul.mubr.f32.gmra.mrb[74].mxu0 %v9787_v15  ;;  %3087 = vmatmul.mubr.f32.gmra.mrb[90].mxu1 %v9787_v15  ;;  %v1801_v15 = vld [vmem:[#allocation9 + $0x1600] sm:$0xff]  ;;  %v1811_v48 = vld [vmem:[#allocation9 + $0x1650] sm:$0xff]  ;;  %v6899_v0 = vpack.c.bf16 %v1810_v56, %v1802_v42  ;;  %v7155_v34 = vpack.c.bf16 %v1812_v4, %v1804_v37 }
 0x214   :  { %6890 = vmatpush1.bf16.msra.mxu0 %v6889_v27  ;;  %7146 = vmatpush1.bf16.msra.mxu1 %v7145_v11  ;;  %v9803_v41 = vpop.f32.mrb[54].mxu1  ;;  %v9805_v39 = vpop.f32.mrb[54].mxu0  ;;  %11296 = vst [vmem:[#allocation104_spill] sm:$0xff] %v9807_v55  ;;  %v1787_v11 = vld [vmem:[#allocation9 + $0x1590] sm:$0xff]  ;;  %v6895_v27 = vpack.c.bf16 %v1794_v40, %v1786_v53  ;;  %v633_v53 = vadd.f32 %v9617_v19, %v9536_v10 }
 0x215   :  { %11295 = vst [vmem:[#allocation103_spill] sm:$0xff] %v9803_v41  ;;  %2448 = vmatprep.mubr.f32.mxu0 %v9791_v47  ;;  %3092 = vmatprep.mubr.f32.mxu1 %v9791_v47  ;;  %v9817_v26 = vpop.f32.mrb[55].mxu1  ;;  %v9819_v23 = vpop.f32.mrb[55].mxu0  ;;  %v7153_v47 = vpack.c.bf16 %v1795_v46, %v1787_v11  ;;  %v7157_v11 = vpack.c.bf16 %v1811_v48, %v1803_v28  ;;  %v1817_v46 = vld [vmem:[#allocation9 + $0x1680] sm:$0xff]  ;;  %v1819_v56 = vld [vmem:[#allocation9 + $0x1690] sm:$0xff]  ;;  %v1844_v28 = vld [vmem:[#allocation9 + $0x1758] sm:$0xff] }
 0x216   :  { %11298 = vst [vmem:[#allocation106_spill] sm:$0xff] %v9817_v26  ;;  %6892 = vmatprep.subr.bf16.mxu0 %v6891_v50  ;;  %7148 = vmatprep.subr.bf16.mxu1 %v7147_v57  ;;  %v9825_v26 = vmax.f32 %v619_v17, 0.0  ;;  %v625_v50 = vadd.f32 %v9583_v31, %v9561_v2  ;;  %v9829_v57 = vmax.f32 %v627_v49, 0.0  ;;  %v1826_v31 = vld [vmem:[#allocation9 + $0x16c8] sm:$0xff]  ;;  %v1820_v17 = vld [vmem:[#allocation9 + $0x1698] sm:$0xff]  ;;  %v9846_v42 = vmax.f32 %v633_v53, 0.0 }
 0x217   :  { %2449 = vmatmul.mubr.f32.gmra.mrb[76].mxu0 %v9807_v55  ;;  %3093 = vmatmul.mubr.f32.gmra.mrb[92].mxu1 %v9807_v55  ;;  %v1828_v49 = vld [vmem:[#allocation9 + $0x16d8] sm:$0xff]  ;;  %v1827_v37 = vld [vmem:[#allocation9 + $0x16d0] sm:$0xff] }
 0x218   :  { %6894 = vmatpush1.bf16.msra.mxu0 %v6893_v18  ;;  %7150 = vmatpush1.bf16.msra.mxu1 %v7149_v21  ;;  %v9823_v41 = vpop.f32.mrb[56].mxu1  ;;  %11299 = vst [vmem:[#allocation107_spill] sm:$0xff] %v9825_v26  ;;  %11300 = vst [vmem:[#allocation108_spill] sm:$0xff] %v9829_v57  ;;  %v1809_v21 = vld [vmem:[#allocation9 + $0x1640] sm:$0xff]  ;;  %v1818_v18 = vld [vmem:[#allocation9 + $0x1688] sm:$0xff]  ;;  %v7161_v48 = vpack.c.bf16 %v1827_v37, %v1819_v56 }
 0x219   :  { %2454 = vmatprep.mubr.f32.mxu0 %v9811_v20  ;;  %3098 = vmatprep.mubr.f32.mxu1 %v9811_v20  ;;  %v9835_v40 = vpop.f32.mrb[57].mxu1  ;;  %v6901_v19 = vpack.c.bf16 %v1809_v21, %v1801_v15  ;;  %11302 = vst [vmem:[#allocation110_spill] sm:$0xff] %v9846_v42  ;;  %v639_v15 = vadd.f32 %v9637_v13, %v9536_v10  ;;  %v1834_v21 = vld [vmem:[#allocation9 + $0x1708] sm:$0xff]  ;;  %v1836_v53 = vld [vmem:[#allocation9 + $0x1718] sm:$0xff] }
 0x21a   :  { %6896 = vmatprep.subr.bf16.mxu0 %v6895_v27  ;;  %7152 = vmatprep.subr.bf16.mxu1 %v7151_v14  ;;  %v9842_v27 = vmax.f32 %v625_v50, 0.0  ;;  %v631_v14 = vadd.f32 %v9603_v12, %v9561_v2  ;;  %v7159_v50 = vpack.c.bf16 %v1828_v49, %v1820_v17  ;;  %v1842_v12 = vld [vmem:[#allocation9 + $0x1748] sm:$0xff]  ;;  %v637_v17 = vadd.f32 %v9623_v6, %v9561_v2  ;;  %v1860_v20 = vld [vmem:[#allocation9 + $0x17d8] sm:$0xff] }
 0x21b   :  { %2455 = vmatmul.mubr.f32.gmra.mrb[78].mxu0 %v9825_v26  ;;  %3099 = vmatmul.mubr.f32.gmra.mrb[94].mxu1 %v9825_v26  ;;  %v9857_v26 = vld [vmem:[#allocation8] sm:$0xff]  ;;  %v9870_v49 = vmax.f32 %v639_v15, 0.0  ;;  %v7163_v37 = vpack.c.bf16 %v1844_v28, %v1836_v53  ;;  %v1858_v6 = vld [vmem:[#allocation9 + $0x17c8] sm:$0xff]  ;;  %v643_v53 = vadd.f32 %v9643_v51, %v9561_v2 }
 0x21c   :  { %6898 = vmatpush1.bf16.msra.mxu0 %v6897_v63  ;;  %7154 = vmatpush1.bf16.msra.mxu1 %v7153_v47  ;;  %v9840_v55 = vpop.f32.mrb[58].mxu1  ;;  %11301 = vst [vmem:[#allocation109_spill] sm:$0xff] %v9842_v27  ;;  %v1825_v47 = vld [vmem:[#allocation9 + $0x16c0] sm:$0xff]  ;;  %v6903_v63 = vpack.c.bf16 %v1826_v31, %v1818_v18  ;;  %v9866_v31 = vmax.f32 %v631_v14, 0.0  ;;  %v6907_v14 = vpack.c.bf16 %v1842_v12, %v1834_v21  ;;  %v1852_v15 = vld [vmem:[#allocation9 + $0x1798] sm:$0xff]  ;;  %v9887_v12 = vmax.f32 %v637_v17, 0.0 }
 0x21d   :  { %2460 = vmatprep.mubr.f32.mxu0 %v9829_v57  ;;  %3104 = vmatprep.mubr.f32.mxu1 %v9829_v57  ;;  %v9852_v4 = vpop.f32.mrb[59].mxu1  ;;  %v6905_v13 = vpack.c.bf16 %v1825_v47, %v1817_v46  ;;  %v1833_v57 = vld [vmem:[#allocation9 + $0x1700] sm:$0xff]  ;;  %11305 = vst [vmem:[#allocation112_spill] sm:$0xff] %v9870_v49  ;;  %v1835_v46 = vld [vmem:[#allocation9 + $0x1710] sm:$0xff]  ;;  %v1874_v2 = vld [vmem:[#allocation9 + $0x1848] sm:$0xff] }
 0x21e   :  { %6900 = vmatprep.subr.bf16.mxu0 %v6899_v0  ;;  %7156 = vmatprep.subr.bf16.mxu1 %v7155_v34  ;;  %v11303_v0 = vsub.s32 5, %v9310_v43  ;;  %11304 = vst [vmem:[#allocation111_spill] sm:$0xff] %v9866_v31  ;;  %v1843_v47 = vld [vmem:[#allocation9 + $0x1750] sm:$0xff]  ;;  %11308 = vst [vmem:[#allocation114_spill] sm:$0xff] %v9887_v12  ;;  %v1868_v51 = vld [vmem:[#allocation9 + $0x1818] sm:$0xff] }
 0x21f   :  { %2461 = vmatmul.mubr.f32.gmra.mrb[80].mxu0 %v9842_v27  ;;  %3105 = vmatmul.mubr.f32.gmra.mrb[96].mxu1 %v9842_v27 }
 0x220   :  { %6902 = vmatpush1.bf16.msra.mxu0 %v6901_v19  ;;  %7158 = vmatpush1.bf16.msra.mxu1 %v7157_v11  ;;  %v9862_v34 = vrot.slane %v9857_v26, %v11303_v0  ;;  %v9864_v18 = vpop.f32.mrb[60].mxu1  ;;  %v645_v19 = vadd.f32 %v9657_v30, %v9536_v10  ;;  %v1841_v11 = vld [vmem:[#allocation9 + $0x1740] sm:$0xff]  ;;  %v1850_v0 = vld [vmem:[#allocation9 + $0x1788] sm:$0xff]  ;;  %v11306_v10 = vsub.s32 4, %v9310_v43 }
 0x221   :  { %2466 = vmatprep.mubr.f32.mxu0 %v9846_v42  ;;  %3110 = vmatprep.mubr.f32.mxu1 %v9846_v42  ;;  %v9876_v56 = vpop.f32.mrb[61].mxu1  ;;  %v6909_v42 = vpack.c.bf16 %v1841_v11, %v1833_v57  ;;  %v1851_v57 = vld [vmem:[#allocation9 + $0x1790] sm:$0xff]  ;;  %v6911_v17 = vpack.c.bf16 %v1858_v6, %v1850_v0 }
 0x222   :  { %6904 = vmatprep.subr.bf16.mxu0 %v6903_v63  ;;  %7160 = vmatprep.subr.bf16.mxu1 %v7159_v50  ;;  %v9883_v30 = vrot.slane %v9857_v26, %v11306_v10  ;;  %v7165_v63 = vpack.c.bf16 %v1843_v47, %v1835_v46  ;;  %v1849_v50 = vld [vmem:[#allocation9 + $0x1780] sm:$0xff]  ;;  %v9891_v28 = vmax.f32 %v645_v19, 0.0  ;;  %v1859_v11 = vld [vmem:[#allocation9 + $0x17d0] sm:$0xff]  ;;  %v7167_v47 = vpack.c.bf16 %v1860_v20, %v1852_v15  ;;  %v1866_v10 = vld [vmem:[#allocation9 + $0x1808] sm:$0xff] }
 0x223   :  { %2467 = vmatmul.mubr.f32.gmra.mrb[82].mxu0 %v9866_v31  ;;  %3111 = vmatmul.mubr.f32.gmra.mrb[98].mxu1 %v9866_v31  ;;  %v1876_v19 = vld [vmem:[#allocation9 + $0x1858] sm:$0xff]  ;;  %v1865_v31 = vld [vmem:[#allocation9 + $0x1800] sm:$0xff]  ;;  %v1867_v0 = vld [vmem:[#allocation9 + $0x1810] sm:$0xff] }
 0x224   :  { %6906 = vmatpush1.bf16.msra.mxu0 %v6905_v13  ;;  %7162 = vmatpush1.bf16.msra.mxu1 %v7161_v48  ;;  %v9885_v21 = vpop.f32.mrb[62].mxu1  ;;  %11309 = vst [vmem:[#allocation115_spill] sm:$0xff] %v9891_v28  ;;  %v716_v13 = vadd.f32 %v9505_v7, %v9862_v34  ;;  %v1857_v48 = vld [vmem:[#allocation9 + $0x17c0] sm:$0xff]  ;;  %v714_v20 = vadd.f32 %v9493_v45, %v9883_v30  ;;  %v1875_v6 = vld [vmem:[#allocation9 + $0x1850] sm:$0xff]  ;;  %v1890_v45 = vld [vmem:[#allocation9 + $0x18c8] sm:$0xff] }
 0x225   :  { %11307 = vst [vmem:[#allocation113_spill] sm:$0xff] %v9885_v21  ;;  %2472 = vmatprep.mubr.f32.mxu0 %v9870_v49  ;;  %3116 = vmatprep.mubr.f32.mxu1 %v9870_v49  ;;  %v9897_v46 = vpop.f32.mrb[63].mxu1  ;;  %v6913_v7 = vpack.c.bf16 %v1857_v48, %v1849_v50  ;;  %v7169_v49 = vpack.c.bf16 %v1859_v11, %v1851_v57  ;;  %v9903_v21 = vmax.f32 %v643_v53, 0.0  ;;  %v1882_v53 = vld [vmem:[#allocation9 + $0x1888] sm:$0xff]  ;;  %v1892_v48 = vld [vmem:[#allocation9 + $0x18d8] sm:$0xff]  ;;  %v1881_v11 = vld [vmem:[#allocation9 + $0x1880] sm:$0xff] }
 0x226   :  { %6908 = vmatprep.subr.bf16.mxu0 %v6907_v14  ;;  %7164 = vmatprep.subr.bf16.mxu1 %v7163_v37  ;;  %v9907_v14 = vmax.f32 %v716_v13, 0.0  ;;  %v1873_v37 = vld [vmem:[#allocation9 + $0x1840] sm:$0xff]  ;;  %v7171_v50 = vpack.c.bf16 %v1876_v19, %v1868_v51  ;;  %v1884_v13 = vld [vmem:[#allocation9 + $0x1898] sm:$0xff]  ;;  %v7173_v57 = vpack.c.bf16 %v1875_v6, %v1867_v0  ;;  %v6919_v19 = vpack.c.bf16 %v1890_v45, %v1882_v53 }
 0x227   :  { %2473 = vmatmul.mubr.f32.gmra.mrb[84].mxu0 %v9887_v12  ;;  %3117 = vmatmul.mubr.f32.gmra.mrb[100].mxu1 %v9887_v12  ;;  %11310 = vst [vmem:[#allocation116_spill] sm:$0xff] %v9903_v21  ;;  %v9919_v12 = vmax.f32 %v714_v20, 0.0  ;;  %v1898_v20 = vld [vmem:[#allocation9 + $0x1908] sm:$0xff]  ;;  %v1897_v6 = vld [vmem:[#allocation9 + $0x1900] sm:$0xff]  ;;  %v734_v53 = vadd.f32 %v9579_v44, %v9862_v34 }
 0x228   :  { %6910 = vmatpush1.bf16.msra.mxu0 %v6909_v42  ;;  %7166 = vmatpush1.bf16.msra.mxu1 %v7165_v63  ;;  %v9901_v27 = vpop.f32.mrb[64].mxu1  ;;  %11311 = vst [vmem:[#allocation117_spill] sm:$0xff] %v9907_v14  ;;  %v722_v42 = vadd.f32 %v9528_v60, %v9862_v34  ;;  %v6915_v63 = vpack.c.bf16 %v1874_v2, %v1866_v10  ;;  %v1891_v2 = vld [vmem:[#allocation9 + $0x18d0] sm:$0xff]  ;;  %v1905_v45 = vld [vmem:[#allocation9 + $0x1940] sm:$0xff] }
 0x229   :  { %2478 = vmatprep.mubr.f32.mxu0 %v9891_v28  ;;  %3122 = vmatprep.mubr.f32.mxu1 %v9891_v28  ;;  %v9913_v15 = vpop.f32.mrb[65].mxu1  ;;  %v6917_v60 = vpack.c.bf16 %v1873_v37, %v1865_v31  ;;  %11312 = vst [vmem:[#allocation118_spill] sm:$0xff] %v9919_v12  ;;  %v728_v10 = vadd.f32 %v9554_v61, %v9862_v34  ;;  %v1883_v31 = vld [vmem:[#allocation9 + $0x1890] sm:$0xff]  ;;  %v1908_v37 = vld [vmem:[#allocation9 + $0x1958] sm:$0xff] }
 0x22a   :  { %6912 = vmatprep.subr.bf16.mxu0 %v6911_v17  ;;  %7168 = vmatprep.subr.bf16.mxu1 %v7167_v47  ;;  %v720_v17 = vadd.f32 %v9514_v52, %v9883_v30  ;;  %v9923_v47 = vmax.f32 %v722_v42, 0.0  ;;  %v1906_v52 = vld [vmem:[#allocation9 + $0x1948] sm:$0xff]  ;;  %v1900_v42 = vld [vmem:[#allocation9 + $0x1918] sm:$0xff]  ;;  %v7177_v0 = vpack.c.bf16 %v1891_v2, %v1883_v31  ;;  %v6925_v44 = vpack.c.bf16 %v1905_v45, %v1897_v6  ;;  %v1913_v2 = vld [vmem:[#allocation9 + $0x1980] sm:$0xff] }
 0x22b   :  { %2479 = vmatmul.mubr.f32.gmra.mrb[86].mxu0 %v9903_v21  ;;  %3123 = vmatmul.mubr.f32.gmra.mrb[102].mxu1 %v9903_v21  ;;  %v1940_v45 = vld [vmem:[#allocation9 + $0x1a58] sm:$0xff] }
 0x22c   :  { %6914 = vmatpush1.bf16.msra.mxu0 %v6913_v7  ;;  %7170 = vmatpush1.bf16.msra.mxu1 %v7169_v49  ;;  %v9917_v28 = vpop.f32.mrb[66].mxu1  ;;  %11313 = vst [vmem:[#allocation119_spill] sm:$0xff] %v9923_v47  ;;  %v1889_v49 = vld [vmem:[#allocation9 + $0x18c0] sm:$0xff]  ;;  %v7175_v7 = vpack.c.bf16 %v1892_v48, %v1884_v13  ;;  %v9935_v21 = vmax.f32 %v720_v17, 0.0  ;;  %v1899_v13 = vld [vmem:[#allocation9 + $0x1910] sm:$0xff]  ;;  %v1914_v17 = vld [vmem:[#allocation9 + $0x1988] sm:$0xff] }
 0x22d   :  { %2549 = vmatprep.mubr.f32.mxu0 %v9907_v14  ;;  %3193 = vmatprep.mubr.f32.mxu1 %v9907_v14  ;;  %v9929_v51 = vpop.f32.mrb[67].mxu1  ;;  %v6921_v61 = vpack.c.bf16 %v1889_v49, %v1881_v11  ;;  %v1907_v48 = vld [vmem:[#allocation9 + $0x1950] sm:$0xff]  ;;  %v7179_v11 = vpack.c.bf16 %v1908_v37, %v1900_v42  ;;  %v1924_v49 = vld [vmem:[#allocation9 + $0x19d8] sm:$0xff] }
 0x22e   :  { %6916 = vmatprep.subr.bf16.mxu0 %v6915_v63  ;;  %7172 = vmatprep.subr.bf16.mxu1 %v7171_v50  ;;  %v726_v63 = vadd.f32 %v9540_v25, %v9883_v30  ;;  %v9939_v50 = vmax.f32 %v728_v10, 0.0  ;;  %v1922_v25 = vld [vmem:[#allocation9 + $0x19c8] sm:$0xff]  ;;  %v1916_v10 = vld [vmem:[#allocation9 + $0x1998] sm:$0xff]  ;;  %v7181_v31 = vpack.c.bf16 %v1907_v48, %v1899_v13  ;;  %v1915_v42 = vld [vmem:[#allocation9 + $0x1990] sm:$0xff] }
 0x22f   :  { %2550 = vmatmul.mubr.f32.vlgmr.msra.gmra.mrb[56].mxu0 %v9919_v12  ;;  %3194 = vmatmul.mubr.f32.vlgmr.msra.gmra.mrb[72].mxu1 %v9919_v12  ;;  %v1923_v37 = vld [vmem:[#allocation9 + $0x19d0] sm:$0xff]  ;;  %v7183_v6 = vpack.c.bf16 %v1924_v49, %v1916_v10  ;;  %v1929_v48 = vld [vmem:[#allocation9 + $0x1a00] sm:$0xff] }
 0x230   :  { %6918 = vmatpush1.bf16.msra.mxu0 %v6917_v60  ;;  %7174 = vmatpush1.bf16.msra.mxu1 %v7173_v57  ;;  %v9933_v14 = vpop.f32.mrb[68].mxu1  ;;  %11314 = vst [vmem:[#allocation120_spill] sm:$0xff] %v9939_v50  ;;  %v6923_v57 = vpack.c.bf16 %v1906_v52, %v1898_v20  ;;  %v9951_v12 = vmax.f32 %v726_v63, 0.0  ;;  %v740_v20 = vadd.f32 %v9599_v36, %v9862_v34  ;;  %v1921_v52 = vld [vmem:[#allocation9 + $0x19c0] sm:$0xff]  ;;  %v1930_v63 = vld [vmem:[#allocation9 + $0x1a08] sm:$0xff]  ;;  %v1931_v49 = vld [vmem:[#allocation9 + $0x1a10] sm:$0xff] }
 0x231   :  { %2555 = vmatprep.mubr.f32.mxu0 %v9923_v47  ;;  %3199 = vmatprep.mubr.f32.mxu1 %v9923_v47  ;;  %v9945_v60 = vpop.f32.mrb[69].mxu1  ;;  %v6929_v36 = vpack.c.bf16 %v1921_v52, %v1913_v2  ;;  %v7185_v13 = vpack.c.bf16 %v1923_v37, %v1915_v42  ;;  %v1937_v10 = vld [vmem:[#allocation9 + $0x1a40] sm:$0xff]  ;;  %v1956_v52 = vld [vmem:[#allocation9 + $0x1ad8] sm:$0xff] }
 0x232   :  { %6920 = vmatprep.subr.bf16.mxu0 %v6919_v19  ;;  %7176 = vmatprep.subr.bf16.mxu1 %v7175_v7  ;;  %v732_v19 = vadd.f32 %v9565_v24, %v9883_v30  ;;  %v9955_v7 = vmax.f32 %v734_v53, 0.0  ;;  %v1938_v24 = vld [vmem:[#allocation9 + $0x1a48] sm:$0xff]  ;;  %v1932_v53 = vld [vmem:[#allocation9 + $0x1a18] sm:$0xff]  ;;  %v6933_v42 = vpack.c.bf16 %v1937_v10, %v1929_v48 }
 0x233   :  { %2556 = vmatmul.mubr.f32.gmra.mrb[58].mxu0 %v9935_v21  ;;  %3200 = vmatmul.mubr.f32.gmra.mrb[74].mxu1 %v9935_v21  ;;  %v7187_v2 = vpack.c.bf16 %v1940_v45, %v1932_v53  ;;  %v1953_v45 = vld [vmem:[#allocation9 + $0x1ac0] sm:$0xff]  ;;  %v1962_v10 = vld [vmem:[#allocation9 + $0x1b08] sm:$0xff] }
 0x234   :  { %6922 = vmatpush1.bf16.msra.mxu0 %v6921_v61  ;;  %7178 = vmatpush1.bf16.msra.mxu1 %v7177_v0  ;;  %v9949_v47 = vpop.f32.mrb[70].mxu1  ;;  %11315 = vst [vmem:[#allocation121_spill] sm:$0xff] %v9955_v7  ;;  %v6927_v0 = vpack.c.bf16 %v1922_v25, %v1914_v17  ;;  %v11318_v17 = vld [vmem:[#allocation67_spill] sm:$0xff] }
 0x235   :  { %2561 = vmatprep.mubr.f32.mxu0 %v9939_v50  ;;  %3205 = vmatprep.mubr.f32.mxu1 %v9939_v50  ;;  %v9961_v61 = vpop.f32.mrb[71].mxu1  ;;  %v9965_v50 = vmax.f32 %v732_v19, 0.0  ;;  %v746_v25 = vadd.f32 %v11318_v17, %v9862_v34  ;;  %v1946_v19 = vld [vmem:[#allocation9 + $0x1a88] sm:$0xff]  ;;  %v1945_v17 = vld [vmem:[#allocation9 + $0x1a80] sm:$0xff] }
 0x236   :  { %6924 = vmatprep.subr.bf16.mxu0 %v6923_v57  ;;  %7180 = vmatprep.subr.bf16.mxu1 %v7179_v11  ;;  %v738_v57 = vadd.f32 %v9585_v32, %v9883_v30  ;;  %v9969_v11 = vmax.f32 %v740_v20, 0.0  ;;  %v1954_v32 = vld [vmem:[#allocation9 + $0x1ac8] sm:$0xff]  ;;  %v1948_v20 = vld [vmem:[#allocation9 + $0x1a98] sm:$0xff] }
 0x237   :  { %2562 = vmatmul.mubr.f32.gmra.mrb[60].mxu0 %v9951_v12  ;;  %3206 = vmatmul.mubr.f32.gmra.mrb[76].mxu1 %v9951_v12  ;;  %11316 = vst [vmem:[#allocation122_spill] sm:$0xff] %v9965_v50  ;;  %v6935_v48 = vpack.c.bf16 %v1954_v32, %v1946_v19  ;;  %v758_v32 = vadd.f32 %v9659_v35, %v9862_v34  ;;  %v1977_v35 = vld [vmem:[#allocation9 + $0x1b80] sm:$0xff] }
 0x238   :  { %6926 = vmatpush1.bf16.msra.mxu0 %v6925_v44  ;;  %7182 = vmatpush1.bf16.msra.mxu1 %v7181_v31  ;;  %11317 = vst [vmem:[#allocation123_spill] sm:$0xff] %v9969_v11  ;;  %v1939_v44 = vld [vmem:[#allocation9 + $0x1a50] sm:$0xff]  ;;  %v6931_v31 = vpack.c.bf16 %v1938_v24, %v1930_v63  ;;  %v9981_v63 = vmax.f32 %v746_v25, 0.0  ;;  %v11321_v24 = vld [vmem:[#allocation71_spill] sm:$0xff]  ;;  %v1970_v25 = vld [vmem:[#allocation9 + $0x1b48] sm:$0xff] }
 0x239   :  { %2567 = vmatprep.mubr.f32.mxu0 %v9955_v7  ;;  %3211 = vmatprep.mubr.f32.mxu1 %v9955_v7  ;;  %v7189_v37 = vpack.c.bf16 %v1939_v44, %v1931_v49  ;;  %v9977_v7 = vmax.f32 %v738_v57, 0.0  ;;  %v752_v53 = vadd.f32 %v11321_v24, %v9862_v34  ;;  %v7191_v57 = vpack.c.bf16 %v1956_v52, %v1948_v20  ;;  %v1964_v49 = vld [vmem:[#allocation9 + $0x1b18] sm:$0xff]  ;;  %v1961_v24 = vld [vmem:[#allocation9 + $0x1b00] sm:$0xff]  ;;  %v1963_v52 = vld [vmem:[#allocation9 + $0x1b10] sm:$0xff] }
 0x23a   :  { %6928 = vmatprep.subr.bf16.mxu0 %v6927_v0  ;;  %7184 = vmatprep.subr.bf16.mxu1 %v7183_v6  ;;  %v11319_v0 = vld [vmem:[#allocation64_spill] sm:$0xff]  ;;  %11320 = vst [vmem:[#allocation67_spill] sm:$0xff] %v9981_v63  ;;  %v1972_v44 = vld [vmem:[#allocation9 + $0x1b58] sm:$0xff]  ;;  %v1969_v20 = vld [vmem:[#allocation9 + $0x1b40] sm:$0xff] }
 0x23b   :  { %2568 = vmatmul.mubr.f32.gmra.mrb[62].mxu0 %v9965_v50  ;;  %3212 = vmatmul.mubr.f32.gmra.mrb[78].mxu1 %v9965_v50  ;;  %v744_v6 = vadd.f32 %v11319_v0, %v9883_v30  ;;  %v6937_v0 = vpack.c.bf16 %v1953_v45, %v1945_v17  ;;  %v9993_v19 = vmax.f32 %v752_v53, 0.0  ;;  %v7195_v17 = vpack.c.bf16 %v1972_v44, %v1964_v49  ;;  %v1986_v53 = vld [vmem:[#allocation9 + $0x1bc8] sm:$0xff]  ;;  %v1980_v45 = vld [vmem:[#allocation9 + $0x1b98] sm:$0xff]  ;;  %v1985_v49 = vld [vmem:[#allocation9 + $0x1bc0] sm:$0xff] }
 0x23c   :  { %6930 = vmatpush1.bf16.msra.mxu0 %v6929_v36  ;;  %7186 = vmatpush1.bf16.msra.mxu1 %v7185_v13  ;;  %v1947_v36 = vld [vmem:[#allocation9 + $0x1a90] sm:$0xff] }
 0x23d   :  { %2573 = vmatprep.mubr.f32.mxu0 %v9969_v11  ;;  %3217 = vmatprep.mubr.f32.mxu1 %v9969_v11  ;;  %v1955_v13 = vld [vmem:[#allocation9 + $0x1ad0] sm:$0xff]  ;;  %v9989_v50 = vmax.f32 %v744_v6, 0.0  ;;  %11323 = vst [vmem:[#allocation64_spill] sm:$0xff] %v9993_v19  ;;  %v1978_v6 = vld [vmem:[#allocation9 + $0x1b88] sm:$0xff] }
 0x23e   :  { %6932 = vmatprep.subr.bf16.mxu0 %v6931_v31  ;;  %7188 = vmatprep.subr.bf16.mxu1 %v7187_v2  ;;  %v7193_v11 = vpack.c.bf16 %v1955_v13, %v1947_v36  ;;  %v11322_v31 = vld [vmem:[#allocation68_spill] sm:$0xff]  ;;  %v1988_v36 = vld [vmem:[#allocation9 + $0x1bd8] sm:$0xff]  ;;  %v6941_v13 = vpack.c.bf16 %v1969_v20, %v1961_v24  ;;  %v1979_v44 = vld [vmem:[#allocation9 + $0x1b90] sm:$0xff] }
 0x23f   :  { %2574 = vmatmul.mubr.f32.gmra.mrb[64].mxu0 %v9977_v7  ;;  %3218 = vmatmul.mubr.f32.gmra.mrb[80].mxu1 %v9977_v7  ;;  %v750_v2 = vadd.f32 %v11322_v31, %v9883_v30  ;;  %v7199_v24 = vpack.c.bf16 %v1988_v36, %v1980_v45  ;;  %v1996_v20 = vld [vmem:[#allocation9 + $0x1c18] sm:$0xff]  ;;  %v1995_v45 = vld [vmem:[#allocation9 + $0x1c10] sm:$0xff] }
 0x240   :  { %6934 = vmatpush1.bf16.msra.mxu0 %v6933_v42  ;;  %7190 = vmatpush1.bf16.msra.mxu1 %v7189_v37  ;;  %v1971_v42 = vld [vmem:[#allocation9 + $0x1b50] sm:$0xff]  ;;  %v6939_v37 = vpack.c.bf16 %v1970_v25, %v1962_v10  ;;  %v10005_v10 = vmax.f32 %v758_v32, 0.0  ;;  %v764_v25 = vadd.f32 %v9679_v5, %v9862_v34  ;;  %v2002_v32 = vld [vmem:[#allocation9 + $0x1c48] sm:$0xff]  ;;  %v1993_v5 = vld [vmem:[#allocation9 + $0x1c00] sm:$0xff] }
 0x241   :  { %2579 = vmatprep.mubr.f32.mxu0 %v9981_v63  ;;  %3223 = vmatprep.mubr.f32.mxu1 %v9981_v63  ;;  %v7197_v31 = vpack.c.bf16 %v1971_v42, %v1963_v52  ;;  %v10001_v63 = vmax.f32 %v750_v2, 0.0  ;;  %v1994_v2 = vld [vmem:[#allocation9 + $0x1c08] sm:$0xff]  ;;  %v2004_v52 = vld [vmem:[#allocation9 + $0x1c58] sm:$0xff]  ;;  %v6945_v42 = vpack.c.bf16 %v1985_v49, %v1977_v35  ;;  %v2003_v36 = vld [vmem:[#allocation9 + $0x1c50] sm:$0xff] }
 0x242   :  { %6936 = vmatprep.subr.bf16.mxu0 %v6935_v48  ;;  %7192 = vmatprep.subr.bf16.mxu1 %v7191_v57  ;;  %v11324_v48 = vld [vmem:[#allocation72_spill] sm:$0xff] }
 0x243   :  { %2580 = vmatmul.mubr.f32.gmra.mrb[66].mxu0 %v9989_v50  ;;  %3224 = vmatmul.mubr.f32.gmra.mrb[82].mxu1 %v9989_v50  ;;  %v756_v57 = vadd.f32 %v11324_v48, %v9883_v30  ;;  %v2010_v35 = vld [vmem:[#allocation9 + $0x1c88] sm:$0xff] }
 0x244   :  { %6938 = vmatpush1.bf16.msra.mxu0 %v6937_v0  ;;  %7194 = vmatpush1.bf16.msra.mxu1 %v7193_v11  ;;  %v1987_v11 = vld [vmem:[#allocation9 + $0x1bd0] sm:$0xff]  ;;  %v6943_v0 = vpack.c.bf16 %v1986_v53, %v1978_v6  ;;  %v770_v6 = vadd.f32 %v9699_v38, %v9862_v34  ;;  %v2001_v53 = vld [vmem:[#allocation9 + $0x1c40] sm:$0xff] }
 0x245   :  { %2585 = vmatprep.mubr.f32.mxu0 %v9993_v19  ;;  %3229 = vmatprep.mubr.f32.mxu1 %v9993_v19  ;;  %v7201_v48 = vpack.c.bf16 %v1987_v11, %v1979_v44  ;;  %v10013_v19 = vmax.f32 %v756_v57, 0.0  ;;  %v2012_v57 = vld [vmem:[#allocation9 + $0x1c98] sm:$0xff]  ;;  %v6949_v49 = vpack.c.bf16 %v2001_v53, %v1993_v5  ;;  %v7205_v44 = vpack.c.bf16 %v2003_v36, %v1995_v45  ;;  %v2009_v38 = vld [vmem:[#allocation9 + $0x1c80] sm:$0xff]  ;;  %v2026_v5 = vld [vmem:[#allocation9 + $0x1d08] sm:$0xff] }
 0x246   :  { %6940 = vmatprep.subr.bf16.mxu0 %v6939_v37  ;;  %7196 = vmatprep.subr.bf16.mxu1 %v7195_v17  ;;  %v762_v37 = vadd.f32 %v9665_v59, %v9883_v30  ;;  %v10017_v17 = vmax.f32 %v764_v25, 0.0  ;;  %v2018_v59 = vld [vmem:[#allocation9 + $0x1cc8] sm:$0xff]  ;;  %v2020_v25 = vld [vmem:[#allocation9 + $0x1cd8] sm:$0xff] }
 0x247   :  { %2586 = vmatmul.mubr.f32.gmra.mrb[68].mxu0 %v10001_v63  ;;  %3230 = vmatmul.mubr.f32.gmra.mrb[84].mxu1 %v10001_v63 }
 0x248   :  { %6942 = vmatpush1.bf16.msra.mxu0 %v6941_v13  ;;  %7198 = vmatpush1.bf16.msra.mxu1 %v7197_v31  ;;  %v6947_v13 = vpack.c.bf16 %v2002_v32, %v1994_v2  ;;  %v7203_v31 = vpack.c.bf16 %v2004_v52, %v1996_v20  ;;  %v10025_v11 = vmax.f32 %v762_v37, 0.0  ;;  %v776_v2 = vadd.f32 %v9719_v58, %v9862_v34  ;;  %v2017_v32 = vld [vmem:[#allocation9 + $0x1cc0] sm:$0xff]  ;;  %v2011_v20 = vld [vmem:[#allocation9 + $0x1c90] sm:$0xff]  ;;  %v2028_v37 = vld [vmem:[#allocation9 + $0x1d18] sm:$0xff] }
 0x249   :  { %2591 = vmatprep.mubr.f32.mxu0 %v10005_v10  ;;  %3235 = vmatprep.mubr.f32.mxu1 %v10005_v10  ;;  %v2019_v52 = vld [vmem:[#allocation9 + $0x1cd0] sm:$0xff]  ;;  %v6953_v53 = vpack.c.bf16 %v2017_v32, %v2009_v38  ;;  %v2025_v58 = vld [vmem:[#allocation9 + $0x1d00] sm:$0xff]  ;;  %v2042_v38 = vld [vmem:[#allocation9 + $0x1d88] sm:$0xff] }
 0x24a   :  { %6944 = vmatprep.subr.bf16.mxu0 %v6943_v0  ;;  %7200 = vmatprep.subr.bf16.mxu1 %v7199_v24  ;;  %v768_v0 = vadd.f32 %v9685_v33, %v9883_v30  ;;  %v10029_v24 = vmax.f32 %v770_v6, 0.0  ;;  %v2034_v33 = vld [vmem:[#allocation9 + $0x1d48] sm:$0xff]  ;;  %v2036_v6 = vld [vmem:[#allocation9 + $0x1d58] sm:$0xff]  ;;  %v7209_v45 = vpack.c.bf16 %v2019_v52, %v2011_v20 }
 0x24b   :  { %2592 = vmatmul.mubr.f32.gmra.mrb[70].mxu0 %v10013_v19  ;;  %3236 = vmatmul.mubr.f32.gmra.mrb[86].mxu1 %v10013_v19 }
 0x24c   :  { %6946 = vmatpush1.bf16.msra.mxu0 %v6945_v42  ;;  %7202 = vmatpush1.bf16.msra.mxu1 %v7201_v48  ;;  %v6951_v42 = vpack.c.bf16 %v2018_v59, %v2010_v35  ;;  %v7207_v48 = vpack.c.bf16 %v2020_v25, %v2012_v57  ;;  %v10037_v36 = vmax.f32 %v768_v0, 0.0  ;;  %v782_v35 = vadd.f32 %v9739_v8, %v9862_v34  ;;  %v2033_v59 = vld [vmem:[#allocation9 + $0x1d40] sm:$0xff]  ;;  %v2027_v57 = vld [vmem:[#allocation9 + $0x1d10] sm:$0xff]  ;;  %v2044_v0 = vld [vmem:[#allocation9 + $0x1d98] sm:$0xff] }
 0x24d   :  { %2597 = vmatprep.mubr.f32.mxu0 %v10017_v17  ;;  %3241 = vmatprep.mubr.f32.mxu1 %v10017_v17  ;;  %v2035_v25 = vld [vmem:[#allocation9 + $0x1d50] sm:$0xff]  ;;  %v6957_v32 = vpack.c.bf16 %v2033_v59, %v2025_v58  ;;  %v2041_v8 = vld [vmem:[#allocation9 + $0x1d80] sm:$0xff]  ;;  %v2058_v58 = vld [vmem:[#allocation9 + $0x1e08] sm:$0xff] }
 0x24e   :  { %6948 = vmatprep.subr.bf16.mxu0 %v6947_v13  ;;  %7204 = vmatprep.subr.bf16.mxu1 %v7203_v31  ;;  %v774_v13 = vadd.f32 %v9705_v9, %v9883_v30  ;;  %v10041_v31 = vmax.f32 %v776_v2, 0.0  ;;  %v2050_v9 = vld [vmem:[#allocation9 + $0x1dc8] sm:$0xff]  ;;  %v2052_v2 = vld [vmem:[#allocation9 + $0x1dd8] sm:$0xff]  ;;  %v7213_v20 = vpack.c.bf16 %v2035_v25, %v2027_v57 }
 0x24f   :  { %2598 = vmatmul.mubr.f32.gmra.mrb[72].mxu0 %v10025_v11  ;;  %3242 = vmatmul.mubr.f32.gmra.mrb[88].mxu1 %v10025_v11 }
 0x250   :  { %6950 = vmatpush1.bf16.msra.mxu0 %v6949_v49  ;;  %7206 = vmatpush1.bf16.msra.mxu1 %v7205_v44  ;;  %v6955_v49 = vpack.c.bf16 %v2034_v33, %v2026_v5  ;;  %v7211_v44 = vpack.c.bf16 %v2036_v6, %v2028_v37  ;;  %v10049_v52 = vmax.f32 %v774_v13, 0.0  ;;  %v788_v5 = vadd.f32 %v9759_v29, %v9862_v34  ;;  %v2049_v33 = vld [vmem:[#allocation9 + $0x1dc0] sm:$0xff]  ;;  %v2043_v37 = vld [vmem:[#allocation9 + $0x1d90] sm:$0xff]  ;;  %v2060_v13 = vld [vmem:[#allocation9 + $0x1e18] sm:$0xff] }
 0x251   :  { %2603 = vmatprep.mubr.f32.mxu0 %v10029_v24  ;;  %3247 = vmatprep.mubr.f32.mxu1 %v10029_v24  ;;  %v2051_v6 = vld [vmem:[#allocation9 + $0x1dd0] sm:$0xff]  ;;  %v6961_v59 = vpack.c.bf16 %v2049_v33, %v2041_v8  ;;  %v2057_v29 = vld [vmem:[#allocation9 + $0x1e00] sm:$0xff]  ;;  %v2074_v8 = vld [vmem:[#allocation9 + $0x1e88] sm:$0xff] }
 0x252   :  { %6952 = vmatprep.subr.bf16.mxu0 %v6951_v42  ;;  %7208 = vmatprep.subr.bf16.mxu1 %v7207_v48  ;;  %v780_v42 = vadd.f32 %v9725_v1, %v9883_v30  ;;  %v10053_v48 = vmax.f32 %v782_v35, 0.0  ;;  %v2066_v1 = vld [vmem:[#allocation9 + $0x1e48] sm:$0xff]  ;;  %v2068_v35 = vld [vmem:[#allocation9 + $0x1e58] sm:$0xff]  ;;  %v7217_v57 = vpack.c.bf16 %v2051_v6, %v2043_v37 }
 0x253   :  { %2604 = vmatmul.mubr.f32.gmra.mrb[74].mxu0 %v10037_v36  ;;  %3248 = vmatmul.mubr.f32.gmra.mrb[90].mxu1 %v10037_v36 }
 0x254   :  { %6954 = vmatpush1.bf16.msra.mxu0 %v6953_v53  ;;  %7210 = vmatpush1.bf16.msra.mxu1 %v7209_v45  ;;  %v6959_v53 = vpack.c.bf16 %v2050_v9, %v2042_v38  ;;  %v7215_v45 = vpack.c.bf16 %v2052_v2, %v2044_v0  ;;  %v10061_v25 = vmax.f32 %v780_v42, 0.0  ;;  %v794_v38 = vadd.f32 %v9779_v16, %v9862_v34  ;;  %v2065_v9 = vld [vmem:[#allocation9 + $0x1e40] sm:$0xff]  ;;  %v2059_v0 = vld [vmem:[#allocation9 + $0x1e10] sm:$0xff]  ;;  %v2076_v42 = vld [vmem:[#allocation9 + $0x1e98] sm:$0xff] }
 0x255   :  { %2609 = vmatprep.mubr.f32.mxu0 %v10041_v31  ;;  %3253 = vmatprep.mubr.f32.mxu1 %v10041_v31  ;;  %v2067_v2 = vld [vmem:[#allocation9 + $0x1e50] sm:$0xff]  ;;  %v6965_v33 = vpack.c.bf16 %v2065_v9, %v2057_v29  ;;  %v2073_v16 = vld [vmem:[#allocation9 + $0x1e80] sm:$0xff]  ;;  %v2100_v9 = vld [vmem:[#allocation9 + $0x1f58] sm:$0xff] }
 0x256   :  { %6956 = vmatprep.subr.bf16.mxu0 %v6955_v49  ;;  %7212 = vmatprep.subr.bf16.mxu1 %v7211_v44  ;;  %v786_v49 = vadd.f32 %v9745_v22, %v9883_v30  ;;  %v10065_v44 = vmax.f32 %v788_v5, 0.0  ;;  %v2082_v22 = vld [vmem:[#allocation9 + $0x1ec8] sm:$0xff]  ;;  %v2084_v5 = vld [vmem:[#allocation9 + $0x1ed8] sm:$0xff]  ;;  %v7221_v37 = vpack.c.bf16 %v2067_v2, %v2059_v0  ;;  %v11188_v0 = vsub.s32 6, %v9310_v43 }
 0x257   :  { %2610 = vmatmul.mubr.f32.gmra.mrb[76].mxu0 %v10049_v52  ;;  %3254 = vmatmul.mubr.f32.gmra.mrb[92].mxu1 %v10049_v52  ;;  %v7223_v29 = vpack.c.bf16 %v2084_v5, %v2076_v42  ;;  %v2091_v42 = vld [vmem:[#allocation9 + $0x1f10] sm:$0xff] }
 0x258   :  { %6958 = vmatpush1.bf16.msra.mxu0 %v6957_v32  ;;  %7214 = vmatpush1.bf16.msra.mxu1 %v7213_v20  ;;  %11325 = vst [vmem:[#allocation71_spill] sm:$0xff] %v10065_v44  ;;  %v6963_v32 = vpack.c.bf16 %v2066_v1, %v2058_v58  ;;  %v7219_v20 = vpack.c.bf16 %v2068_v35, %v2060_v13  ;;  %v10073_v6 = vmax.f32 %v786_v49, 0.0  ;;  %v2081_v1 = vld [vmem:[#allocation9 + $0x1ec0] sm:$0xff]  ;;  %v2075_v13 = vld [vmem:[#allocation9 + $0x1e90] sm:$0xff]  ;;  %v2090_v49 = vld [vmem:[#allocation9 + $0x1f08] sm:$0xff] }
 0x259   :  { %2615 = vmatprep.mubr.f32.mxu0 %v10053_v48  ;;  %3259 = vmatprep.mubr.f32.mxu1 %v10053_v48  ;;  %v800_v58 = vadd.f32 %v9799_v54, %v9862_v34  ;;  %v2083_v35 = vld [vmem:[#allocation9 + $0x1ed0] sm:$0xff]  ;;  %v6969_v54 = vpack.c.bf16 %v2081_v1, %v2073_v16  ;;  %v2108_v1 = vld [vmem:[#allocation9 + $0x1f98] sm:$0xff] }
 0x25a   :  { %6960 = vmatprep.subr.bf16.mxu0 %v6959_v53  ;;  %7216 = vmatprep.subr.bf16.mxu1 %v7215_v45  ;;  %v792_v53 = vadd.f32 %v9765_v62, %v9883_v30  ;;  %v10077_v45 = vmax.f32 %v794_v38, 0.0  ;;  %v2098_v62 = vld [vmem:[#allocation9 + $0x1f48] sm:$0xff]  ;;  %v2092_v38 = vld [vmem:[#allocation9 + $0x1f18] sm:$0xff]  ;;  %v7225_v2 = vpack.c.bf16 %v2083_v35, %v2075_v13  ;;  %v2099_v5 = vld [vmem:[#allocation9 + $0x1f50] sm:$0xff]  ;;  %v10107_v35 = vrot.slane %v9857_v26, %v11188_v0 }
 0x25b   :  { %2616 = vmatmul.mubr.f32.gmra.mrb[78].mxu0 %v10061_v25  ;;  %3260 = vmatmul.mubr.f32.gmra.mrb[94].mxu1 %v10061_v25  ;;  %v7227_v16 = vpack.c.bf16 %v2100_v9, %v2092_v38  ;;  %v7229_v13 = vpack.c.bf16 %v2099_v5, %v2091_v42  ;;  %v2113_v38 = vld [vmem:[#allocation9 + $0x1fc0] sm:$0xff] }
 0x25c   :  { %6962 = vmatpush1.bf16.msra.mxu0 %v6961_v59  ;;  %7218 = vmatpush1.bf16.msra.mxu1 %v7217_v57  ;;  %v6967_v57 = vpack.c.bf16 %v2082_v22, %v2074_v8  ;;  %v10087_v59 = vmax.f32 %v792_v53, 0.0  ;;  %v806_v8 = vadd.f32 %v9819_v23, %v9862_v34  ;;  %v2097_v22 = vld [vmem:[#allocation9 + $0x1f40] sm:$0xff]  ;;  %v2106_v53 = vld [vmem:[#allocation9 + $0x1f88] sm:$0xff]  ;;  %v2116_v23 = vld [vmem:[#allocation9 + $0x1fd8] sm:$0xff] }
 0x25d   :  { %2621 = vmatprep.mubr.f32.mxu0 %v10065_v44  ;;  %3265 = vmatprep.mubr.f32.mxu1 %v10065_v44  ;;  %v2089_v44 = vld [vmem:[#allocation9 + $0x1f00] sm:$0xff] }
 0x25e   :  { %6964 = vmatprep.subr.bf16.mxu0 %v6963_v32  ;;  %7220 = vmatprep.subr.bf16.mxu1 %v7219_v20  ;;  %v798_v32 = vadd.f32 %v9785_v3, %v9883_v30  ;;  %v10091_v20 = vmax.f32 %v800_v58, 0.0  ;;  %v6971_v3 = vpack.c.bf16 %v2098_v62, %v2090_v49  ;;  %v2114_v58 = vld [vmem:[#allocation9 + $0x1fc8] sm:$0xff]  ;;  %v6973_v34 = vpack.c.bf16 %v2097_v22, %v2089_v44  ;;  %v2105_v62 = vld [vmem:[#allocation9 + $0x1f80] sm:$0xff]  ;;  %v11327_v44 = vld [vmem:[#allocation78_spill] sm:$0xff] }
 0x25f   :  { %2622 = vmatmul.mubr.f32.gmra.mrb[80].mxu0 %v10073_v6  ;;  %3266 = vmatmul.mubr.f32.gmra.mrb[96].mxu1 %v10073_v6  ;;  %v10113_v49 = vmax.f32 %v806_v8, 0.0  ;;  %v1102_v22 = vld [vmem:[#allocation9 + $0x28] sm:$0xff]  ;;  %v1112_v8 = vld [vmem:[#allocation9 + $0x78] sm:$0xff]  ;;  %v6977_v42 = vpack.c.bf16 %v2113_v38, %v2105_v62  ;;  %v11328_v5 = vld [vmem:[#allocation75_spill] sm:$0xff] }
 0x260   :  { %6966 = vmatpush1.bf16.msra.mxu0 %v6965_v33  ;;  %7222 = vmatpush1.bf16.msra.mxu1 %v7221_v37  ;;  %v11326_v33 = vsub.s32 7, %v9310_v43  ;;  %v11331_v62 = vld [vmem:[#allocation82_spill] sm:$0xff]  ;;  %v1127_v43 = vld [vmem:[#allocation9 + $0xf0] sm:$0xff] }
 0x261   :  { %2627 = vmatprep.mubr.f32.mxu0 %v10077_v45  ;;  %3271 = vmatprep.mubr.f32.mxu1 %v10077_v45 }
 0x262   :  { %v10100_v37 = vrot.slane %v9857_v26, %v11326_v33  ;;  %6968 = vmatprep.subr.bf16.mxu0 %v6967_v57  ;;  %7224 = vmatprep.subr.bf16.mxu1 %v7223_v29  ;;  %v10109_v57 = vmax.f32 %v798_v32, 0.0  ;;  %v804_v29 = vadd.f32 %v9805_v39, %v9883_v30  ;;  %v6975_v26 = vpack.c.bf16 %v2114_v58, %v2106_v53  ;;  %v2115_v32 = vld [vmem:[#allocation9 + $0x1fd0] sm:$0xff]  ;;  %v1110_v39 = vld [vmem:[#allocation9 + $0x68] sm:$0xff]  ;;  %v1104_v30 = vld [vmem:[#allocation9 + $0x38] sm:$0xff] }
 0x263   :  { %2628 = vmatmul.mubr.f32.gmra.mrb[82].mxu0 %v10087_v59  ;;  %3272 = vmatmul.mubr.f32.gmra.mrb[98].mxu1 %v10087_v59  ;;  %v875_v33 = vadd.f32 %v11328_v5, %v10107_v35  ;;  %v1101_v53 = vld [vmem:[#allocation9 + $0x20] sm:$0xff]  ;;  %v1126_v5 = vld [vmem:[#allocation9 + $0xe8] sm:$0xff] }
 0x264   :  { %6970 = vmatpush1.bf16.msra.mxu0 %v6969_v54  ;;  %7226 = vmatpush1.bf16.msra.mxu1 %v7225_v2  ;;  %v877_v9 = vadd.f32 %v11327_v44, %v10100_v37  ;;  %v7231_v54 = vpack.c.bf16 %v2116_v23, %v2108_v1  ;;  %v2107_v2 = vld [vmem:[#allocation9 + $0x1f90] sm:$0xff]  ;;  %v1109_v58 = vld [vmem:[#allocation9 + $0x60] sm:$0xff]  ;;  %v7235_v23 = vpack.c.bf16 %v1110_v39, %v1102_v22  ;;  %v1118_v44 = vld [vmem:[#allocation9 + $0xa8] sm:$0xff] }
 0x265   :  { %2633 = vmatprep.mubr.f32.mxu0 %v10091_v20  ;;  %3277 = vmatprep.mubr.f32.mxu1 %v10091_v20  ;;  %v883_v38 = vadd.f32 %v11331_v62, %v10100_v37  ;;  %v1117_v39 = vld [vmem:[#allocation9 + $0xa0] sm:$0xff]  ;;  %v7239_v62 = vpack.c.bf16 %v1126_v5, %v1118_v44 }
 0x266   :  { %6972 = vmatprep.subr.bf16.mxu0 %v6971_v3  ;;  %7228 = vmatprep.subr.bf16.mxu1 %v7227_v16  ;;  %v10123_v3 = vmax.f32 %v804_v29, 0.0  ;;  %v7233_v16 = vpack.c.bf16 %v2115_v32, %v2107_v2  ;;  %v10127_v1 = vmax.f32 %v877_v9, 0.0  ;;  %v1111_v29 = vld [vmem:[#allocation9 + $0x70] sm:$0xff]  ;;  %v7237_v9 = vpack.c.bf16 %v1109_v58, %v1101_v53  ;;  %v1120_v2 = vld [vmem:[#allocation9 + $0xb8] sm:$0xff]  ;;  %v11333_v32 = vld [vmem:[#allocation79_spill] sm:$0xff] }
 0x267   :  { %2634 = vmatmul.mubr.f32.gmra.mrb[84].mxu0 %v10109_v57  ;;  %3278 = vmatmul.mubr.f32.gmra.mrb[100].mxu1 %v10109_v57  ;;  %v881_v22 = vadd.f32 %v11333_v32, %v10107_v35  ;;  %v10139_v0 = vmax.f32 %v883_v38, 0.0  ;;  %v11335_v53 = vld [vmem:[#allocation86_spill] sm:$0xff]  ;;  %v1134_v32 = vld [vmem:[#allocation9 + $0x128] sm:$0xff]  ;;  %v11337_v38 = vld [vmem:[#allocation83_spill] sm:$0xff] }
 0x268   :  { %6974 = vmatpush1.bf16.msra.mxu0 %v6973_v34  ;;  %7230 = vmatpush1.bf16.msra.mxu1 %v7229_v13  ;;  %11329 = vst [vmem:[#allocation68_spill] sm:$0xff] %v10123_v3  ;;  %11330 = vst [vmem:[#allocation72_spill] sm:$0xff] %v10127_v1  ;;  %v7491_v34 = vpack.c.bf16 %v1112_v8, %v1104_v30  ;;  %v1103_v13 = vld [vmem:[#allocation9 + $0x30] sm:$0xff]  ;;  %v1125_v30 = vld [vmem:[#allocation9 + $0xe0] sm:$0xff]  ;;  %v889_v58 = vadd.f32 %v11335_v53, %v10100_v37 }
 0x269   :  { %2639 = vmatprep.mubr.f32.mxu0 %v10113_v49  ;;  %3283 = vmatprep.mubr.f32.mxu1 %v10113_v49  ;;  %v7493_v8 = vpack.c.bf16 %v1111_v29, %v1103_v13  ;;  %11334 = vst [vmem:[#allocation75_spill] sm:$0xff] %v10139_v0  ;;  %v10145_v13 = vmax.f32 %v881_v22, 0.0  ;;  %v887_v29 = vadd.f32 %v11337_v38, %v10107_v35  ;;  %v1133_v44 = vld [vmem:[#allocation9 + $0x120] sm:$0xff]  ;;  %v1135_v53 = vld [vmem:[#allocation9 + $0x130] sm:$0xff] }
 0x26a   :  { %6976 = vmatprep.subr.bf16.mxu0 %v6975_v26  ;;  %7232 = vmatprep.subr.bf16.mxu1 %v7231_v54  ;;  %v1128_v26 = vld [vmem:[#allocation9 + $0xf8] sm:$0xff]  ;;  %v10134_v54 = vmax.f32 %v875_v33, 0.0  ;;  %v1141_v5 = vld [vmem:[#allocation9 + $0x160] sm:$0xff]  ;;  %v1143_v38 = vld [vmem:[#allocation9 + $0x170] sm:$0xff] }
 0x26b   :  { %2640 = vmatmul.mubr.f32.gmra.mrb[86].mxu0 %v10123_v3  ;;  %3284 = vmatmul.mubr.f32.gmra.mrb[102].mxu1 %v10123_v3  ;;  %v7495_v33 = vpack.c.bf16 %v1128_v26, %v1120_v2  ;;  %11336 = vst [vmem:[#allocation82_spill] sm:$0xff] %v10145_v13  ;;  %v1158_v3 = vld [vmem:[#allocation9 + $0x1e8] sm:$0xff] }
 0x26c   :  { %6978 = vmatpush1.bf16.msra.mxu0 %v6977_v42  ;;  %2710 = vmatprep.mubr.f32.mxu0 %v10127_v1  ;;  %11332 = vst [vmem:[#allocation78_spill] sm:$0xff] %v10134_v54  ;;  %v1119_v42 = vld [vmem:[#allocation9 + $0xb0] sm:$0xff] }
 0x26d   :  { %7234 = vmatpush1.bf16.msra.mxu1 %v7233_v16  ;;  %3354 = vmatprep.mubr.f32.mxu1 %v10127_v1  ;;  %v1142_v16 = vld [vmem:[#allocation9 + $0x168] sm:$0xff]  ;;  %v7241_v1 = vpack.c.bf16 %v1125_v30, %v1117_v39  ;;  %v7497_v2 = vpack.c.bf16 %v1127_v43, %v1119_v42  ;;  %v11339_v39 = vld [vmem:[#allocation90_spill] sm:$0xff]  ;;  %v10157_v42 = vmax.f32 %v887_v29, 0.0 }
 0x26e   :  { %7236 = vmatprep.subr.bf16.mxu0 %v7235_v23  ;;  %7492 = vmatprep.subr.bf16.mxu1 %v7491_v34  ;;  %v1136_v23 = vld [vmem:[#allocation9 + $0x138] sm:$0xff]  ;;  %v7243_v26 = vpack.c.bf16 %v1142_v16, %v1134_v32  ;;  %v895_v22 = vadd.f32 %v11339_v39, %v10100_v37  ;;  %v1157_v16 = vld [vmem:[#allocation9 + $0x1e0] sm:$0xff]  ;;  %v1151_v39 = vld [vmem:[#allocation9 + $0x1b0] sm:$0xff] }
 0x26f   :  { %2711 = vmatmul.mubr.f32.vlgmr.msra.gmra.mrb[56].mxu0 %v10134_v54  ;;  %v1144_v34 = vld [vmem:[#allocation9 + $0x178] sm:$0xff]  ;;  %11340 = vst [vmem:[#allocation86_spill] sm:$0xff] %v10157_v42 }
 0x270   :  { %3355 = vmatmul.mubr.f32.vlgmr.msra.gmra.mrb[72].mxu1 %v10134_v54  ;;  %7238 = vmatpush1.bf16.msra.mxu0 %v7237_v9  ;;  %v10151_v9 = vmax.f32 %v889_v58, 0.0  ;;  %v7499_v30 = vpack.c.bf16 %v1144_v34, %v1136_v23  ;;  %v1150_v54 = vld [vmem:[#allocation9 + $0x1a8] sm:$0xff]  ;;  %v1160_v43 = vld [vmem:[#allocation9 + $0x1f8] sm:$0xff]  ;;  %v11341_v58 = vld [vmem:[#allocation87_spill] sm:$0xff]  ;;  %v7501_v23 = vpack.c.bf16 %v1143_v38, %v1135_v53 }
 0x271   :  { %2716 = vmatprep.mubr.f32.mxu0 %v10139_v0  ;;  %3360 = vmatprep.mubr.f32.mxu1 %v10139_v0  ;;  %v893_v32 = vadd.f32 %v11341_v58, %v10107_v35  ;;  %v7247_v34 = vpack.c.bf16 %v1158_v3, %v1150_v54  ;;  %v1159_v58 = vld [vmem:[#allocation9 + $0x1f0] sm:$0xff]  ;;  %v1174_v0 = vld [vmem:[#allocation9 + $0x268] sm:$0xff]  ;;  %v1176_v53 = vld [vmem:[#allocation9 + $0x278] sm:$0xff] }
 0x272   :  { %7494 = vmatpush1.bf16.msra.mxu1 %v7493_v8  ;;  %7240 = vmatprep.subr.bf16.mxu0 %v7239_v62  ;;  %11338 = vst [vmem:[#allocation79_spill] sm:$0xff] %v10151_v9  ;;  %v7245_v8 = vpack.c.bf16 %v1141_v5, %v1133_v44  ;;  %v1152_v62 = vld [vmem:[#allocation9 + $0x1b8] sm:$0xff]  ;;  %v11345_v54 = vld [vmem:[#allocation91_spill] sm:$0xff] }
 0x273   :  { %2717 = vmatmul.mubr.f32.gmra.mrb[58].mxu0 %v10145_v13  ;;  %7496 = vmatprep.subr.bf16.mxu1 %v7495_v33  ;;  %v1149_v33 = vld [vmem:[#allocation9 + $0x1a0] sm:$0xff]  ;;  %v11343_v44 = vld [vmem:[#allocation94_spill] sm:$0xff]  ;;  %v7503_v5 = vpack.c.bf16 %v1160_v43, %v1152_v62  ;;  %v10169_v3 = vmax.f32 %v893_v32, 0.0  ;;  %v7505_v62 = vpack.c.bf16 %v1159_v58, %v1151_v39 }
 0x274   :  { %3361 = vmatmul.mubr.f32.gmra.mrb[74].mxu1 %v10145_v13  ;;  %7242 = vmatpush1.bf16.msra.mxu0 %v7241_v1  ;;  %v10163_v1 = vmax.f32 %v895_v22, 0.0  ;;  %v901_v29 = vadd.f32 %v11343_v44, %v10100_v37  ;;  %v1166_v13 = vld [vmem:[#allocation9 + $0x228] sm:$0xff]  ;;  %v899_v22 = vadd.f32 %v11345_v54, %v10107_v35  ;;  %v1173_v38 = vld [vmem:[#allocation9 + $0x260] sm:$0xff]  ;;  %v1167_v44 = vld [vmem:[#allocation9 + $0x230] sm:$0xff] }
 0x275   :  { %2722 = vmatprep.mubr.f32.mxu0 %v10151_v9  ;;  %3366 = vmatprep.mubr.f32.mxu1 %v10151_v9  ;;  %11344 = vst [vmem:[#allocation90_spill] sm:$0xff] %v10169_v3  ;;  %v7251_v43 = vpack.c.bf16 %v1174_v0, %v1166_v13  ;;  %v1175_v54 = vld [vmem:[#allocation9 + $0x270] sm:$0xff]  ;;  %v1190_v9 = vld [vmem:[#allocation9 + $0x2e8] sm:$0xff]  ;;  %v1192_v39 = vld [vmem:[#allocation9 + $0x2f8] sm:$0xff] }
 0x276   :  { %7498 = vmatpush1.bf16.msra.mxu1 %v7497_v2  ;;  %7244 = vmatprep.subr.bf16.mxu0 %v7243_v26  ;;  %11342 = vst [vmem:[#allocation83_spill] sm:$0xff] %v10163_v1  ;;  %v7249_v2 = vpack.c.bf16 %v1157_v16, %v1149_v33  ;;  %v1168_v26 = vld [vmem:[#allocation9 + $0x238] sm:$0xff]  ;;  %v10181_v0 = vmax.f32 %v899_v22, 0.0  ;;  %v11349_v13 = vld [vmem:[#allocation95_spill] sm:$0xff] }
 0x277   :  { %2723 = vmatmul.mubr.f32.gmra.mrb[60].mxu0 %v10157_v42  ;;  %7500 = vmatprep.subr.bf16.mxu1 %v7499_v30  ;;  %v1165_v30 = vld [vmem:[#allocation9 + $0x220] sm:$0xff]  ;;  %v11347_v33 = vld [vmem:[#allocation98_spill] sm:$0xff]  ;;  %v7507_v16 = vpack.c.bf16 %v1176_v53, %v1168_v26  ;;  %v7509_v26 = vpack.c.bf16 %v1175_v54, %v1167_v44 }
 0x278   :  { %3367 = vmatmul.mubr.f32.gmra.mrb[76].mxu1 %v10157_v42  ;;  %7246 = vmatpush1.bf16.msra.mxu0 %v7245_v8  ;;  %v10175_v8 = vmax.f32 %v901_v29, 0.0  ;;  %v907_v32 = vadd.f32 %v11347_v33, %v10100_v37  ;;  %v1182_v42 = vld [vmem:[#allocation9 + $0x2a8] sm:$0xff]  ;;  %11348 = vst [vmem:[#allocation94_spill] sm:$0xff] %v10181_v0  ;;  %v905_v29 = vadd.f32 %v11349_v13, %v10107_v35  ;;  %v1189_v58 = vld [vmem:[#allocation9 + $0x2e0] sm:$0xff]  ;;  %v1183_v33 = vld [vmem:[#allocation9 + $0x2b0] sm:$0xff] }
 0x279   :  { %2728 = vmatprep.mubr.f32.mxu0 %v10163_v1  ;;  %3372 = vmatprep.mubr.f32.mxu1 %v10163_v1  ;;  %v7255_v53 = vpack.c.bf16 %v1190_v9, %v1182_v42  ;;  %v1191_v13 = vld [vmem:[#allocation9 + $0x2f0] sm:$0xff]  ;;  %v1206_v1 = vld [vmem:[#allocation9 + $0x368] sm:$0xff]  ;;  %v1208_v44 = vld [vmem:[#allocation9 + $0x378] sm:$0xff] }
 0x27a   :  { %7502 = vmatpush1.bf16.msra.mxu1 %v7501_v23  ;;  %7248 = vmatprep.subr.bf16.mxu0 %v7247_v34  ;;  %11346 = vst [vmem:[#allocation87_spill] sm:$0xff] %v10175_v8  ;;  %v7253_v23 = vpack.c.bf16 %v1173_v38, %v1165_v30  ;;  %v1184_v34 = vld [vmem:[#allocation9 + $0x2b8] sm:$0xff]  ;;  %v10193_v9 = vmax.f32 %v905_v29, 0.0  ;;  %v11352_v42 = vld [vmem:[#allocation99_spill] sm:$0xff] }
 0x27b   :  { %2729 = vmatmul.mubr.f32.gmra.mrb[62].mxu0 %v10169_v3  ;;  %7504 = vmatprep.subr.bf16.mxu1 %v7503_v5  ;;  %v1181_v5 = vld [vmem:[#allocation9 + $0x2a0] sm:$0xff]  ;;  %v11350_v30 = vld [vmem:[#allocation102_spill] sm:$0xff]  ;;  %v7511_v38 = vpack.c.bf16 %v1192_v39, %v1184_v34  ;;  %v7513_v34 = vpack.c.bf16 %v1191_v13, %v1183_v33 }
 0x27c   :  { %3373 = vmatmul.mubr.f32.gmra.mrb[78].mxu1 %v10169_v3  ;;  %7250 = vmatpush1.bf16.msra.mxu0 %v7249_v2  ;;  %v10187_v2 = vmax.f32 %v907_v32, 0.0  ;;  %v913_v22 = vadd.f32 %v11350_v30, %v10100_v37  ;;  %v1198_v3 = vld [vmem:[#allocation9 + $0x328] sm:$0xff]  ;;  %11351 = vst [vmem:[#allocation91_spill] sm:$0xff] %v10193_v9  ;;  %v911_v32 = vadd.f32 %v11352_v42, %v10107_v35  ;;  %v1205_v54 = vld [vmem:[#allocation9 + $0x360] sm:$0xff]  ;;  %v1199_v30 = vld [vmem:[#allocation9 + $0x330] sm:$0xff] }
 0x27d   :  { %2734 = vmatprep.mubr.f32.mxu0 %v10175_v8  ;;  %3378 = vmatprep.mubr.f32.mxu1 %v10175_v8  ;;  %v7259_v39 = vpack.c.bf16 %v1206_v1, %v1198_v3  ;;  %v1207_v42 = vld [vmem:[#allocation9 + $0x370] sm:$0xff]  ;;  %v1222_v8 = vld [vmem:[#allocation9 + $0x3e8] sm:$0xff]  ;;  %v1224_v33 = vld [vmem:[#allocation9 + $0x3f8] sm:$0xff] }
 0x27e   :  { %7506 = vmatpush1.bf16.msra.mxu1 %v7505_v62  ;;  %7252 = vmatprep.subr.bf16.mxu0 %v7251_v43  ;;  %v7257_v62 = vpack.c.bf16 %v1189_v58, %v1181_v5  ;;  %v1200_v43 = vld [vmem:[#allocation9 + $0x338] sm:$0xff]  ;;  %v10205_v1 = vmax.f32 %v911_v32, 0.0  ;;  %v11354_v3 = vld [vmem:[#allocation103_spill] sm:$0xff]  ;;  %v925_v32 = vadd.f32 %v9835_v40, %v10100_v37 }
 0x27f   :  { %2735 = vmatmul.mubr.f32.gmra.mrb[64].mxu0 %v10181_v0  ;;  %7508 = vmatprep.subr.bf16.mxu1 %v7507_v16  ;;  %v1197_v16 = vld [vmem:[#allocation9 + $0x320] sm:$0xff]  ;;  %v11353_v5 = vld [vmem:[#allocation106_spill] sm:$0xff]  ;;  %v7515_v58 = vpack.c.bf16 %v1208_v44, %v1200_v43  ;;  %v7517_v43 = vpack.c.bf16 %v1207_v42, %v1199_v30 }
 0x280   :  { %3379 = vmatmul.mubr.f32.gmra.mrb[80].mxu1 %v10181_v0  ;;  %7254 = vmatpush1.bf16.msra.mxu0 %v7253_v23  ;;  %v10199_v23 = vmax.f32 %v913_v22, 0.0  ;;  %v919_v29 = vadd.f32 %v11353_v5, %v10100_v37  ;;  %v1214_v0 = vld [vmem:[#allocation9 + $0x3a8] sm:$0xff]  ;;  %v917_v22 = vadd.f32 %v11354_v3, %v10107_v35  ;;  %v1221_v13 = vld [vmem:[#allocation9 + $0x3e0] sm:$0xff]  ;;  %v1215_v5 = vld [vmem:[#allocation9 + $0x3b0] sm:$0xff] }
 0x281   :  { %2740 = vmatprep.mubr.f32.mxu0 %v10187_v2  ;;  %3384 = vmatprep.mubr.f32.mxu1 %v10187_v2  ;;  %v7263_v44 = vpack.c.bf16 %v1222_v8, %v1214_v0  ;;  %v1230_v3 = vld [vmem:[#allocation9 + $0x428] sm:$0xff]  ;;  %v1240_v30 = vld [vmem:[#allocation9 + $0x478] sm:$0xff]  ;;  %v923_v0 = vadd.f32 %v9823_v41, %v10107_v35  ;;  %v1229_v40 = vld [vmem:[#allocation9 + $0x420] sm:$0xff] }
 0x282   :  { %7510 = vmatpush1.bf16.msra.mxu1 %v7509_v26  ;;  %7256 = vmatprep.subr.bf16.mxu0 %v7255_v53  ;;  %v7261_v26 = vpack.c.bf16 %v1205_v54, %v1197_v16  ;;  %v1216_v53 = vld [vmem:[#allocation9 + $0x3b8] sm:$0xff]  ;;  %v1223_v54 = vld [vmem:[#allocation9 + $0x3f0] sm:$0xff]  ;;  %v10217_v8 = vmax.f32 %v917_v22, 0.0 }
 0x283   :  { %2741 = vmatmul.mubr.f32.gmra.mrb[66].mxu0 %v10193_v9  ;;  %7512 = vmatprep.subr.bf16.mxu1 %v7511_v38  ;;  %v1213_v38 = vld [vmem:[#allocation9 + $0x3a0] sm:$0xff]  ;;  %v7519_v16 = vpack.c.bf16 %v1224_v33, %v1216_v53  ;;  %v1231_v53 = vld [vmem:[#allocation9 + $0x430] sm:$0xff]  ;;  %v931_v33 = vadd.f32 %v9852_v4, %v10100_v37 }
 0x284   :  { %3385 = vmatmul.mubr.f32.gmra.mrb[82].mxu1 %v10193_v9  ;;  %7258 = vmatpush1.bf16.msra.mxu0 %v7257_v62  ;;  %v10211_v62 = vmax.f32 %v919_v29, 0.0  ;;  %v1238_v9 = vld [vmem:[#allocation9 + $0x468] sm:$0xff]  ;;  %v1237_v29 = vld [vmem:[#allocation9 + $0x460] sm:$0xff]  ;;  %v1239_v22 = vld [vmem:[#allocation9 + $0x470] sm:$0xff] }
 0x285   :  { %2746 = vmatprep.mubr.f32.mxu0 %v10199_v23  ;;  %3390 = vmatprep.mubr.f32.mxu1 %v10199_v23  ;;  %v7267_v42 = vpack.c.bf16 %v1238_v9, %v1230_v3  ;;  %v10229_v9 = vmax.f32 %v923_v0, 0.0  ;;  %v1245_v4 = vld [vmem:[#allocation9 + $0x4a0] sm:$0xff]  ;;  %v1255_v0 = vld [vmem:[#allocation9 + $0x4f0] sm:$0xff] }
 0x286   :  { %7514 = vmatpush1.bf16.msra.mxu1 %v7513_v34  ;;  %7260 = vmatprep.subr.bf16.mxu0 %v7259_v39  ;;  %v7265_v34 = vpack.c.bf16 %v1221_v13, %v1213_v38  ;;  %v1232_v39 = vld [vmem:[#allocation9 + $0x438] sm:$0xff]  ;;  %v1246_v38 = vld [vmem:[#allocation9 + $0x4a8] sm:$0xff] }
 0x287   :  { %2747 = vmatmul.mubr.f32.gmra.mrb[68].mxu0 %v10205_v1  ;;  %7516 = vmatprep.subr.bf16.mxu1 %v7515_v58  ;;  %v7521_v58 = vpack.c.bf16 %v1223_v54, %v1215_v5  ;;  %v7523_v41 = vpack.c.bf16 %v1240_v30, %v1232_v39  ;;  %v1254_v13 = vld [vmem:[#allocation9 + $0x4e8] sm:$0xff]  ;;  %v1256_v5 = vld [vmem:[#allocation9 + $0x4f8] sm:$0xff]  ;;  %v7525_v54 = vpack.c.bf16 %v1239_v22, %v1231_v53  ;;  %v1247_v39 = vld [vmem:[#allocation9 + $0x4b0] sm:$0xff] }
 0x288   :  { %3391 = vmatmul.mubr.f32.gmra.mrb[84].mxu1 %v10205_v1  ;;  %7262 = vmatpush1.bf16.msra.mxu0 %v7261_v26  ;;  %v10223_v26 = vmax.f32 %v925_v32, 0.0  ;;  %v929_v32 = vadd.f32 %v9840_v55, %v10107_v35  ;;  %v7271_v3 = vpack.c.bf16 %v1254_v13, %v1246_v38  ;;  %v937_v30 = vadd.f32 %v9876_v56, %v10100_v37  ;;  %v1272_v53 = vld [vmem:[#allocation9 + $0x578] sm:$0xff]  ;;  %v1261_v56 = vld [vmem:[#allocation9 + $0x520] sm:$0xff] }
 0x289   :  { %2752 = vmatprep.mubr.f32.mxu0 %v10211_v62  ;;  %3396 = vmatprep.mubr.f32.mxu1 %v10211_v62  ;;  %v7529_v38 = vpack.c.bf16 %v1255_v0, %v1247_v39  ;;  %v1288_v39 = vld [vmem:[#allocation9 + $0x5f8] sm:$0xff] }
 0x28a   :  { %7518 = vmatpush1.bf16.msra.mxu1 %v7517_v43  ;;  %7264 = vmatprep.subr.bf16.mxu0 %v7263_v44  ;;  %v7269_v43 = vpack.c.bf16 %v1237_v29, %v1229_v40  ;;  %v1248_v44 = vld [vmem:[#allocation9 + $0x4b8] sm:$0xff]  ;;  %v1262_v40 = vld [vmem:[#allocation9 + $0x528] sm:$0xff]  ;;  %v10241_v22 = vmax.f32 %v929_v32, 0.0  ;;  %v1271_v32 = vld [vmem:[#allocation9 + $0x570] sm:$0xff] }
 0x28b   :  { %2753 = vmatmul.mubr.f32.gmra.mrb[70].mxu0 %v10217_v8  ;;  %7520 = vmatprep.subr.bf16.mxu1 %v7519_v16  ;;  %v1253_v16 = vld [vmem:[#allocation9 + $0x4e0] sm:$0xff]  ;;  %v7527_v55 = vpack.c.bf16 %v1256_v5, %v1248_v44  ;;  %v1270_v29 = vld [vmem:[#allocation9 + $0x568] sm:$0xff]  ;;  %v1263_v44 = vld [vmem:[#allocation9 + $0x530] sm:$0xff]  ;;  %v943_v5 = vadd.f32 %v9897_v46, %v10100_v37 }
 0x28c   :  { %3397 = vmatmul.mubr.f32.gmra.mrb[86].mxu1 %v10217_v8  ;;  %7266 = vmatpush1.bf16.msra.mxu0 %v7265_v34  ;;  %v10235_v34 = vmax.f32 %v931_v33, 0.0  ;;  %11355 = vst [vmem:[#allocation98_spill] sm:$0xff] %v10241_v22  ;;  %v935_v33 = vadd.f32 %v9864_v18, %v10107_v35  ;;  %v7275_v13 = vpack.c.bf16 %v1270_v29, %v1262_v40  ;;  %v1277_v46 = vld [vmem:[#allocation9 + $0x5a0] sm:$0xff] }
 0x28d   :  { %2758 = vmatprep.mubr.f32.mxu0 %v10223_v26  ;;  %3402 = vmatprep.mubr.f32.mxu1 %v10223_v26  ;;  %v7533_v29 = vpack.c.bf16 %v1271_v32, %v1263_v44  ;;  %v1304_v44 = vld [vmem:[#allocation9 + $0x678] sm:$0xff] }
 0x28e   :  { %7522 = vmatpush1.bf16.msra.mxu1 %v7521_v58  ;;  %7268 = vmatprep.subr.bf16.mxu0 %v7267_v42  ;;  %v7273_v58 = vpack.c.bf16 %v1253_v16, %v1245_v4  ;;  %v1264_v42 = vld [vmem:[#allocation9 + $0x538] sm:$0xff]  ;;  %v1278_v4 = vld [vmem:[#allocation9 + $0x5a8] sm:$0xff]  ;;  %v10253_v0 = vmax.f32 %v935_v33, 0.0  ;;  %v949_v33 = vadd.f32 %v9913_v15, %v10100_v37  ;;  %v1293_v15 = vld [vmem:[#allocation9 + $0x620] sm:$0xff] }
 0x28f   :  { %2759 = vmatmul.mubr.f32.gmra.mrb[72].mxu0 %v10229_v9  ;;  %7524 = vmatprep.subr.bf16.mxu1 %v7523_v41  ;;  %v1269_v41 = vld [vmem:[#allocation9 + $0x560] sm:$0xff]  ;;  %v7531_v18 = vpack.c.bf16 %v1272_v53, %v1264_v42  ;;  %v1286_v16 = vld [vmem:[#allocation9 + $0x5e8] sm:$0xff]  ;;  %v1279_v53 = vld [vmem:[#allocation9 + $0x5b0] sm:$0xff] }
 0x290   :  { %3403 = vmatmul.mubr.f32.gmra.mrb[88].mxu1 %v10229_v9  ;;  %7270 = vmatpush1.bf16.msra.mxu0 %v7269_v43  ;;  %v10247_v43 = vmax.f32 %v937_v30, 0.0  ;;  %v11356_v30 = vld [vmem:[#allocation113_spill] sm:$0xff]  ;;  %v7279_v42 = vpack.c.bf16 %v1286_v16, %v1278_v4 }
 0x291   :  { %2764 = vmatprep.mubr.f32.mxu0 %v10235_v34  ;;  %3408 = vmatprep.mubr.f32.mxu1 %v10235_v34  ;;  %v941_v40 = vadd.f32 %v11356_v30, %v10107_v35  ;;  %v1294_v30 = vld [vmem:[#allocation9 + $0x628] sm:$0xff] }
 0x292   :  { %7526 = vmatpush1.bf16.msra.mxu1 %v7525_v54  ;;  %7272 = vmatprep.subr.bf16.mxu0 %v7271_v3  ;;  %v7277_v54 = vpack.c.bf16 %v1269_v41, %v1261_v56  ;;  %v1280_v3 = vld [vmem:[#allocation9 + $0x5b8] sm:$0xff]  ;;  %v1287_v41 = vld [vmem:[#allocation9 + $0x5f0] sm:$0xff] }
 0x293   :  { %2765 = vmatmul.mubr.f32.gmra.mrb[74].mxu0 %v10241_v22  ;;  %7528 = vmatprep.subr.bf16.mxu1 %v7527_v55  ;;  %v1285_v55 = vld [vmem:[#allocation9 + $0x5e0] sm:$0xff]  ;;  %v7535_v56 = vpack.c.bf16 %v1288_v39, %v1280_v3  ;;  %v10265_v32 = vmax.f32 %v941_v40, 0.0  ;;  %v7537_v4 = vpack.c.bf16 %v1287_v41, %v1279_v53  ;;  %v1295_v3 = vld [vmem:[#allocation9 + $0x630] sm:$0xff]  ;;  %v955_v39 = vadd.f32 %v9929_v51, %v10100_v37  ;;  %v1320_v53 = vld [vmem:[#allocation9 + $0x6f8] sm:$0xff] }
 0x294   :  { %3409 = vmatmul.mubr.f32.gmra.mrb[90].mxu1 %v10241_v22  ;;  %7274 = vmatpush1.bf16.msra.mxu0 %v7273_v58  ;;  %v10259_v58 = vmax.f32 %v943_v5, 0.0  ;;  %v1302_v22 = vld [vmem:[#allocation9 + $0x668] sm:$0xff]  ;;  %v947_v5 = vadd.f32 %v9901_v27, %v10107_v35  ;;  %v1303_v40 = vld [vmem:[#allocation9 + $0x670] sm:$0xff]  ;;  %v1309_v51 = vld [vmem:[#allocation9 + $0x6a0] sm:$0xff] }
 0x295   :  { %2770 = vmatprep.mubr.f32.mxu0 %v10247_v43  ;;  %3414 = vmatprep.mubr.f32.mxu1 %v10247_v43  ;;  %v7283_v16 = vpack.c.bf16 %v1302_v22, %v1294_v30  ;;  %v7541_v41 = vpack.c.bf16 %v1303_v40, %v1295_v3  ;;  %v1336_v3 = vld [vmem:[#allocation9 + $0x778] sm:$0xff] }
 0x296   :  { %7530 = vmatpush1.bf16.msra.mxu1 %v7529_v38  ;;  %7276 = vmatprep.subr.bf16.mxu0 %v7275_v13  ;;  %v7281_v38 = vpack.c.bf16 %v1285_v55, %v1277_v46  ;;  %v1296_v13 = vld [vmem:[#allocation9 + $0x638] sm:$0xff]  ;;  %v1310_v46 = vld [vmem:[#allocation9 + $0x6a8] sm:$0xff]  ;;  %v10277_v22 = vmax.f32 %v947_v5, 0.0  ;;  %v1319_v5 = vld [vmem:[#allocation9 + $0x6f0] sm:$0xff] }
 0x297   :  { %2771 = vmatmul.mubr.f32.gmra.mrb[76].mxu0 %v10253_v0  ;;  %7532 = vmatprep.subr.bf16.mxu1 %v7531_v18  ;;  %v1301_v18 = vld [vmem:[#allocation9 + $0x660] sm:$0xff]  ;;  %v7539_v27 = vpack.c.bf16 %v1304_v44, %v1296_v13  ;;  %v1318_v55 = vld [vmem:[#allocation9 + $0x6e8] sm:$0xff]  ;;  %v1311_v13 = vld [vmem:[#allocation9 + $0x6b0] sm:$0xff]  ;;  %v961_v44 = vadd.f32 %v9945_v60, %v10100_v37 }
 0x298   :  { %3415 = vmatmul.mubr.f32.gmra.mrb[92].mxu1 %v10253_v0  ;;  %7278 = vmatpush1.bf16.msra.mxu0 %v7277_v54  ;;  %v10271_v54 = vmax.f32 %v949_v33, 0.0  ;;  %v953_v33 = vadd.f32 %v9917_v28, %v10107_v35  ;;  %v7287_v30 = vpack.c.bf16 %v1318_v55, %v1310_v46  ;;  %v1325_v60 = vld [vmem:[#allocation9 + $0x720] sm:$0xff]  ;;  %v7545_v46 = vpack.c.bf16 %v1319_v5, %v1311_v13  ;;  %v1352_v13 = vld [vmem:[#allocation9 + $0x7f8] sm:$0xff] }
 0x299   :  { %2776 = vmatprep.mubr.f32.mxu0 %v10259_v58  ;;  %3420 = vmatprep.mubr.f32.mxu1 %v10259_v58 }
 0x29a   :  { %7534 = vmatpush1.bf16.msra.mxu1 %v7533_v29  ;;  %7280 = vmatprep.subr.bf16.mxu0 %v7279_v42  ;;  %v7285_v29 = vpack.c.bf16 %v1301_v18, %v1293_v15  ;;  %v1312_v42 = vld [vmem:[#allocation9 + $0x6b8] sm:$0xff]  ;;  %v1326_v15 = vld [vmem:[#allocation9 + $0x728] sm:$0xff]  ;;  %v10289_v40 = vmax.f32 %v953_v33, 0.0  ;;  %v1335_v33 = vld [vmem:[#allocation9 + $0x770] sm:$0xff] }
 0x29b   :  { %2777 = vmatmul.mubr.f32.gmra.mrb[78].mxu0 %v10265_v32  ;;  %7536 = vmatprep.subr.bf16.mxu1 %v7535_v56  ;;  %v1317_v56 = vld [vmem:[#allocation9 + $0x6e0] sm:$0xff]  ;;  %v7543_v28 = vpack.c.bf16 %v1320_v53, %v1312_v42  ;;  %v1334_v18 = vld [vmem:[#allocation9 + $0x768] sm:$0xff]  ;;  %v1327_v42 = vld [vmem:[#allocation9 + $0x730] sm:$0xff]  ;;  %v967_v53 = vadd.f32 %v9961_v61, %v10100_v37 }
 0x29c   :  { %3421 = vmatmul.mubr.f32.gmra.mrb[94].mxu1 %v10265_v32  ;;  %7282 = vmatpush1.bf16.msra.mxu0 %v7281_v38  ;;  %v10283_v38 = vmax.f32 %v955_v39, 0.0  ;;  %v959_v39 = vadd.f32 %v9933_v14, %v10107_v35  ;;  %v7291_v55 = vpack.c.bf16 %v1334_v18, %v1326_v15  ;;  %v1341_v61 = vld [vmem:[#allocation9 + $0x7a0] sm:$0xff]  ;;  %v1343_v18 = vld [vmem:[#allocation9 + $0x7b0] sm:$0xff] }
 0x29d   :  { %2782 = vmatprep.mubr.f32.mxu0 %v10271_v54  ;;  %3426 = vmatprep.mubr.f32.mxu1 %v10271_v54  ;;  %v1349_v37 = vld [vmem:[#allocation9 + $0x7e0] sm:$0xff] }
 0x29e   :  { %7538 = vmatpush1.bf16.msra.mxu1 %v7537_v4  ;;  %7284 = vmatprep.subr.bf16.mxu0 %v7283_v16  ;;  %v7289_v4 = vpack.c.bf16 %v1317_v56, %v1309_v51  ;;  %v1328_v16 = vld [vmem:[#allocation9 + $0x738] sm:$0xff]  ;;  %v1342_v51 = vld [vmem:[#allocation9 + $0x7a8] sm:$0xff]  ;;  %v10301_v5 = vmax.f32 %v959_v39, 0.0 }
 0x29f   :  { %2783 = vmatmul.mubr.f32.gmra.mrb[80].mxu0 %v10277_v22  ;;  %7540 = vmatprep.subr.bf16.mxu1 %v7539_v27  ;;  %v1333_v27 = vld [vmem:[#allocation9 + $0x760] sm:$0xff]  ;;  %v7547_v14 = vpack.c.bf16 %v1336_v3, %v1328_v16  ;;  %v1350_v56 = vld [vmem:[#allocation9 + $0x7e8] sm:$0xff]  ;;  %v1351_v3 = vld [vmem:[#allocation9 + $0x7f0] sm:$0xff] }
 0x2a0   :  { %3427 = vmatmul.mubr.f32.gmra.mrb[96].mxu1 %v10277_v22  ;;  %7286 = vmatpush1.bf16.msra.mxu0 %v7285_v29  ;;  %v10295_v29 = vmax.f32 %v961_v44, 0.0  ;;  %v965_v44 = vadd.f32 %v9949_v47, %v10107_v35  ;;  %v7295_v15 = vpack.c.bf16 %v1350_v56, %v1342_v51  ;;  %v1358_v39 = vld [vmem:[#allocation9 + $0x828] sm:$0xff]  ;;  %v7297_v35 = vpack.c.bf16 %v1349_v37, %v1341_v61  ;;  %v1384_v61 = vld [vmem:[#allocation9 + $0x8f8] sm:$0xff]  ;;  %v11358_v37 = vld [vmem:[#allocation31_spill] sm:$0xff] }
 0x2a1   :  { %2788 = vmatprep.mubr.f32.mxu0 %v10283_v38  ;;  %3432 = vmatprep.mubr.f32.mxu1 %v10283_v38  ;;  %v1366_v47 = vld [vmem:[#allocation9 + $0x868] sm:$0xff] }
 0x2a2   :  { %7542 = vmatpush1.bf16.msra.mxu1 %v7541_v41  ;;  %7288 = vmatprep.subr.bf16.mxu0 %v7287_v30  ;;  %v7293_v41 = vpack.c.bf16 %v1333_v27, %v1325_v60  ;;  %v1344_v30 = vld [vmem:[#allocation9 + $0x7b8] sm:$0xff]  ;;  %v1382_v51 = vld [vmem:[#allocation9 + $0x8e8] sm:$0xff] }
 0x2a3   :  { %2789 = vmatmul.mubr.f32.gmra.mrb[82].mxu0 %v10289_v40  ;;  %7544 = vmatprep.subr.bf16.mxu1 %v7543_v28  ;;  %v7549_v28 = vpack.c.bf16 %v1335_v33, %v1327_v42  ;;  %v7551_v16 = vpack.c.bf16 %v1352_v13, %v1344_v30  ;;  %v1360_v60 = vld [vmem:[#allocation9 + $0x838] sm:$0xff]  ;;  %v1365_v42 = vld [vmem:[#allocation9 + $0x860] sm:$0xff]  ;;  %v1374_v33 = vld [vmem:[#allocation9 + $0x8a8] sm:$0xff] }
 0x2a4   :  { %3433 = vmatmul.mubr.f32.gmra.mrb[98].mxu1 %v10289_v40  ;;  %7290 = vmatpush1.bf16.msra.mxu0 %v7289_v4  ;;  %v10307_v4 = vmax.f32 %v967_v53, 0.0  ;;  %v1368_v27 = vld [vmem:[#allocation9 + $0x878] sm:$0xff]  ;;  %v7553_v53 = vpack.c.bf16 %v1351_v3, %v1343_v18  ;;  %v1367_v30 = vld [vmem:[#allocation9 + $0x870] sm:$0xff]  ;;  %v1381_v18 = vld [vmem:[#allocation9 + $0x8e0] sm:$0xff] }
 0x2a5   :  { %2794 = vmatprep.mubr.f32.mxu0 %v10295_v29  ;;  %3438 = vmatprep.mubr.f32.mxu1 %v10295_v29  ;;  %v7555_v56 = vpack.c.bf16 %v1368_v27, %v1360_v60  ;;  %v1383_v27 = vld [vmem:[#allocation9 + $0x8f0] sm:$0xff] }
 0x2a6   :  { %7546 = vmatpush1.bf16.msra.mxu1 %v7545_v46  ;;  %7292 = vmatprep.subr.bf16.mxu0 %v7291_v55  ;;  %v10311_v46 = vmax.f32 %v965_v44, 0.0  ;;  %v1357_v55 = vld [vmem:[#allocation9 + $0x820] sm:$0xff]  ;;  %v1376_v44 = vld [vmem:[#allocation9 + $0x8b8] sm:$0xff] }
 0x2a7   :  { %2795 = vmatmul.mubr.f32.gmra.mrb[84].mxu0 %v10301_v5  ;;  %7548 = vmatprep.subr.bf16.mxu1 %v7547_v14  ;;  %v7299_v14 = vpack.c.bf16 %v1366_v47, %v1358_v39  ;;  %v7301_v13 = vpack.c.bf16 %v1365_v42, %v1357_v55  ;;  %v1398_v39 = vld [vmem:[#allocation9 + $0x968] sm:$0xff]  ;;  %v7559_v60 = vpack.c.bf16 %v1384_v61, %v1376_v44  ;;  %v11360_v55 = vld [vmem:[#allocation33_spill] sm:$0xff] }
 0x2a8   :  { %3439 = vmatmul.mubr.f32.gmra.mrb[100].mxu1 %v10301_v5  ;;  %7294 = vmatpush1.bf16.msra.mxu0 %v7293_v41  ;;  %11357 = vst [vmem:[#allocation95_spill] sm:$0xff] %v10311_v46  ;;  %v1359_v41 = vld [vmem:[#allocation9 + $0x830] sm:$0xff]  ;;  %v11359_v47 = vld [vmem:[#allocation32_spill] sm:$0xff] }
 0x2a9   :  { %2800 = vmatprep.mubr.f32.mxu0 %v10307_v4  ;;  %3444 = vmatprep.mubr.f32.mxu1 %v10307_v4  ;;  %v7557_v3 = vpack.c.bf16 %v1367_v30, %v1359_v41  ;;  %v1414_v41 = vld [vmem:[#allocation9 + $0x9e8] sm:$0xff]  ;;  %v11361_v30 = vld [vmem:[#allocation34_spill] sm:$0xff]  ;;  %v1391_v44 = vld [vmem:[#allocation9 + $0x930] sm:$0xff] }
 0x2aa   :  { %7550 = vmatpush1.bf16.msra.mxu1 %v7549_v28  ;;  %7296 = vmatprep.subr.bf16.mxu0 %v7295_v15  ;;  %v7303_v28 = vpack.c.bf16 %v1382_v51, %v1374_v33  ;;  %v1373_v15 = vld [vmem:[#allocation9 + $0x8a0] sm:$0xff]  ;;  %v1399_v61 = vld [vmem:[#allocation9 + $0x970] sm:$0xff] }
 0x2ab   :  { %2801 = vmatmul.mubr.f32.gmra.mrb[86].mxu0 %v10311_v46  ;;  %7552 = vmatprep.subr.bf16.mxu1 %v7551_v16  ;;  %v1390_v16 = vld [vmem:[#allocation9 + $0x928] sm:$0xff]  ;;  %v7305_v42 = vpack.c.bf16 %v1381_v18, %v1373_v15  ;;  %v1397_v33 = vld [vmem:[#allocation9 + $0x960] sm:$0xff] }
 0x2ac   :  { %3445 = vmatmul.mubr.f32.gmra.mrb[102].mxu1 %v10311_v46  ;;  %7298 = vmatpush1.bf16.msra.mxu0 %v7297_v35  ;;  %v1375_v35 = vld [vmem:[#allocation9 + $0x8b0] sm:$0xff]  ;;  %v1392_v46 = vld [vmem:[#allocation9 + $0x938] sm:$0xff]  ;;  %v11362_v15 = vld [vmem:[#allocation35_spill] sm:$0xff] }
 0x2ad   :  { %3515 = vmatprep.mubr.f32.mxu0 %v11358_v37  ;;  %4159 = vmatprep.mubr.f32.mxu1 %v11358_v37  ;;  %v1400_v37 = vld [vmem:[#allocation9 + $0x978] sm:$0xff]  ;;  %v7561_v51 = vpack.c.bf16 %v1383_v27, %v1375_v35  ;;  %v7565_v35 = vpack.c.bf16 %v1399_v61, %v1391_v44  ;;  %v11363_v27 = vld [vmem:[#allocation36_spill] sm:$0xff] }
 0x2ae   :  { %7554 = vmatpush1.bf16.msra.mxu1 %v7553_v53  ;;  %7300 = vmatprep.subr.bf16.mxu0 %v7299_v14  ;;  %v7307_v53 = vpack.c.bf16 %v1398_v39, %v1390_v16  ;;  %v1389_v14 = vld [vmem:[#allocation9 + $0x920] sm:$0xff]  ;;  %v1416_v16 = vld [vmem:[#allocation9 + $0x9f8] sm:$0xff]  ;;  %v1446_v61 = vld [vmem:[#allocation9 + $0xae8] sm:$0xff] }
 0x2af   :  { %3516 = vmatmul.mubr.f32.vlgmr.msra.gmra.mrb[88].mxu0 %v11359_v47  ;;  %7556 = vmatprep.subr.bf16.mxu1 %v7555_v56  ;;  %v1406_v56 = vld [vmem:[#allocation9 + $0x9a8] sm:$0xff]  ;;  %v7309_v18 = vpack.c.bf16 %v1397_v33, %v1389_v14  ;;  %v11364_v14 = vld [vmem:[#allocation37_spill] sm:$0xff] }
 0x2b0   :  { %7302 = vmatpush1.bf16.msra.mxu0 %v7301_v13  ;;  %3521 = vmatprep.mubr.f32.mxu0 %v11360_v55  ;;  %v7563_v13 = vpack.c.bf16 %v1400_v37, %v1392_v46  ;;  %v7311_v39 = vpack.c.bf16 %v1414_v41, %v1406_v56  ;;  %v1430_v46 = vld [vmem:[#allocation9 + $0xa68] sm:$0xff]  ;;  %v1415_v37 = vld [vmem:[#allocation9 + $0x9f0] sm:$0xff]  ;;  %v1432_v56 = vld [vmem:[#allocation9 + $0xa78] sm:$0xff] }
 0x2b1   :  { %4160 = vmatmul.mubr.f32.vlgmr.msra.gmra.mrb[104].mxu1 %v11359_v47  ;;  %7304 = vmatprep.subr.bf16.mxu0 %v7303_v28  ;;  %v1408_v28 = vld [vmem:[#allocation9 + $0x9b8] sm:$0xff]  ;;  %v1413_v47 = vld [vmem:[#allocation9 + $0x9e0] sm:$0xff] }
 0x2b2   :  { %4165 = vmatprep.mubr.f32.mxu1 %v11360_v55  ;;  %7558 = vmatpush1.bf16.msra.mxu1 %v7557_v3  ;;  %v1405_v3 = vld [vmem:[#allocation9 + $0x9a0] sm:$0xff]  ;;  %v7567_v55 = vpack.c.bf16 %v1416_v16, %v1408_v28  ;;  %v1423_v28 = vld [vmem:[#allocation9 + $0xa30] sm:$0xff] }
 0x2b3   :  { %3522 = vmatmul.mubr.f32.gmra.mrb[90].mxu0 %v11361_v30  ;;  %7560 = vmatprep.subr.bf16.mxu1 %v7559_v60  ;;  %v1422_v60 = vld [vmem:[#allocation9 + $0xa28] sm:$0xff]  ;;  %v7313_v33 = vpack.c.bf16 %v1413_v47, %v1405_v3  ;;  %v1431_v16 = vld [vmem:[#allocation9 + $0xa70] sm:$0xff]  ;;  %v11366_v3 = vld [vmem:[#allocation39_spill] sm:$0xff] }
 0x2b4   :  { %7306 = vmatpush1.bf16.msra.mxu0 %v7305_v42  ;;  %3527 = vmatprep.mubr.f32.mxu0 %v11362_v15  ;;  %v1407_v42 = vld [vmem:[#allocation9 + $0x9b0] sm:$0xff]  ;;  %v7315_v41 = vpack.c.bf16 %v1430_v46, %v1422_v60  ;;  %v1448_v60 = vld [vmem:[#allocation9 + $0xaf8] sm:$0xff] }
 0x2b5   :  { %4166 = vmatmul.mubr.f32.gmra.mrb[106].mxu1 %v11361_v30  ;;  %7308 = vmatprep.subr.bf16.mxu0 %v7307_v53  ;;  %v1424_v53 = vld [vmem:[#allocation9 + $0xa38] sm:$0xff]  ;;  %v1429_v30 = vld [vmem:[#allocation9 + $0xa60] sm:$0xff]  ;;  %v7569_v44 = vpack.c.bf16 %v1415_v37, %v1407_v42  ;;  %v7573_v42 = vpack.c.bf16 %v1431_v16, %v1423_v28  ;;  %v1462_v37 = vld [vmem:[#allocation9 + $0xb68] sm:$0xff] }
 0x2b6   :  { %4171 = vmatprep.mubr.f32.mxu1 %v11362_v15  ;;  %7562 = vmatpush1.bf16.msra.mxu1 %v7561_v51  ;;  %v1421_v51 = vld [vmem:[#allocation9 + $0xa20] sm:$0xff]  ;;  %v11365_v15 = vld [vmem:[#allocation38_spill] sm:$0xff]  ;;  %v1478_v16 = vld [vmem:[#allocation9 + $0xbe8] sm:$0xff] }
 0x2b7   :  { %3528 = vmatmul.mubr.f32.gmra.mrb[92].mxu0 %v11363_v27  ;;  %7564 = vmatprep.subr.bf16.mxu1 %v7563_v13  ;;  %v1438_v13 = vld [vmem:[#allocation9 + $0xaa8] sm:$0xff]  ;;  %v7317_v47 = vpack.c.bf16 %v1429_v30, %v1421_v51  ;;  %v11368_v51 = vld [vmem:[#allocation41_spill] sm:$0xff] }
 0x2b8   :  { %7310 = vmatpush1.bf16.msra.mxu0 %v7309_v18  ;;  %3533 = vmatprep.mubr.f32.mxu0 %v11364_v14  ;;  %v7571_v18 = vpack.c.bf16 %v1432_v56, %v1424_v53  ;;  %v7319_v46 = vpack.c.bf16 %v1446_v61, %v1438_v13  ;;  %v1439_v53 = vld [vmem:[#allocation9 + $0xab0] sm:$0xff]  ;;  %v1464_v13 = vld [vmem:[#allocation9 + $0xb78] sm:$0xff] }
 0x2b9   :  { %4172 = vmatmul.mubr.f32.gmra.mrb[108].mxu1 %v11363_v27  ;;  %7312 = vmatprep.subr.bf16.mxu0 %v7311_v39  ;;  %v1440_v39 = vld [vmem:[#allocation9 + $0xab8] sm:$0xff]  ;;  %v1445_v27 = vld [vmem:[#allocation9 + $0xae0] sm:$0xff]  ;;  %v1447_v56 = vld [vmem:[#allocation9 + $0xaf0] sm:$0xff] }
 0x2ba   :  { %4177 = vmatprep.mubr.f32.mxu1 %v11364_v14  ;;  %7566 = vmatpush1.bf16.msra.mxu1 %v7565_v35  ;;  %v1437_v35 = vld [vmem:[#allocation9 + $0xaa0] sm:$0xff]  ;;  %v11367_v14 = vld [vmem:[#allocation40_spill] sm:$0xff]  ;;  %v7577_v28 = vpack.c.bf16 %v1447_v56, %v1439_v53 }
 0x2bb   :  { %3534 = vmatmul.mubr.f32.gmra.mrb[94].mxu0 %v11365_v15  ;;  %7568 = vmatprep.subr.bf16.mxu1 %v7567_v55  ;;  %v1454_v55 = vld [vmem:[#allocation9 + $0xb28] sm:$0xff]  ;;  %v7321_v30 = vpack.c.bf16 %v1445_v27, %v1437_v35  ;;  %v11370_v35 = vld [vmem:[#allocation43_spill] sm:$0xff] }
 0x2bc   :  { %7314 = vmatpush1.bf16.msra.mxu0 %v7313_v33  ;;  %3539 = vmatprep.mubr.f32.mxu0 %v11366_v3  ;;  %v7575_v33 = vpack.c.bf16 %v1448_v60, %v1440_v39  ;;  %v7323_v61 = vpack.c.bf16 %v1462_v37, %v1454_v55  ;;  %v1455_v39 = vld [vmem:[#allocation9 + $0xb30] sm:$0xff]  ;;  %v1480_v55 = vld [vmem:[#allocation9 + $0xbf8] sm:$0xff]  ;;  %v1494_v56 = vld [vmem:[#allocation9 + $0xc68] sm:$0xff] }
 0x2bd   :  { %4178 = vmatmul.mubr.f32.gmra.mrb[110].mxu1 %v11365_v15  ;;  %7316 = vmatprep.subr.bf16.mxu0 %v7315_v41  ;;  %v1456_v41 = vld [vmem:[#allocation9 + $0xb38] sm:$0xff]  ;;  %v1461_v15 = vld [vmem:[#allocation9 + $0xb60] sm:$0xff]  ;;  %v1463_v60 = vld [vmem:[#allocation9 + $0xb70] sm:$0xff] }
 0x2be   :  { %4183 = vmatprep.mubr.f32.mxu1 %v11366_v3  ;;  %7570 = vmatpush1.bf16.msra.mxu1 %v7569_v44  ;;  %v1453_v44 = vld [vmem:[#allocation9 + $0xb20] sm:$0xff]  ;;  %v11369_v3 = vld [vmem:[#allocation42_spill] sm:$0xff]  ;;  %v7581_v53 = vpack.c.bf16 %v1463_v60, %v1455_v39  ;;  %v1510_v60 = vld [vmem:[#allocation9 + $0xce8] sm:$0xff] }
 0x2bf   :  { %3540 = vmatmul.mubr.f32.gmra.mrb[96].mxu0 %v11367_v14  ;;  %7572 = vmatprep.subr.bf16.mxu1 %v7571_v18  ;;  %v1470_v18 = vld [vmem:[#allocation9 + $0xba8] sm:$0xff]  ;;  %v7325_v27 = vpack.c.bf16 %v1461_v15, %v1453_v44  ;;  %v11372_v44 = vld [vmem:[#allocation45_spill] sm:$0xff] }
 0x2c0   :  { %7318 = vmatpush1.bf16.msra.mxu0 %v7317_v47  ;;  %3545 = vmatprep.mubr.f32.mxu0 %v11368_v51  ;;  %v7579_v47 = vpack.c.bf16 %v1464_v13, %v1456_v41  ;;  %v7327_v37 = vpack.c.bf16 %v1478_v16, %v1470_v18  ;;  %v1471_v41 = vld [vmem:[#allocation9 + $0xbb0] sm:$0xff]  ;;  %v1496_v18 = vld [vmem:[#allocation9 + $0xc78] sm:$0xff] }
 0x2c1   :  { %4184 = vmatmul.mubr.f32.gmra.mrb[112].mxu1 %v11367_v14  ;;  %7320 = vmatprep.subr.bf16.mxu0 %v7319_v46  ;;  %v1472_v46 = vld [vmem:[#allocation9 + $0xbb8] sm:$0xff]  ;;  %v1477_v14 = vld [vmem:[#allocation9 + $0xbe0] sm:$0xff]  ;;  %v1479_v13 = vld [vmem:[#allocation9 + $0xbf0] sm:$0xff] }
 0x2c2   :  { %4189 = vmatprep.mubr.f32.mxu1 %v11368_v51  ;;  %7574 = vmatpush1.bf16.msra.mxu1 %v7573_v42  ;;  %v1469_v42 = vld [vmem:[#allocation9 + $0xba0] sm:$0xff]  ;;  %v11371_v51 = vld [vmem:[#allocation44_spill] sm:$0xff]  ;;  %v7585_v39 = vpack.c.bf16 %v1479_v13, %v1471_v41 }
 0x2c3   :  { %3546 = vmatmul.mubr.f32.gmra.mrb[98].mxu0 %v11369_v3  ;;  %7576 = vmatprep.subr.bf16.mxu1 %v7575_v33  ;;  %v1486_v33 = vld [vmem:[#allocation9 + $0xc28] sm:$0xff]  ;;  %v7329_v15 = vpack.c.bf16 %v1477_v14, %v1469_v42  ;;  %v11374_v42 = vld [vmem:[#allocation47_spill] sm:$0xff] }
 0x2c4   :  { %7322 = vmatpush1.bf16.msra.mxu0 %v7321_v30  ;;  %3551 = vmatprep.mubr.f32.mxu0 %v11370_v35  ;;  %v7583_v30 = vpack.c.bf16 %v1480_v55, %v1472_v46  ;;  %v7331_v16 = vpack.c.bf16 %v1494_v56, %v1486_v33  ;;  %v1487_v46 = vld [vmem:[#allocation9 + $0xc30] sm:$0xff]  ;;  %v1512_v33 = vld [vmem:[#allocation9 + $0xcf8] sm:$0xff]  ;;  %v1526_v13 = vld [vmem:[#allocation9 + $0xd68] sm:$0xff] }
 0x2c5   :  { %4190 = vmatmul.mubr.f32.gmra.mrb[114].mxu1 %v11369_v3  ;;  %7324 = vmatprep.subr.bf16.mxu0 %v7323_v61  ;;  %v1488_v61 = vld [vmem:[#allocation9 + $0xc38] sm:$0xff]  ;;  %v1493_v3 = vld [vmem:[#allocation9 + $0xc60] sm:$0xff]  ;;  %v1495_v55 = vld [vmem:[#allocation9 + $0xc70] sm:$0xff] }
 0x2c6   :  { %4195 = vmatprep.mubr.f32.mxu1 %v11370_v35  ;;  %7578 = vmatpush1.bf16.msra.mxu1 %v7577_v28  ;;  %v1485_v28 = vld [vmem:[#allocation9 + $0xc20] sm:$0xff]  ;;  %v11373_v35 = vld [vmem:[#allocation46_spill] sm:$0xff]  ;;  %v7589_v41 = vpack.c.bf16 %v1495_v55, %v1487_v46  ;;  %v1542_v55 = vld [vmem:[#allocation9 + $0xde8] sm:$0xff] }
 0x2c7   :  { %3552 = vmatmul.mubr.f32.gmra.mrb[100].mxu0 %v11371_v51  ;;  %7580 = vmatprep.subr.bf16.mxu1 %v7579_v47  ;;  %v1502_v47 = vld [vmem:[#allocation9 + $0xca8] sm:$0xff]  ;;  %v7333_v14 = vpack.c.bf16 %v1493_v3, %v1485_v28  ;;  %v11376_v28 = vld [vmem:[#allocation49_spill] sm:$0xff] }
 0x2c8   :  { %7326 = vmatpush1.bf16.msra.mxu0 %v7325_v27  ;;  %3557 = vmatprep.mubr.f32.mxu0 %v11372_v44  ;;  %v7587_v27 = vpack.c.bf16 %v1496_v18, %v1488_v61  ;;  %v7335_v56 = vpack.c.bf16 %v1510_v60, %v1502_v47  ;;  %v1503_v61 = vld [vmem:[#allocation9 + $0xcb0] sm:$0xff]  ;;  %v1528_v47 = vld [vmem:[#allocation9 + $0xd78] sm:$0xff] }
 0x2c9   :  { %4196 = vmatmul.mubr.f32.gmra.mrb[116].mxu1 %v11371_v51  ;;  %7328 = vmatprep.subr.bf16.mxu0 %v7327_v37  ;;  %v1504_v37 = vld [vmem:[#allocation9 + $0xcb8] sm:$0xff]  ;;  %v1509_v51 = vld [vmem:[#allocation9 + $0xce0] sm:$0xff]  ;;  %v1511_v18 = vld [vmem:[#allocation9 + $0xcf0] sm:$0xff] }
 0x2ca   :  { %4201 = vmatprep.mubr.f32.mxu1 %v11372_v44  ;;  %7582 = vmatpush1.bf16.msra.mxu1 %v7581_v53  ;;  %v1501_v53 = vld [vmem:[#allocation9 + $0xca0] sm:$0xff]  ;;  %v11375_v44 = vld [vmem:[#allocation48_spill] sm:$0xff]  ;;  %v7593_v46 = vpack.c.bf16 %v1511_v18, %v1503_v61 }
 0x2cb   :  { %3558 = vmatmul.mubr.f32.gmra.mrb[102].mxu0 %v11373_v35  ;;  %7584 = vmatprep.subr.bf16.mxu1 %v7583_v30  ;;  %v1518_v30 = vld [vmem:[#allocation9 + $0xd28] sm:$0xff]  ;;  %v7337_v3 = vpack.c.bf16 %v1509_v51, %v1501_v53  ;;  %v11378_v53 = vld [vmem:[#allocation51_spill] sm:$0xff] }
 0x2cc   :  { %7330 = vmatpush1.bf16.msra.mxu0 %v7329_v15  ;;  %3563 = vmatprep.mubr.f32.mxu0 %v11374_v42  ;;  %v7591_v15 = vpack.c.bf16 %v1512_v33, %v1504_v37  ;;  %v7339_v60 = vpack.c.bf16 %v1526_v13, %v1518_v30  ;;  %v1519_v37 = vld [vmem:[#allocation9 + $0xd30] sm:$0xff]  ;;  %v1544_v30 = vld [vmem:[#allocation9 + $0xdf8] sm:$0xff]  ;;  %v1558_v18 = vld [vmem:[#allocation9 + $0xe68] sm:$0xff] }
 0x2cd   :  { %4202 = vmatmul.mubr.f32.gmra.mrb[118].mxu1 %v11373_v35  ;;  %7332 = vmatprep.subr.bf16.mxu0 %v7331_v16  ;;  %v1520_v16 = vld [vmem:[#allocation9 + $0xd38] sm:$0xff]  ;;  %v1525_v35 = vld [vmem:[#allocation9 + $0xd60] sm:$0xff]  ;;  %v1527_v33 = vld [vmem:[#allocation9 + $0xd70] sm:$0xff] }
 0x2ce   :  { %4207 = vmatprep.mubr.f32.mxu1 %v11374_v42  ;;  %7586 = vmatpush1.bf16.msra.mxu1 %v7585_v39  ;;  %v1517_v39 = vld [vmem:[#allocation9 + $0xd20] sm:$0xff]  ;;  %v11377_v42 = vld [vmem:[#allocation50_spill] sm:$0xff]  ;;  %v7597_v61 = vpack.c.bf16 %v1527_v33, %v1519_v37  ;;  %v1574_v33 = vld [vmem:[#allocation9 + $0xee8] sm:$0xff] }
 0x2cf   :  { %3564 = vmatmul.mubr.f32.gmra.mrb[104].mxu0 %v11375_v44  ;;  %7588 = vmatprep.subr.bf16.mxu1 %v7587_v27  ;;  %v1534_v27 = vld [vmem:[#allocation9 + $0xda8] sm:$0xff]  ;;  %v7341_v51 = vpack.c.bf16 %v1525_v35, %v1517_v39  ;;  %v11380_v39 = vld [vmem:[#allocation53_spill] sm:$0xff] }
 0x2d0   :  { %7334 = vmatpush1.bf16.msra.mxu0 %v7333_v14  ;;  %3569 = vmatprep.mubr.f32.mxu0 %v11376_v28  ;;  %v7595_v14 = vpack.c.bf16 %v1528_v47, %v1520_v16  ;;  %v7343_v13 = vpack.c.bf16 %v1542_v55, %v1534_v27  ;;  %v1535_v16 = vld [vmem:[#allocation9 + $0xdb0] sm:$0xff]  ;;  %v1560_v27 = vld [vmem:[#allocation9 + $0xe78] sm:$0xff] }
 0x2d1   :  { %4208 = vmatmul.mubr.f32.gmra.mrb[120].mxu1 %v11375_v44  ;;  %7336 = vmatprep.subr.bf16.mxu0 %v7335_v56  ;;  %v1536_v56 = vld [vmem:[#allocation9 + $0xdb8] sm:$0xff]  ;;  %v1541_v44 = vld [vmem:[#allocation9 + $0xde0] sm:$0xff]  ;;  %v1543_v47 = vld [vmem:[#allocation9 + $0xdf0] sm:$0xff] }
 0x2d2   :  { %4213 = vmatprep.mubr.f32.mxu1 %v11376_v28  ;;  %7590 = vmatpush1.bf16.msra.mxu1 %v7589_v41  ;;  %v1533_v41 = vld [vmem:[#allocation9 + $0xda0] sm:$0xff]  ;;  %v11379_v28 = vld [vmem:[#allocation52_spill] sm:$0xff]  ;;  %v7601_v37 = vpack.c.bf16 %v1543_v47, %v1535_v16 }
 0x2d3   :  { %3570 = vmatmul.mubr.f32.gmra.mrb[106].mxu0 %v11377_v42  ;;  %7592 = vmatprep.subr.bf16.mxu1 %v7591_v15  ;;  %v1550_v15 = vld [vmem:[#allocation9 + $0xe28] sm:$0xff]  ;;  %v7345_v35 = vpack.c.bf16 %v1541_v44, %v1533_v41  ;;  %v11382_v41 = vld [vmem:[#allocation55_spill] sm:$0xff] }
 0x2d4   :  { %7338 = vmatpush1.bf16.msra.mxu0 %v7337_v3  ;;  %3575 = vmatprep.mubr.f32.mxu0 %v11378_v53  ;;  %v7599_v3 = vpack.c.bf16 %v1544_v30, %v1536_v56  ;;  %v7347_v55 = vpack.c.bf16 %v1558_v18, %v1550_v15  ;;  %v1551_v56 = vld [vmem:[#allocation9 + $0xe30] sm:$0xff]  ;;  %v1576_v15 = vld [vmem:[#allocation9 + $0xef8] sm:$0xff]  ;;  %v1590_v47 = vld [vmem:[#allocation9 + $0xf68] sm:$0xff] }
 0x2d5   :  { %4214 = vmatmul.mubr.f32.gmra.mrb[122].mxu1 %v11377_v42  ;;  %7340 = vmatprep.subr.bf16.mxu0 %v7339_v60  ;;  %v1552_v60 = vld [vmem:[#allocation9 + $0xe38] sm:$0xff]  ;;  %v1557_v42 = vld [vmem:[#allocation9 + $0xe60] sm:$0xff]  ;;  %v1559_v30 = vld [vmem:[#allocation9 + $0xe70] sm:$0xff] }
 0x2d6   :  { %4219 = vmatprep.mubr.f32.mxu1 %v11378_v53  ;;  %7594 = vmatpush1.bf16.msra.mxu1 %v7593_v46  ;;  %v1549_v46 = vld [vmem:[#allocation9 + $0xe20] sm:$0xff]  ;;  %v11381_v53 = vld [vmem:[#allocation54_spill] sm:$0xff]  ;;  %v7605_v16 = vpack.c.bf16 %v1559_v30, %v1551_v56  ;;  %v1606_v30 = vld [vmem:[#allocation9 + $0xfe8] sm:$0xff] }
 0x2d7   :  { %3576 = vmatmul.mubr.f32.gmra.mrb[108].mxu0 %v11379_v28  ;;  %7596 = vmatprep.subr.bf16.mxu1 %v7595_v14  ;;  %v1566_v14 = vld [vmem:[#allocation9 + $0xea8] sm:$0xff]  ;;  %v7349_v44 = vpack.c.bf16 %v1557_v42, %v1549_v46  ;;  %v11384_v46 = vld [vmem:[#allocation57_spill] sm:$0xff] }
 0x2d8   :  { %7342 = vmatpush1.bf16.msra.mxu0 %v7341_v51  ;;  %3581 = vmatprep.mubr.f32.mxu0 %v11380_v39  ;;  %v7603_v51 = vpack.c.bf16 %v1560_v27, %v1552_v60  ;;  %v7351_v18 = vpack.c.bf16 %v1574_v33, %v1566_v14  ;;  %v1567_v60 = vld [vmem:[#allocation9 + $0xeb0] sm:$0xff]  ;;  %v1592_v14 = vld [vmem:[#allocation9 + $0xf78] sm:$0xff] }
 0x2d9   :  { %4220 = vmatmul.mubr.f32.gmra.mrb[124].mxu1 %v11379_v28  ;;  %7344 = vmatprep.subr.bf16.mxu0 %v7343_v13  ;;  %v1568_v13 = vld [vmem:[#allocation9 + $0xeb8] sm:$0xff]  ;;  %v1573_v28 = vld [vmem:[#allocation9 + $0xee0] sm:$0xff]  ;;  %v1575_v27 = vld [vmem:[#allocation9 + $0xef0] sm:$0xff] }
 0x2da   :  { %4225 = vmatprep.mubr.f32.mxu1 %v11380_v39  ;;  %7598 = vmatpush1.bf16.msra.mxu1 %v7597_v61  ;;  %v1565_v61 = vld [vmem:[#allocation9 + $0xea0] sm:$0xff]  ;;  %v11383_v39 = vld [vmem:[#allocation56_spill] sm:$0xff]  ;;  %v7609_v56 = vpack.c.bf16 %v1575_v27, %v1567_v60 }
 0x2db   :  { %3582 = vmatmul.mubr.f32.gmra.mrb[110].mxu0 %v11381_v53  ;;  %7600 = vmatprep.subr.bf16.mxu1 %v7599_v3  ;;  %v1582_v3 = vld [vmem:[#allocation9 + $0xf28] sm:$0xff]  ;;  %v7353_v42 = vpack.c.bf16 %v1573_v28, %v1565_v61  ;;  %v11386_v61 = vld [vmem:[#allocation59_spill] sm:$0xff] }
 0x2dc   :  { %7346 = vmatpush1.bf16.msra.mxu0 %v7345_v35  ;;  %3587 = vmatprep.mubr.f32.mxu0 %v11382_v41  ;;  %v7607_v35 = vpack.c.bf16 %v1576_v15, %v1568_v13  ;;  %v7355_v33 = vpack.c.bf16 %v1590_v47, %v1582_v3  ;;  %v1583_v13 = vld [vmem:[#allocation9 + $0xf30] sm:$0xff]  ;;  %v1608_v3 = vld [vmem:[#allocation9 + $0xff8] sm:$0xff]  ;;  %v1622_v27 = vld [vmem:[#allocation9 + $0x1068] sm:$0xff] }
 0x2dd   :  { %4226 = vmatmul.mubr.f32.gmra.mrb[126].mxu1 %v11381_v53  ;;  %7348 = vmatprep.subr.bf16.mxu0 %v7347_v55  ;;  %v1584_v55 = vld [vmem:[#allocation9 + $0xf38] sm:$0xff]  ;;  %v1589_v53 = vld [vmem:[#allocation9 + $0xf60] sm:$0xff]  ;;  %v1591_v15 = vld [vmem:[#allocation9 + $0xf70] sm:$0xff] }
 0x2de   :  { %4231 = vmatprep.mubr.f32.mxu1 %v11382_v41  ;;  %7602 = vmatpush1.bf16.msra.mxu1 %v7601_v37  ;;  %v1581_v37 = vld [vmem:[#allocation9 + $0xf20] sm:$0xff]  ;;  %v11385_v41 = vld [vmem:[#allocation58_spill] sm:$0xff]  ;;  %v7613_v60 = vpack.c.bf16 %v1591_v15, %v1583_v13  ;;  %v1638_v15 = vld [vmem:[#allocation9 + $0x10e8] sm:$0xff] }
 0x2df   :  { %3588 = vmatmul.mubr.f32.gmra.mrb[112].mxu0 %v11383_v39  ;;  %7604 = vmatprep.subr.bf16.mxu1 %v7603_v51  ;;  %v1598_v51 = vld [vmem:[#allocation9 + $0xfa8] sm:$0xff]  ;;  %v7357_v28 = vpack.c.bf16 %v1589_v53, %v1581_v37  ;;  %v11388_v37 = vld [vmem:[#allocation61_spill] sm:$0xff] }
 0x2e0   :  { %7350 = vmatpush1.bf16.msra.mxu0 %v7349_v44  ;;  %3593 = vmatprep.mubr.f32.mxu0 %v11384_v46  ;;  %v7611_v44 = vpack.c.bf16 %v1592_v14, %v1584_v55  ;;  %v7359_v47 = vpack.c.bf16 %v1606_v30, %v1598_v51  ;;  %v1599_v55 = vld [vmem:[#allocation9 + $0xfb0] sm:$0xff]  ;;  %v1624_v51 = vld [vmem:[#allocation9 + $0x1078] sm:$0xff] }
 0x2e1   :  { %4232 = vmatmul.mubr.f32.gmra.mrb[128].mxu1 %v11383_v39  ;;  %7352 = vmatprep.subr.bf16.mxu0 %v7351_v18  ;;  %v1600_v18 = vld [vmem:[#allocation9 + $0xfb8] sm:$0xff]  ;;  %v1605_v39 = vld [vmem:[#allocation9 + $0xfe0] sm:$0xff]  ;;  %v1607_v14 = vld [vmem:[#allocation9 + $0xff0] sm:$0xff] }
 0x2e2   :  { %4237 = vmatprep.mubr.f32.mxu1 %v11384_v46  ;;  %7606 = vmatpush1.bf16.msra.mxu1 %v7605_v16  ;;  %v1597_v16 = vld [vmem:[#allocation9 + $0xfa0] sm:$0xff]  ;;  %v11387_v46 = vld [vmem:[#allocation60_spill] sm:$0xff]  ;;  %v7617_v13 = vpack.c.bf16 %v1607_v14, %v1599_v55 }
 0x2e3   :  { %3594 = vmatmul.mubr.f32.gmra.mrb[114].mxu0 %v11385_v41  ;;  %7608 = vmatprep.subr.bf16.mxu1 %v7607_v35  ;;  %v1614_v35 = vld [vmem:[#allocation9 + $0x1028] sm:$0xff]  ;;  %v7361_v53 = vpack.c.bf16 %v1605_v39, %v1597_v16  ;;  %v11390_v16 = vld [vmem:[#allocation63_spill] sm:$0xff] }
 0x2e4   :  { %7354 = vmatpush1.bf16.msra.mxu0 %v7353_v42  ;;  %3599 = vmatprep.mubr.f32.mxu0 %v11386_v61  ;;  %v7615_v42 = vpack.c.bf16 %v1608_v3, %v1600_v18  ;;  %v7363_v30 = vpack.c.bf16 %v1622_v27, %v1614_v35  ;;  %v1615_v18 = vld [vmem:[#allocation9 + $0x1030] sm:$0xff]  ;;  %v1640_v35 = vld [vmem:[#allocation9 + $0x10f8] sm:$0xff]  ;;  %v1654_v14 = vld [vmem:[#allocation9 + $0x1168] sm:$0xff] }
 0x2e5   :  { %4238 = vmatmul.mubr.f32.gmra.mrb[130].mxu1 %v11385_v41  ;;  %7356 = vmatprep.subr.bf16.mxu0 %v7355_v33  ;;  %v1616_v33 = vld [vmem:[#allocation9 + $0x1038] sm:$0xff]  ;;  %v1621_v41 = vld [vmem:[#allocation9 + $0x1060] sm:$0xff]  ;;  %v1623_v3 = vld [vmem:[#allocation9 + $0x1070] sm:$0xff] }
 0x2e6   :  { %4243 = vmatprep.mubr.f32.mxu1 %v11386_v61  ;;  %7610 = vmatpush1.bf16.msra.mxu1 %v7609_v56  ;;  %v1613_v56 = vld [vmem:[#allocation9 + $0x1020] sm:$0xff]  ;;  %v11389_v61 = vld [vmem:[#allocation62_spill] sm:$0xff]  ;;  %v7621_v55 = vpack.c.bf16 %v1623_v3, %v1615_v18  ;;  %v1670_v3 = vld [vmem:[#allocation9 + $0x11e8] sm:$0xff] }
 0x2e7   :  { %3600 = vmatmul.mubr.f32.gmra.mrb[116].mxu0 %v11387_v46  ;;  %7612 = vmatprep.subr.bf16.mxu1 %v7611_v44  ;;  %v1630_v44 = vld [vmem:[#allocation9 + $0x10a8] sm:$0xff]  ;;  %v7365_v39 = vpack.c.bf16 %v1621_v41, %v1613_v56  ;;  %v11392_v56 = vld [vmem:[#allocation66_spill] sm:$0xff] }
 0x2e8   :  { %7358 = vmatpush1.bf16.msra.mxu0 %v7357_v28  ;;  %3605 = vmatprep.mubr.f32.mxu0 %v11388_v37  ;;  %v7619_v28 = vpack.c.bf16 %v1624_v51, %v1616_v33  ;;  %v7367_v27 = vpack.c.bf16 %v1638_v15, %v1630_v44  ;;  %v1631_v33 = vld [vmem:[#allocation9 + $0x10b0] sm:$0xff]  ;;  %v1656_v44 = vld [vmem:[#allocation9 + $0x1178] sm:$0xff]  ;;  %v1645_v15 = vld [vmem:[#allocation9 + $0x1120] sm:$0xff] }
 0x2e9   :  { %4244 = vmatmul.mubr.f32.gmra.mrb[132].mxu1 %v11387_v46  ;;  %7360 = vmatprep.subr.bf16.mxu0 %v7359_v47  ;;  %v1632_v47 = vld [vmem:[#allocation9 + $0x10b8] sm:$0xff]  ;;  %v1637_v46 = vld [vmem:[#allocation9 + $0x10e0] sm:$0xff]  ;;  %v1639_v51 = vld [vmem:[#allocation9 + $0x10f0] sm:$0xff] }
 0x2ea   :  { %4249 = vmatprep.mubr.f32.mxu1 %v11388_v37  ;;  %7614 = vmatpush1.bf16.msra.mxu1 %v7613_v60  ;;  %v1629_v60 = vld [vmem:[#allocation9 + $0x10a0] sm:$0xff]  ;;  %v11391_v37 = vld [vmem:[#allocation65_spill] sm:$0xff]  ;;  %v7625_v18 = vpack.c.bf16 %v1639_v51, %v1631_v33  ;;  %v1686_v51 = vld [vmem:[#allocation9 + $0x1268] sm:$0xff] }
 0x2eb   :  { %3606 = vmatmul.mubr.f32.gmra.mrb[118].mxu0 %v11389_v61  ;;  %7616 = vmatprep.subr.bf16.mxu1 %v7615_v42  ;;  %v1646_v42 = vld [vmem:[#allocation9 + $0x1128] sm:$0xff]  ;;  %v7369_v41 = vpack.c.bf16 %v1637_v46, %v1629_v60  ;;  %v11394_v60 = vld [vmem:[#allocation70_spill] sm:$0xff] }
 0x2ec   :  { %7362 = vmatpush1.bf16.msra.mxu0 %v7361_v53  ;;  %3676 = vmatprep.mubr.f32.mxu0 %v11390_v16  ;;  %v7623_v53 = vpack.c.bf16 %v1640_v35, %v1632_v47  ;;  %v1647_v47 = vld [vmem:[#allocation9 + $0x1130] sm:$0xff] }
 0x2ed   :  { %4250 = vmatmul.mubr.f32.gmra.mrb[134].mxu1 %v11389_v61  ;;  %7364 = vmatprep.subr.bf16.mxu0 %v7363_v30  ;;  %v1648_v30 = vld [vmem:[#allocation9 + $0x1138] sm:$0xff]  ;;  %v1653_v61 = vld [vmem:[#allocation9 + $0x1160] sm:$0xff]  ;;  %v1655_v35 = vld [vmem:[#allocation9 + $0x1170] sm:$0xff] }
 0x2ee   :  { %7618 = vmatpush1.bf16.msra.mxu1 %v7617_v13  ;;  %4320 = vmatprep.mubr.f32.mxu1 %v11390_v16  ;;  %v7371_v13 = vpack.c.bf16 %v1654_v14, %v1646_v42  ;;  %v11393_v16 = vld [vmem:[#allocation69_spill] sm:$0xff]  ;;  %v7373_v46 = vpack.c.bf16 %v1653_v61, %v1645_v15  ;;  %v1672_v42 = vld [vmem:[#allocation9 + $0x11f8] sm:$0xff]  ;;  %v7629_v33 = vpack.c.bf16 %v1655_v35, %v1647_v47  ;;  %v1702_v35 = vld [vmem:[#allocation9 + $0x12e8] sm:$0xff] }
 0x2ef   :  { %3677 = vmatmul.mubr.f32.vlgmr.msra.gmra.mrb[88].mxu0 %v11391_v37  ;;  %7620 = vmatprep.subr.bf16.mxu1 %v7619_v28  ;;  %v1662_v28 = vld [vmem:[#allocation9 + $0x11a8] sm:$0xff]  ;;  %v11396_v15 = vld [vmem:[#allocation74_spill] sm:$0xff] }
 0x2f0   :  { %7366 = vmatpush1.bf16.msra.mxu0 %v7365_v39  ;;  %3682 = vmatprep.mubr.f32.mxu0 %v11392_v56  ;;  %v7627_v39 = vpack.c.bf16 %v1656_v44, %v1648_v30  ;;  %v7375_v14 = vpack.c.bf16 %v1670_v3, %v1662_v28  ;;  %v1663_v30 = vld [vmem:[#allocation9 + $0x11b0] sm:$0xff]  ;;  %v1688_v28 = vld [vmem:[#allocation9 + $0x1278] sm:$0xff] }
 0x2f1   :  { %4321 = vmatmul.mubr.f32.vlgmr.msra.gmra.mrb[104].mxu1 %v11391_v37  ;;  %7368 = vmatprep.subr.bf16.mxu0 %v7367_v27  ;;  %v1664_v27 = vld [vmem:[#allocation9 + $0x11b8] sm:$0xff]  ;;  %v1669_v37 = vld [vmem:[#allocation9 + $0x11e0] sm:$0xff]  ;;  %v1671_v44 = vld [vmem:[#allocation9 + $0x11f0] sm:$0xff] }
 0x2f2   :  { %4326 = vmatprep.mubr.f32.mxu1 %v11392_v56  ;;  %7622 = vmatpush1.bf16.msra.mxu1 %v7621_v55  ;;  %v1661_v55 = vld [vmem:[#allocation9 + $0x11a0] sm:$0xff]  ;;  %v11395_v56 = vld [vmem:[#allocation73_spill] sm:$0xff]  ;;  %v7633_v47 = vpack.c.bf16 %v1671_v44, %v1663_v30  ;;  %v1718_v44 = vld [vmem:[#allocation9 + $0x1368] sm:$0xff] }
 0x2f3   :  { %3683 = vmatmul.mubr.f32.gmra.mrb[90].mxu0 %v11393_v16  ;;  %7624 = vmatprep.subr.bf16.mxu1 %v7623_v53  ;;  %v1678_v53 = vld [vmem:[#allocation9 + $0x1228] sm:$0xff]  ;;  %v7377_v61 = vpack.c.bf16 %v1669_v37, %v1661_v55  ;;  %v11398_v55 = vld [vmem:[#allocation77_spill] sm:$0xff] }
 0x2f4   :  { %7370 = vmatpush1.bf16.msra.mxu0 %v7369_v41  ;;  %3688 = vmatprep.mubr.f32.mxu0 %v11394_v60  ;;  %v7631_v41 = vpack.c.bf16 %v1672_v42, %v1664_v27  ;;  %v7379_v3 = vpack.c.bf16 %v1686_v51, %v1678_v53  ;;  %v1679_v27 = vld [vmem:[#allocation9 + $0x1230] sm:$0xff]  ;;  %v1704_v53 = vld [vmem:[#allocation9 + $0x12f8] sm:$0xff] }
 0x2f5   :  { %4327 = vmatmul.mubr.f32.gmra.mrb[106].mxu1 %v11393_v16  ;;  %7372 = vmatprep.subr.bf16.mxu0 %v7371_v13  ;;  %v1680_v13 = vld [vmem:[#allocation9 + $0x1238] sm:$0xff]  ;;  %v1685_v16 = vld [vmem:[#allocation9 + $0x1260] sm:$0xff]  ;;  %v1687_v42 = vld [vmem:[#allocation9 + $0x1270] sm:$0xff] }
 0x2f6   :  { %4332 = vmatprep.mubr.f32.mxu1 %v11394_v60  ;;  %7626 = vmatpush1.bf16.msra.mxu1 %v7625_v18  ;;  %v1677_v18 = vld [vmem:[#allocation9 + $0x1220] sm:$0xff]  ;;  %v11397_v60 = vld [vmem:[#allocation76_spill] sm:$0xff]  ;;  %v7637_v30 = vpack.c.bf16 %v1687_v42, %v1679_v27 }
 0x2f7   :  { %3689 = vmatmul.mubr.f32.gmra.mrb[92].mxu0 %v11395_v56  ;;  %7628 = vmatprep.subr.bf16.mxu1 %v7627_v39  ;;  %v1694_v39 = vld [vmem:[#allocation9 + $0x12a8] sm:$0xff]  ;;  %v7381_v37 = vpack.c.bf16 %v1685_v16, %v1677_v18  ;;  %v11400_v18 = vld [vmem:[#allocation81_spill] sm:$0xff] }
 0x2f8   :  { %7374 = vmatpush1.bf16.msra.mxu0 %v7373_v46  ;;  %3694 = vmatprep.mubr.f32.mxu0 %v11396_v15  ;;  %v7635_v46 = vpack.c.bf16 %v1688_v28, %v1680_v13  ;;  %v7383_v51 = vpack.c.bf16 %v1702_v35, %v1694_v39  ;;  %v1695_v13 = vld [vmem:[#allocation9 + $0x12b0] sm:$0xff]  ;;  %v1720_v39 = vld [vmem:[#allocation9 + $0x1378] sm:$0xff]  ;;  %v1734_v42 = vld [vmem:[#allocation9 + $0x13e8] sm:$0xff] }
 0x2f9   :  { %4333 = vmatmul.mubr.f32.gmra.mrb[108].mxu1 %v11395_v56  ;;  %7376 = vmatprep.subr.bf16.mxu0 %v7375_v14  ;;  %v1696_v14 = vld [vmem:[#allocation9 + $0x12b8] sm:$0xff]  ;;  %v1701_v56 = vld [vmem:[#allocation9 + $0x12e0] sm:$0xff]  ;;  %v1703_v28 = vld [vmem:[#allocation9 + $0x12f0] sm:$0xff] }
 0x2fa   :  { %4338 = vmatprep.mubr.f32.mxu1 %v11396_v15  ;;  %7630 = vmatpush1.bf16.msra.mxu1 %v7629_v33  ;;  %v1693_v33 = vld [vmem:[#allocation9 + $0x12a0] sm:$0xff]  ;;  %v11399_v15 = vld [vmem:[#allocation80_spill] sm:$0xff]  ;;  %v7641_v27 = vpack.c.bf16 %v1703_v28, %v1695_v13 }
 0x2fb   :  { %3695 = vmatmul.mubr.f32.gmra.mrb[94].mxu0 %v11397_v60  ;;  %7632 = vmatprep.subr.bf16.mxu1 %v7631_v41  ;;  %v1710_v41 = vld [vmem:[#allocation9 + $0x1328] sm:$0xff]  ;;  %v7385_v16 = vpack.c.bf16 %v1701_v56, %v1693_v33  ;;  %v11402_v33 = vld [vmem:[#allocation85_spill] sm:$0xff] }
 0x2fc   :  { %7378 = vmatpush1.bf16.msra.mxu0 %v7377_v61  ;;  %3700 = vmatprep.mubr.f32.mxu0 %v11398_v55  ;;  %v7639_v61 = vpack.c.bf16 %v1704_v53, %v1696_v14  ;;  %v7387_v35 = vpack.c.bf16 %v1718_v44, %v1710_v41  ;;  %v1711_v14 = vld [vmem:[#allocation9 + $0x1330] sm:$0xff]  ;;  %v1736_v41 = vld [vmem:[#allocation9 + $0x13f8] sm:$0xff]  ;;  %v1750_v28 = vld [vmem:[#allocation9 + $0x1468] sm:$0xff] }
 0x2fd   :  { %4339 = vmatmul.mubr.f32.gmra.mrb[110].mxu1 %v11397_v60  ;;  %7380 = vmatprep.subr.bf16.mxu0 %v7379_v3  ;;  %v1712_v3 = vld [vmem:[#allocation9 + $0x1338] sm:$0xff]  ;;  %v1717_v60 = vld [vmem:[#allocation9 + $0x1360] sm:$0xff]  ;;  %v1719_v53 = vld [vmem:[#allocation9 + $0x1370] sm:$0xff] }
 0x2fe   :  { %4344 = vmatprep.mubr.f32.mxu1 %v11398_v55  ;;  %7634 = vmatpush1.bf16.msra.mxu1 %v7633_v47  ;;  %v1709_v47 = vld [vmem:[#allocation9 + $0x1320] sm:$0xff]  ;;  %v11401_v55 = vld [vmem:[#allocation84_spill] sm:$0xff]  ;;  %v7645_v13 = vpack.c.bf16 %v1719_v53, %v1711_v14 }
 0x2ff   :  { %3701 = vmatmul.mubr.f32.gmra.mrb[96].mxu0 %v11399_v15  ;;  %7636 = vmatprep.subr.bf16.mxu1 %v7635_v46  ;;  %v1726_v46 = vld [vmem:[#allocation9 + $0x13a8] sm:$0xff]  ;;  %v7389_v56 = vpack.c.bf16 %v1717_v60, %v1709_v47  ;;  %v11404_v47 = vld [vmem:[#allocation89_spill] sm:$0xff] }
 0x300   :  { %7382 = vmatpush1.bf16.msra.mxu0 %v7381_v37  ;;  %3706 = vmatprep.mubr.f32.mxu0 %v11400_v18  ;;  %v7643_v37 = vpack.c.bf16 %v1720_v39, %v1712_v3  ;;  %v7391_v44 = vpack.c.bf16 %v1734_v42, %v1726_v46  ;;  %v1727_v3 = vld [vmem:[#allocation9 + $0x13b0] sm:$0xff]  ;;  %v1752_v46 = vld [vmem:[#allocation9 + $0x1478] sm:$0xff]  ;;  %v1766_v53 = vld [vmem:[#allocation9 + $0x14e8] sm:$0xff] }
 0x301   :  { %4345 = vmatmul.mubr.f32.gmra.mrb[112].mxu1 %v11399_v15  ;;  %7384 = vmatprep.subr.bf16.mxu0 %v7383_v51  ;;  %v1728_v51 = vld [vmem:[#allocation9 + $0x13b8] sm:$0xff]  ;;  %v1733_v15 = vld [vmem:[#allocation9 + $0x13e0] sm:$0xff]  ;;  %v1735_v39 = vld [vmem:[#allocation9 + $0x13f0] sm:$0xff] }
 0x302   :  { %4350 = vmatprep.mubr.f32.mxu1 %v11400_v18  ;;  %7638 = vmatpush1.bf16.msra.mxu1 %v7637_v30  ;;  %v1725_v30 = vld [vmem:[#allocation9 + $0x13a0] sm:$0xff]  ;;  %v11403_v18 = vld [vmem:[#allocation88_spill] sm:$0xff]  ;;  %v7649_v14 = vpack.c.bf16 %v1735_v39, %v1727_v3 }
 0x303   :  { %3707 = vmatmul.mubr.f32.gmra.mrb[98].mxu0 %v11401_v55  ;;  %7640 = vmatprep.subr.bf16.mxu1 %v7639_v61  ;;  %v1742_v61 = vld [vmem:[#allocation9 + $0x1428] sm:$0xff]  ;;  %v7393_v60 = vpack.c.bf16 %v1733_v15, %v1725_v30  ;;  %v11406_v30 = vld [vmem:[#allocation93_spill] sm:$0xff] }
 0x304   :  { %7386 = vmatpush1.bf16.msra.mxu0 %v7385_v16  ;;  %3712 = vmatprep.mubr.f32.mxu0 %v11402_v33  ;;  %v7647_v16 = vpack.c.bf16 %v1736_v41, %v1728_v51  ;;  %v7395_v42 = vpack.c.bf16 %v1750_v28, %v1742_v61  ;;  %v1743_v51 = vld [vmem:[#allocation9 + $0x1430] sm:$0xff]  ;;  %v1768_v61 = vld [vmem:[#allocation9 + $0x14f8] sm:$0xff]  ;;  %v1782_v39 = vld [vmem:[#allocation9 + $0x1568] sm:$0xff] }
 0x305   :  { %4351 = vmatmul.mubr.f32.gmra.mrb[114].mxu1 %v11401_v55  ;;  %7388 = vmatprep.subr.bf16.mxu0 %v7387_v35  ;;  %v1744_v35 = vld [vmem:[#allocation9 + $0x1438] sm:$0xff]  ;;  %v1749_v55 = vld [vmem:[#allocation9 + $0x1460] sm:$0xff]  ;;  %v1751_v41 = vld [vmem:[#allocation9 + $0x1470] sm:$0xff] }
 0x306   :  { %4356 = vmatprep.mubr.f32.mxu1 %v11402_v33  ;;  %7642 = vmatpush1.bf16.msra.mxu1 %v7641_v27  ;;  %v1741_v27 = vld [vmem:[#allocation9 + $0x1420] sm:$0xff]  ;;  %v11405_v33 = vld [vmem:[#allocation92_spill] sm:$0xff]  ;;  %v7653_v3 = vpack.c.bf16 %v1751_v41, %v1743_v51 }
 0x307   :  { %3713 = vmatmul.mubr.f32.gmra.mrb[100].mxu0 %v11403_v18  ;;  %7644 = vmatprep.subr.bf16.mxu1 %v7643_v37  ;;  %v1758_v37 = vld [vmem:[#allocation9 + $0x14a8] sm:$0xff]  ;;  %v7397_v15 = vpack.c.bf16 %v1749_v55, %v1741_v27  ;;  %v11408_v27 = vld [vmem:[#allocation97_spill] sm:$0xff] }
 0x308   :  { %7390 = vmatpush1.bf16.msra.mxu0 %v7389_v56  ;;  %3718 = vmatprep.mubr.f32.mxu0 %v11404_v47  ;;  %v7651_v56 = vpack.c.bf16 %v1752_v46, %v1744_v35  ;;  %v7399_v28 = vpack.c.bf16 %v1766_v53, %v1758_v37  ;;  %v1759_v35 = vld [vmem:[#allocation9 + $0x14b0] sm:$0xff]  ;;  %v1784_v37 = vld [vmem:[#allocation9 + $0x1578] sm:$0xff]  ;;  %v1798_v41 = vld [vmem:[#allocation9 + $0x15e8] sm:$0xff] }
 0x309   :  { %4357 = vmatmul.mubr.f32.gmra.mrb[116].mxu1 %v11403_v18  ;;  %7392 = vmatprep.subr.bf16.mxu0 %v7391_v44  ;;  %v1760_v44 = vld [vmem:[#allocation9 + $0x14b8] sm:$0xff]  ;;  %v1765_v18 = vld [vmem:[#allocation9 + $0x14e0] sm:$0xff]  ;;  %v1767_v46 = vld [vmem:[#allocation9 + $0x14f0] sm:$0xff] }
 0x30a   :  { %4362 = vmatprep.mubr.f32.mxu1 %v11404_v47  ;;  %7646 = vmatpush1.bf16.msra.mxu1 %v7645_v13  ;;  %v1757_v13 = vld [vmem:[#allocation9 + $0x14a0] sm:$0xff]  ;;  %v11407_v47 = vld [vmem:[#allocation96_spill] sm:$0xff]  ;;  %v7657_v51 = vpack.c.bf16 %v1767_v46, %v1759_v35 }
 0x30b   :  { %3719 = vmatmul.mubr.f32.gmra.mrb[102].mxu0 %v11405_v33  ;;  %7648 = vmatprep.subr.bf16.mxu1 %v7647_v16  ;;  %v1774_v16 = vld [vmem:[#allocation9 + $0x1528] sm:$0xff]  ;;  %v7401_v55 = vpack.c.bf16 %v1765_v18, %v1757_v13  ;;  %v11410_v13 = vld [vmem:[#allocation101_spill] sm:$0xff] }
 0x30c   :  { %7394 = vmatpush1.bf16.msra.mxu0 %v7393_v60  ;;  %3724 = vmatprep.mubr.f32.mxu0 %v11406_v30  ;;  %v7655_v60 = vpack.c.bf16 %v1768_v61, %v1760_v44  ;;  %v7403_v53 = vpack.c.bf16 %v1782_v39, %v1774_v16  ;;  %v1775_v44 = vld [vmem:[#allocation9 + $0x1530] sm:$0xff]  ;;  %v1800_v16 = vld [vmem:[#allocation9 + $0x15f8] sm:$0xff]  ;;  %v1814_v46 = vld [vmem:[#allocation9 + $0x1668] sm:$0xff] }
 0x30d   :  { %4363 = vmatmul.mubr.f32.gmra.mrb[118].mxu1 %v11405_v33  ;;  %7396 = vmatprep.subr.bf16.mxu0 %v7395_v42  ;;  %v1776_v42 = vld [vmem:[#allocation9 + $0x1538] sm:$0xff]  ;;  %v1781_v33 = vld [vmem:[#allocation9 + $0x1560] sm:$0xff]  ;;  %v1783_v61 = vld [vmem:[#allocation9 + $0x1570] sm:$0xff] }
 0x30e   :  { %4368 = vmatprep.mubr.f32.mxu1 %v11406_v30  ;;  %7650 = vmatpush1.bf16.msra.mxu1 %v7649_v14  ;;  %v1773_v14 = vld [vmem:[#allocation9 + $0x1520] sm:$0xff]  ;;  %v11409_v30 = vld [vmem:[#allocation100_spill] sm:$0xff]  ;;  %v7661_v35 = vpack.c.bf16 %v1783_v61, %v1775_v44 }
 0x30f   :  { %3725 = vmatmul.mubr.f32.gmra.mrb[104].mxu0 %v11407_v47  ;;  %7652 = vmatprep.subr.bf16.mxu1 %v7651_v56  ;;  %v1790_v56 = vld [vmem:[#allocation9 + $0x15a8] sm:$0xff]  ;;  %v7405_v18 = vpack.c.bf16 %v1781_v33, %v1773_v14  ;;  %v11412_v14 = vld [vmem:[#allocation105_spill] sm:$0xff] }
 0x310   :  { %7398 = vmatpush1.bf16.msra.mxu0 %v7397_v15  ;;  %3730 = vmatprep.mubr.f32.mxu0 %v11408_v27  ;;  %v7659_v15 = vpack.c.bf16 %v1784_v37, %v1776_v42  ;;  %v7407_v39 = vpack.c.bf16 %v1798_v41, %v1790_v56  ;;  %v1791_v42 = vld [vmem:[#allocation9 + $0x15b0] sm:$0xff]  ;;  %v1816_v56 = vld [vmem:[#allocation9 + $0x1678] sm:$0xff]  ;;  %v1830_v61 = vld [vmem:[#allocation9 + $0x16e8] sm:$0xff] }
 0x311   :  { %4369 = vmatmul.mubr.f32.gmra.mrb[120].mxu1 %v11407_v47  ;;  %7400 = vmatprep.subr.bf16.mxu0 %v7399_v28  ;;  %v1792_v28 = vld [vmem:[#allocation9 + $0x15b8] sm:$0xff]  ;;  %v1797_v47 = vld [vmem:[#allocation9 + $0x15e0] sm:$0xff]  ;;  %v1799_v37 = vld [vmem:[#allocation9 + $0x15f0] sm:$0xff] }
 0x312   :  { %4374 = vmatprep.mubr.f32.mxu1 %v11408_v27  ;;  %7654 = vmatpush1.bf16.msra.mxu1 %v7653_v3  ;;  %v1789_v3 = vld [vmem:[#allocation9 + $0x15a0] sm:$0xff]  ;;  %v11411_v27 = vld [vmem:[#allocation104_spill] sm:$0xff]  ;;  %v7665_v44 = vpack.c.bf16 %v1799_v37, %v1791_v42 }
 0x313   :  { %3731 = vmatmul.mubr.f32.gmra.mrb[106].mxu0 %v11409_v30  ;;  %7656 = vmatprep.subr.bf16.mxu1 %v7655_v60  ;;  %v1806_v60 = vld [vmem:[#allocation9 + $0x1628] sm:$0xff]  ;;  %v7409_v33 = vpack.c.bf16 %v1797_v47, %v1789_v3 }
 0x314   :  { %7402 = vmatpush1.bf16.msra.mxu0 %v7401_v55  ;;  %3736 = vmatprep.mubr.f32.mxu0 %v11410_v13  ;;  %v7663_v55 = vpack.c.bf16 %v1800_v16, %v1792_v28  ;;  %v7411_v41 = vpack.c.bf16 %v1814_v46, %v1806_v60  ;;  %v1807_v28 = vld [vmem:[#allocation9 + $0x1630] sm:$0xff]  ;;  %v11414_v3 = vld [vmem:[#allocation108_spill] sm:$0xff]  ;;  %v1832_v60 = vld [vmem:[#allocation9 + $0x16f8] sm:$0xff] }
 0x315   :  { %4375 = vmatmul.mubr.f32.gmra.mrb[122].mxu1 %v11409_v30  ;;  %7404 = vmatprep.subr.bf16.mxu0 %v7403_v53  ;;  %v1808_v53 = vld [vmem:[#allocation9 + $0x1638] sm:$0xff]  ;;  %v1813_v30 = vld [vmem:[#allocation9 + $0x1660] sm:$0xff]  ;;  %v1815_v16 = vld [vmem:[#allocation9 + $0x1670] sm:$0xff] }
 0x316   :  { %4380 = vmatprep.mubr.f32.mxu1 %v11410_v13  ;;  %7658 = vmatpush1.bf16.msra.mxu1 %v7657_v51  ;;  %v1805_v51 = vld [vmem:[#allocation9 + $0x1620] sm:$0xff]  ;;  %v7669_v42 = vpack.c.bf16 %v1815_v16, %v1807_v28  ;;  %v1846_v37 = vld [vmem:[#allocation9 + $0x1768] sm:$0xff] }
 0x317   :  { %3737 = vmatmul.mubr.f32.gmra.mrb[108].mxu0 %v11411_v27  ;;  %7660 = vmatprep.subr.bf16.mxu1 %v7659_v15  ;;  %v1822_v15 = vld [vmem:[#allocation9 + $0x16a8] sm:$0xff]  ;;  %v11413_v13 = vld [vmem:[#allocation107_spill] sm:$0xff]  ;;  %v7413_v47 = vpack.c.bf16 %v1813_v30, %v1805_v51  ;;  %v11416_v51 = vld [vmem:[#allocation110_spill] sm:$0xff] }
 0x318   :  { %7406 = vmatpush1.bf16.msra.mxu0 %v7405_v18  ;;  %3742 = vmatprep.mubr.f32.mxu0 %v11412_v14  ;;  %v7667_v18 = vpack.c.bf16 %v1816_v56, %v1808_v53  ;;  %v7415_v46 = vpack.c.bf16 %v1830_v61, %v1822_v15  ;;  %v1823_v53 = vld [vmem:[#allocation9 + $0x16b0] sm:$0xff]  ;;  %v1848_v15 = vld [vmem:[#allocation9 + $0x1778] sm:$0xff]  ;;  %v1862_v16 = vld [vmem:[#allocation9 + $0x17e8] sm:$0xff] }
 0x319   :  { %4381 = vmatmul.mubr.f32.gmra.mrb[124].mxu1 %v11411_v27  ;;  %7408 = vmatprep.subr.bf16.mxu0 %v7407_v39  ;;  %v1824_v39 = vld [vmem:[#allocation9 + $0x16b8] sm:$0xff]  ;;  %v1829_v27 = vld [vmem:[#allocation9 + $0x16e0] sm:$0xff]  ;;  %v1831_v56 = vld [vmem:[#allocation9 + $0x16f0] sm:$0xff] }
 0x31a   :  { %4386 = vmatprep.mubr.f32.mxu1 %v11412_v14  ;;  %7662 = vmatpush1.bf16.msra.mxu1 %v7661_v35  ;;  %v1821_v35 = vld [vmem:[#allocation9 + $0x16a0] sm:$0xff]  ;;  %v11415_v14 = vld [vmem:[#allocation109_spill] sm:$0xff]  ;;  %v7673_v28 = vpack.c.bf16 %v1831_v56, %v1823_v53  ;;  %v1878_v56 = vld [vmem:[#allocation9 + $0x1868] sm:$0xff] }
 0x31b   :  { %3743 = vmatmul.mubr.f32.gmra.mrb[110].mxu0 %v11413_v13  ;;  %7664 = vmatprep.subr.bf16.mxu1 %v7663_v55  ;;  %v1838_v55 = vld [vmem:[#allocation9 + $0x1728] sm:$0xff]  ;;  %v7417_v30 = vpack.c.bf16 %v1829_v27, %v1821_v35 }
 0x31c   :  { %7410 = vmatpush1.bf16.msra.mxu0 %v7409_v33  ;;  %3748 = vmatprep.mubr.f32.mxu0 %v11414_v3  ;;  %v7671_v33 = vpack.c.bf16 %v1832_v60, %v1824_v39  ;;  %v7419_v61 = vpack.c.bf16 %v1846_v37, %v1838_v55  ;;  %v1839_v39 = vld [vmem:[#allocation9 + $0x1730] sm:$0xff]  ;;  %v11418_v35 = vld [vmem:[#allocation112_spill] sm:$0xff]  ;;  %v1864_v55 = vld [vmem:[#allocation9 + $0x17f8] sm:$0xff] }
 0x31d   :  { %4387 = vmatmul.mubr.f32.gmra.mrb[126].mxu1 %v11413_v13  ;;  %7412 = vmatprep.subr.bf16.mxu0 %v7411_v41  ;;  %v1840_v41 = vld [vmem:[#allocation9 + $0x1738] sm:$0xff]  ;;  %v1845_v13 = vld [vmem:[#allocation9 + $0x1760] sm:$0xff]  ;;  %v1847_v60 = vld [vmem:[#allocation9 + $0x1770] sm:$0xff] }
 0x31e   :  { %4392 = vmatprep.mubr.f32.mxu1 %v11414_v3  ;;  %7666 = vmatpush1.bf16.msra.mxu1 %v7665_v44  ;;  %v1837_v44 = vld [vmem:[#allocation9 + $0x1720] sm:$0xff]  ;;  %v7677_v53 = vpack.c.bf16 %v1847_v60, %v1839_v39  ;;  %v1894_v60 = vld [vmem:[#allocation9 + $0x18e8] sm:$0xff] }
 0x31f   :  { %3749 = vmatmul.mubr.f32.gmra.mrb[112].mxu0 %v11415_v14  ;;  %7668 = vmatprep.subr.bf16.mxu1 %v7667_v18  ;;  %v1854_v18 = vld [vmem:[#allocation9 + $0x17a8] sm:$0xff]  ;;  %v11417_v3 = vld [vmem:[#allocation111_spill] sm:$0xff]  ;;  %v7421_v27 = vpack.c.bf16 %v1845_v13, %v1837_v44 }
 0x320   :  { %7414 = vmatpush1.bf16.msra.mxu0 %v7413_v47  ;;  %3754 = vmatprep.mubr.f32.mxu0 %v11416_v51  ;;  %v7675_v47 = vpack.c.bf16 %v1848_v15, %v1840_v41  ;;  %v7423_v37 = vpack.c.bf16 %v1862_v16, %v1854_v18  ;;  %v1855_v41 = vld [vmem:[#allocation9 + $0x17b0] sm:$0xff]  ;;  %v11420_v44 = vld [vmem:[#allocation115_spill] sm:$0xff]  ;;  %v1880_v18 = vld [vmem:[#allocation9 + $0x1878] sm:$0xff] }
 0x321   :  { %4393 = vmatmul.mubr.f32.gmra.mrb[128].mxu1 %v11415_v14  ;;  %7416 = vmatprep.subr.bf16.mxu0 %v7415_v46  ;;  %v1856_v46 = vld [vmem:[#allocation9 + $0x17b8] sm:$0xff]  ;;  %v1861_v14 = vld [vmem:[#allocation9 + $0x17e0] sm:$0xff]  ;;  %v1863_v15 = vld [vmem:[#allocation9 + $0x17f0] sm:$0xff] }
 0x322   :  { %4398 = vmatprep.mubr.f32.mxu1 %v11416_v51  ;;  %7670 = vmatpush1.bf16.msra.mxu1 %v7669_v42  ;;  %v1853_v42 = vld [vmem:[#allocation9 + $0x17a0] sm:$0xff]  ;;  %v11419_v51 = vld [vmem:[#allocation114_spill] sm:$0xff]  ;;  %v7681_v39 = vpack.c.bf16 %v1863_v15, %v1855_v41  ;;  %v1910_v15 = vld [vmem:[#allocation9 + $0x1968] sm:$0xff] }
 0x323   :  { %3755 = vmatmul.mubr.f32.gmra.mrb[114].mxu0 %v11417_v3  ;;  %7672 = vmatprep.subr.bf16.mxu1 %v7671_v33  ;;  %v1870_v33 = vld [vmem:[#allocation9 + $0x1828] sm:$0xff]  ;;  %v7425_v13 = vpack.c.bf16 %v1861_v14, %v1853_v42  ;;  %v11422_v42 = vld [vmem:[#allocation117_spill] sm:$0xff] }
 0x324   :  { %7418 = vmatpush1.bf16.msra.mxu0 %v7417_v30  ;;  %3760 = vmatprep.mubr.f32.mxu0 %v11418_v35  ;;  %v7679_v30 = vpack.c.bf16 %v1864_v55, %v1856_v46  ;;  %v7427_v16 = vpack.c.bf16 %v1878_v56, %v1870_v33  ;;  %v1871_v46 = vld [vmem:[#allocation9 + $0x1830] sm:$0xff]  ;;  %v1896_v33 = vld [vmem:[#allocation9 + $0x18f8] sm:$0xff] }
 0x325   :  { %4399 = vmatmul.mubr.f32.gmra.mrb[130].mxu1 %v11417_v3  ;;  %7420 = vmatprep.subr.bf16.mxu0 %v7419_v61  ;;  %v1872_v61 = vld [vmem:[#allocation9 + $0x1838] sm:$0xff]  ;;  %v1877_v3 = vld [vmem:[#allocation9 + $0x1860] sm:$0xff]  ;;  %v1879_v55 = vld [vmem:[#allocation9 + $0x1870] sm:$0xff] }
 0x326   :  { %4404 = vmatprep.mubr.f32.mxu1 %v11418_v35  ;;  %7674 = vmatpush1.bf16.msra.mxu1 %v7673_v28  ;;  %v1869_v28 = vld [vmem:[#allocation9 + $0x1820] sm:$0xff]  ;;  %v11421_v35 = vld [vmem:[#allocation116_spill] sm:$0xff]  ;;  %v7685_v41 = vpack.c.bf16 %v1879_v55, %v1871_v46 }
 0x327   :  { %3761 = vmatmul.mubr.f32.gmra.mrb[116].mxu0 %v11419_v51  ;;  %7676 = vmatprep.subr.bf16.mxu1 %v7675_v47  ;;  %v1886_v47 = vld [vmem:[#allocation9 + $0x18a8] sm:$0xff]  ;;  %v7429_v14 = vpack.c.bf16 %v1877_v3, %v1869_v28  ;;  %v11424_v28 = vld [vmem:[#allocation119_spill] sm:$0xff] }
 0x328   :  { %7422 = vmatpush1.bf16.msra.mxu0 %v7421_v27  ;;  %3766 = vmatprep.mubr.f32.mxu0 %v11420_v44  ;;  %v7683_v27 = vpack.c.bf16 %v1880_v18, %v1872_v61  ;;  %v7431_v56 = vpack.c.bf16 %v1894_v60, %v1886_v47  ;;  %v1887_v61 = vld [vmem:[#allocation9 + $0x18b0] sm:$0xff]  ;;  %v1912_v47 = vld [vmem:[#allocation9 + $0x1978] sm:$0xff]  ;;  %v1901_v60 = vld [vmem:[#allocation9 + $0x1920] sm:$0xff] }
 0x329   :  { %4405 = vmatmul.mubr.f32.gmra.mrb[132].mxu1 %v11419_v51  ;;  %7424 = vmatprep.subr.bf16.mxu0 %v7423_v37  ;;  %v1888_v37 = vld [vmem:[#allocation9 + $0x18b8] sm:$0xff]  ;;  %v1893_v51 = vld [vmem:[#allocation9 + $0x18e0] sm:$0xff]  ;;  %v1895_v18 = vld [vmem:[#allocation9 + $0x18f0] sm:$0xff] }
 0x32a   :  { %4410 = vmatprep.mubr.f32.mxu1 %v11420_v44  ;;  %7678 = vmatpush1.bf16.msra.mxu1 %v7677_v53  ;;  %v1885_v53 = vld [vmem:[#allocation9 + $0x18a0] sm:$0xff]  ;;  %v11423_v44 = vld [vmem:[#allocation118_spill] sm:$0xff]  ;;  %v7689_v46 = vpack.c.bf16 %v1895_v18, %v1887_v61  ;;  %v1926_v55 = vld [vmem:[#allocation9 + $0x19e8] sm:$0xff] }
 0x32b   :  { %3767 = vmatmul.mubr.f32.gmra.mrb[118].mxu0 %v11421_v35  ;;  %7680 = vmatprep.subr.bf16.mxu1 %v7679_v30  ;;  %v1902_v30 = vld [vmem:[#allocation9 + $0x1928] sm:$0xff]  ;;  %v7433_v3 = vpack.c.bf16 %v1893_v51, %v1885_v53  ;;  %v1928_v51 = vld [vmem:[#allocation9 + $0x19f8] sm:$0xff] }
 0x32c   :  { %7426 = vmatpush1.bf16.msra.mxu0 %v7425_v13  ;;  %3837 = vmatprep.mubr.f32.mxu0 %v11422_v42  ;;  %v7687_v13 = vpack.c.bf16 %v1896_v33, %v1888_v37  ;;  %v1911_v37 = vld [vmem:[#allocation9 + $0x1970] sm:$0xff]  ;;  %v11425_v33 = vld [vmem:[#allocation120_spill] sm:$0xff] }
 0x32d   :  { %4411 = vmatmul.mubr.f32.gmra.mrb[134].mxu1 %v11421_v35  ;;  %7428 = vmatprep.subr.bf16.mxu0 %v7427_v16  ;;  %v1904_v16 = vld [vmem:[#allocation9 + $0x1938] sm:$0xff]  ;;  %v1909_v35 = vld [vmem:[#allocation9 + $0x1960] sm:$0xff]  ;;  %v1942_v61 = vld [vmem:[#allocation9 + $0x1a68] sm:$0xff] }
 0x32e   :  { %7682 = vmatpush1.bf16.msra.mxu1 %v7681_v39  ;;  %4481 = vmatprep.mubr.f32.mxu1 %v11422_v42  ;;  %v7435_v39 = vpack.c.bf16 %v1910_v15, %v1902_v30  ;;  %v7691_v42 = vpack.c.bf16 %v1912_v47, %v1904_v16  ;;  %v7437_v53 = vpack.c.bf16 %v1909_v35, %v1901_v60  ;;  %v1925_v15 = vld [vmem:[#allocation9 + $0x19e0] sm:$0xff]  ;;  %v11426_v16 = vld [vmem:[#allocation121_spill] sm:$0xff]  ;;  %v1936_v47 = vld [vmem:[#allocation9 + $0x1a38] sm:$0xff] }
 0x32f   :  { %3838 = vmatmul.mubr.f32.vlgmr.msra.gmra.mrb[88].mxu0 %v11423_v44  ;;  %7684 = vmatprep.subr.bf16.mxu1 %v7683_v27  ;;  %v1918_v27 = vld [vmem:[#allocation9 + $0x19a8] sm:$0xff]  ;;  %v1933_v35 = vld [vmem:[#allocation9 + $0x1a20] sm:$0xff] }
 0x330   :  { %7430 = vmatpush1.bf16.msra.mxu0 %v7429_v14  ;;  %3843 = vmatprep.mubr.f32.mxu0 %v11424_v28  ;;  %v1903_v14 = vld [vmem:[#allocation9 + $0x1930] sm:$0xff]  ;;  %v7439_v30 = vpack.c.bf16 %v1926_v55, %v1918_v27  ;;  %v1950_v55 = vld [vmem:[#allocation9 + $0x1aa8] sm:$0xff] }
 0x331   :  { %4482 = vmatmul.mubr.f32.vlgmr.msra.gmra.mrb[104].mxu1 %v11423_v44  ;;  %7432 = vmatprep.subr.bf16.mxu0 %v7431_v56  ;;  %v1920_v56 = vld [vmem:[#allocation9 + $0x19b8] sm:$0xff]  ;;  %v7693_v44 = vpack.c.bf16 %v1911_v37, %v1903_v14 }
 0x332   :  { %4487 = vmatprep.mubr.f32.mxu1 %v11424_v28  ;;  %7686 = vmatpush1.bf16.msra.mxu1 %v7685_v41  ;;  %v1917_v41 = vld [vmem:[#allocation9 + $0x19a0] sm:$0xff]  ;;  %v7695_v18 = vpack.c.bf16 %v1928_v51, %v1920_v56  ;;  %v1919_v28 = vld [vmem:[#allocation9 + $0x19b0] sm:$0xff]  ;;  %v11427_v14 = vld [vmem:[#allocation122_spill] sm:$0xff] }
 0x333   :  { %3844 = vmatmul.mubr.f32.gmra.mrb[90].mxu0 %v9935_v21  ;;  %7688 = vmatprep.subr.bf16.mxu1 %v7687_v13  ;;  %v1934_v13 = vld [vmem:[#allocation9 + $0x1a28] sm:$0xff]  ;;  %v11428_v56 = vld [vmem:[#allocation123_spill] sm:$0xff]  ;;  %v1952_v51 = vld [vmem:[#allocation9 + $0x1ab8] sm:$0xff] }
 0x334   :  { %7434 = vmatpush1.bf16.msra.mxu0 %v7433_v3  ;;  %3849 = vmatprep.mubr.f32.mxu0 %v11425_v33  ;;  %v1927_v3 = vld [vmem:[#allocation9 + $0x19f0] sm:$0xff]  ;;  %v7443_v60 = vpack.c.bf16 %v1942_v61, %v1934_v13  ;;  %v1966_v61 = vld [vmem:[#allocation9 + $0x1b28] sm:$0xff] }
 0x335   :  { %4488 = vmatmul.mubr.f32.gmra.mrb[106].mxu1 %v9935_v21  ;;  %7436 = vmatprep.subr.bf16.mxu0 %v7435_v39  ;;  %v7441_v21 = vpack.c.bf16 %v1925_v15, %v1917_v41  ;;  %v1944_v39 = vld [vmem:[#allocation9 + $0x1a78] sm:$0xff]  ;;  %v7697_v27 = vpack.c.bf16 %v1927_v3, %v1919_v28  ;;  %v1949_v15 = vld [vmem:[#allocation9 + $0x1aa0] sm:$0xff]  ;;  %v1951_v3 = vld [vmem:[#allocation9 + $0x1ab0] sm:$0xff] }
 0x336   :  { %4493 = vmatprep.mubr.f32.mxu1 %v11425_v33  ;;  %7690 = vmatpush1.bf16.msra.mxu1 %v7689_v46  ;;  %v1941_v46 = vld [vmem:[#allocation9 + $0x1a60] sm:$0xff]  ;;  %v7699_v37 = vpack.c.bf16 %v1944_v39, %v1936_v47  ;;  %v1935_v33 = vld [vmem:[#allocation9 + $0x1a30] sm:$0xff]  ;;  %v1968_v39 = vld [vmem:[#allocation9 + $0x1b38] sm:$0xff] }
 0x337   :  { %3850 = vmatmul.mubr.f32.gmra.mrb[92].mxu0 %v9951_v12  ;;  %7692 = vmatprep.subr.bf16.mxu1 %v7691_v42  ;;  %v1958_v42 = vld [vmem:[#allocation9 + $0x1ae8] sm:$0xff] }
 0x338   :  { %7438 = vmatpush1.bf16.msra.mxu0 %v7437_v53  ;;  %3855 = vmatprep.mubr.f32.mxu0 %v11426_v16  ;;  %v1943_v53 = vld [vmem:[#allocation9 + $0x1a70] sm:$0xff]  ;;  %v7447_v41 = vpack.c.bf16 %v1958_v42, %v1950_v55 }
 0x339   :  { %4494 = vmatmul.mubr.f32.gmra.mrb[108].mxu1 %v9951_v12  ;;  %7440 = vmatprep.subr.bf16.mxu0 %v7439_v30  ;;  %v7445_v12 = vpack.c.bf16 %v1941_v46, %v1933_v35  ;;  %v1960_v30 = vld [vmem:[#allocation9 + $0x1af8] sm:$0xff]  ;;  %v7701_v13 = vpack.c.bf16 %v1943_v53, %v1935_v33  ;;  %v1965_v46 = vld [vmem:[#allocation9 + $0x1b20] sm:$0xff] }
 0x33a   :  { %4499 = vmatprep.mubr.f32.mxu1 %v11426_v16  ;;  %7694 = vmatpush1.bf16.msra.mxu1 %v7693_v44  ;;  %v1957_v44 = vld [vmem:[#allocation9 + $0x1ae0] sm:$0xff]  ;;  %v7703_v28 = vpack.c.bf16 %v1960_v30, %v1952_v51  ;;  %v1959_v16 = vld [vmem:[#allocation9 + $0x1af0] sm:$0xff]  ;;  %v11430_v30 = vld [vmem:[#allocation64_spill] sm:$0xff] }
 0x33b   :  { %3856 = vmatmul.mubr.f32.gmra.mrb[94].mxu0 %v11427_v14  ;;  %7696 = vmatprep.subr.bf16.mxu1 %v7695_v18  ;;  %v1974_v18 = vld [vmem:[#allocation9 + $0x1b68] sm:$0xff]  ;;  %v7449_v47 = vpack.c.bf16 %v1957_v44, %v1949_v15  ;;  %v7705_v42 = vpack.c.bf16 %v1959_v16, %v1951_v3  ;;  %v1984_v15 = vld [vmem:[#allocation9 + $0x1bb8] sm:$0xff] }
 0x33c   :  { %7442 = vmatpush1.bf16.msra.mxu0 %v7441_v21  ;;  %3861 = vmatprep.mubr.f32.mxu0 %v11428_v56  ;;  %v11429_v21 = vld [vmem:[#allocation67_spill] sm:$0xff]  ;;  %v7451_v35 = vpack.c.bf16 %v1974_v18, %v1966_v61  ;;  %v1992_v44 = vld [vmem:[#allocation9 + $0x1bf8] sm:$0xff]  ;;  %v1998_v16 = vld [vmem:[#allocation9 + $0x1c28] sm:$0xff] }
 0x33d   :  { %4500 = vmatmul.mubr.f32.gmra.mrb[110].mxu1 %v11427_v14  ;;  %7444 = vmatprep.subr.bf16.mxu0 %v7443_v60  ;;  %v1976_v60 = vld [vmem:[#allocation9 + $0x1b78] sm:$0xff]  ;;  %v1982_v14 = vld [vmem:[#allocation9 + $0x1ba8] sm:$0xff]  ;;  %v1981_v61 = vld [vmem:[#allocation9 + $0x1ba0] sm:$0xff] }
 0x33e   :  { %4505 = vmatprep.mubr.f32.mxu1 %v11428_v56  ;;  %7698 = vmatpush1.bf16.msra.mxu1 %v7697_v27  ;;  %v1973_v27 = vld [vmem:[#allocation9 + $0x1b60] sm:$0xff]  ;;  %v1967_v56 = vld [vmem:[#allocation9 + $0x1b30] sm:$0xff] }
 0x33f   :  { %3862 = vmatmul.mubr.f32.gmra.mrb[96].mxu0 %v9977_v7  ;;  %7700 = vmatprep.subr.bf16.mxu1 %v7699_v37  ;;  %v1990_v37 = vld [vmem:[#allocation9 + $0x1be8] sm:$0xff]  ;;  %v1989_v18 = vld [vmem:[#allocation9 + $0x1be0] sm:$0xff] }
 0x340   :  { %7446 = vmatpush1.bf16.msra.mxu0 %v7445_v12  ;;  %3867 = vmatprep.mubr.f32.mxu0 %v11429_v21  ;;  %v1975_v12 = vld [vmem:[#allocation9 + $0x1b70] sm:$0xff] }
 0x341   :  { %4506 = vmatmul.mubr.f32.gmra.mrb[112].mxu1 %v9977_v7  ;;  %7448 = vmatprep.subr.bf16.mxu0 %v7447_v41  ;;  %v7707_v7 = vpack.c.bf16 %v1976_v60, %v1968_v39  ;;  %v7453_v41 = vpack.c.bf16 %v1973_v27, %v1965_v46  ;;  %v7709_v3 = vpack.c.bf16 %v1975_v12, %v1967_v56  ;;  %v1983_v60 = vld [vmem:[#allocation9 + $0x1bb0] sm:$0xff]  ;;  %v1997_v56 = vld [vmem:[#allocation9 + $0x1c20] sm:$0xff] }
 0x342   :  { %4511 = vmatprep.mubr.f32.mxu1 %v11429_v21  ;;  %7702 = vmatpush1.bf16.msra.mxu1 %v7701_v13  ;;  %v10467_v55 = vpop.f32.mrb[56].mxu0  ;;  %v7455_v13 = vpack.c.bf16 %v1990_v37, %v1982_v14  ;;  %v2006_v21 = vld [vmem:[#allocation9 + $0x1c68] sm:$0xff]  ;;  %v7457_v27 = vpack.c.bf16 %v1989_v18, %v1981_v61  ;;  %v2008_v14 = vld [vmem:[#allocation9 + $0x1c78] sm:$0xff]  ;;  %v2005_v12 = vld [vmem:[#allocation9 + $0x1c60] sm:$0xff] }
 0x343   :  { %v10469_v33 = vpop.f32.mrb[72].mxu1  ;;  %v10471_v53 = vpop.f32.mrb[57].mxu0  ;;  %3868 = vmatmul.mubr.f32.gmra.mrb[98].mxu0 %v9989_v50  ;;  %7704 = vmatprep.subr.bf16.mxu1 %v7703_v28  ;;  %v7459_v37 = vpack.c.bf16 %v2006_v21, %v1998_v16  ;;  %v2007_v61 = vld [vmem:[#allocation9 + $0x1c70] sm:$0xff]  ;;  %v2024_v16 = vld [vmem:[#allocation9 + $0x1cf8] sm:$0xff] }
 0x344   :  { %v10474_v51 = vpop.f32.mrb[73].mxu1  ;;  %7450 = vmatpush1.bf16.msra.mxu0 %v7449_v47  ;;  %3873 = vmatprep.mubr.f32.mxu0 %v11430_v30 }
 0x345   :  { %4512 = vmatmul.mubr.f32.gmra.mrb[114].mxu1 %v9989_v50  ;;  %7452 = vmatprep.subr.bf16.mxu0 %v7451_v35  ;;  %v7711_v50 = vpack.c.bf16 %v1992_v44, %v1984_v15  ;;  %v1991_v35 = vld [vmem:[#allocation9 + $0x1bf0] sm:$0xff]  ;;  %v2014_v15 = vld [vmem:[#allocation9 + $0x1ca8] sm:$0xff] }
 0x346   :  { %4517 = vmatprep.mubr.f32.mxu1 %v11430_v30  ;;  %7706 = vmatpush1.bf16.msra.mxu1 %v7705_v42  ;;  %v10479_v28 = vpop.f32.mrb[58].mxu0  ;;  %v2000_v42 = vld [vmem:[#allocation9 + $0x1c38] sm:$0xff]  ;;  %v7713_v30 = vpack.c.bf16 %v1991_v35, %v1983_v60  ;;  %v2022_v44 = vld [vmem:[#allocation9 + $0x1ce8] sm:$0xff]  ;;  %v2013_v60 = vld [vmem:[#allocation9 + $0x1ca0] sm:$0xff] }
 0x347   :  { %v10481_v47 = vpop.f32.mrb[74].mxu1  ;;  %v10483_v39 = vpop.f32.mrb[59].mxu0  ;;  %3874 = vmatmul.mubr.f32.gmra.mrb[100].mxu0 %v10001_v63  ;;  %7708 = vmatprep.subr.bf16.mxu1 %v7707_v7  ;;  %v7463_v21 = vpack.c.bf16 %v2022_v44, %v2014_v15  ;;  %v2021_v35 = vld [vmem:[#allocation9 + $0x1ce0] sm:$0xff]  ;;  %v2040_v15 = vld [vmem:[#allocation9 + $0x1d78] sm:$0xff] }
 0x348   :  { %11431 = vst [vmem:[#allocation102_spill] sm:$0xff] %v10481_v47  ;;  %v10486_v46 = vpop.f32.mrb[75].mxu1  ;;  %7454 = vmatpush1.bf16.msra.mxu0 %v7453_v41  ;;  %3879 = vmatprep.mubr.f32.mxu0 %v10005_v10 }
 0x349   :  { %4518 = vmatmul.mubr.f32.gmra.mrb[116].mxu1 %v10001_v63  ;;  %7456 = vmatprep.subr.bf16.mxu0 %v7455_v13  ;;  %v7715_v63 = vpack.c.bf16 %v2008_v14, %v2000_v42  ;;  %v1999_v13 = vld [vmem:[#allocation9 + $0x1c30] sm:$0xff]  ;;  %v2030_v14 = vld [vmem:[#allocation9 + $0x1d28] sm:$0xff] }
 0x34a   :  { %4523 = vmatprep.mubr.f32.mxu1 %v10005_v10  ;;  %7710 = vmatpush1.bf16.msra.mxu1 %v7709_v3  ;;  %v10491_v7 = vpop.f32.mrb[60].mxu0  ;;  %v7461_v10 = vpack.c.bf16 %v2005_v12, %v1997_v56  ;;  %v2016_v3 = vld [vmem:[#allocation9 + $0x1cb8] sm:$0xff]  ;;  %v7717_v42 = vpack.c.bf16 %v2007_v61, %v1999_v13  ;;  %v2023_v56 = vld [vmem:[#allocation9 + $0x1cf0] sm:$0xff]  ;;  %v2029_v13 = vld [vmem:[#allocation9 + $0x1d20] sm:$0xff] }
 0x34b   :  { %11432 = vst [vmem:[#allocation99_spill] sm:$0xff] %v10491_v7  ;;  %v10493_v41 = vpop.f32.mrb[76].mxu1  ;;  %v10495_v47 = vpop.f32.mrb[61].mxu0  ;;  %3880 = vmatmul.mubr.f32.gmra.mrb[102].mxu0 %v10013_v19  ;;  %7712 = vmatprep.subr.bf16.mxu1 %v7711_v50  ;;  %v2037_v61 = vld [vmem:[#allocation9 + $0x1d60] sm:$0xff] }
 0x34c   :  { %11433 = vst [vmem:[#allocation106_spill] sm:$0xff] %v10493_v41  ;;  %v10498_v18 = vpop.f32.mrb[77].mxu1  ;;  %7458 = vmatpush1.bf16.msra.mxu0 %v7457_v27  ;;  %3885 = vmatprep.mubr.f32.mxu0 %v10017_v17  ;;  %v2038_v41 = vld [vmem:[#allocation9 + $0x1d68] sm:$0xff] }
 0x34d   :  { %4524 = vmatmul.mubr.f32.gmra.mrb[118].mxu1 %v10013_v19  ;;  %7460 = vmatprep.subr.bf16.mxu0 %v7459_v37  ;;  %v7719_v19 = vpack.c.bf16 %v2024_v16, %v2016_v3  ;;  %v2015_v37 = vld [vmem:[#allocation9 + $0x1cb0] sm:$0xff]  ;;  %v7467_v44 = vpack.c.bf16 %v2038_v41, %v2030_v14  ;;  %v2046_v16 = vld [vmem:[#allocation9 + $0x1da8] sm:$0xff] }
 0x34e   :  { %4529 = vmatprep.mubr.f32.mxu1 %v10017_v17  ;;  %7714 = vmatpush1.bf16.msra.mxu1 %v7713_v30  ;;  %v10503_v50 = vpop.f32.mrb[62].mxu0  ;;  %v7465_v17 = vpack.c.bf16 %v2021_v35, %v2013_v60  ;;  %v2032_v30 = vld [vmem:[#allocation9 + $0x1d38] sm:$0xff]  ;;  %v7721_v3 = vpack.c.bf16 %v2023_v56, %v2015_v37  ;;  %v2039_v41 = vld [vmem:[#allocation9 + $0x1d70] sm:$0xff]  ;;  %v2045_v37 = vld [vmem:[#allocation9 + $0x1da0] sm:$0xff] }
 0x34f   :  { %11434 = vst [vmem:[#allocation103_spill] sm:$0xff] %v10503_v50  ;;  %v10505_v27 = vpop.f32.mrb[78].mxu1  ;;  %v10507_v7 = vpop.f32.mrb[63].mxu0  ;;  %3886 = vmatmul.mubr.f32.gmra.mrb[104].mxu0 %v10025_v11  ;;  %7716 = vmatprep.subr.bf16.mxu1 %v7715_v63  ;;  %v2048_v35 = vld [vmem:[#allocation9 + $0x1db8] sm:$0xff]  ;;  %v2053_v56 = vld [vmem:[#allocation9 + $0x1de0] sm:$0xff] }
 0x350   :  { %11435 = vst [vmem:[#allocation113_spill] sm:$0xff] %v10505_v27  ;;  %v10510_v12 = vpop.f32.mrb[79].mxu1  ;;  %7462 = vmatpush1.bf16.msra.mxu0 %v7461_v10  ;;  %3891 = vmatprep.mubr.f32.mxu0 %v10029_v24  ;;  %v2054_v27 = vld [vmem:[#allocation9 + $0x1de8] sm:$0xff] }
 0x351   :  { %4530 = vmatmul.mubr.f32.gmra.mrb[120].mxu1 %v10025_v11  ;;  %7464 = vmatprep.subr.bf16.mxu0 %v7463_v21  ;;  %v7723_v11 = vpack.c.bf16 %v2040_v15, %v2032_v30  ;;  %v2031_v21 = vld [vmem:[#allocation9 + $0x1d30] sm:$0xff]  ;;  %v7471_v14 = vpack.c.bf16 %v2054_v27, %v2046_v16  ;;  %v2062_v15 = vld [vmem:[#allocation9 + $0x1e28] sm:$0xff] }
 0x352   :  { %4535 = vmatprep.mubr.f32.mxu1 %v10029_v24  ;;  %7718 = vmatpush1.bf16.msra.mxu1 %v7717_v42  ;;  %v10515_v63 = vpop.f32.mrb[64].mxu0  ;;  %v7469_v24 = vpack.c.bf16 %v2037_v61, %v2029_v13  ;;  %v2056_v42 = vld [vmem:[#allocation9 + $0x1df8] sm:$0xff]  ;;  %v7725_v30 = vpack.c.bf16 %v2039_v41, %v2031_v21  ;;  %v2055_v27 = vld [vmem:[#allocation9 + $0x1df0] sm:$0xff]  ;;  %v2061_v21 = vld [vmem:[#allocation9 + $0x1e20] sm:$0xff] }
 0x353   :  { %11436 = vst [vmem:[#allocation31_spill] sm:$0xff] %v10515_v63  ;;  %v10517_v10 = vpop.f32.mrb[80].mxu1  ;;  %v10519_v50 = vpop.f32.mrb[65].mxu0  ;;  %3892 = vmatmul.mubr.f32.gmra.mrb[106].mxu0 %v10037_v36  ;;  %7720 = vmatprep.subr.bf16.mxu1 %v7719_v19  ;;  %v2064_v61 = vld [vmem:[#allocation9 + $0x1e38] sm:$0xff]  ;;  %v2069_v41 = vld [vmem:[#allocation9 + $0x1e60] sm:$0xff] }
 0x354   :  { %11437 = vst [vmem:[#allocation32_spill] sm:$0xff] %v10517_v10  ;;  %v10522_v60 = vpop.f32.mrb[81].mxu1  ;;  %7466 = vmatpush1.bf16.msra.mxu0 %v7465_v17  ;;  %3897 = vmatprep.mubr.f32.mxu0 %v10041_v31  ;;  %v2070_v10 = vld [vmem:[#allocation9 + $0x1e68] sm:$0xff] }
 0x355   :  { %4536 = vmatmul.mubr.f32.gmra.mrb[122].mxu1 %v10037_v36  ;;  %7468 = vmatprep.subr.bf16.mxu0 %v7467_v44  ;;  %v7727_v36 = vpack.c.bf16 %v2056_v42, %v2048_v35  ;;  %v2047_v44 = vld [vmem:[#allocation9 + $0x1db0] sm:$0xff]  ;;  %v7475_v16 = vpack.c.bf16 %v2070_v10, %v2062_v15  ;;  %v2078_v42 = vld [vmem:[#allocation9 + $0x1ea8] sm:$0xff]  ;;  %v2088_v15 = vld [vmem:[#allocation9 + $0x1ef8] sm:$0xff] }
 0x356   :  { %4541 = vmatprep.mubr.f32.mxu1 %v10041_v31  ;;  %7722 = vmatpush1.bf16.msra.mxu1 %v7721_v3  ;;  %v10527_v19 = vpop.f32.mrb[66].mxu0  ;;  %v7473_v31 = vpack.c.bf16 %v2053_v56, %v2045_v37  ;;  %v2072_v3 = vld [vmem:[#allocation9 + $0x1e78] sm:$0xff]  ;;  %v7729_v35 = vpack.c.bf16 %v2055_v27, %v2047_v44  ;;  %v2071_v10 = vld [vmem:[#allocation9 + $0x1e70] sm:$0xff]  ;;  %v7477_v56 = vpack.c.bf16 %v2069_v41, %v2061_v21  ;;  %v2077_v27 = vld [vmem:[#allocation9 + $0x1ea0] sm:$0xff] }
 0x357   :  { %11438 = vst [vmem:[#allocation33_spill] sm:$0xff] %v10527_v19  ;;  %v10529_v17 = vpop.f32.mrb[82].mxu1  ;;  %v10531_v63 = vpop.f32.mrb[67].mxu0  ;;  %3898 = vmatmul.mubr.f32.gmra.mrb[108].mxu0 %v10049_v52  ;;  %7724 = vmatprep.subr.bf16.mxu1 %v7723_v11 }
 0x358   :  { %11439 = vst [vmem:[#allocation34_spill] sm:$0xff] %v10529_v17  ;;  %v10534_v13 = vpop.f32.mrb[83].mxu1  ;;  %7470 = vmatpush1.bf16.msra.mxu0 %v7469_v24  ;;  %3903 = vmatprep.mubr.f32.mxu0 %v10053_v48  ;;  %v2086_v17 = vld [vmem:[#allocation9 + $0x1ee8] sm:$0xff] }
 0x359   :  { %4542 = vmatmul.mubr.f32.gmra.mrb[124].mxu1 %v10049_v52  ;;  %7472 = vmatprep.subr.bf16.mxu0 %v7471_v14  ;;  %v7731_v52 = vpack.c.bf16 %v2072_v3, %v2064_v61  ;;  %v2063_v14 = vld [vmem:[#allocation9 + $0x1e30] sm:$0xff]  ;;  %v7479_v44 = vpack.c.bf16 %v2086_v17, %v2078_v42  ;;  %v2094_v3 = vld [vmem:[#allocation9 + $0x1f28] sm:$0xff]  ;;  %v2104_v42 = vld [vmem:[#allocation9 + $0x1f78] sm:$0xff] }
 0x35a   :  { %4547 = vmatprep.mubr.f32.mxu1 %v10053_v48  ;;  %7726 = vmatpush1.bf16.msra.mxu1 %v7725_v30  ;;  %v10539_v11 = vpop.f32.mrb[68].mxu0  ;;  %v11443_v48 = vld [vmem:[#allocation71_spill] sm:$0xff]  ;;  %v2080_v30 = vld [vmem:[#allocation9 + $0x1eb8] sm:$0xff]  ;;  %v7733_v61 = vpack.c.bf16 %v2071_v10, %v2063_v14  ;;  %v2087_v17 = vld [vmem:[#allocation9 + $0x1ef0] sm:$0xff] }
 0x35b   :  { %11440 = vst [vmem:[#allocation35_spill] sm:$0xff] %v10539_v11  ;;  %v10541_v24 = vpop.f32.mrb[84].mxu1  ;;  %v10543_v19 = vpop.f32.mrb[69].mxu0  ;;  %3904 = vmatmul.mubr.f32.gmra.mrb[110].mxu0 %v10061_v25  ;;  %7728 = vmatprep.subr.bf16.mxu1 %v7727_v36  ;;  %v2102_v11 = vld [vmem:[#allocation9 + $0x1f68] sm:$0xff]  ;;  %v2093_v10 = vld [vmem:[#allocation9 + $0x1f20] sm:$0xff] }
 0x35c   :  { %11441 = vst [vmem:[#allocation36_spill] sm:$0xff] %v10541_v24  ;;  %v10546_v37 = vpop.f32.mrb[85].mxu1  ;;  %7474 = vmatpush1.bf16.msra.mxu0 %v7473_v31  ;;  %3909 = vmatprep.mubr.f32.mxu0 %v11443_v48  ;;  %v2085_v24 = vld [vmem:[#allocation9 + $0x1ee0] sm:$0xff]  ;;  %v7483_v14 = vpack.c.bf16 %v2102_v11, %v2094_v3  ;;  %v2103_v11 = vld [vmem:[#allocation9 + $0x1f70] sm:$0xff] }
 0x35d   :  { %11442 = vst [vmem:[#allocation37_spill] sm:$0xff] %v10546_v37  ;;  %4548 = vmatmul.mubr.f32.gmra.mrb[126].mxu1 %v10061_v25  ;;  %7476 = vmatprep.subr.bf16.mxu0 %v7475_v16  ;;  %v7735_v25 = vpack.c.bf16 %v2088_v15, %v2080_v30  ;;  %v2079_v16 = vld [vmem:[#allocation9 + $0x1eb0] sm:$0xff]  ;;  %v7481_v41 = vpack.c.bf16 %v2085_v24, %v2077_v27  ;;  %v2110_v15 = vld [vmem:[#allocation9 + $0x1fa8] sm:$0xff]  ;;  %v2112_v27 = vld [vmem:[#allocation9 + $0x1fb8] sm:$0xff] }
 0x35e   :  { %4553 = vmatprep.mubr.f32.mxu1 %v11443_v48  ;;  %7730 = vmatpush1.bf16.msra.mxu1 %v7729_v35  ;;  %v10551_v36 = vpop.f32.mrb[70].mxu0  ;;  %v2096_v35 = vld [vmem:[#allocation9 + $0x1f38] sm:$0xff]  ;;  %v2101_v48 = vld [vmem:[#allocation9 + $0x1f60] sm:$0xff]  ;;  %v7737_v30 = vpack.c.bf16 %v2087_v17, %v2079_v16  ;;  %v2095_v24 = vld [vmem:[#allocation9 + $0x1f30] sm:$0xff] }
 0x35f   :  { %11444 = vst [vmem:[#allocation38_spill] sm:$0xff] %v10551_v36  ;;  %v10553_v31 = vpop.f32.mrb[86].mxu1  ;;  %v10555_v37 = vpop.f32.mrb[71].mxu0  ;;  %3910 = vmatmul.mubr.f32.gmra.mrb[112].mxu0 %v10073_v6  ;;  %7732 = vmatprep.subr.bf16.mxu1 %v7731_v52  ;;  %v2109_v16 = vld [vmem:[#allocation9 + $0x1fa0] sm:$0xff] }
 0x360   :  { %11445 = vst [vmem:[#allocation39_spill] sm:$0xff] %v10553_v31  ;;  %v10558_v21 = vpop.f32.mrb[87].mxu1  ;;  %7478 = vmatpush1.bf16.msra.mxu0 %v7477_v56  ;;  %3915 = vmatprep.mubr.f32.mxu0 %v10077_v45  ;;  %v2118_v31 = vld [vmem:[#allocation9 + $0x1fe8] sm:$0xff]  ;;  %v2117_v17 = vld [vmem:[#allocation9 + $0x1fe0] sm:$0xff] }
 0x361   :  { %4554 = vmatmul.mubr.f32.gmra.mrb[128].mxu1 %v10073_v6  ;;  %7480 = vmatprep.subr.bf16.mxu0 %v7479_v44  ;;  %v7739_v6 = vpack.c.bf16 %v2104_v42, %v2096_v35  ;;  %v7487_v3 = vpack.c.bf16 %v2118_v31, %v2110_v15  ;;  %v7741_v35 = vpack.c.bf16 %v2103_v11, %v2095_v24  ;;  %v4883_v42 = vld [vmem:[#allocation12 + $0x80] sm:$0xff]  ;;  %v2119_v31 = vld [vmem:[#allocation9 + $0x1ff0] sm:$0xff] }
 0x362   :  { %4559 = vmatprep.mubr.f32.mxu1 %v10077_v45  ;;  %7734 = vmatpush1.bf16.msra.mxu1 %v7733_v61  ;;  %v10563_v52 = vpop.f32.mrb[72].mxu0  ;;  %v7485_v45 = vpack.c.bf16 %v2101_v48, %v2093_v10  ;;  %v2120_v61 = vld [vmem:[#allocation9 + $0x1ff8] sm:$0xff]  ;;  %v4915_v48 = vld [vmem:[#allocation12 + $0x180] sm:$0xff]  ;;  %v4868_v11 = vld [vmem:[#allocation12 + $0x8] sm:$0xff] }
 0x363   :  { %11446 = vst [vmem:[#allocation40_spill] sm:$0xff] %v10563_v52  ;;  %v10565_v56 = vpop.f32.mrb[88].mxu1  ;;  %v10567_v36 = vpop.f32.mrb[73].mxu0  ;;  %3916 = vmatmul.mubr.f32.gmra.mrb[114].mxu0 %v10087_v59  ;;  %7736 = vmatprep.subr.bf16.mxu1 %v7735_v25  ;;  %v4867_v24 = vld [vmem:[#allocation12] sm:$0xff] }
 0x364   :  { %11447 = vst [vmem:[#allocation41_spill] sm:$0xff] %v10565_v56  ;;  %v10570_v44 = vpop.f32.mrb[89].mxu1  ;;  %7482 = vmatpush1.bf16.msra.mxu0 %v7481_v41  ;;  %3921 = vmatprep.mubr.f32.mxu0 %v10091_v20  ;;  %v4884_v56 = vld [vmem:[#allocation12 + $0x88] sm:$0xff] }
 0x365   :  { %4560 = vmatmul.mubr.f32.gmra.mrb[130].mxu1 %v10087_v59  ;;  %7484 = vmatprep.subr.bf16.mxu0 %v7483_v14  ;;  %v7743_v59 = vpack.c.bf16 %v2120_v61, %v2112_v27  ;;  %v2111_v14 = vld [vmem:[#allocation9 + $0x1fb0] sm:$0xff]  ;;  %v7747_v15 = vpack.c.bf16 %v4884_v56, %v4883_v42  ;;  %v4885_v61 = vld [vmem:[#allocation12 + $0x90] sm:$0xff] }
 0x366   :  { %4565 = vmatprep.mubr.f32.mxu1 %v10091_v20  ;;  %7738 = vmatpush1.bf16.msra.mxu1 %v7737_v30  ;;  %v10575_v25 = vpop.f32.mrb[74].mxu0  ;;  %v7489_v20 = vpack.c.bf16 %v2117_v17, %v2109_v16  ;;  %v4916_v30 = vld [vmem:[#allocation12 + $0x188] sm:$0xff]  ;;  %v7745_v27 = vpack.c.bf16 %v2119_v31, %v2111_v14  ;;  %v11453_v16 = vld [vmem:[#allocation68_spill] sm:$0xff]  ;;  %v4917_v42 = vld [vmem:[#allocation12 + $0x190] sm:$0xff] }
 0x367   :  { %11448 = vst [vmem:[#allocation42_spill] sm:$0xff] %v10575_v25  ;;  %v10577_v41 = vpop.f32.mrb[90].mxu1  ;;  %v10579_v52 = vpop.f32.mrb[75].mxu0  ;;  %3922 = vmatmul.mubr.f32.gmra.mrb[116].mxu0 %v10109_v57  ;;  %7740 = vmatprep.subr.bf16.mxu1 %v7739_v6  ;;  %v4900_v56 = vld [vmem:[#allocation12 + $0x108] sm:$0xff]  ;;  %v4918_v14 = vld [vmem:[#allocation12 + $0x198] sm:$0xff] }
 0x368   :  { %11449 = vst [vmem:[#allocation43_spill] sm:$0xff] %v10577_v41  ;;  %v10582_v10 = vpop.f32.mrb[91].mxu1  ;;  %7486 = vmatpush1.bf16.msra.mxu0 %v7485_v45  ;;  %3927 = vmatprep.mubr.f32.mxu0 %v10113_v49  ;;  %v4886_v41 = vld [vmem:[#allocation12 + $0x98] sm:$0xff] }
 0x369   :  { %4566 = vmatmul.mubr.f32.gmra.mrb[132].mxu1 %v10109_v57  ;;  %7488 = vmatprep.subr.bf16.mxu0 %v7487_v3  ;;  %v7779_v57 = vpack.c.bf16 %v4916_v30, %v4915_v48  ;;  %v4899_v3 = vld [vmem:[#allocation12 + $0x100] sm:$0xff]  ;;  %v7751_v31 = vpack.c.bf16 %v4886_v41, %v4885_v61  ;;  %v4902_v41 = vld [vmem:[#allocation12 + $0x118] sm:$0xff] }
 0x36a   :  { %4571 = vmatprep.mubr.f32.mxu1 %v10113_v49  ;;  %7742 = vmatpush1.bf16.msra.mxu1 %v7741_v35  ;;  %v10587_v6 = vpop.f32.mrb[76].mxu0  ;;  %v11455_v49 = vld [vmem:[#allocation72_spill] sm:$0xff]  ;;  %v7749_v35 = vpack.c.bf16 %v4868_v11, %v4867_v24  ;;  %v7781_v48 = vpack.c.bf16 %v4900_v56, %v4899_v3  ;;  %v11459_v24 = vld [vmem:[#allocation78_spill] sm:$0xff]  ;;  %v7783_v11 = vpack.c.bf16 %v4918_v14, %v4917_v42  ;;  %v4920_v3 = vld [vmem:[#allocation12 + $0x1a8] sm:$0xff] }
 0x36b   :  { %11450 = vst [vmem:[#allocation44_spill] sm:$0xff] %v10587_v6  ;;  %v10589_v45 = vpop.f32.mrb[92].mxu1  ;;  %v10591_v25 = vpop.f32.mrb[77].mxu0  ;;  %3928 = vmatmul.mubr.f32.gmra.mrb[118].mxu0 %v11453_v16  ;;  %7744 = vmatprep.subr.bf16.mxu1 %v7743_v59  ;;  %v4870_v6 = vld [vmem:[#allocation12 + $0x18] sm:$0xff]  ;;  %v4887_v30 = vld [vmem:[#allocation12 + $0xa0] sm:$0xff]  ;;  %v4889_v14 = vld [vmem:[#allocation12 + $0xb0] sm:$0xff] }
 0x36c   :  { %11451 = vst [vmem:[#allocation45_spill] sm:$0xff] %v10589_v45  ;;  %11452 = vst [vmem:[#allocation46_spill] sm:$0xff] %v10591_v25  ;;  %v10594_v17 = vpop.f32.mrb[93].mxu1  ;;  %7490 = vmatpush1.bf16.msra.mxu0 %v7489_v20  ;;  %3998 = vmatprep.mubr.f32.mxu0 %v11455_v49  ;;  %v4869_v45 = vld [vmem:[#allocation12 + $0x10] sm:$0xff] }
 0x36d   :  { %11454 = vst [vmem:[#allocation47_spill] sm:$0xff] %v10594_v17  ;;  %4572 = vmatmul.mubr.f32.gmra.mrb[134].mxu1 %v11453_v16  ;;  %7748 = vmatprep.subr.bf16.mxu0 %v7747_v15  ;;  %v4888_v17 = vld [vmem:[#allocation12 + $0xa8] sm:$0xff]  ;;  %v4901_v15 = vld [vmem:[#allocation12 + $0x110] sm:$0xff]  ;;  %v7753_v16 = vpack.c.bf16 %v4870_v6, %v4869_v45 }
 0x36e   :  { %7746 = vmatpush1.bf16.msra.mxu1 %v7745_v27  ;;  %4642 = vmatprep.mubr.f32.mxu1 %v11455_v49  ;;  %v10599_v59 = vpop.f32.mrb[78].mxu0  ;;  %v11461_v27 = vld [vmem:[#allocation75_spill] sm:$0xff]  ;;  %v4919_v49 = vld [vmem:[#allocation12 + $0x1a0] sm:$0xff]  ;;  %v7755_v56 = vpack.c.bf16 %v4888_v17, %v4887_v30  ;;  %v7785_v42 = vpack.c.bf16 %v4902_v41, %v4901_v15  ;;  %v11465_v6 = vld [vmem:[#allocation82_spill] sm:$0xff] }
 0x36f   :  { %11456 = vst [vmem:[#allocation48_spill] sm:$0xff] %v10599_v59  ;;  %v10601_v20 = vpop.f32.mrb[94].mxu1  ;;  %v10603_v25 = vpop.f32.mrb[79].mxu0  ;;  %3999 = vmatmul.mubr.f32.vlgmr.msra.gmra.mrb[88].mxu0 %v11459_v24  ;;  %7780 = vmatprep.subr.bf16.mxu1 %v7779_v57  ;;  %v4872_v59 = vld [vmem:[#allocation12 + $0x28] sm:$0xff]  ;;  %v7787_v45 = vpack.c.bf16 %v4920_v3, %v4919_v49  ;;  %v4922_v15 = vld [vmem:[#allocation12 + $0x1b8] sm:$0xff]  ;;  %v4891_v3 = vld [vmem:[#allocation12 + $0xc0] sm:$0xff] }
 0x370   :  { %11457 = vst [vmem:[#allocation49_spill] sm:$0xff] %v10601_v20  ;;  %11458 = vst [vmem:[#allocation50_spill] sm:$0xff] %v10603_v25  ;;  %v10606_v61 = vpop.f32.mrb[95].mxu1  ;;  %4004 = vmatprep.mubr.f32.mxu0 %v11461_v27  ;;  %7750 = vmatpush3.bf16.msra.mxu0 %v7749_v35  ;;  %v4871_v20 = vld [vmem:[#allocation12 + $0x20] sm:$0xff]  ;;  %v4904_v17 = vld [vmem:[#allocation12 + $0x128] sm:$0xff] }
 0x371   :  { %11460 = vst [vmem:[#allocation51_spill] sm:$0xff] %v10606_v61  ;;  %4643 = vmatmul.mubr.f32.vlgmr.msra.gmra.mrb[104].mxu1 %v11459_v24  ;;  %7752 = vmatprep.subr.bf16.mxu0 %v7751_v31  ;;  %v4890_v61 = vld [vmem:[#allocation12 + $0xb8] sm:$0xff]  ;;  %v4903_v31 = vld [vmem:[#allocation12 + $0x120] sm:$0xff] }
 0x372   :  { %4648 = vmatprep.mubr.f32.mxu1 %v11461_v27  ;;  %v10611_v57 = vpop.f32.mrb[80].mxu0  ;;  %7782 = vmatpush3.bf16.msra.mxu1 %v7781_v48  ;;  %v11467_v24 = vld [vmem:[#allocation79_spill] sm:$0xff]  ;;  %v7757_v27 = vpack.c.bf16 %v4872_v59, %v4871_v20  ;;  %v4921_v48 = vld [vmem:[#allocation12 + $0x1b0] sm:$0xff]  ;;  %v7759_v41 = vpack.c.bf16 %v4890_v61, %v4889_v14  ;;  %v7789_v49 = vpack.c.bf16 %v4904_v17, %v4903_v31  ;;  %v4924_v31 = vld [vmem:[#allocation12 + $0x1c8] sm:$0xff] }
 0x373   :  { %11462 = vst [vmem:[#allocation52_spill] sm:$0xff] %v10611_v57  ;;  %v10613_v25 = vpop.f32.mrb[96].mxu1  ;;  %v10615_v35 = vpop.f32.mrb[81].mxu0  ;;  %4005 = vmatmul.mubr.f32.gmra.mrb[90].mxu0 %v11465_v6  ;;  %7784 = vmatprep.subr.bf16.mxu1 %v7783_v11  ;;  %v4874_v57 = vld [vmem:[#allocation12 + $0x38] sm:$0xff]  ;;  %v11471_v59 = vld [vmem:[#allocation86_spill] sm:$0xff]  ;;  %v7791_v20 = vpack.c.bf16 %v4922_v15, %v4921_v48 }
 0x374   :  { %11463 = vst [vmem:[#allocation53_spill] sm:$0xff] %v10613_v25  ;;  %11464 = vst [vmem:[#allocation54_spill] sm:$0xff] %v10615_v35  ;;  %v10618_v30 = vpop.f32.mrb[97].mxu1  ;;  %4010 = vmatprep.mubr.f32.mxu0 %v11467_v24  ;;  %7754 = vmatpush3.bf16.msra.mxu0 %v7753_v16  ;;  %v4873_v25 = vld [vmem:[#allocation12 + $0x30] sm:$0xff]  ;;  %v4906_v61 = vld [vmem:[#allocation12 + $0x138] sm:$0xff] }
 0x375   :  { %11466 = vst [vmem:[#allocation55_spill] sm:$0xff] %v10618_v30  ;;  %4649 = vmatmul.mubr.f32.gmra.mrb[106].mxu1 %v11465_v6  ;;  %7756 = vmatprep.subr.bf16.mxu0 %v7755_v56  ;;  %v4892_v30 = vld [vmem:[#allocation12 + $0xc8] sm:$0xff]  ;;  %v4905_v56 = vld [vmem:[#allocation12 + $0x130] sm:$0xff]  ;;  %v11473_v6 = vld [vmem:[#allocation83_spill] sm:$0xff] }
 0x376   :  { %4654 = vmatprep.mubr.f32.mxu1 %v11467_v24  ;;  %v10623_v11 = vpop.f32.mrb[82].mxu0  ;;  %7786 = vmatpush3.bf16.msra.mxu1 %v7785_v42  ;;  %v7761_v24 = vpack.c.bf16 %v4874_v57, %v4873_v25  ;;  %v4923_v42 = vld [vmem:[#allocation12 + $0x1c0] sm:$0xff]  ;;  %v7763_v17 = vpack.c.bf16 %v4892_v30, %v4891_v3  ;;  %v7793_v48 = vpack.c.bf16 %v4906_v61, %v4905_v56  ;;  %v4893_v15 = vld [vmem:[#allocation12 + $0xd0] sm:$0xff]  ;;  %v4908_v30 = vld [vmem:[#allocation12 + $0x148] sm:$0xff] }
 0x377   :  { %11468 = vst [vmem:[#allocation56_spill] sm:$0xff] %v10623_v11  ;;  %v10625_v35 = vpop.f32.mrb[98].mxu1  ;;  %v10627_v16 = vpop.f32.mrb[83].mxu0  ;;  %4011 = vmatmul.mubr.f32.gmra.mrb[92].mxu0 %v11471_v59  ;;  %7788 = vmatprep.subr.bf16.mxu1 %v7787_v45  ;;  %v4876_v11 = vld [vmem:[#allocation12 + $0x48] sm:$0xff]  ;;  %v11477_v25 = vld [vmem:[#allocation90_spill] sm:$0xff]  ;;  %v7795_v57 = vpack.c.bf16 %v4924_v31, %v4923_v42  ;;  %v4926_v56 = vld [vmem:[#allocation12 + $0x1d8] sm:$0xff] }
 0x378   :  { %11469 = vst [vmem:[#allocation57_spill] sm:$0xff] %v10625_v35  ;;  %11470 = vst [vmem:[#allocation58_spill] sm:$0xff] %v10627_v16  ;;  %v10630_v14 = vpop.f32.mrb[99].mxu1  ;;  %4016 = vmatprep.mubr.f32.mxu0 %v11473_v6  ;;  %7758 = vmatpush3.bf16.msra.mxu0 %v7757_v27  ;;  %v4875_v35 = vld [vmem:[#allocation12 + $0x40] sm:$0xff] }
 0x379   :  { %11472 = vst [vmem:[#allocation59_spill] sm:$0xff] %v10630_v14  ;;  %4655 = vmatmul.mubr.f32.gmra.mrb[108].mxu1 %v11471_v59  ;;  %7760 = vmatprep.subr.bf16.mxu0 %v7759_v41  ;;  %v4894_v14 = vld [vmem:[#allocation12 + $0xd8] sm:$0xff]  ;;  %v4907_v41 = vld [vmem:[#allocation12 + $0x140] sm:$0xff] }
 0x37a   :  { %4660 = vmatprep.mubr.f32.mxu1 %v11473_v6  ;;  %v10635_v45 = vpop.f32.mrb[84].mxu0  ;;  %7790 = vmatpush3.bf16.msra.mxu1 %v7789_v49  ;;  %v11479_v59 = vld [vmem:[#allocation87_spill] sm:$0xff]  ;;  %v7765_v6 = vpack.c.bf16 %v4876_v11, %v4875_v35  ;;  %v4925_v49 = vld [vmem:[#allocation12 + $0x1d0] sm:$0xff]  ;;  %v7767_v61 = vpack.c.bf16 %v4894_v14, %v4893_v15  ;;  %v7797_v42 = vpack.c.bf16 %v4908_v30, %v4907_v41  ;;  %v4895_v31 = vld [vmem:[#allocation12 + $0xe0] sm:$0xff] }
 0x37b   :  { %11474 = vst [vmem:[#allocation60_spill] sm:$0xff] %v10635_v45  ;;  %v10637_v16 = vpop.f32.mrb[100].mxu1  ;;  %v10639_v27 = vpop.f32.mrb[85].mxu0  ;;  %4017 = vmatmul.mubr.f32.gmra.mrb[94].mxu0 %v11477_v25  ;;  %7792 = vmatprep.subr.bf16.mxu1 %v7791_v20  ;;  %v4878_v45 = vld [vmem:[#allocation12 + $0x58] sm:$0xff]  ;;  %v11482_v35 = vld [vmem:[#allocation94_spill] sm:$0xff]  ;;  %v7799_v11 = vpack.c.bf16 %v4926_v56, %v4925_v49  ;;  %v4928_v41 = vld [vmem:[#allocation12 + $0x1e8] sm:$0xff] }
 0x37c   :  { %11475 = vst [vmem:[#allocation61_spill] sm:$0xff] %v10637_v16  ;;  %11476 = vst [vmem:[#allocation62_spill] sm:$0xff] %v10639_v27  ;;  %v10642_v3 = vpop.f32.mrb[101].mxu1  ;;  %4022 = vmatprep.mubr.f32.mxu0 %v11479_v59  ;;  %7762 = vmatpush3.bf16.msra.mxu0 %v7761_v24  ;;  %v4877_v16 = vld [vmem:[#allocation12 + $0x50] sm:$0xff]  ;;  %v4910_v14 = vld [vmem:[#allocation12 + $0x158] sm:$0xff] }
 0x37d   :  { %11478 = vst [vmem:[#allocation63_spill] sm:$0xff] %v10642_v3  ;;  %4661 = vmatmul.mubr.f32.gmra.mrb[110].mxu1 %v11477_v25  ;;  %7764 = vmatprep.subr.bf16.mxu0 %v7763_v17  ;;  %v4896_v3 = vld [vmem:[#allocation12 + $0xe8] sm:$0xff]  ;;  %v4909_v17 = vld [vmem:[#allocation12 + $0x150] sm:$0xff]  ;;  %v7769_v25 = vpack.c.bf16 %v4878_v45, %v4877_v16  ;;  %v4898_v56 = vld [vmem:[#allocation12 + $0xf8] sm:$0xff] }
 0x37e   :  { %4666 = vmatprep.mubr.f32.mxu1 %v11479_v59  ;;  %v10647_v20 = vpop.f32.mrb[86].mxu0  ;;  %7794 = vmatpush3.bf16.msra.mxu1 %v7793_v48  ;;  %v4927_v48 = vld [vmem:[#allocation12 + $0x1e0] sm:$0xff]  ;;  %v7771_v30 = vpack.c.bf16 %v4896_v3, %v4895_v31  ;;  %v4897_v49 = vld [vmem:[#allocation12 + $0xf0] sm:$0xff]  ;;  %v4912_v16 = vld [vmem:[#allocation12 + $0x168] sm:$0xff] }
 0x37f   :  { %11480 = vst [vmem:[#allocation65_spill] sm:$0xff] %v10647_v20  ;;  %v10649_v27 = vpop.f32.mrb[102].mxu1  ;;  %v10651_v24 = vpop.f32.mrb[87].mxu0  ;;  %4023 = vmatmul.mubr.f32.gmra.mrb[96].mxu0 %v11482_v35  ;;  %7796 = vmatprep.subr.bf16.mxu1 %v7795_v57  ;;  %v4879_v59 = vld [vmem:[#allocation12 + $0x60] sm:$0xff]  ;;  %v7801_v57 = vpack.c.bf16 %v4910_v14, %v4909_v17  ;;  %v11484_v20 = vld [vmem:[#allocation91_spill] sm:$0xff]  ;;  %v4948_v17 = vld [vmem:[#allocation12 + $0x288] sm:$0xff] }
 0x380   :  { %11481 = vst [vmem:[#allocation66_spill] sm:$0xff] %v10649_v27  ;;  %v10654_v15 = vpop.f32.mrb[103].mxu1  ;;  %4028 = vmatprep.mubr.f32.mxu0 %v10187_v2  ;;  %7766 = vmatpush3.bf16.msra.mxu0 %v7765_v6  ;;  %v4880_v27 = vld [vmem:[#allocation12 + $0x68] sm:$0xff]  ;;  %v4911_v6 = vld [vmem:[#allocation12 + $0x160] sm:$0xff]  ;;  %v4930_v3 = vld [vmem:[#allocation12 + $0x1f8] sm:$0xff] }
 0x381   :  { %11483 = vst [vmem:[#allocation69_spill] sm:$0xff] %v10654_v15  ;;  %4667 = vmatmul.mubr.f32.gmra.mrb[112].mxu1 %v11482_v35  ;;  %7768 = vmatprep.subr.bf16.mxu0 %v7767_v61  ;;  %v7803_v15 = vpack.c.bf16 %v4928_v41, %v4927_v48  ;;  %v7773_v45 = vpack.c.bf16 %v4880_v27, %v4879_v59  ;;  %v4929_v61 = vld [vmem:[#allocation12 + $0x1f0] sm:$0xff]  ;;  %v4882_v31 = vld [vmem:[#allocation12 + $0x78] sm:$0xff]  ;;  %v4979_v48 = vld [vmem:[#allocation12 + $0x380] sm:$0xff] }
 0x382   :  { %4672 = vmatprep.mubr.f32.mxu1 %v10187_v2  ;;  %7798 = vmatpush3.bf16.msra.mxu1 %v7797_v42  ;;  %v7775_v2 = vpack.c.bf16 %v4898_v56, %v4897_v49  ;;  %v4881_v42 = vld [vmem:[#allocation12 + $0x70] sm:$0xff]  ;;  %v7805_v35 = vpack.c.bf16 %v4912_v16, %v4911_v6  ;;  %v7807_v14 = vpack.c.bf16 %v4930_v3, %v4929_v61  ;;  %v4914_v27 = vld [vmem:[#allocation12 + $0x178] sm:$0xff]  ;;  %v4980_v41 = vld [vmem:[#allocation12 + $0x388] sm:$0xff] }
 0x383   :  { %4029 = vmatmul.mubr.f32.gmra.mrb[98].mxu0 %v11484_v20  ;;  %7800 = vmatprep.subr.bf16.mxu1 %v7799_v11  ;;  %v4947_v11 = vld [vmem:[#allocation12 + $0x280] sm:$0xff]  ;;  %v4932_v59 = vld [vmem:[#allocation12 + $0x208] sm:$0xff]  ;;  %v4949_v49 = vld [vmem:[#allocation12 + $0x290] sm:$0xff] }
 0x384   :  { %4034 = vmatprep.mubr.f32.mxu0 %v10199_v23  ;;  %7770 = vmatpush3.bf16.msra.mxu0 %v7769_v25  ;;  %v4913_v25 = vld [vmem:[#allocation12 + $0x170] sm:$0xff]  ;;  %v4950_v56 = vld [vmem:[#allocation12 + $0x298] sm:$0xff]  ;;  %v4963_v16 = vld [vmem:[#allocation12 + $0x300] sm:$0xff] }
 0x385   :  { %4673 = vmatmul.mubr.f32.gmra.mrb[114].mxu1 %v11484_v20  ;;  %7772 = vmatprep.subr.bf16.mxu0 %v7771_v30  ;;  %v7777_v20 = vpack.c.bf16 %v4882_v31, %v4881_v42  ;;  %v7809_v30 = vpack.c.bf16 %v4914_v27, %v4913_v25  ;;  %v11491_v6 = vld [vmem:[#allocation95_spill] sm:$0xff]  ;;  %v4981_v3 = vld [vmem:[#allocation12 + $0x390] sm:$0xff]  ;;  %v7815_v42 = vpack.c.bf16 %v4950_v56, %v4949_v49 }
 0x386   :  { %4678 = vmatprep.mubr.f32.mxu1 %v10199_v23  ;;  %7802 = vmatpush3.bf16.msra.mxu1 %v7801_v57  ;;  %v7811_v23 = vpack.c.bf16 %v4948_v17, %v4947_v11  ;;  %v4934_v31 = vld [vmem:[#allocation12 + $0x218] sm:$0xff]  ;;  %v11492_v27 = vld [vmem:[#allocation102_spill] sm:$0xff] }
 0x387   :  { %4035 = vmatmul.mubr.f32.gmra.mrb[100].mxu0 %v10205_v1  ;;  %7804 = vmatprep.subr.bf16.mxu1 %v7803_v15  ;;  %v7843_v15 = vpack.c.bf16 %v4980_v41, %v4979_v48  ;;  %v4966_v41 = vld [vmem:[#allocation12 + $0x318] sm:$0xff]  ;;  %v11494_v56 = vld [vmem:[#allocation106_spill] sm:$0xff] }
 0x388   :  { %4040 = vmatprep.mubr.f32.mxu0 %v10211_v62  ;;  %7774 = vmatpush3.bf16.msra.mxu0 %v7773_v45  ;;  %v4964_v45 = vld [vmem:[#allocation12 + $0x308] sm:$0xff] }
 0x389   :  { %4679 = vmatmul.mubr.f32.gmra.mrb[116].mxu1 %v10205_v1  ;;  %7776 = vmatprep.subr.bf16.mxu0 %v7775_v2  ;;  %v11485_v1 = vld [vmem:[#allocation98_spill] sm:$0xff]  ;;  %v4982_v2 = vld [vmem:[#allocation12 + $0x398] sm:$0xff]  ;;  %v7845_v17 = vpack.c.bf16 %v4964_v45, %v4963_v16  ;;  %v4967_v16 = vld [vmem:[#allocation12 + $0x320] sm:$0xff] }
 0x38a   :  { %4684 = vmatprep.mubr.f32.mxu1 %v10211_v62  ;;  %7806 = vmatpush3.bf16.msra.mxu1 %v7805_v35  ;;  %v10687_v62 = vld [vmem:[#allocation11] sm:$0xff]  ;;  %v7847_v48 = vpack.c.bf16 %v4982_v2, %v4981_v3  ;;  %v4968_v45 = vld [vmem:[#allocation12 + $0x328] sm:$0xff] }
 0x38b   :  { %4041 = vmatmul.mubr.f32.gmra.mrb[102].mxu0 %v10217_v8  ;;  %7808 = vmatprep.subr.bf16.mxu1 %v7807_v14  ;;  %v4952_v14 = vld [vmem:[#allocation12 + $0x2a8] sm:$0xff]  ;;  %v4986_v3 = vld [vmem:[#allocation12 + $0x3b8] sm:$0xff] }
 0x38c   :  { %4046 = vmatprep.mubr.f32.mxu0 %v10223_v26  ;;  %7778 = vmatpush3.bf16.msra.mxu0 %v7777_v20 }
 0x38d   :  { %4685 = vmatmul.mubr.f32.gmra.mrb[118].mxu1 %v10217_v8  ;;  %7812 = vmatprep.subr.bf16.mxu0 %v7811_v23  ;;  %v11486_v8 = vld [vmem:[#allocation29_spill] sm:$0xff] }
 0x38e   :  { %4690 = vmatprep.mubr.f32.mxu1 %v10223_v26  ;;  %7810 = vmatpush3.bf16.msra.mxu1 %v7809_v30  ;;  %v11487_v26 = vsub.s32 1, %v11486_v8 }
 0x38f   :  { %4047 = vmatmul.mubr.f32.gmra.mrb[104].mxu0 %v10229_v9  ;;  %7844 = vmatprep.subr.bf16.mxu1 %v7843_v15 }
 0x390   :  { %4052 = vmatprep.mubr.f32.mxu0 %v10235_v34 }
 0x391   :  { %4691 = vmatmul.mubr.f32.gmra.mrb[120].mxu1 %v10229_v9  ;;  %v10695_v9 = vrot.slane %v10687_v62, %v11487_v26 }
 0x392   :  { %4696 = vmatprep.mubr.f32.mxu1 %v10235_v34  ;;  %v11488_v34 = vsub.s32 3, %v11486_v8 }
 0x393   :  { %4053 = vmatmul.mubr.f32.gmra.mrb[106].mxu0 %v11485_v1  ;;  %v7970_v57 = vadd.f32 %v10483_v39, %v10695_v9  ;;  %v7972_v11 = vadd.f32 %v10495_v47, %v10695_v9  ;;  %v4983_v47 = vld [vmem:[#allocation12 + $0x3a0] sm:$0xff] }
 0x394   :  { %4058 = vmatprep.mubr.f32.mxu0 %v10247_v43 }
 0x395   :  { %4697 = vmatmul.mubr.f32.gmra.mrb[122].mxu1 %v11485_v1  ;;  %v4748_v35 = vmax.f32 %v7970_v57, 0.0  ;;  %v4984_v1 = vld [vmem:[#allocation12 + $0x3a8] sm:$0xff]  ;;  %v4954_v57 = vld [vmem:[#allocation12 + $0x2b8] sm:$0xff] }
 0x396   :  { %4702 = vmatprep.mubr.f32.mxu1 %v10247_v43  ;;  %v10702_v43 = vrot.slane %v10687_v62, %v11488_v34  ;;  %v11493_v34 = vld [vmem:[#allocation99_spill] sm:$0xff] }
 0x397   :  { %4059 = vmatmul.mubr.f32.gmra.mrb[108].mxu0 %v10253_v0 }
 0x398   :  { %4064 = vmatprep.mubr.f32.mxu0 %v10259_v58  ;;  %v8004_v30 = vadd.f32 %v10498_v18, %v10702_v43 }
 0x399   :  { %4703 = vmatmul.mubr.f32.gmra.mrb[124].mxu1 %v10253_v0  ;;  %v11489_v0 = vld [vmem:[#allocation30_spill] sm:$0xff] }
 0x39a   :  { %4708 = vmatprep.mubr.f32.mxu1 %v10259_v58  ;;  %v10707_v58 = vrot.slane %v10687_v62, %v11489_v0 }
 0x39b   :  { %4065 = vmatmul.mubr.f32.gmra.mrb[110].mxu0 %v10265_v32 }
 0x39c   :  { %4070 = vmatprep.mubr.f32.mxu0 %v10271_v54 }
 0x39d   :  { %4709 = vmatmul.mubr.f32.gmra.mrb[126].mxu1 %v10265_v32  ;;  %v7968_v32 = vadd.f32 %v10471_v53, %v10695_v9  ;;  %v4931_v53 = vld [vmem:[#allocation12 + $0x200] sm:$0xff] }
 0x39e   :  { %4714 = vmatprep.mubr.f32.mxu1 %v10271_v54  ;;  %v11490_v54 = vsub.s32 2, %v11486_v8  ;;  %v7813_v61 = vpack.c.bf16 %v4932_v59, %v4931_v53  ;;  %v4756_v53 = vmax.f32 %v7972_v11, 0.0  ;;  %v7974_v59 = vadd.f32 %v10507_v7, %v10695_v9 }
 0x39f   :  { %4071 = vmatmul.mubr.f32.gmra.mrb[112].mxu0 %v10277_v22  ;;  %v7976_v11 = vadd.f32 %v10519_v50, %v10695_v9 }
 0x3a0   :  { %4076 = vmatprep.mubr.f32.mxu0 %v10283_v38 }
 0x3a1   :  { %4715 = vmatmul.mubr.f32.gmra.mrb[128].mxu1 %v10277_v22  ;;  %v10716_v22 = vrot.slane %v10687_v62, %v11490_v54 }
 0x3a2   :  { %4720 = vmatprep.mubr.f32.mxu1 %v10283_v38  ;;  %v8000_v38 = vadd.f32 %v10474_v51, %v10702_v43 }
 0x3a3   :  { %4077 = vmatmul.mubr.f32.gmra.mrb[114].mxu0 %v10289_v40  ;;  %v7999_v51 = vadd.f32 %v10469_v33, %v10716_v22  ;;  %v4933_v33 = vld [vmem:[#allocation12 + $0x210] sm:$0xff]  ;;  %v8001_v20 = vadd.f32 %v11492_v27, %v10716_v22 }
 0x3a4   :  { %4082 = vmatprep.mubr.f32.mxu0 %v10295_v29  ;;  %v7817_v15 = vpack.c.bf16 %v4934_v31, %v4933_v33  ;;  %v4937_v33 = vld [vmem:[#allocation12 + $0x230] sm:$0xff]  ;;  %v4938_v31 = vld [vmem:[#allocation12 + $0x238] sm:$0xff] }
 0x3a5   :  { %4721 = vmatmul.mubr.f32.gmra.mrb[130].mxu1 %v10289_v40  ;;  %v7967_v40 = vadd.f32 %v10467_v55, %v10707_v58  ;;  %v4742_v55 = vmax.f32 %v8000_v38, 0.0  ;;  %v4741_v25 = vmax.f32 %v7999_v51, 0.0  ;;  %v4935_v38 = vld [vmem:[#allocation12 + $0x220] sm:$0xff]  ;;  %v4749_v49 = vmax.f32 %v8001_v20, 0.0 }
 0x3a6   :  { %4726 = vmatprep.mubr.f32.mxu1 %v10295_v29  ;;  %v4740_v29 = vmax.f32 %v7968_v32, 0.0  ;;  %v7971_v32 = vadd.f32 %v11493_v34, %v10707_v58  ;;  %v8003_v51 = vadd.f32 %v11494_v56, %v10716_v22  ;;  %v7825_v50 = vpack.c.bf16 %v4938_v31, %v4937_v33  ;;  %v4971_v56 = vld [vmem:[#allocation12 + $0x340] sm:$0xff]  ;;  %v4960_v31 = vld [vmem:[#allocation12 + $0x2e8] sm:$0xff] }
 0x3a7   :  { %4083 = vmatmul.mubr.f32.gmra.mrb[116].mxu0 %v10301_v5  ;;  %v4739_v39 = vmax.f32 %v7967_v40, 0.0  ;;  %v4936_v40 = vld [vmem:[#allocation12 + $0x228] sm:$0xff]  ;;  %v4959_v33 = vld [vmem:[#allocation12 + $0x2e0] sm:$0xff] }
 0x3a8   :  { %4088 = vmatprep.mubr.f32.mxu0 %v10307_v4  ;;  %v7821_v7 = vpack.c.bf16 %v4936_v40, %v4935_v38  ;;  %v4755_v2 = vmax.f32 %v7971_v32, 0.0  ;;  %v4939_v32 = vld [vmem:[#allocation12 + $0x240] sm:$0xff]  ;;  %v4772_v38 = vmax.f32 %v7976_v11, 0.0  ;;  %v7978_v40 = vadd.f32 %v10531_v63, %v10695_v9  ;;  %v11500_v11 = vld [vmem:[#allocation34_spill] sm:$0xff] }
 0x3a9   :  { %4727 = vmatmul.mubr.f32.gmra.mrb[132].mxu1 %v10301_v5  ;;  %v8002_v5 = vadd.f32 %v10486_v46, %v10702_v43  ;;  %v4951_v46 = vld [vmem:[#allocation12 + $0x2a0] sm:$0xff] }
 0x3aa   :  { %4732 = vmatprep.mubr.f32.mxu1 %v10307_v4  ;;  %v7969_v4 = vadd.f32 %v10479_v28, %v10707_v58  ;;  %v4965_v28 = vld [vmem:[#allocation12 + $0x310] sm:$0xff]  ;;  %v7819_v54 = vpack.c.bf16 %v4952_v14, %v4951_v46  ;;  %v4956_v46 = vld [vmem:[#allocation12 + $0x2c8] sm:$0xff]  ;;  %v4757_v14 = vmax.f32 %v8003_v51, 0.0 }
 0x3ab   :  { %4089 = vmatmul.mubr.f32.gmra.mrb[118].mxu0 %v11491_v6  ;;  %v4750_v23 = vmax.f32 %v8002_v5, 0.0  ;;  %v7849_v18 = vpack.c.bf16 %v4966_v41, %v4965_v28  ;;  %v8006_v5 = vadd.f32 %v10510_v12, %v10702_v43  ;;  %v7853_v12 = vpack.c.bf16 %v4968_v45, %v4967_v16  ;;  %v4970_v28 = vld [vmem:[#allocation12 + $0x338] sm:$0xff]  ;;  %v4972_v51 = vld [vmem:[#allocation12 + $0x348] sm:$0xff]  ;;  %v4989_v45 = vld [vmem:[#allocation12 + $0x3d0] sm:$0xff] }
 0x3ac   :  { %5075 = vmatprep.mubr.f32.mxu0 %v4740_v29  ;;  %v4747_v26 = vmax.f32 %v7969_v4, 0.0  ;;  %v4953_v29 = vld [vmem:[#allocation12 + $0x2b0] sm:$0xff]  ;;  %v8010_v16 = vadd.f32 %v10534_v13, %v10702_v43  ;;  %v7861_v13 = vpack.c.bf16 %v4972_v51, %v4971_v56  ;;  %v4994_v56 = vld [vmem:[#allocation12 + $0x3f8] sm:$0xff] }
 0x3ad   :  { %4733 = vmatmul.mubr.f32.gmra.mrb[134].mxu1 %v11491_v6  ;;  %v7851_v6 = vpack.c.bf16 %v4984_v1, %v4983_v47  ;;  %v4766_v41 = vmax.f32 %v8006_v5, 0.0  ;;  %v11497_v1 = vld [vmem:[#allocation31_spill] sm:$0xff] }
 0x3ae   :  { %5220 = vmatprep.mubr.f32.mxu1 %v4742_v55  ;;  %v4758_v55 = vmax.f32 %v8004_v30, 0.0  ;;  %v4987_v30 = vld [vmem:[#allocation12 + $0x3c0] sm:$0xff] }
 0x3af   :  { %5076 = vmatmul.mubr.f32.vlgmr.msra.gmra.mrb[120].mxu0 %v4739_v39  ;;  %v11495_v39 = vld [vmem:[#allocation103_spill] sm:$0xff] }
 0x3b0   :  { %5080 = vmatprep.mubr.f32.mxu0 %v4748_v35  ;;  %7814 = vmatpush3.bf16.msra.mxu0 %v7813_v61  ;;  %v4985_v61 = vld [vmem:[#allocation12 + $0x3b0] sm:$0xff]  ;;  %v7973_v4 = vadd.f32 %v11495_v39, %v10707_v58  ;;  %v4764_v35 = vmax.f32 %v7974_v59, 0.0  ;;  %v4958_v59 = vld [vmem:[#allocation12 + $0x2d8] sm:$0xff] }
 0x3b1   :  { %5221 = vmatmul.mubr.f32.vlgmr.msra.gmra.mrb[136].mxu1 %v4741_v25  ;;  %7816 = vmatprep.subr.bf16.mxu0 %v7815_v42  ;;  %v7823_v42 = vpack.c.bf16 %v4954_v57, %v4953_v29  ;;  %v11496_v25 = vld [vmem:[#allocation113_spill] sm:$0xff]  ;;  %v7855_v20 = vpack.c.bf16 %v4986_v3, %v4985_v61  ;;  %v11498_v29 = vld [vmem:[#allocation32_spill] sm:$0xff]  ;;  %v4942_v39 = vld [vmem:[#allocation12 + $0x258] sm:$0xff] }
 0x3b2   :  { %5225 = vmatprep.mubr.f32.mxu1 %v4750_v23  ;;  %7846 = vmatpush3.bf16.msra.mxu1 %v7845_v17  ;;  %v4955_v17 = vld [vmem:[#allocation12 + $0x2c0] sm:$0xff]  ;;  %v8005_v27 = vadd.f32 %v11496_v25, %v10716_v22  ;;  %v8008_v23 = vadd.f32 %v10522_v60, %v10702_v43  ;;  %v4763_v47 = vmax.f32 %v7973_v4, 0.0  ;;  %v8007_v57 = vadd.f32 %v11498_v29, %v10716_v22 }
 0x3b3   :  { %5081 = vmatmul.mubr.f32.gmra.mrb[122].mxu0 %v4747_v26  ;;  %7848 = vmatprep.subr.bf16.mxu1 %v7847_v48  ;;  %v4969_v48 = vld [vmem:[#allocation12 + $0x330] sm:$0xff]  ;;  %v7975_v26 = vadd.f32 %v11497_v1, %v10707_v58  ;;  %v7827_v34 = vpack.c.bf16 %v4956_v46, %v4955_v17  ;;  %v4780_v4 = vmax.f32 %v7978_v40, 0.0  ;;  %v4782_v25 = vmax.f32 %v8010_v16, 0.0  ;;  %v11503_v40 = vld [vmem:[#allocation36_spill] sm:$0xff] }
 0x3b4   :  { %5085 = vmatprep.mubr.f32.mxu0 %v4756_v53  ;;  %7818 = vmatpush3.bf16.msra.mxu0 %v7817_v15  ;;  %v4988_v15 = vld [vmem:[#allocation12 + $0x3c8] sm:$0xff]  ;;  %v7857_v60 = vpack.c.bf16 %v4970_v28, %v4969_v48  ;;  %v4957_v53 = vld [vmem:[#allocation12 + $0x2d0] sm:$0xff]  ;;  %v4991_v48 = vld [vmem:[#allocation12 + $0x3e0] sm:$0xff] }
 0x3b5   :  { %5226 = vmatmul.mubr.f32.gmra.mrb[138].mxu1 %v4749_v49  ;;  %7820 = vmatprep.subr.bf16.mxu0 %v7819_v54  ;;  %v4940_v54 = vld [vmem:[#allocation12 + $0x248] sm:$0xff]  ;;  %v7859_v49 = vpack.c.bf16 %v4988_v15, %v4987_v30  ;;  %v4771_v5 = vmax.f32 %v7975_v26, 0.0  ;;  %v7831_v3 = vpack.c.bf16 %v4958_v59, %v4957_v53  ;;  %v4973_v46 = vld [vmem:[#allocation12 + $0x350] sm:$0xff]  ;;  %v7835_v30 = vpack.c.bf16 %v4960_v31, %v4959_v33  ;;  %v4943_v15 = vld [vmem:[#allocation12 + $0x260] sm:$0xff] }
 0x3b6   :  { %5230 = vmatprep.mubr.f32.mxu1 %v4758_v55  ;;  %7850 = vmatpush3.bf16.msra.mxu1 %v7849_v18  ;;  %v4765_v18 = vmax.f32 %v8005_v27, 0.0  ;;  %v7829_v63 = vpack.c.bf16 %v4940_v54, %v4939_v32  ;;  %v4990_v55 = vld [vmem:[#allocation12 + $0x3d8] sm:$0xff]  ;;  %v11501_v27 = vld [vmem:[#allocation37_spill] sm:$0xff]  ;;  %v7982_v26 = vadd.f32 %v10555_v37, %v10695_v9  ;;  %v4961_v32 = vld [vmem:[#allocation12 + $0x2f0] sm:$0xff]  ;;  %v8016_v33 = vadd.f32 %v10570_v44, %v10702_v43 }
 0x3b7   :  { %5086 = vmatmul.mubr.f32.gmra.mrb[124].mxu0 %v4755_v2  ;;  %7852 = vmatprep.subr.bf16.mxu1 %v7851_v6  ;;  %v4774_v6 = vmax.f32 %v8008_v23, 0.0  ;;  %v4941_v2 = vld [vmem:[#allocation12 + $0x250] sm:$0xff]  ;;  %v7863_v17 = vpack.c.bf16 %v4990_v55, %v4989_v45  ;;  %v4992_v28 = vld [vmem:[#allocation12 + $0x3e8] sm:$0xff]  ;;  %v11502_v23 = vld [vmem:[#allocation35_spill] sm:$0xff] }
 0x3b8   :  { %5090 = vmatprep.mubr.f32.mxu0 %v4764_v35  ;;  %7822 = vmatpush3.bf16.msra.mxu0 %v7821_v7  ;;  %v11499_v7 = vld [vmem:[#allocation33_spill] sm:$0xff]  ;;  %v4773_v35 = vmax.f32 %v8007_v57, 0.0  ;;  %v4962_v54 = vld [vmem:[#allocation12 + $0x2f8] sm:$0xff]  ;;  %v7867_v53 = vpack.c.bf16 %v4992_v28, %v4991_v48  ;;  %v4975_v59 = vld [vmem:[#allocation12 + $0x360] sm:$0xff]  ;;  %v8014_v57 = vadd.f32 %v10558_v21, %v10702_v43 }
 0x3b9   :  { %5231 = vmatmul.mubr.f32.gmra.mrb[140].mxu1 %v4757_v14  ;;  %7824 = vmatprep.subr.bf16.mxu0 %v7823_v42  ;;  %v7977_v61 = vadd.f32 %v11499_v7, %v10707_v58  ;;  %v7980_v42 = vadd.f32 %v10543_v19, %v10695_v9  ;;  %v4974_v14 = vld [vmem:[#allocation12 + $0x358] sm:$0xff]  ;;  %v7833_v19 = vpack.c.bf16 %v4942_v39, %v4941_v2  ;;  %v4945_v45 = vld [vmem:[#allocation12 + $0x270] sm:$0xff] }
 0x3ba   :  { %5235 = vmatprep.mubr.f32.mxu1 %v4766_v41  ;;  %7854 = vmatpush3.bf16.msra.mxu1 %v7853_v12  ;;  %v8009_v12 = vadd.f32 %v11500_v11, %v10716_v22  ;;  %v4946_v55 = vld [vmem:[#allocation12 + $0x278] sm:$0xff]  ;;  %v7984_v7 = vadd.f32 %v10567_v36, %v10695_v9  ;;  %v11508_v48 = vld [vmem:[#allocation42_spill] sm:$0xff] }
 0x3bb   :  { %5091 = vmatmul.mubr.f32.gmra.mrb[126].mxu0 %v4763_v47  ;;  %7856 = vmatprep.subr.bf16.mxu1 %v7855_v20  ;;  %v8012_v20 = vadd.f32 %v11501_v27, %v10702_v43  ;;  %v4779_v41 = vmax.f32 %v7977_v61, 0.0  ;;  %v4944_v47 = vld [vmem:[#allocation12 + $0x268] sm:$0xff]  ;;  %v4788_v1 = vmax.f32 %v7980_v42, 0.0  ;;  %v4978_v42 = vld [vmem:[#allocation12 + $0x378] sm:$0xff]  ;;  %v7841_v31 = vpack.c.bf16 %v4946_v55, %v4945_v45 }
 0x3bc   :  { %5095 = vmatprep.mubr.f32.mxu0 %v4772_v38  ;;  %7826 = vmatpush3.bf16.msra.mxu0 %v7825_v50  ;;  %v7979_v50 = vadd.f32 %v11502_v23, %v10707_v58  ;;  %v4781_v38 = vmax.f32 %v8009_v12, 0.0  ;;  %v7837_v37 = vpack.c.bf16 %v4944_v47, %v4943_v15  ;;  %v4804_v12 = vmax.f32 %v7984_v7, 0.0  ;;  %v11518_v45 = vld [vmem:[#allocation49_spill] sm:$0xff]  ;;  %v11519_v7 = vld [vmem:[#allocation55_spill] sm:$0xff] }
 0x3bd   :  { %5236 = vmatmul.mubr.f32.gmra.mrb[142].mxu1 %v4765_v18  ;;  %7828 = vmatprep.subr.bf16.mxu0 %v7827_v34  ;;  %v7865_v34 = vpack.c.bf16 %v4974_v14, %v4973_v46  ;;  %v4976_v18 = vld [vmem:[#allocation12 + $0x368] sm:$0xff]  ;;  %v4790_v29 = vmax.f32 %v8012_v20, 0.0  ;;  %v4806_v27 = vmax.f32 %v8016_v33, 0.0  ;;  %v8018_v20 = vadd.f32 %v10582_v10, %v10702_v43  ;;  %v11511_v10 = vld [vmem:[#allocation47_spill] sm:$0xff] }
 0x3be   :  { %5240 = vmatprep.mubr.f32.mxu1 %v4774_v6  ;;  %7858 = vmatpush3.bf16.msra.mxu1 %v7857_v60  ;;  %v8011_v60 = vadd.f32 %v11503_v40, %v10716_v22  ;;  %v4787_v51 = vmax.f32 %v7979_v50, 0.0  ;;  %v11504_v6 = vld [vmem:[#allocation38_spill] sm:$0xff]  ;;  %v7869_v21 = vpack.c.bf16 %v4976_v18, %v4975_v59  ;;  %v7985_v28 = vadd.f32 %v11508_v48, %v10707_v58  ;;  %v11522_v33 = vld [vmem:[#allocation53_spill] sm:$0xff] }
 0x3bf   :  { %5096 = vmatmul.mubr.f32.gmra.mrb[128].mxu0 %v4771_v5  ;;  %7860 = vmatprep.subr.bf16.mxu1 %v7859_v49  ;;  %v4993_v49 = vld [vmem:[#allocation12 + $0x3f0] sm:$0xff]  ;;  %v7981_v16 = vadd.f32 %v11504_v6, %v10707_v58  ;;  %v4796_v5 = vmax.f32 %v7982_v26, 0.0  ;;  %v4814_v47 = vmax.f32 %v8018_v20, 0.0  ;;  %v8021_v55 = vadd.f32 %v11518_v45, %v10716_v22  ;;  %v11526_v20 = vld [vmem:[#allocation57_spill] sm:$0xff] }
 0x3c0   :  { %5100 = vmatprep.mubr.f32.mxu0 %v4780_v4  ;;  %7830 = vmatpush3.bf16.msra.mxu0 %v7829_v63  ;;  %v7839_v63 = vpack.c.bf16 %v4962_v54, %v4961_v32  ;;  %v4789_v61 = vmax.f32 %v8011_v60, 0.0  ;;  %v7871_v39 = vpack.c.bf16 %v4994_v56, %v4993_v49  ;;  %v4977_v4 = vld [vmem:[#allocation12 + $0x370] sm:$0xff]  ;;  %v4811_v26 = vmax.f32 %v7985_v28, 0.0  ;;  %v11516_v49 = vld [vmem:[#allocation48_spill] sm:$0xff]  ;;  %v11527_v28 = vld [vmem:[#allocation63_spill] sm:$0xff] }
 0x3c1   :  { %5241 = vmatmul.mubr.f32.gmra.mrb[144].mxu1 %v4773_v35  ;;  %7832 = vmatprep.subr.bf16.mxu0 %v7831_v3  ;;  %v11505_v3 = vld [vmem:[#allocation39_spill] sm:$0xff]  ;;  %v4795_v36 = vmax.f32 %v7981_v16, 0.0  ;;  %v11506_v35 = vld [vmem:[#allocation40_spill] sm:$0xff]  ;;  %v7873_v46 = vpack.c.bf16 %v4978_v42, %v4977_v4  ;;  %v7989_v56 = vadd.f32 %v11516_v49, %v10707_v58  ;;  %v11517_v6 = vld [vmem:[#allocation54_spill] sm:$0xff] }
 0x3c2   :  { %5245 = vmatprep.mubr.f32.mxu1 %v4782_v25  ;;  %7862 = vmatpush3.bf16.msra.mxu1 %v7861_v13  ;;  %v8013_v2 = vadd.f32 %v11505_v3, %v10716_v22  ;;  %v4798_v13 = vmax.f32 %v8014_v57, 0.0  ;;  %v7983_v11 = vadd.f32 %v11506_v35, %v10707_v58  ;;  %v11507_v25 = vld [vmem:[#allocation41_spill] sm:$0xff]  ;;  %v7992_v16 = vadd.f32 %v11517_v6, %v10695_v9  ;;  %v11520_v3 = vld [vmem:[#allocation52_spill] sm:$0xff]  ;;  %v11521_v4 = vld [vmem:[#allocation58_spill] sm:$0xff] }
 0x3c3   :  { %5101 = vmatmul.mubr.f32.gmra.mrb[130].mxu0 %v4779_v41  ;;  %7864 = vmatprep.subr.bf16.mxu1 %v7863_v17  ;;  %v7986_v17 = vadd.f32 %v10579_v52, %v10695_v9  ;;  %v8015_v44 = vadd.f32 %v11507_v25, %v10716_v22  ;;  %v11509_v41 = vld [vmem:[#allocation46_spill] sm:$0xff]  ;;  %v7994_v42 = vadd.f32 %v11521_v4, %v10695_v9  ;;  %v11523_v35 = vld [vmem:[#allocation59_spill] sm:$0xff] }
 0x3c4   :  { %5105 = vmatprep.mubr.f32.mxu0 %v4788_v1  ;;  %7834 = vmatpush3.bf16.msra.mxu0 %v7833_v19  ;;  %v4797_v14 = vmax.f32 %v8013_v2, 0.0  ;;  %v4803_v19 = vmax.f32 %v7983_v11, 0.0  ;;  %v7988_v23 = vadd.f32 %v11509_v41, %v10695_v9  ;;  %v8020_v1 = vadd.f32 %v11511_v10, %v10702_v43  ;;  %v11525_v25 = vld [vmem:[#allocation62_spill] sm:$0xff]  ;;  %v11529_v10 = vld [vmem:[#allocation61_spill] sm:$0xff] }
 0x3c5   :  { %5246 = vmatmul.mubr.f32.gmra.mrb[146].mxu1 %v4781_v38  ;;  %7836 = vmatprep.subr.bf16.mxu0 %v7835_v30  ;;  %v4812_v52 = vmax.f32 %v7986_v17, 0.0  ;;  %v4805_v50 = vmax.f32 %v8015_v44, 0.0  ;;  %v11510_v30 = vld [vmem:[#allocation43_spill] sm:$0xff]  ;;  %v11513_v38 = vld [vmem:[#allocation50_spill] sm:$0xff]  ;;  %v7991_v2 = vadd.f32 %v11520_v3, %v10707_v58  ;;  %v8026_v11 = vadd.f32 %v11523_v35, %v10702_v43  ;;  %v11524_v17 = vld [vmem:[#allocation56_spill] sm:$0xff] }
 0x3c6   :  { %5250 = vmatprep.mubr.f32.mxu1 %v4790_v29  ;;  %7866 = vmatpush3.bf16.msra.mxu1 %v7865_v34  ;;  %v8017_v15 = vadd.f32 %v11510_v30, %v10716_v22  ;;  %v11512_v34 = vld [vmem:[#allocation44_spill] sm:$0xff]  ;;  %v4820_v54 = vmax.f32 %v7988_v23, 0.0  ;;  %v7990_v40 = vadd.f32 %v11513_v38, %v10695_v9  ;;  %v4822_v18 = vmax.f32 %v8020_v1, 0.0  ;;  %v11515_v29 = vld [vmem:[#allocation51_spill] sm:$0xff]  ;;  %v11531_v38 = vld [vmem:[#allocation65_spill] sm:$0xff] }
 0x3c7   :  { %5106 = vmatmul.mubr.f32.gmra.mrb[132].mxu0 %v4787_v51  ;;  %7868 = vmatprep.subr.bf16.mxu1 %v7867_v53  ;;  %v7987_v32 = vadd.f32 %v11512_v34, %v10707_v58  ;;  %v11514_v53 = vld [vmem:[#allocation45_spill] sm:$0xff]  ;;  %v8022_v57 = vadd.f32 %v11515_v29, %v10702_v43  ;;  %v7996_v44 = vadd.f32 %v11525_v25, %v10695_v9  ;;  %v4846_v48 = vmax.f32 %v8026_v11, 0.0  ;;  %v11528_v23 = vld [vmem:[#allocation60_spill] sm:$0xff] }
 0x3c8   :  { %5110 = vmatprep.mubr.f32.mxu0 %v4796_v5  ;;  %7838 = vmatpush3.bf16.msra.mxu0 %v7837_v37  ;;  %v4813_v60 = vmax.f32 %v8017_v15, 0.0  ;;  %v8019_v59 = vadd.f32 %v11514_v53, %v10716_v22  ;;  %v4828_v51 = vmax.f32 %v7990_v40, 0.0  ;;  %v7998_v15 = vadd.f32 %v10651_v24, %v10695_v9  ;;  %v11530_v34 = vld [vmem:[#allocation69_spill] sm:$0xff]  ;;  %v11532_v24 = vld [vmem:[#allocation66_spill] sm:$0xff] }
 0x3c9   :  { %5251 = vmatmul.mubr.f32.gmra.mrb[148].mxu1 %v4789_v61  ;;  %7840 = vmatprep.subr.bf16.mxu0 %v7839_v63  ;;  %v4819_v37 = vmax.f32 %v7987_v32, 0.0  ;;  %v4830_v5 = vmax.f32 %v8022_v57, 0.0  ;;  %v4827_v61 = vmax.f32 %v7989_v56, 0.0  ;;  %v4852_v30 = vmax.f32 %v7996_v44, 0.0 }
 0x3ca   :  { %5255 = vmatprep.mubr.f32.mxu1 %v4798_v13  ;;  %7870 = vmatpush3.bf16.msra.mxu1 %v7869_v21  ;;  %v4821_v63 = vmax.f32 %v8019_v59, 0.0  ;;  %v8024_v21 = vadd.f32 %v11519_v7, %v10702_v43  ;;  %v4829_v13 = vmax.f32 %v8021_v55, 0.0  ;;  %v8027_v1 = vadd.f32 %v11529_v10, %v10716_v22  ;;  %v5608_v7 = vld [vmem:[#allocation14 + $0x8] sm:$0xff] }
 0x3cb   :  { %5111 = vmatmul.mubr.f32.gmra.mrb[134].mxu0 %v4795_v36  ;;  %7872 = vmatprep.subr.bf16.mxu1 %v7871_v39  ;;  %v4836_v39 = vmax.f32 %v7992_v16, 0.0  ;;  %v8030_v32 = vadd.f32 %v11530_v34, %v10702_v43  ;;  %v7997_v40 = vadd.f32 %v11531_v38, %v10707_v58  ;;  %v8029_v9 = vadd.f32 %v11532_v24, %v10716_v22 }
 0x3cc   :  { %5115 = vmatprep.mubr.f32.mxu0 %v4804_v12  ;;  %7842 = vmatpush3.bf16.msra.mxu0 %v7841_v31  ;;  %v8023_v31 = vadd.f32 %v11522_v33, %v10716_v22  ;;  %v4838_v36 = vmax.f32 %v8024_v21, 0.0  ;;  %v4835_v12 = vmax.f32 %v7991_v2, 0.0  ;;  %v4853_v53 = vmax.f32 %v8027_v1, 0.0  ;;  %v5609_v21 = vld [vmem:[#allocation14 + $0x10] sm:$0xff] }
 0x3cd   :  { %5256 = vmatmul.mubr.f32.gmra.mrb[150].mxu1 %v4797_v14  ;;  %v4844_v14 = vmax.f32 %v7994_v42, 0.0  ;;  %v4862_v59 = vmax.f32 %v8030_v32, 0.0  ;;  %v4861_v29 = vmax.f32 %v8029_v9, 0.0  ;;  %v11534_v57 = vsub.s32 5, %v11486_v8 }
 0x3ce   :  { %5260 = vmatprep.mubr.f32.mxu1 %v4806_v27  ;;  %7874 = vmatpush3.bf16.msra.mxu1 %v7873_v46  ;;  %v7993_v46 = vadd.f32 %v11524_v17, %v10707_v58  ;;  %v4837_v27 = vmax.f32 %v8023_v31, 0.0  ;;  %v5612_v17 = vld [vmem:[#allocation14 + $0x28] sm:$0xff] }
 0x3cf   :  { %5116 = vmatmul.mubr.f32.gmra.mrb[136].mxu0 %v4803_v19  ;;  %v8025_v19 = vadd.f32 %v11526_v20, %v10716_v22  ;;  %v11535_v22 = vsub.s32 6, %v11486_v8 }
 0x3d0   :  { %5120 = vmatprep.mubr.f32.mxu0 %v4812_v52  ;;  %v8028_v52 = vadd.f32 %v11527_v28, %v10702_v43  ;;  %v4843_v41 = vmax.f32 %v7993_v46, 0.0  ;;  %v11533_v43 = vsub.s32 4, %v11486_v8 }
 0x3d1   :  { %5261 = vmatmul.mubr.f32.gmra.mrb[152].mxu1 %v4805_v50  ;;  %v7995_v50 = vadd.f32 %v11528_v23, %v10707_v58  ;;  %v10863_v49 = vrot.slane %v10687_v62, %v11535_v22 }
 0x3d2   :  { %5265 = vmatprep.mubr.f32.mxu1 %v4814_v47  ;;  %v4845_v47 = vmax.f32 %v8025_v19, 0.0  ;;  %v10853_v58 = vrot.slane %v10687_v62, %v11533_v43 }
 0x3d3   :  { %5121 = vmatmul.mubr.f32.gmra.mrb[138].mxu0 %v4811_v26  ;;  %v4854_v26 = vmax.f32 %v8028_v52, 0.0 }
 0x3d4   :  { %5125 = vmatprep.mubr.f32.mxu0 %v4820_v54  ;;  %v4851_v54 = vmax.f32 %v7995_v50, 0.0 }
 0x3d5   :  { %5266 = vmatmul.mubr.f32.gmra.mrb[154].mxu1 %v4813_v60  ;;  %v4860_v60 = vmax.f32 %v7998_v15, 0.0  ;;  %v5614_v15 = vld [vmem:[#allocation14 + $0x38] sm:$0xff] }
 0x3d6   :  { %5270 = vmatprep.mubr.f32.mxu1 %v4822_v18  ;;  %v4859_v18 = vmax.f32 %v7997_v40, 0.0 }
 0x3d7   :  { %5126 = vmatmul.mubr.f32.gmra.mrb[140].mxu0 %v4819_v37  ;;  %v10858_v37 = vrot.slane %v10687_v62, %v11534_v57 }
 0x3d8   :  { %5130 = vmatprep.mubr.f32.mxu0 %v4828_v51  ;;  %v11536_v51 = vsub.s32 7, %v11486_v8 }
 0x3d9   :  { %5271 = vmatmul.mubr.f32.gmra.mrb[156].mxu1 %v4821_v63 }
 0x3da   :  { %5275 = vmatprep.mubr.f32.mxu1 %v4830_v5  ;;  %v10868_v6 = vrot.slane %v10687_v62, %v11536_v51  ;;  %v5607_v5 = vld [vmem:[#allocation14] sm:$0xff] }
 0x3db   :  { %5131 = vmatmul.mubr.f32.gmra.mrb[142].mxu0 %v4827_v61  ;;  %v7875_v2 = vpack.c.bf16 %v5608_v7, %v5607_v5 }
 0x3dc   :  { %5135 = vmatprep.mubr.f32.mxu0 %v4836_v39  ;;  %v5610_v39 = vld [vmem:[#allocation14 + $0x18] sm:$0xff] }
 0x3dd   :  { %5276 = vmatmul.mubr.f32.gmra.mrb[158].mxu1 %v4829_v13  ;;  %7876 = vmatprep.subr.bf16.mxu0 %v7875_v2  ;;  %v7879_v31 = vpack.c.bf16 %v5610_v39, %v5609_v21 }
 0x3de   :  { %5280 = vmatprep.mubr.f32.mxu1 %v4838_v36 }
 0x3df   :  { %5136 = vmatmul.mubr.f32.gmra.mrb[144].mxu0 %v4835_v12  ;;  %v5611_v12 = vld [vmem:[#allocation14 + $0x20] sm:$0xff] }
 0x3e0   :  { %5140 = vmatprep.mubr.f32.mxu0 %v4844_v14  ;;  %v7883_v52 = vpack.c.bf16 %v5612_v17, %v5611_v12  ;;  %v5619_v17 = vld [vmem:[#allocation14 + $0x60] sm:$0xff] }
 0x3e1   :  { %5281 = vmatmul.mubr.f32.gmra.mrb[160].mxu1 %v4837_v27 }
 0x3e2   :  { %5285 = vmatprep.mubr.f32.mxu1 %v4846_v48 }
 0x3e3   :  { %5141 = vmatmul.mubr.f32.gmra.mrb[146].mxu0 %v4843_v41 }
 0x3e4   :  { %5145 = vmatprep.mubr.f32.mxu0 %v4852_v30  ;;  %v5613_v30 = vld [vmem:[#allocation14 + $0x30] sm:$0xff] }
 0x3e5   :  { %5286 = vmatmul.mubr.f32.gmra.mrb[162].mxu1 %v4845_v47 }
 0x3e6   :  { %5290 = vmatprep.mubr.f32.mxu1 %v4854_v26 }
 0x3e7   :  { %5146 = vmatmul.mubr.f32.gmra.mrb[148].mxu0 %v4851_v54 }
 0x3e8   :  { %5150 = vmatprep.mubr.f32.mxu0 %v4860_v60  ;;  %v7887_v60 = vpack.c.bf16 %v5614_v15, %v5613_v30 }
 0x3e9   :  { %5291 = vmatmul.mubr.f32.gmra.mrb[164].mxu1 %v4853_v53 }
 0x3ea   :  { %5295 = vmatprep.mubr.f32.mxu1 %v4862_v59  ;;  %v5615_v59 = vld [vmem:[#allocation14 + $0x40] sm:$0xff] }
 0x3eb   :  { %5151 = vmatmul.mubr.f32.gmra.mrb[150].mxu0 %v4859_v18  ;;  %v5616_v18 = vld [vmem:[#allocation14 + $0x48] sm:$0xff] }
 0x3ed   :  { %5296 = vmatmul.mubr.f32.gmra.mrb[166].mxu1 %v4861_v29 }
 0x442   :  { %v4000_v56 = vpop.f32.mrb[88].mxu0 }
 0x443   :  { %v8031_v16 = vadd.f32 %v4000_v56, %v10853_v58  ;;  %v4002_v63 = vpop.f32.mrb[89].mxu0 }
 0x444   :  { %v4644_v45 = vpop.f32.mrb[104].mxu1  ;;  %v8032_v55 = vadd.f32 %v4002_v63, %v10858_v37 }
 0x445   :  { %v8063_v61 = vadd.f32 %v4644_v45, %v10863_v49  ;;  %v4646_v3 = vpop.f32.mrb[105].mxu1  ;;  %v4743_v62 = vmax.f32 %v8031_v16, 0.0 }
 0x446   :  { %v4744_v4 = vmax.f32 %v8032_v55, 0.0  ;;  %v8064_v8 = vadd.f32 %v4646_v3, %v10868_v6  ;;  %v4006_v42 = vpop.f32.mrb[90].mxu0  ;;  %v7891_v55 = vpack.c.bf16 %v5616_v18, %v5615_v59  ;;  %v5618_v3 = vld [vmem:[#allocation14 + $0x58] sm:$0xff] }
 0x447   :  { %v8033_v13 = vadd.f32 %v4006_v42, %v10853_v58  ;;  %v4008_v33 = vpop.f32.mrb[91].mxu0  ;;  %v4745_v46 = vmax.f32 %v8063_v61, 0.0  ;;  %v5617_v61 = vld [vmem:[#allocation14 + $0x50] sm:$0xff] }
 0x448   :  { %v4746_v36 = vmax.f32 %v8064_v8, 0.0  ;;  %v4650_v35 = vpop.f32.mrb[106].mxu1  ;;  %v8034_v11 = vadd.f32 %v4008_v33, %v10858_v37  ;;  %5365 = vmatprep.mubr.f32.mxu0 %v4744_v4 }
 0x449   :  { %v8065_v14 = vadd.f32 %v4650_v35, %v10863_v49  ;;  %v4652_v25 = vpop.f32.mrb[107].mxu1  ;;  %5366 = vmatmul.mubr.f32.vlgmr.msra.gmra.mrb[152].mxu0 %v4743_v62  ;;  %v4751_v19 = vmax.f32 %v8033_v13, 0.0 }
 0x44a   :  { %v4752_v44 = vmax.f32 %v8034_v11, 0.0  ;;  %v8066_v27 = vadd.f32 %v4652_v25, %v10868_v6  ;;  %5510 = vmatprep.mubr.f32.mxu1 %v4746_v36  ;;  %v4012_v20 = vpop.f32.mrb[92].mxu0  ;;  %7878 = vmatpush3.bf16.msra.mxu0 %v7875_v2  ;;  %v7895_v36 = vpack.c.bf16 %v5618_v3, %v5617_v61 }
 0x44b   :  { %5511 = vmatmul.mubr.f32.vlgmr.msra.gmra.mrb[168].mxu1 %v4745_v46  ;;  %v8035_v48 = vadd.f32 %v4012_v20, %v10853_v58  ;;  %v4014_v28 = vpop.f32.mrb[93].mxu0  ;;  %7880 = vmatprep.subr.bf16.mxu0 %v7879_v31  ;;  %v4753_v47 = vmax.f32 %v8065_v14, 0.0  ;;  %v5620_v46 = vld [vmem:[#allocation14 + $0x68] sm:$0xff] }
 0x44c   :  { %v4754_v41 = vmax.f32 %v8066_v27, 0.0  ;;  %v4656_v23 = vpop.f32.mrb[108].mxu1  ;;  %v8036_v50 = vadd.f32 %v4014_v28, %v10858_v37  ;;  %5370 = vmatprep.mubr.f32.mxu0 %v4752_v44 }
 0x44d   :  { %v8067_v10 = vadd.f32 %v4656_v23, %v10863_v49  ;;  %v4658_v1 = vpop.f32.mrb[109].mxu1  ;;  %5371 = vmatmul.mubr.f32.gmra.mrb[154].mxu0 %v4751_v19  ;;  %v4759_v54 = vmax.f32 %v8035_v48, 0.0 }
 0x44e   :  { %v4760_v26 = vmax.f32 %v8036_v50, 0.0  ;;  %v8068_v34 = vadd.f32 %v4658_v1, %v10868_v6  ;;  %5515 = vmatprep.mubr.f32.mxu1 %v4754_v41  ;;  %v4018_v32 = vpop.f32.mrb[94].mxu0  ;;  %7882 = vmatpush3.bf16.msra.mxu0 %v7879_v31  ;;  %v7899_v41 = vpack.c.bf16 %v5620_v46, %v5619_v17 }
 0x44f   :  { %5516 = vmatmul.mubr.f32.gmra.mrb[170].mxu1 %v4753_v47  ;;  %v8037_v38 = vadd.f32 %v4018_v32, %v10853_v58  ;;  %v4020_v40 = vpop.f32.mrb[95].mxu0  ;;  %7884 = vmatprep.subr.bf16.mxu0 %v7883_v52  ;;  %v4761_v29 = vmax.f32 %v8067_v10, 0.0 }
 0x450   :  { %v4762_v53 = vmax.f32 %v8068_v34, 0.0  ;;  %v4662_v24 = vpop.f32.mrb[110].mxu1  ;;  %v8038_v9 = vadd.f32 %v4020_v40, %v10858_v37  ;;  %5375 = vmatprep.mubr.f32.mxu0 %v4760_v26 }
 0x451   :  { %v8069_v43 = vadd.f32 %v4662_v24, %v10863_v49  ;;  %v4664_v57 = vpop.f32.mrb[111].mxu1  ;;  %5376 = vmatmul.mubr.f32.gmra.mrb[156].mxu0 %v4759_v54  ;;  %v4767_v16 = vmax.f32 %v8037_v38, 0.0 }
 0x452   :  { %v4768_v22 = vmax.f32 %v8038_v9, 0.0  ;;  %v8070_v56 = vadd.f32 %v4664_v57, %v10868_v6  ;;  %5520 = vmatprep.mubr.f32.mxu1 %v4762_v53  ;;  %v4024_v51 = vpop.f32.mrb[96].mxu0  ;;  %7886 = vmatpush3.bf16.msra.mxu0 %v7883_v52 }
 0x453   :  { %5521 = vmatmul.mubr.f32.gmra.mrb[172].mxu1 %v4761_v29  ;;  %v8039_v63 = vadd.f32 %v4024_v51, %v10853_v58  ;;  %v4026_v45 = vpop.f32.mrb[97].mxu0  ;;  %7888 = vmatprep.subr.bf16.mxu0 %v7887_v60  ;;  %v4769_v2 = vmax.f32 %v8069_v43, 0.0 }
 0x454   :  { %v4770_v5 = vmax.f32 %v8070_v56, 0.0  ;;  %v4668_v7 = vpop.f32.mrb[112].mxu1  ;;  %v8040_v21 = vadd.f32 %v4026_v45, %v10858_v37  ;;  %5380 = vmatprep.mubr.f32.mxu0 %v4768_v22 }
 0x455   :  { %v8071_v39 = vadd.f32 %v4668_v7, %v10863_v49  ;;  %v4670_v4 = vpop.f32.mrb[113].mxu1  ;;  %5381 = vmatmul.mubr.f32.gmra.mrb[158].mxu0 %v4767_v16  ;;  %v4775_v13 = vmax.f32 %v8039_v63, 0.0 }
 0x456   :  { %v4776_v8 = vmax.f32 %v8040_v21, 0.0  ;;  %v8072_v42 = vadd.f32 %v4670_v4, %v10868_v6  ;;  %5525 = vmatprep.mubr.f32.mxu1 %v4770_v5  ;;  %v4030_v62 = vpop.f32.mrb[98].mxu0  ;;  %7890 = vmatpush3.bf16.msra.mxu0 %v7887_v60 }
 0x457   :  { %5526 = vmatmul.mubr.f32.gmra.mrb[174].mxu1 %v4769_v2  ;;  %v8041_v33 = vadd.f32 %v4030_v62, %v10853_v58  ;;  %v4032_v31 = vpop.f32.mrb[99].mxu0  ;;  %7892 = vmatprep.subr.bf16.mxu0 %v7891_v55  ;;  %v4777_v14 = vmax.f32 %v8071_v39, 0.0 }
 0x458   :  { %v4778_v35 = vmax.f32 %v8072_v42, 0.0  ;;  %v4674_v11 = vpop.f32.mrb[114].mxu1  ;;  %v8042_v12 = vadd.f32 %v4032_v31, %v10858_v37  ;;  %5385 = vmatprep.mubr.f32.mxu0 %v4776_v8 }
 0x459   :  { %v8073_v25 = vadd.f32 %v4674_v11, %v10863_v49  ;;  %v4676_v44 = vpop.f32.mrb[115].mxu1  ;;  %5386 = vmatmul.mubr.f32.gmra.mrb[160].mxu0 %v4775_v13  ;;  %v4783_v48 = vmax.f32 %v8041_v33, 0.0 }
 0x45a   :  { %v4784_v27 = vmax.f32 %v8042_v12, 0.0  ;;  %v8074_v20 = vadd.f32 %v4676_v44, %v10868_v6  ;;  %5530 = vmatprep.mubr.f32.mxu1 %v4778_v35  ;;  %v4036_v19 = vpop.f32.mrb[100].mxu0  ;;  %7894 = vmatpush3.bf16.msra.mxu0 %v7891_v55 }
 0x45b   :  { %5531 = vmatmul.mubr.f32.gmra.mrb[176].mxu1 %v4777_v14  ;;  %v8043_v28 = vadd.f32 %v4036_v19, %v10853_v58  ;;  %v4038_v52 = vpop.f32.mrb[101].mxu0  ;;  %7896 = vmatprep.subr.bf16.mxu0 %v7895_v36  ;;  %v4785_v15 = vmax.f32 %v8073_v25, 0.0 }
 0x45c   :  { %v4786_v23 = vmax.f32 %v8074_v20, 0.0  ;;  %v4680_v50 = vpop.f32.mrb[116].mxu1  ;;  %v8044_v30 = vadd.f32 %v4038_v52, %v10858_v37  ;;  %5390 = vmatprep.mubr.f32.mxu0 %v4784_v27 }
 0x45d   :  { %v8075_v47 = vadd.f32 %v4680_v50, %v10863_v49  ;;  %v4682_v10 = vpop.f32.mrb[117].mxu1  ;;  %5391 = vmatmul.mubr.f32.gmra.mrb[162].mxu0 %v4783_v48  ;;  %v4791_v32 = vmax.f32 %v8043_v28, 0.0 }
 0x45e   :  { %v4792_v1 = vmax.f32 %v8044_v30, 0.0  ;;  %v8076_v26 = vadd.f32 %v4682_v10, %v10868_v6  ;;  %5535 = vmatprep.mubr.f32.mxu1 %v4786_v23  ;;  %v4042_v34 = vpop.f32.mrb[102].mxu0  ;;  %7898 = vmatpush3.bf16.msra.mxu0 %v7895_v36 }
 0x45f   :  { %5536 = vmatmul.mubr.f32.gmra.mrb[178].mxu1 %v4785_v15  ;;  %v8045_v54 = vadd.f32 %v4042_v34, %v10853_v58  ;;  %v4044_v38 = vpop.f32.mrb[103].mxu0  ;;  %7900 = vmatprep.subr.bf16.mxu0 %v7899_v41  ;;  %v4793_v24 = vmax.f32 %v8075_v47, 0.0 }
 0x460   :  { %v4794_v40 = vmax.f32 %v8076_v26, 0.0  ;;  %v4686_v60 = vpop.f32.mrb[118].mxu1  ;;  %v8046_v53 = vadd.f32 %v4044_v38, %v10858_v37  ;;  %5395 = vmatprep.mubr.f32.mxu0 %v4792_v1 }
 0x461   :  { %v8077_v9 = vadd.f32 %v4686_v60, %v10863_v49  ;;  %v4688_v59 = vpop.f32.mrb[119].mxu1  ;;  %5396 = vmatmul.mubr.f32.gmra.mrb[164].mxu0 %v4791_v32  ;;  %v4799_v57 = vmax.f32 %v8045_v54, 0.0 }
 0x462   :  { %v4800_v18 = vmax.f32 %v8046_v53, 0.0  ;;  %v8078_v29 = vadd.f32 %v4688_v59, %v10868_v6  ;;  %5540 = vmatprep.mubr.f32.mxu1 %v4794_v40  ;;  %v4048_v43 = vpop.f32.mrb[104].mxu0  ;;  %7902 = vmatpush3.bf16.msra.mxu0 %v7899_v41 }
 0x463   :  { %5541 = vmatmul.mubr.f32.gmra.mrb[180].mxu1 %v4793_v24  ;;  %v8047_v22 = vadd.f32 %v4048_v43, %v10853_v58  ;;  %v4050_v56 = vpop.f32.mrb[105].mxu0  ;;  %v4801_v45 = vmax.f32 %v8077_v9, 0.0 }
 0x464   :  { %v4802_v51 = vmax.f32 %v8078_v29, 0.0  ;;  %v4692_v16 = vpop.f32.mrb[120].mxu1  ;;  %v8048_v63 = vadd.f32 %v4050_v56, %v10858_v37  ;;  %5400 = vmatprep.mubr.f32.mxu0 %v4800_v18 }
 0x465   :  { %v8079_v55 = vadd.f32 %v4692_v16, %v10863_v49  ;;  %v4694_v5 = vpop.f32.mrb[121].mxu1  ;;  %5401 = vmatmul.mubr.f32.gmra.mrb[166].mxu0 %v4799_v57  ;;  %v4807_v3 = vmax.f32 %v8047_v22, 0.0 }
 0x466   :  { %v4808_v7 = vmax.f32 %v8048_v63, 0.0  ;;  %v8080_v21 = vadd.f32 %v4694_v5, %v10868_v6  ;;  %5545 = vmatprep.mubr.f32.mxu1 %v4802_v51  ;;  %v4054_v61 = vpop.f32.mrb[106].mxu0 }
 0x467   :  { %5546 = vmatmul.mubr.f32.gmra.mrb[182].mxu1 %v4801_v45  ;;  %v8049_v2 = vadd.f32 %v4054_v61, %v10853_v58  ;;  %v4056_v39 = vpop.f32.mrb[107].mxu0  ;;  %v4809_v62 = vmax.f32 %v8079_v55, 0.0 }
 0x468   :  { %v4810_v4 = vmax.f32 %v8080_v21, 0.0  ;;  %v4698_v8 = vpop.f32.mrb[122].mxu1  ;;  %v8050_v42 = vadd.f32 %v4056_v39, %v10858_v37  ;;  %5405 = vmatprep.mubr.f32.mxu0 %v4808_v7 }
 0x469   :  { %v8081_v13 = vadd.f32 %v4698_v8, %v10863_v49  ;;  %v4700_v33 = vpop.f32.mrb[123].mxu1  ;;  %5406 = vmatmul.mubr.f32.gmra.mrb[168].mxu0 %v4807_v3  ;;  %v4815_v11 = vmax.f32 %v8049_v2, 0.0 }
 0x46a   :  { %v4816_v31 = vmax.f32 %v8050_v42, 0.0  ;;  %v8082_v36 = vadd.f32 %v4700_v33, %v10868_v6  ;;  %5550 = vmatprep.mubr.f32.mxu1 %v4810_v4  ;;  %v4060_v35 = vpop.f32.mrb[108].mxu0 }
 0x46b   :  { %5551 = vmatmul.mubr.f32.gmra.mrb[184].mxu1 %v4809_v62  ;;  %v8051_v12 = vadd.f32 %v4060_v35, %v10853_v58  ;;  %v4062_v17 = vpop.f32.mrb[109].mxu0  ;;  %v4817_v44 = vmax.f32 %v8081_v13, 0.0 }
 0x46c   :  { %v4818_v46 = vmax.f32 %v8082_v36, 0.0  ;;  %v4704_v14 = vpop.f32.mrb[124].mxu1  ;;  %v8052_v25 = vadd.f32 %v4062_v17, %v10858_v37  ;;  %5410 = vmatprep.mubr.f32.mxu0 %v4816_v31 }
 0x46d   :  { %v8083_v27 = vadd.f32 %v4704_v14, %v10863_v49  ;;  %v4706_v20 = vpop.f32.mrb[125].mxu1  ;;  %5411 = vmatmul.mubr.f32.gmra.mrb[170].mxu0 %v4815_v11  ;;  %v4823_v52 = vmax.f32 %v8051_v12, 0.0 }
 0x46e   :  { %v4824_v19 = vmax.f32 %v8052_v25, 0.0  ;;  %v8084_v48 = vadd.f32 %v4706_v20, %v10868_v6  ;;  %5555 = vmatprep.mubr.f32.mxu1 %v4818_v46  ;;  %v4066_v28 = vpop.f32.mrb[110].mxu0 }
 0x46f   :  { %5556 = vmatmul.mubr.f32.gmra.mrb[186].mxu1 %v4817_v44  ;;  %v8053_v41 = vadd.f32 %v4066_v28, %v10853_v58  ;;  %v4068_v23 = vpop.f32.mrb[111].mxu0  ;;  %v4825_v47 = vmax.f32 %v8083_v27, 0.0 }
 0x470   :  { %v4826_v50 = vmax.f32 %v8084_v48, 0.0  ;;  %v4710_v30 = vpop.f32.mrb[126].mxu1  ;;  %v8054_v15 = vadd.f32 %v4068_v23, %v10858_v37  ;;  %5415 = vmatprep.mubr.f32.mxu0 %v4824_v19  ;;  %v4995_v23 = vld [vmem:[#allocation3] sm:$0xff] }
 0x471   :  { %v8085_v10 = vadd.f32 %v4710_v30, %v10863_v49  ;;  %v4712_v1 = vpop.f32.mrb[127].mxu1  ;;  %5416 = vmatmul.mubr.f32.gmra.mrb[172].mxu0 %v4823_v52  ;;  %v4831_v54 = vmax.f32 %v8053_v41, 0.0 }
 0x472   :  { %v4832_v26 = vmax.f32 %v8054_v15, 0.0  ;;  %v8086_v34 = vadd.f32 %v4712_v1, %v10868_v6  ;;  %5560 = vmatprep.mubr.f32.mxu1 %v4826_v50  ;;  %v4072_v32 = vpop.f32.mrb[112].mxu0 }
 0x473   :  { %5561 = vmatmul.mubr.f32.gmra.mrb[188].mxu1 %v4825_v47  ;;  %v8055_v38 = vadd.f32 %v4072_v32, %v10853_v58  ;;  %v4074_v40 = vpop.f32.mrb[113].mxu0  ;;  %v4833_v9 = vmax.f32 %v8085_v10, 0.0 }
 0x474   :  { %v4834_v60 = vmax.f32 %v8086_v34, 0.0  ;;  %v4716_v53 = vpop.f32.mrb[128].mxu1  ;;  %v8056_v24 = vadd.f32 %v4074_v40, %v10858_v37  ;;  %5420 = vmatprep.mubr.f32.mxu0 %v4832_v26  ;;  %v4996_v26 = vld [vmem:[#allocation3 + $0x8] sm:$0xff] }
 0x475   :  { %v8087_v59 = vadd.f32 %v4716_v53, %v10863_v49  ;;  %v4718_v18 = vpop.f32.mrb[129].mxu1  ;;  %5421 = vmatmul.mubr.f32.gmra.mrb[174].mxu0 %v4831_v54  ;;  %v4839_v22 = vmax.f32 %v8055_v38, 0.0 }
 0x476   :  { %v4840_v29 = vmax.f32 %v8056_v24, 0.0  ;;  %v8088_v43 = vadd.f32 %v4718_v18, %v10868_v6  ;;  %5565 = vmatprep.mubr.f32.mxu1 %v4834_v60  ;;  %v4078_v57 = vpop.f32.mrb[114].mxu0  ;;  %v4997_v24 = vld [vmem:[#allocation3 + $0x10] sm:$0xff] }
 0x477   :  { %5566 = vmatmul.mubr.f32.gmra.mrb[190].mxu1 %v4833_v9  ;;  %v8057_v56 = vadd.f32 %v4078_v57, %v10853_v58  ;;  %v4080_v51 = vpop.f32.mrb[115].mxu0  ;;  %v4841_v55 = vmax.f32 %v8087_v59, 0.0 }
 0x478   :  { %v4842_v16 = vmax.f32 %v8088_v43, 0.0  ;;  %v4722_v63 = vpop.f32.mrb[130].mxu1  ;;  %v8058_v45 = vadd.f32 %v4080_v51, %v10858_v37  ;;  %5425 = vmatprep.mubr.f32.mxu0 %v4840_v29  ;;  %v4998_v51 = vld [vmem:[#allocation3 + $0x18] sm:$0xff] }
 0x479   :  { %v8089_v5 = vadd.f32 %v4722_v63, %v10863_v49  ;;  %v4724_v7 = vpop.f32.mrb[131].mxu1  ;;  %5426 = vmatmul.mubr.f32.gmra.mrb[176].mxu0 %v4839_v22  ;;  %v4847_v2 = vmax.f32 %v8057_v56, 0.0 }
 0x47a   :  { %v4848_v21 = vmax.f32 %v8058_v45, 0.0  ;;  %v8090_v61 = vadd.f32 %v4724_v7, %v10868_v6  ;;  %5570 = vmatprep.mubr.f32.mxu1 %v4842_v16  ;;  %v4084_v3 = vpop.f32.mrb[116].mxu0 }
 0x47b   :  { %5571 = vmatmul.mubr.f32.gmra.mrb[192].mxu1 %v4841_v55  ;;  %v8059_v39 = vadd.f32 %v4084_v3, %v10853_v58  ;;  %v4086_v4 = vpop.f32.mrb[117].mxu0  ;;  %v4849_v13 = vmax.f32 %v8089_v5, 0.0  ;;  %v4999_v3 = vld [vmem:[#allocation3 + $0x20] sm:$0xff] }
 0x47c   :  { %v4850_v8 = vmax.f32 %v8090_v61, 0.0  ;;  %v4728_v42 = vpop.f32.mrb[132].mxu1  ;;  %v8060_v62 = vadd.f32 %v4086_v4, %v10858_v37  ;;  %5430 = vmatprep.mubr.f32.mxu0 %v4848_v21 }
 0x47d   :  { %v8091_v33 = vadd.f32 %v4728_v42, %v10863_v49  ;;  %v4730_v31 = vpop.f32.mrb[133].mxu1  ;;  %5431 = vmatmul.mubr.f32.gmra.mrb[178].mxu0 %v4847_v2  ;;  %v4855_v12 = vmax.f32 %v8059_v39, 0.0 }
 0x47e   :  { %v4856_v36 = vmax.f32 %v8060_v62, 0.0  ;;  %v8092_v35 = vadd.f32 %v4730_v31, %v10868_v6  ;;  %5575 = vmatprep.mubr.f32.mxu1 %v4850_v8  ;;  %v4090_v11 = vpop.f32.mrb[118].mxu0  ;;  %v5000_v31 = vld [vmem:[#allocation3 + $0x28] sm:$0xff] }
 0x47f   :  { %5576 = vmatmul.mubr.f32.gmra.mrb[194].mxu1 %v4849_v13  ;;  %v8061_v17 = vadd.f32 %v4090_v11, %v10853_v58  ;;  %v4092_v46 = vpop.f32.mrb[119].mxu0  ;;  %v4857_v27 = vmax.f32 %v8091_v33, 0.0 }
 0x480   :  { %v4858_v14 = vmax.f32 %v8092_v35, 0.0  ;;  %v4734_v25 = vpop.f32.mrb[134].mxu1  ;;  %v8062_v44 = vadd.f32 %v4092_v46, %v10858_v37  ;;  %5435 = vmatprep.mubr.f32.mxu0 %v4856_v36 }
 0x481   :  { %v8093_v20 = vadd.f32 %v4734_v25, %v10863_v49  ;;  %v4736_v19 = vpop.f32.mrb[135].mxu1  ;;  %5436 = vmatmul.mubr.f32.gmra.mrb[180].mxu0 %v4855_v12  ;;  %v4863_v41 = vmax.f32 %v8061_v17, 0.0 }
 0x482   :  { %v4864_v48 = vmax.f32 %v8062_v44, 0.0  ;;  %v8094_v28 = vadd.f32 %v4736_v19, %v10868_v6  ;;  %5580 = vmatprep.mubr.f32.mxu1 %v4858_v14  ;;  %v6175_v52 = vpop.f32.mrb[120].mxu0  ;;  %v5001_v44 = vld [vmem:[#allocation3 + $0x30] sm:$0xff] }
 0x483   :  { %5581 = vmatmul.mubr.f32.gmra.mrb[196].mxu1 %v4857_v27  ;;  %v6176_v58 = vpop.f32.mrb[121].mxu0  ;;  %v4865_v37 = vmax.f32 %v8093_v20, 0.0 }
 0x484   :  { %v4866_v50 = vmax.f32 %v8094_v28, 0.0  ;;  %v6255_v30 = vpop.f32.mrb[136].mxu1  ;;  %v6177_v15 = vadd.f32 %v6176_v58, %v6175_v52  ;;  %5440 = vmatprep.mubr.f32.mxu0 %v4864_v48  ;;  %v5002_v58 = vld [vmem:[#allocation3 + $0x38] sm:$0xff] }
 0x485   :  { %v6256_v47 = vpop.f32.mrb[137].mxu1  ;;  %5441 = vmatmul.mubr.f32.gmra.mrb[182].mxu0 %v4863_v41 }
 0x486   :  { %v5078_v10 = vadd.f32 %v6177_v15, %v4995_v23  ;;  %v6257_v49 = vadd.f32 %v6256_v47, %v6255_v30  ;;  %5585 = vmatprep.mubr.f32.mxu1 %v4866_v50  ;;  %v6178_v1 = vpop.f32.mrb[122].mxu0 }
 0x487   :  { %5586 = vmatmul.mubr.f32.gmra.mrb[198].mxu1 %v4865_v37  ;;  %v6179_v6 = vpop.f32.mrb[123].mxu0 }
 0x488   :  { %v10934_v34 = vadd.f32 %v6257_v49, %v5078_v10  ;;  %v6258_v32 = vpop.f32.mrb[138].mxu1  ;;  %v6180_v54 = vadd.f32 %v6179_v6, %v6178_v1 }
 0x489   :  { %v6259_v38 = vpop.f32.mrb[139].mxu1 }
 0x48a   :  { %v5083_v40 = vadd.f32 %v6180_v54, %v4996_v26  ;;  %v6260_v60 = vadd.f32 %v6259_v38, %v6258_v32  ;;  %v6181_v53 = vpop.f32.mrb[124].mxu0  ;;  %v5003_v26 = vld [vmem:[#allocation3 + $0x40] sm:$0xff] }
 0x48b   :  { %v6182_v9 = vpop.f32.mrb[125].mxu0 }
 0x48c   :  { %v10936_v59 = vadd.f32 %v6260_v60, %v5083_v40  ;;  %v6261_v18 = vpop.f32.mrb[140].mxu1  ;;  %v6183_v29 = vadd.f32 %v6182_v9, %v6181_v53  ;;  %v5621_v60 = vld [vmem:[#allocation14 + $0x70] sm:$0xff]  ;;  %v5622_v53 = vld [vmem:[#allocation14 + $0x78] sm:$0xff] }
 0x48d   :  { %v6262_v43 = vpop.f32.mrb[141].mxu1 }
 0x48e   :  { %v5088_v57 = vadd.f32 %v6183_v29, %v4997_v24  ;;  %v6263_v22 = vadd.f32 %v6262_v43, %v6261_v18  ;;  %v6184_v56 = vpop.f32.mrb[126].mxu0  ;;  %v7903_v29 = vpack.c.bf16 %v5622_v53, %v5621_v60  ;;  %v5004_v43 = vld [vmem:[#allocation3 + $0x48] sm:$0xff] }
 0x48f   :  { %v6185_v16 = vpop.f32.mrb[127].mxu0 }
 0x490   :  { %v10938_v63 = vadd.f32 %v6263_v22, %v5088_v57  ;;  %v6264_v45 = vpop.f32.mrb[142].mxu1  ;;  %v6186_v55 = vadd.f32 %v6185_v16, %v6184_v56  ;;  %7904 = vmatprep.subr.bf16.mxu0 %v7903_v29 }
 0x491   :  { %v6265_v5 = vpop.f32.mrb[143].mxu1  ;;  %7906 = vmatpush3.bf16.msra.mxu0 %v7903_v29  ;;  %v5010_v29 = vld [vmem:[#allocation3 + $0x78] sm:$0xff] }
 0x492   :  { %v5093_v7 = vadd.f32 %v6186_v55, %v4998_v51  ;;  %v6266_v21 = vadd.f32 %v6265_v5, %v6264_v45  ;;  %v6187_v61 = vpop.f32.mrb[128].mxu0 }
 0x493   :  { %v6188_v2 = vpop.f32.mrb[129].mxu0 }
 0x494   :  { %v10940_v39 = vadd.f32 %v6266_v21, %v5093_v7  ;;  %v6267_v4 = vpop.f32.mrb[144].mxu1  ;;  %v6189_v8 = vadd.f32 %v6188_v2, %v6187_v61  ;;  %v5005_v7 = vld [vmem:[#allocation3 + $0x50] sm:$0xff] }
 0x495   :  { %v6268_v42 = vpop.f32.mrb[145].mxu1 }
 0x496   :  { %v5098_v62 = vadd.f32 %v6189_v8, %v4999_v3  ;;  %v6269_v13 = vadd.f32 %v6268_v42, %v6267_v4  ;;  %v6190_v33 = vpop.f32.mrb[130].mxu0 }
 0x497   :  { %v6191_v36 = vpop.f32.mrb[131].mxu0 }
 0x498   :  { %v10942_v35 = vadd.f32 %v6269_v13, %v5098_v62  ;;  %v6270_v11 = vpop.f32.mrb[146].mxu1  ;;  %v6192_v12 = vadd.f32 %v6191_v36, %v6190_v33  ;;  %v5006_v13 = vld [vmem:[#allocation3 + $0x58] sm:$0xff] }
 0x499   :  { %v6271_v17 = vpop.f32.mrb[147].mxu1 }
 0x49a   :  { %v5103_v46 = vadd.f32 %v6192_v12, %v5000_v31  ;;  %v6272_v14 = vadd.f32 %v6271_v17, %v6270_v11  ;;  %v6193_v25 = vpop.f32.mrb[132].mxu0 }
 0x49b   :  { %v6194_v27 = vpop.f32.mrb[133].mxu0 }
 0x49c   :  { %v10944_v20 = vadd.f32 %v6272_v14, %v5103_v46  ;;  %v6273_v19 = vpop.f32.mrb[148].mxu1  ;;  %v6195_v48 = vadd.f32 %v6194_v27, %v6193_v25  ;;  %v5007_v25 = vld [vmem:[#allocation3 + $0x60] sm:$0xff] }
 0x49d   :  { %v6274_v28 = vpop.f32.mrb[149].mxu1 }
 0x49e   :  { %v5108_v52 = vadd.f32 %v6195_v48, %v5001_v44  ;;  %v6275_v41 = vadd.f32 %v6274_v28, %v6273_v19  ;;  %v6196_v23 = vpop.f32.mrb[134].mxu0 }
 0x49f   :  { %v6197_v50 = vpop.f32.mrb[135].mxu0 }
 0x4a0   :  { %v10946_v30 = vadd.f32 %v6275_v41, %v5108_v52  ;;  %v6276_v15 = vpop.f32.mrb[150].mxu1  ;;  %v6198_v37 = vadd.f32 %v6197_v50, %v6196_v23 }
 0x4a1   :  { %v6277_v47 = vpop.f32.mrb[151].mxu1 }
 0x4a2   :  { %v5113_v10 = vadd.f32 %v6198_v37, %v5002_v58  ;;  %v6278_v49 = vadd.f32 %v6277_v47, %v6276_v15  ;;  %v6199_v1 = vpop.f32.mrb[136].mxu0  ;;  %v5008_v58 = vld [vmem:[#allocation3 + $0x68] sm:$0xff] }
 0x4a3   :  { %v6200_v6 = vpop.f32.mrb[137].mxu0 }
 0x4a4   :  { %v10948_v32 = vadd.f32 %v6278_v49, %v5113_v10  ;;  %v6279_v54 = vpop.f32.mrb[152].mxu1  ;;  %v6201_v38 = vadd.f32 %v6200_v6, %v6199_v1  ;;  %v5009_v6 = vld [vmem:[#allocation3 + $0x70] sm:$0xff] }
 0x4a5   :  { %v6280_v40 = vpop.f32.mrb[153].mxu1 }
 0x4a6   :  { %v5118_v24 = vadd.f32 %v6201_v38, %v5003_v26  ;;  %v6281_v9 = vadd.f32 %v6280_v40, %v6279_v54  ;;  %v6202_v18 = vpop.f32.mrb[138].mxu0 }
 0x4a7   :  { %v6203_v57 = vpop.f32.mrb[139].mxu0 }
 0x4a8   :  { %v10950_v22 = vadd.f32 %v6281_v9, %v5118_v24  ;;  %v6282_v56 = vpop.f32.mrb[154].mxu1  ;;  %v6204_v51 = vadd.f32 %v6203_v57, %v6202_v18 }
 0x4a9   :  { %v6283_v16 = vpop.f32.mrb[155].mxu1 }
 0x4aa   :  { %v5123_v45 = vadd.f32 %v6204_v51, %v5004_v43  ;;  %v6284_v55 = vadd.f32 %v6283_v16, %v6282_v56  ;;  %v6205_v5 = vpop.f32.mrb[140].mxu0 }
 0x4ab   :  { %v6206_v21 = vpop.f32.mrb[141].mxu0 }
 0x4ac   :  { %v10952_v61 = vadd.f32 %v6284_v55, %v5123_v45  ;;  %v6285_v3 = vpop.f32.mrb[156].mxu1  ;;  %v6207_v2 = vadd.f32 %v6206_v21, %v6205_v5  ;;  %v5792_v21 = vld [vmem:[#allocation17 + $0x8] sm:$0xff] }
 0x4ad   :  { %v6286_v4 = vpop.f32.mrb[157].mxu1 }
 0x4ae   :  { %v5128_v8 = vadd.f32 %v6207_v2, %v5005_v7  ;;  %v6287_v42 = vadd.f32 %v6286_v4, %v6285_v3  ;;  %v6208_v62 = vpop.f32.mrb[142].mxu0  ;;  %v5791_v7 = vld [vmem:[#allocation17] sm:$0xff]  ;;  %v5793_v3 = vld [vmem:[#allocation17 + $0x10] sm:$0xff]  ;;  %v5794_v4 = vld [vmem:[#allocation17 + $0x18] sm:$0xff] }
 0x4af   :  { %v6209_v33 = vpop.f32.mrb[143].mxu0  ;;  %v7907_v2 = vpack.c.bf16 %v5792_v21, %v5791_v7 }
 0x4b0   :  { %v10954_v31 = vadd.f32 %v6287_v42, %v5128_v8  ;;  %v6288_v36 = vpop.f32.mrb[158].mxu1  ;;  %v6210_v11 = vadd.f32 %v6209_v33, %v6208_v62  ;;  %v7911_v8 = vpack.c.bf16 %v5794_v4, %v5793_v3  ;;  %v5795_v42 = vld [vmem:[#allocation17 + $0x20] sm:$0xff]  ;;  %v5796_v62 = vld [vmem:[#allocation17 + $0x28] sm:$0xff]  ;;  %v5797_v33 = vld [vmem:[#allocation17 + $0x30] sm:$0xff] }
 0x4b1   :  { %v6289_v12 = vpop.f32.mrb[159].mxu1  ;;  %7908 = vmatprep.subr.bf16.mxu1 %v7907_v2 }
 0x4b2   :  { %v5133_v17 = vadd.f32 %v6210_v11, %v5006_v13  ;;  %v6290_v46 = vadd.f32 %v6289_v12, %v6288_v36  ;;  %v6211_v14 = vpop.f32.mrb[144].mxu0  ;;  %7910 = vmatpush3.bf16.msra.mxu1 %v7907_v2  ;;  %v7915_v13 = vpack.c.bf16 %v5796_v62, %v5795_v42  ;;  %v5798_v36 = vld [vmem:[#allocation17 + $0x38] sm:$0xff]  ;;  %v5799_v12 = vld [vmem:[#allocation17 + $0x40] sm:$0xff] }
 0x4b3   :  { %v6212_v44 = vpop.f32.mrb[145].mxu0  ;;  %7912 = vmatprep.subr.bf16.mxu1 %v7911_v8  ;;  %v7919_v11 = vpack.c.bf16 %v5798_v36, %v5797_v33 }
 0x4b4   :  { %v10956_v27 = vadd.f32 %v6290_v46, %v5133_v17  ;;  %v6291_v19 = vpop.f32.mrb[160].mxu1  ;;  %v6213_v48 = vadd.f32 %v6212_v44, %v6211_v14  ;;  %v5800_v17 = vld [vmem:[#allocation17 + $0x48] sm:$0xff]  ;;  %v5801_v14 = vld [vmem:[#allocation17 + $0x50] sm:$0xff] }
 0x4b5   :  { %v6292_v28 = vpop.f32.mrb[161].mxu1  ;;  %v7923_v46 = vpack.c.bf16 %v5800_v17, %v5799_v12 }
 0x4b6   :  { %v5138_v52 = vadd.f32 %v6213_v48, %v5007_v25  ;;  %v6293_v41 = vadd.f32 %v6292_v28, %v6291_v19  ;;  %v6214_v23 = vpop.f32.mrb[146].mxu0  ;;  %7914 = vmatpush3.bf16.msra.mxu1 %v7911_v8  ;;  %v5802_v25 = vld [vmem:[#allocation17 + $0x58] sm:$0xff]  ;;  %v5803_v19 = vld [vmem:[#allocation17 + $0x60] sm:$0xff]  ;;  %v5804_v48 = vld [vmem:[#allocation17 + $0x68] sm:$0xff] }
 0x4b7   :  { %v6215_v50 = vpop.f32.mrb[147].mxu0  ;;  %7916 = vmatprep.subr.bf16.mxu1 %v7915_v13  ;;  %v7927_v44 = vpack.c.bf16 %v5802_v25, %v5801_v14  ;;  %v7931_v28 = vpack.c.bf16 %v5804_v48, %v5803_v19 }
 0x4b8   :  { %v10958_v15 = vadd.f32 %v6293_v41, %v5138_v52  ;;  %v6294_v37 = vpop.f32.mrb[162].mxu1  ;;  %v6216_v47 = vadd.f32 %v6215_v50, %v6214_v23  ;;  %v5805_v52 = vld [vmem:[#allocation17 + $0x70] sm:$0xff]  ;;  %v5806_v41 = vld [vmem:[#allocation17 + $0x78] sm:$0xff] }
 0x4b9   :  { %v6295_v10 = vpop.f32.mrb[163].mxu1  ;;  %v7935_v23 = vpack.c.bf16 %v5806_v41, %v5805_v52 }
 0x4ba   :  { %v5143_v49 = vadd.f32 %v6216_v47, %v5008_v58  ;;  %v6296_v1 = vadd.f32 %v6295_v10, %v6294_v37  ;;  %v6217_v26 = vpop.f32.mrb[148].mxu0  ;;  %7918 = vmatpush3.bf16.msra.mxu1 %v7915_v13 }
 0x4bb   :  { %v6218_v54 = vpop.f32.mrb[149].mxu0  ;;  %7920 = vmatprep.subr.bf16.mxu1 %v7919_v11 }
 0x4bc   :  { %v10960_v38 = vadd.f32 %v6296_v1, %v5143_v49  ;;  %v6297_v40 = vpop.f32.mrb[164].mxu1  ;;  %v6219_v60 = vadd.f32 %v6218_v54, %v6217_v26 }
 0x4bd   :  { %v6298_v53 = vpop.f32.mrb[165].mxu1 }
 0x4be   :  { %v5148_v24 = vadd.f32 %v6219_v60, %v5009_v6  ;;  %v6299_v9 = vadd.f32 %v6298_v53, %v6297_v40  ;;  %v6220_v18 = vpop.f32.mrb[150].mxu0  ;;  %7922 = vmatpush3.bf16.msra.mxu1 %v7919_v11 }
 0x4bf   :  { %v6221_v43 = vpop.f32.mrb[151].mxu0  ;;  %7924 = vmatprep.subr.bf16.mxu1 %v7923_v46 }
 0x4c0   :  { %v10962_v57 = vadd.f32 %v6299_v9, %v5148_v24  ;;  %v6300_v56 = vpop.f32.mrb[166].mxu1  ;;  %v6222_v51 = vadd.f32 %v6221_v43, %v6220_v18 }
 0x4c1   :  { %v6301_v16 = vpop.f32.mrb[167].mxu1 }
 0x4c2   :  { %v5153_v45 = vadd.f32 %v6222_v51, %v5010_v29  ;;  %v6302_v55 = vadd.f32 %v6301_v16, %v6300_v56  ;;  %7926 = vmatpush3.bf16.msra.mxu1 %v7923_v46 }
 0x4c3   :  { %7928 = vmatprep.subr.bf16.mxu1 %v7927_v44 }
 0x4c4   :  { %v10964_v5 = vadd.f32 %v6302_v55, %v5153_v45 }
 0x4c6   :  { %7930 = vmatpush3.bf16.msra.mxu1 %v7927_v44 }
 0x4c7   :  { %7932 = vmatprep.subr.bf16.mxu1 %v7931_v28 }
 0x4ca   :  { %7934 = vmatpush3.bf16.msra.mxu1 %v7931_v28 }
 0x4cb   :  { %7936 = vmatprep.subr.bf16.mxu1 %v7935_v23 }
 0x4ce   :  { %7938 = vmatpush3.bf16.msra.mxu1 %v7935_v23 }
 0x51c   :  { %v6335_v58 = vpop.f32.mrb[152].mxu0 }
 0x51d   :  { %v6336_v50 = vpop.f32.mrb[153].mxu0 }
 0x51e   :  { %v6415_v37 = vpop.f32.mrb[168].mxu1  ;;  %v6337_v47 = vadd.f32 %v6336_v50, %v6335_v58 }
 0x51f   :  { %v6416_v10 = vpop.f32.mrb[169].mxu1 }
 0x520   :  { %v5368_v49 = vadd.f32 %v6337_v47, %v10934_v34  ;;  %v6417_v1 = vadd.f32 %v6416_v10, %v6415_v37  ;;  %v6338_v26 = vpop.f32.mrb[154].mxu0 }
 0x521   :  { %v6339_v6 = vpop.f32.mrb[155].mxu0 }
 0x522   :  { %v5513_v54 = vadd.f32 %v6417_v1, %v5368_v49  ;;  %v6418_v40 = vpop.f32.mrb[170].mxu1  ;;  %v6340_v60 = vadd.f32 %v6339_v6, %v6338_v26 }
 0x523   :  { %v6419_v53 = vpop.f32.mrb[171].mxu1 }
 0x524   :  { %v5591_v24 = vmax.f32 %v5513_v54, 0.0  ;;  %v5373_v9 = vadd.f32 %v6340_v60, %v10936_v59  ;;  %v6420_v18 = vadd.f32 %v6419_v53, %v6418_v40  ;;  %v6341_v29 = vpop.f32.mrb[156].mxu0 }
 0x525   :  { %v6342_v43 = vpop.f32.mrb[157].mxu0 }
 0x526   :  { %v5518_v56 = vadd.f32 %v6420_v18, %v5373_v9  ;;  %v6421_v51 = vpop.f32.mrb[172].mxu1  ;;  %v6343_v16 = vadd.f32 %v6342_v43, %v6341_v29  ;;  %6576 = vmatprep.mubr.f32.mxu0 %v5591_v24 }
 0x527   :  { %v6422_v45 = vpop.f32.mrb[173].mxu1 }
 0x528   :  { %v5592_v55 = vmax.f32 %v5518_v56, 0.0  ;;  %v5378_v34 = vadd.f32 %v6343_v16, %v10938_v63  ;;  %v6423_v7 = vadd.f32 %v6422_v45, %v6421_v51  ;;  %v6344_v21 = vpop.f32.mrb[158].mxu0 }
 0x529   :  { %v6345_v3 = vpop.f32.mrb[159].mxu0 }
 0x52a   :  { %v5523_v2 = vadd.f32 %v6423_v7, %v5378_v34  ;;  %v6424_v4 = vpop.f32.mrb[174].mxu1  ;;  %v6346_v8 = vadd.f32 %v6345_v3, %v6344_v21  ;;  %6577 = vmatmul.mubr.f32.vlgmr.msra.gmra.mrb[184].mxu0 %v5592_v55 }
 0x52b   :  { %v6425_v42 = vpop.f32.mrb[175].mxu1 }
 0x52c   :  { %v5593_v59 = vmax.f32 %v5523_v2, 0.0  ;;  %v5383_v62 = vadd.f32 %v6346_v8, %v10940_v39  ;;  %v6426_v13 = vadd.f32 %v6425_v42, %v6424_v4  ;;  %v6347_v33 = vpop.f32.mrb[160].mxu0 }
 0x52d   :  { %v6348_v36 = vpop.f32.mrb[161].mxu0 }
 0x52e   :  { %v5528_v11 = vadd.f32 %v6426_v13, %v5383_v62  ;;  %v6427_v12 = vpop.f32.mrb[176].mxu1  ;;  %v6349_v17 = vadd.f32 %v6348_v36, %v6347_v33  ;;  %6579 = vmatprep.mubr.f32.mxu0 %v5593_v59 }
 0x52f   :  { %v6428_v46 = vpop.f32.mrb[177].mxu1 }
 0x530   :  { %v5594_v63 = vmax.f32 %v5528_v11, 0.0  ;;  %v5388_v14 = vadd.f32 %v6349_v17, %v10942_v35  ;;  %v6429_v25 = vadd.f32 %v6428_v46, %v6427_v12  ;;  %v6350_v44 = vpop.f32.mrb[162].mxu0 }
 0x531   :  { %v6351_v19 = vpop.f32.mrb[163].mxu0 }
 0x532   :  { %v5533_v48 = vadd.f32 %v6429_v25, %v5388_v14  ;;  %v6430_v28 = vpop.f32.mrb[178].mxu1  ;;  %v6352_v52 = vadd.f32 %v6351_v19, %v6350_v44  ;;  %6580 = vmatmul.mubr.f32.gmra.mrb[186].mxu0 %v5594_v63 }
 0x533   :  { %v6431_v41 = vpop.f32.mrb[179].mxu1 }
 0x534   :  { %v5595_v39 = vmax.f32 %v5533_v48, 0.0  ;;  %v5393_v23 = vadd.f32 %v6352_v52, %v10944_v20  ;;  %v6432_v58 = vadd.f32 %v6431_v41, %v6430_v28  ;;  %v6353_v50 = vpop.f32.mrb[164].mxu0 }
 0x535   :  { %v6354_v37 = vpop.f32.mrb[165].mxu0 }
 0x536   :  { %v5538_v47 = vadd.f32 %v6432_v58, %v5393_v23  ;;  %v6433_v10 = vpop.f32.mrb[180].mxu1  ;;  %v6355_v49 = vadd.f32 %v6354_v37, %v6353_v50  ;;  %6582 = vmatprep.mubr.f32.mxu0 %v5595_v39 }
 0x537   :  { %v6434_v1 = vpop.f32.mrb[181].mxu1 }
 0x538   :  { %v5596_v35 = vmax.f32 %v5538_v47, 0.0  ;;  %v5398_v26 = vadd.f32 %v6355_v49, %v10946_v30  ;;  %v6435_v6 = vadd.f32 %v6434_v1, %v6433_v10  ;;  %v6356_v54 = vpop.f32.mrb[166].mxu0 }
 0x539   :  { %v6357_v40 = vpop.f32.mrb[167].mxu0 }
 0x53a   :  { %v5543_v60 = vadd.f32 %v6435_v6, %v5398_v26  ;;  %v6436_v53 = vpop.f32.mrb[182].mxu1  ;;  %v6358_v24 = vadd.f32 %v6357_v40, %v6356_v54  ;;  %6583 = vmatmul.mubr.f32.gmra.mrb[188].mxu0 %v5596_v35 }
 0x53b   :  { %v6437_v9 = vpop.f32.mrb[183].mxu1 }
 0x53c   :  { %v5597_v20 = vmax.f32 %v5543_v60, 0.0  ;;  %v5403_v18 = vadd.f32 %v6358_v24, %v10948_v32  ;;  %v6438_v29 = vadd.f32 %v6437_v9, %v6436_v53  ;;  %v6359_v43 = vpop.f32.mrb[168].mxu0 }
 0x53d   :  { %v6360_v56 = vpop.f32.mrb[169].mxu0 }
 0x53e   :  { %v5548_v51 = vadd.f32 %v6438_v29, %v5403_v18  ;;  %v6439_v16 = vpop.f32.mrb[184].mxu1  ;;  %v6361_v45 = vadd.f32 %v6360_v56, %v6359_v43  ;;  %6585 = vmatprep.mubr.f32.mxu0 %v5597_v20 }
 0x53f   :  { %v6440_v55 = vpop.f32.mrb[185].mxu1 }
 0x540   :  { %v5598_v30 = vmax.f32 %v5548_v51, 0.0  ;;  %v5408_v34 = vadd.f32 %v6361_v45, %v10950_v22  ;;  %v6441_v7 = vadd.f32 %v6440_v55, %v6439_v16  ;;  %v6362_v21 = vpop.f32.mrb[170].mxu0 }
 0x541   :  { %v6363_v3 = vpop.f32.mrb[171].mxu0 }
 0x542   :  { %v5553_v2 = vadd.f32 %v6441_v7, %v5408_v34  ;;  %v6442_v4 = vpop.f32.mrb[186].mxu1  ;;  %v6364_v8 = vadd.f32 %v6363_v3, %v6362_v21  ;;  %6586 = vmatmul.mubr.f32.gmra.mrb[190].mxu0 %v5598_v30 }
 0x543   :  { %v6443_v42 = vpop.f32.mrb[187].mxu1 }
 0x544   :  { %v5599_v32 = vmax.f32 %v5553_v2, 0.0  ;;  %v5413_v59 = vadd.f32 %v6364_v8, %v10952_v61  ;;  %v6444_v62 = vadd.f32 %v6443_v42, %v6442_v4  ;;  %v6365_v13 = vpop.f32.mrb[172].mxu0  ;;  %v6141_v8 = vld [vmem:[#allocation15] ss:$0 sm:$0xff] }
 0x545   :  { %v6366_v33 = vpop.f32.mrb[173].mxu0 }
 0x546   :  { %v5558_v36 = vadd.f32 %v6444_v62, %v5413_v59  ;;  %v6445_v11 = vpop.f32.mrb[188].mxu1  ;;  %v6367_v12 = vadd.f32 %v6366_v33, %v6365_v13  ;;  %6588 = vmatprep.mubr.f32.mxu0 %v5599_v32 }
 0x547   :  { %v6446_v17 = vpop.f32.mrb[189].mxu1 }
 0x548   :  { %v5600_v22 = vmax.f32 %v5558_v36, 0.0  ;;  %v5418_v46 = vadd.f32 %v6367_v12, %v10954_v31  ;;  %v6447_v63 = vadd.f32 %v6446_v17, %v6445_v11  ;;  %v6368_v14 = vpop.f32.mrb[174].mxu0 }
 0x549   :  { %v6369_v25 = vpop.f32.mrb[175].mxu0 }
 0x54a   :  { %v5563_v44 = vadd.f32 %v6447_v63, %v5418_v46  ;;  %v6448_v19 = vpop.f32.mrb[190].mxu1  ;;  %v6370_v48 = vadd.f32 %v6369_v25, %v6368_v14  ;;  %6589 = vmatmul.mubr.f32.gmra.mrb[192].mxu0 %v5600_v22 }
 0x54b   :  { %v6449_v28 = vpop.f32.mrb[191].mxu1 }
 0x54c   :  { %v5601_v61 = vmax.f32 %v5563_v44, 0.0  ;;  %v5423_v52 = vadd.f32 %v6370_v48, %v10956_v27  ;;  %v6450_v41 = vadd.f32 %v6449_v28, %v6448_v19  ;;  %v6371_v39 = vpop.f32.mrb[176].mxu0 }
 0x54d   :  { %v6372_v23 = vpop.f32.mrb[177].mxu0 }
 0x54e   :  { %v5568_v58 = vadd.f32 %v6450_v41, %v5423_v52  ;;  %v6451_v50 = vpop.f32.mrb[192].mxu1  ;;  %v6373_v37 = vadd.f32 %v6372_v23, %v6371_v39  ;;  %6591 = vmatprep.mubr.f32.mxu0 %v5601_v61 }
 0x54f   :  { %v6452_v47 = vpop.f32.mrb[193].mxu1 }
 0x550   :  { %v5602_v31 = vmax.f32 %v5568_v58, 0.0  ;;  %v5428_v10 = vadd.f32 %v6373_v37, %v10958_v15  ;;  %v6453_v49 = vadd.f32 %v6452_v47, %v6451_v50  ;;  %v6374_v1 = vpop.f32.mrb[178].mxu0 }
 0x551   :  { %v6375_v35 = vpop.f32.mrb[179].mxu0 }
 0x552   :  { %v5573_v26 = vadd.f32 %v6453_v49, %v5428_v10  ;;  %v6454_v6 = vpop.f32.mrb[194].mxu1  ;;  %v6376_v54 = vadd.f32 %v6375_v35, %v6374_v1  ;;  %6592 = vmatmul.mubr.f32.gmra.mrb[194].mxu0 %v5602_v31 }
 0x553   :  { %v6455_v40 = vpop.f32.mrb[195].mxu1 }
 0x554   :  { %v5603_v27 = vmax.f32 %v5573_v26, 0.0  ;;  %v5433_v60 = vadd.f32 %v6376_v54, %v10960_v38  ;;  %v6456_v53 = vadd.f32 %v6455_v40, %v6454_v6  ;;  %v6377_v24 = vpop.f32.mrb[180].mxu0 }
 0x555   :  { %v6378_v9 = vpop.f32.mrb[181].mxu0 }
 0x556   :  { %v5578_v20 = vadd.f32 %v6456_v53, %v5433_v60  ;;  %v6457_v18 = vpop.f32.mrb[196].mxu1  ;;  %v6379_v29 = vadd.f32 %v6378_v9, %v6377_v24  ;;  %6594 = vmatprep.mubr.f32.mxu0 %v5603_v27 }
 0x557   :  { %v6458_v43 = vpop.f32.mrb[197].mxu1 }
 0x558   :  { %v5604_v15 = vmax.f32 %v5578_v20, 0.0  ;;  %v5438_v56 = vadd.f32 %v6379_v29, %v10962_v57  ;;  %v6459_v51 = vadd.f32 %v6458_v43, %v6457_v18  ;;  %v6380_v16 = vpop.f32.mrb[182].mxu0 }
 0x559   :  { %v6381_v45 = vpop.f32.mrb[183].mxu0 }
 0x55a   :  { %v5583_v55 = vadd.f32 %v6459_v51, %v5438_v56  ;;  %v6460_v30 = vpop.f32.mrb[198].mxu1  ;;  %v6382_v34 = vadd.f32 %v6381_v45, %v6380_v16  ;;  %6595 = vmatmul.mubr.f32.gmra.mrb[196].mxu0 %v5604_v15  ;;  %v8795_v15 = vmov 0.0|0.0   ;;  %v11537_v56 = vmov 0.0   ;;  %v5976_v51 = vld [vmem:[#allocation2] sm:$0x1] }
 0x55b   :  { %v6461_v7 = vpop.f32.mrb[199].mxu1  ;;  %7939 = vmatprep.subr.bf16.mxu0 %v8795_v15  ;;  %v8797_v16 = vmov 0   ;;  %v10984_v45 = vld [vmem:[#allocation18] ss:$0 sm:$0xff] }
 0x55c   :  { %v5605_v38 = vmax.f32 %v5583_v55, 0.0  ;;  %v5443_v21 = vadd.f32 %v6382_v34, %v10964_v5  ;;  %v6462_v3 = vadd.f32 %v6461_v7, %v6460_v30  ;;  %8499 = vset.pattern.permute.xlu0 %v8797_v16 }
 0x55d   :  { %5979 = vperm.xlu0 %8499, %v5976_v51  }
 0x55e   :  { %v5588_v2 = vadd.f32 %v6462_v3, %v5443_v21  ;;  %6597 = vmatprep.mubr.f32.mxu0 %v5605_v38 }
 0x560   :  { %v5606_v4 = vmax.f32 %v5588_v2, 0.0 }
 0x562   :  { %6598 = vmatmul.mubr.f32.gmra.mrb[198].mxu0 %v5606_v4 }
 0x563   :  { %6688 = vmatprep.mubr.msk.f32.mxu0 %vm8796_vm1, %v11537_v56 }
 0x5fd   :  { %v6578_v42 = vpop.f32.mrb[184].mxu0 }
 0x5fe   :  { %v5702_v32 = vadd.f32 %v6578_v42, %v6141_v8  ;;  %v5696_v57 = vpop.f32.mrb[185].mxu0 }
 0x5ff   :  { %v5697_v59 = vadd.f32 %v6141_v8, %v5696_v57 }
 0x600   :  { %v5776_v13 = vmax.f32 %v5702_v32, 0.0 }
 0x601   :  { %v5775_v62 = vmax.f32 %v5697_v59, 0.0 }
 0x603   :  { %6632 = vmatprep.mubr.f32.mxu1 %v5775_v62 }
 0x604   :  { %6633 = vmatmul.mubr.f32.vlgmr.msra.gmra.mrb[200].mxu1 %v5776_v13 }
 0x605   :  { %v6581_v33 = vpop.f32.mrb[186].mxu0 }
 0x606   :  { %v5712_v36 = vadd.f32 %v6581_v33, %v6141_v8  ;;  %v5706_v11 = vpop.f32.mrb[187].mxu0 }
 0x607   :  { %v5707_v12 = vadd.f32 %v6141_v8, %v5706_v11 }
 0x608   :  { %v5778_v5 = vmax.f32 %v5712_v36, 0.0 }
 0x609   :  { %v5777_v17 = vmax.f32 %v5707_v12, 0.0 }
 0x60b   :  { %6635 = vmatprep.mubr.f32.mxu1 %v5777_v17 }
 0x60c   :  { %6636 = vmatmul.mubr.f32.gmra.mrb[202].mxu1 %v5778_v5 }
 0x60d   :  { %v6584_v22 = vpop.f32.mrb[188].mxu0 }
 0x60e   :  { %v5722_v46 = vadd.f32 %v6584_v22, %v6141_v8  ;;  %v5716_v63 = vpop.f32.mrb[189].mxu0 }
 0x60f   :  { %v5717_v14 = vadd.f32 %v6141_v8, %v5716_v63 }
 0x610   :  { %v5780_v44 = vmax.f32 %v5722_v46, 0.0 }
 0x611   :  { %v5779_v25 = vmax.f32 %v5717_v14, 0.0 }
 0x613   :  { %6638 = vmatprep.mubr.f32.mxu1 %v5779_v25 }
 0x614   :  { %6639 = vmatmul.mubr.f32.gmra.mrb[204].mxu1 %v5780_v44 }
 0x615   :  { %v6587_v19 = vpop.f32.mrb[190].mxu0 }
 0x616   :  { %v5732_v48 = vadd.f32 %v6587_v19, %v6141_v8  ;;  %v5726_v28 = vpop.f32.mrb[191].mxu0 }
 0x617   :  { %v5727_v61 = vadd.f32 %v6141_v8, %v5726_v28 }
 0x618   :  { %v5782_v41 = vmax.f32 %v5732_v48, 0.0 }
 0x619   :  { %v5781_v52 = vmax.f32 %v5727_v61, 0.0 }
 0x61b   :  { %6641 = vmatprep.mubr.f32.mxu1 %v5781_v52 }
 0x61c   :  { %6642 = vmatmul.mubr.f32.gmra.mrb[206].mxu1 %v5782_v41 }
 0x61d   :  { %v6590_v39 = vpop.f32.mrb[192].mxu0 }
 0x61e   :  { %v5742_v23 = vadd.f32 %v6590_v39, %v6141_v8  ;;  %v5736_v58 = vpop.f32.mrb[193].mxu0 }
 0x61f   :  { %v5737_v50 = vadd.f32 %v6141_v8, %v5736_v58 }
 0x620   :  { %v5784_v47 = vmax.f32 %v5742_v23, 0.0 }
 0x621   :  { %v5783_v37 = vmax.f32 %v5737_v50, 0.0 }
 0x623   :  { %6644 = vmatprep.mubr.f32.mxu1 %v5783_v37 }
 0x624   :  { %6645 = vmatmul.mubr.f32.gmra.mrb[208].mxu1 %v5784_v47 }
 0x625   :  { %v6593_v31 = vpop.f32.mrb[194].mxu0 }
 0x626   :  { %v5752_v10 = vadd.f32 %v6593_v31, %v6141_v8  ;;  %v5746_v49 = vpop.f32.mrb[195].mxu0 }
 0x627   :  { %v5747_v1 = vadd.f32 %v6141_v8, %v5746_v49 }
 0x628   :  { %v5786_v26 = vmax.f32 %v5752_v10, 0.0 }
 0x629   :  { %v5785_v35 = vmax.f32 %v5747_v1, 0.0 }
 0x62b   :  { %6647 = vmatprep.mubr.f32.mxu1 %v5785_v35 }
 0x62c   :  { %6648 = vmatmul.mubr.f32.gmra.mrb[210].mxu1 %v5786_v26 }
 0x62d   :  { %v6596_v6 = vpop.f32.mrb[196].mxu0 }
 0x62e   :  { %v5762_v54 = vadd.f32 %v6596_v6, %v6141_v8  ;;  %v5756_v40 = vpop.f32.mrb[197].mxu0 }
 0x62f   :  { %v5757_v27 = vadd.f32 %v6141_v8, %v5756_v40 }
 0x630   :  { %v5788_v53 = vmax.f32 %v5762_v54, 0.0 }
 0x631   :  { %v5787_v60 = vmax.f32 %v5757_v27, 0.0 }
 0x633   :  { %6650 = vmatprep.mubr.f32.mxu1 %v5787_v60 }
 0x634   :  { %6651 = vmatmul.mubr.f32.gmra.mrb[212].mxu1 %v5788_v53 }
 0x635   :  { %v6599_v24 = vpop.f32.mrb[198].mxu0 }
 0x636   :  { %v5772_v9 = vadd.f32 %v6599_v24, %v6141_v8  ;;  %v5766_v20 = vpop.f32.mrb[199].mxu0 }
 0x637   :  { %v5767_v18 = vadd.f32 %v6141_v8, %v5766_v20 }
 0x638   :  { %v5790_v43 = vmax.f32 %v5772_v9, 0.0 }
 0x639   :  { %v5789_v29 = vmax.f32 %v5767_v18, 0.0 }
 0x63b   :  { %6653 = vmatprep.mubr.f32.mxu1 %v5789_v29  ;;  %v5975_v29 = vld [vmem:[#allocation20] sm:$0x1] }
 0x63c   :  { %6654 = vmatmul.mubr.f32.gmra.mrb[214].mxu1 %v5790_v43  ;;  %v5980_v43 = vpop.permute.xlu0 %5979 }
 0x63d   :  { %v5985_v56 = vrot.slane %v5980_v43, %v11489_v0 }
 0x6d7   :  { %v6634_v55 = vpop.f32.mrb[200].mxu1 }
 0x6d8   :  { %v5886_v30 = vadd.f32 %v6634_v55, %v10984_v45  ;;  %v5880_v34 = vpop.f32.mrb[201].mxu1 }
 0x6d9   :  { %v5881_v7 = vadd.f32 %v10984_v45, %v5880_v34 }
 0x6da   :  { %v5960_v38 = vmax.f32 %v5886_v30, 0.0 }
 0x6db   :  { %v5959_v21 = vmax.f32 %v5881_v7, 0.0 }
 0x6dd   :  { %v7940_v3 = vpack.c.bf16 %v5960_v38, %v5959_v21 }
 0x6df   :  { %v6637_v2 = vpop.f32.mrb[202].mxu1  ;;  %7941 = vmatpush3.bf16.xpose.msra.mxu0 %v7940_v3 }
 0x6e0   :  { %v5896_v4 = vadd.f32 %v6637_v2, %v10984_v45  ;;  %v5890_v8 = vpop.f32.mrb[203].mxu1  ;;  %7942 = vmatprep.subr.bf16.mxu0 %v8795_v15 }
 0x6e1   :  { %v5891_v42 = vadd.f32 %v10984_v45, %v5890_v8 }
 0x6e2   :  { %v5962_v32 = vmax.f32 %v5896_v4, 0.0 }
 0x6e3   :  { %v5961_v57 = vmax.f32 %v5891_v42, 0.0 }
 0x6e5   :  { %v7943_v59 = vpack.c.bf16 %v5962_v32, %v5961_v57 }
 0x6e7   :  { %v6640_v62 = vpop.f32.mrb[204].mxu1  ;;  %7944 = vmatpush3.bf16.xpose.msra.mxu0 %v7943_v59 }
 0x6e8   :  { %v5906_v13 = vadd.f32 %v6640_v62, %v10984_v45  ;;  %v5900_v33 = vpop.f32.mrb[205].mxu1  ;;  %7945 = vmatprep.subr.bf16.mxu0 %v8795_v15 }
 0x6e9   :  { %v5901_v36 = vadd.f32 %v10984_v45, %v5900_v33 }
 0x6ea   :  { %v5964_v11 = vmax.f32 %v5906_v13, 0.0 }
 0x6eb   :  { %v5963_v12 = vmax.f32 %v5901_v36, 0.0 }
 0x6ed   :  { %v7946_v17 = vpack.c.bf16 %v5964_v11, %v5963_v12 }
 0x6ef   :  { %v6643_v5 = vpop.f32.mrb[206].mxu1  ;;  %7947 = vmatpush3.bf16.xpose.msra.mxu0 %v7946_v17 }
 0x6f0   :  { %v5916_v22 = vadd.f32 %v6643_v5, %v10984_v45  ;;  %v5910_v46 = vpop.f32.mrb[207].mxu1  ;;  %7948 = vmatprep.subr.bf16.mxu0 %v8795_v15 }
 0x6f1   :  { %v5911_v63 = vadd.f32 %v10984_v45, %v5910_v46 }
 0x6f2   :  { %v5966_v14 = vmax.f32 %v5916_v22, 0.0 }
 0x6f3   :  { %v5965_v25 = vmax.f32 %v5911_v63, 0.0 }
 0x6f5   :  { %v7949_v44 = vpack.c.bf16 %v5966_v14, %v5965_v25 }
 0x6f7   :  { %v6646_v19 = vpop.f32.mrb[208].mxu1  ;;  %7950 = vmatpush3.bf16.xpose.msra.mxu0 %v7949_v44 }
 0x6f8   :  { %v5926_v48 = vadd.f32 %v6646_v19, %v10984_v45  ;;  %v5920_v28 = vpop.f32.mrb[209].mxu1  ;;  %7951 = vmatprep.subr.bf16.mxu0 %v8795_v15 }
 0x6f9   :  { %v5921_v61 = vadd.f32 %v10984_v45, %v5920_v28 }
 0x6fa   :  { %v5968_v52 = vmax.f32 %v5926_v48, 0.0 }
 0x6fb   :  { %v5967_v41 = vmax.f32 %v5921_v61, 0.0 }
 0x6fd   :  { %v7952_v39 = vpack.c.bf16 %v5968_v52, %v5967_v41 }
 0x6ff   :  { %v6649_v23 = vpop.f32.mrb[210].mxu1  ;;  %7953 = vmatpush3.bf16.xpose.msra.mxu0 %v7952_v39 }
 0x700   :  { %v5936_v58 = vadd.f32 %v6649_v23, %v10984_v45  ;;  %v5930_v50 = vpop.f32.mrb[211].mxu1  ;;  %7954 = vmatprep.subr.bf16.mxu0 %v8795_v15 }
 0x701   :  { %v5931_v37 = vadd.f32 %v10984_v45, %v5930_v50 }
 0x702   :  { %v5970_v47 = vmax.f32 %v5936_v58, 0.0 }
 0x703   :  { %v5969_v31 = vmax.f32 %v5931_v37, 0.0 }
 0x705   :  { %v7955_v10 = vpack.c.bf16 %v5970_v47, %v5969_v31 }
 0x707   :  { %v6652_v49 = vpop.f32.mrb[212].mxu1  ;;  %7956 = vmatpush3.bf16.xpose.msra.mxu0 %v7955_v10 }
 0x708   :  { %v5946_v1 = vadd.f32 %v6652_v49, %v10984_v45  ;;  %v5940_v35 = vpop.f32.mrb[213].mxu1  ;;  %7957 = vmatprep.subr.bf16.mxu0 %v8795_v15 }
 0x709   :  { %v5941_v26 = vadd.f32 %v10984_v45, %v5940_v35 }
 0x70a   :  { %v5972_v6 = vmax.f32 %v5946_v1, 0.0 }
 0x70b   :  { %v5971_v54 = vmax.f32 %v5941_v26, 0.0 }
 0x70d   :  { %v7958_v40 = vpack.c.bf16 %v5972_v6, %v5971_v54 }
 0x70f   :  { %v6655_v27 = vpop.f32.mrb[214].mxu1  ;;  %7959 = vmatpush3.bf16.xpose.msra.mxu0 %v7958_v40 }
 0x710   :  { %v5956_v60 = vadd.f32 %v6655_v27, %v10984_v45  ;;  %v5950_v53 = vpop.f32.mrb[215].mxu1  ;;  %7960 = vmatprep.subr.bf16.mxu0 %v8795_v15 }
 0x711   :  { %v5951_v24 = vadd.f32 %v10984_v45, %v5950_v53 }
 0x712   :  { %v5974_v9 = vmax.f32 %v5956_v60, 0.0 }
 0x713   :  { %v5973_v20 = vmax.f32 %v5951_v24, 0.0 }
 0x715   :  { %v7961_v18 = vpack.c.bf16 %v5974_v9, %v5973_v20 }
 0x717   :  { %7962 = vmatpush3.bf16.xpose.msra.mxu0 %v7961_v18 }
 0x71e   :  { %6689 = vmatmul.mubr.f32.vlgmr.msra.gmra.mrb[200].mxu0 %v5975_v29 }
 0x7f1   :  { %v6052_v51 = vpop.f32.mrb[200].mxu0 }
 0x7f2   :  { %v6053_v16 = vadd.f32 %v6052_v51, %v5985_v56  ;;  %v6690_v55 = vpop.f32.mrb[201].mxu0 }
 0x7f4   :  { %6056 = vst [vmem:[#allocation21] sm:$0x1] %v6053_v16 }
 0x7f5   :  { %8754 = shalt.err (!%p8751_p8)
}
 0x7f6   :  { %s8755_s25 = scalar_lea.hbm %s11035_s13, 16 }
 0x7f7   :  { %p8756_p9 = scmp.ne.s32.totalorder %s11035_s13, %s8755_s25  ;;  %p8759_p10 = scmp.lt.u32.totalorder %s8755_s25, %s11035_s13 }
 0x7f9   :  { %p8761_p11 = pnand %p8759_p10, %p8756_p9 }
 0x7fb   :  { %8764 = shalt.err (!%p8761_p11)
}
 0x7fc   :  { %6066 = dma.vmem_to_hbm [thread:$0]  %s6064_s5, 16, %s11035_s13, [#allocation5]  }
 0x7fd   :  { %8777 = dma.done.wait [#allocation5], 16  }
 0x7fe   :  { %8778 = vsyncadd [#allocation5], 4294967280 }
 0x7ff   :  { %6070 = vsyncpa [#allocation4], 1 }
 0x800   :  { %6071 = vsyncpa [#allocation7], 1 }
 0x801   :  { %6072 = vsyncpa [#allocation10], 1 }
 0x802   :  { %6073 = vsyncpa [#allocation13], 1 }
 0x803   :  { %6074 = vsyncpa [#allocation16], 1 }
 0x804   :  { %6075 = vsyncpa [#allocation19], 1 }
 0x805   :  { %6076 = vsyncpa [#allocation5], 1 }

</bundles_post_ra>
